<compile_context>
chip_gen: v6e
topology: v6e:2x2x1
jax: 0.10.0
libtpu: 0.0.40
codegen_flags: <defaults>
</compile_context>

<pallas_src>
import functools
import math

import jax
import jax.numpy as jnp
from jax.experimental import pallas as pl
from jax.experimental.pallas import tpu as pltpu

EPS = 1e-5
VMEM_LIMIT_BYTES = 48 * 1024 * 1024   # > 32 MiB scoped default, < v7x's 64 MiB physical


# ------------------------------ small helpers -------------------------------

def _cparams(n_axes):
    return pltpu.CompilerParams(
        dimension_semantics=("parallel",) * n_axes,
        vmem_limit_bytes=VMEM_LIMIT_BYTES)


def _pick_tile(m, cap=1024):
    """Row tile for GEMM grids: largest multiple-of-8 divisor of m with tile <= cap and
    tile <= m//2 so the grid has >= 2 steps (v7x can shard them across both TensorCores).
    Falls back to the full dim (grid = 1), which always satisfies the (8,128) rule."""
    limit = min(cap, m // 2)
    for t in range(limit, 7, -1):
        if m % t == 0 and t % 8 == 0:
            return t
    return m


def _batch_groups(n):
    """Grid steps over the batch: >= 2 when possible (two v7x TensorCores) while still
    batching several images per step for large n to amortize per-step overhead."""
    for g in (4, 3, 2):
        if n % g == 0:
            return g
    return n


def _bn_fold(p):
    scale = p['gamma'] / jnp.sqrt(p['var'] + EPS)
    shift = p['beta'] - p['mean'] * scale
    return scale, shift


# ----------------------------- Pallas kernels ------------------------------

def _gemm_bias_act_kernel(x_ref, w_ref, b_ref, o_ref, *, act):
    # 1x1 convs / im2col'ed stem 3x3 convs: bf16 MXU dot, f32 accumulate, BN + act fused.
    y = jnp.dot(x_ref[...], w_ref[...], preferred_element_type=jnp.float32) + b_ref[...]
    if act == 'relu':
        y = jnp.maximum(y, 0.0)
    o_ref[...] = y.astype(o_ref.dtype)


def _gemm_dual_residual_relu_kernel(x_ref, w_ref, b_ref, r_ref, wr_ref, br_ref, o_ref):
    # Fused: conv3 (linear) + downsample 1x1 (linear) + residual add + ReLU.
    y = jnp.dot(x_ref[...], w_ref[...], preferred_element_type=jnp.float32) + b_ref[...]
    y = y + jnp.dot(r_ref[...], wr_ref[...], preferred_element_type=jnp.float32) + br_ref[...]
    o_ref[...] = jnp.maximum(y, 0.0).astype(o_ref.dtype)


def _gemm_residual_relu_kernel(x_ref, w_ref, b_ref, r_ref, o_ref):
    # Fused: conv3 (linear) + identity residual add + ReLU (no downsample case).
    y = jnp.dot(x_ref[...], w_ref[...], preferred_element_type=jnp.float32) + b_ref[...]
    y = y + r_ref[...].astype(jnp.float32)
    o_ref[...] = jnp.maximum(y, 0.0).astype(o_ref.dtype)


def _multi_lite_kernel(x_ref, pw_ref, dwk_ref, b_ref, o_ref, pad_ref, *, NB, H, W, C):
    """One OSBlock "level": several InversedDepthwiseSeparable ops fused in one kernel.

      x_ref  : (NB*H*W, Cin_total)  bf16 activation rows
      pw_ref : (Cin_total, C)       bf16 pointwise weight (dense or block-diagonal)
      dwk_ref: (9, C)               f32 BN-scale-folded depthwise taps
      b_ref  : (1, C)               f32 BN shift
      pad_ref: (NB, H+2, W+2, C)    f32 VMEM scratch holding the zero-padded pointwise
                                    output (padding built in-kernel, never hits HBM)

    NOTE: the fusion relies on the pointwise conv having NO bias, so the zero padding
    stays exactly zero through the pointwise conv and the border depthwise taps.
    """
    # 1) pointwise 1x1 conv: one dense GEMM over all NB*H*W rows (MXU, f32 accumulate).
    y = jnp.dot(x_ref[...], pw_ref[...], preferred_element_type=jnp.float32)

    # 2) in-kernel zero padding: zero the scratch, store the interior.
    pad_ref[...] = jnp.zeros(pad_ref.shape, pad_ref.dtype)
    if W % 8 == 0:
        # layout-preserving split of the row dim (W is a full sublane group)
        pad_ref[:, 1:H + 1, 1:W + 1, :] = y.reshape(NB, H, W, C)
    else:
        for n in range(NB):                      # small static unroll (tiny W case)
            for h in range(H):
                r = (n * H + h) * W
                pad_ref[n, h + 1, 1:W + 1, :] = y[r:r + W, :]

    # 3) depthwise 3x3 + folded BN + ReLU on the VMEM-resident tile (VPU).
    # TODO(synk): on v6e/v7x the 9-tap MAC could run in bf16 for 2x VPU throughput;
    # kept f32 here so the same kernel is exact on v5e (no bf16 VALU).
    dwk = dwk_ref[...]
    acc = jnp.zeros((NB, H, W, C), jnp.float32)
    for dy in range(3):
        for dx in range(3):
            t = dy * 3 + dx
            acc = acc + pad_ref[:, dy:dy + H, dx:dx + W, :] * dwk[t:t + 1, :]
    acc = acc + b_ref[...]
    # TODO(synk): for very small C (< 128 lanes) the store below is a masked partial
    # store; at production OSNet channel counts (4*mid >= 256) it is naturally lane-dense.
    o_ref[...] = jnp.maximum(acc, 0.0).astype(o_ref.dtype)


def _se4_sum_kernel(a_ref, b_ref, c_ref, d_ref, w1_ref, b1_ref, w2_ref, b2_ref, o_ref):
    # Shared SE gate applied to the four OSBlock branches + branch sum, one pass.
    nb, HW, C = a_ref.shape
    inv = 1.0 / HW
    xs = [a_ref[...], b_ref[...], c_ref[...], d_ref[...]]          # (nb, HW, C) bf16
    # Stack the pooled vectors -> two MXU dots instead of eight M=1 dots.
    pooled = jnp.concatenate(
        [jnp.sum(x.astype(jnp.float32), axis=1) * inv for x in xs], axis=0)   # (4*nb, C)
    z = jnp.dot(pooled.astype(jnp.bfloat16), w1_ref[...],
                preferred_element_type=jnp.float32) + b1_ref[...]
    z = jnp.maximum(z, 0.0)
    g = jnp.dot(z.astype(jnp.bfloat16), w2_ref[...],
                preferred_element_type=jnp.float32) + b2_ref[...]
    g = pl.reciprocal(1.0 + jnp.exp(-g), approx=True)               # sigmoid (EUP recip)
    acc = jnp.zeros((nb, HW, C), jnp.float32)
    for k in range(4):
        gk = g[k * nb:(k + 1) * nb, :][:, None, :]                  # (nb, 1, C)
        acc = acc + xs[k].astype(jnp.float32) * gk
    o_ref[...] = acc.astype(o_ref.dtype)


# ----------------------------- kernel wrappers ------------------------------

def gemm_bias_act(x, w, b, act):
    """x: (M, K) bf16, w: (K, N) bf16 (BN folded), b: (1, N) f32 -> (M, N) bf16."""
    m, k = x.shape
    n = w.shape[1]
    tm = _pick_tile(m)
    kernel = functools.partial(_gemm_bias_act_kernel, act=act)
    # TODO(synk): mark the constant weight/bias BlockSpecs single-buffered
    # (pipeline_mode=pl.Buffered(1)) to shave VMEM on v7x at production channel counts.
    return pl.pallas_call(
        kernel,
        out_shape=jax.ShapeDtypeStruct((m, n), jnp.bfloat16),
        grid=(m // tm,),
        in_specs=[pl.BlockSpec((tm, k), lambda i: (i, 0)),
                  pl.BlockSpec((k, n), lambda i: (0, 0)),
                  pl.BlockSpec((1, n), lambda i: (0, 0))],
        out_specs=pl.BlockSpec((tm, n), lambda i: (i, 0)),
        compiler_params=_cparams(1),
    )(x, w, b)


def gemm_dual_residual_relu(x, w, b, r, wr, br):
    """relu(x@w + b + r@wr + br): conv3 + downsample + residual + ReLU in one kernel."""
    m, k = x.shape
    n = w.shape[1]
    kr = r.shape[1]
    tm = _pick_tile(m)
    return pl.pallas_call(
        _gemm_dual_residual_relu_kernel,
        out_shape=jax.ShapeDtypeStruct((m, n), jnp.bfloat16),
        grid=(m // tm,),
        in_specs=[pl.BlockSpec((tm, k), lambda i: (i, 0)),
                  pl.BlockSpec((k, n), lambda i: (0, 0)),
                  pl.BlockSpec((1, n), lambda i: (0, 0)),
                  pl.BlockSpec((tm, kr), lambda i: (i, 0)),
                  pl.BlockSpec((kr, n), lambda i: (0, 0)),
                  pl.BlockSpec((1, n), lambda i: (0, 0))],
        out_specs=pl.BlockSpec((tm, n), lambda i: (i, 0)),
        compiler_params=_cparams(1),
    )(x, w, b, r, wr, br)


def gemm_residual_relu(x, w, b, r):
    """relu(x@w + b + r): conv3 + identity residual + ReLU in one kernel."""
    m, k = x.shape
    n = w.shape[1]
    tm = _pick_tile(m)
    return pl.pallas_call(
        _gemm_residual_relu_kernel,
        out_shape=jax.ShapeDtypeStruct((m, n), jnp.bfloat16),
        grid=(m // tm,),
        in_specs=[pl.BlockSpec((tm, k), lambda i: (i, 0)),
                  pl.BlockSpec((k, n), lambda i: (0, 0)),
                  pl.BlockSpec((1, n), lambda i: (0, 0)),
                  pl.BlockSpec((tm, n), lambda i: (i, 0))],
        out_specs=pl.BlockSpec((tm, n), lambda i: (i, 0)),
        compiler_params=_cparams(1),
    )(x, w, b, r)


def multi_lite(x2d, lvl, n, h, w):
    """One fused OSBlock level of lite convs: x2d (n*h*w, Cin_t) bf16 -> (n,h,w,Cout_t)."""
    cin = x2d.shape[1]
    cout = lvl['pw'].shape[1]
    hw = h * w
    g = _batch_groups(n)
    nb = n // g
    kernel = functools.partial(_multi_lite_kernel, NB=nb, H=h, W=w, C=cout)
    return pl.pallas_call(
        kernel,
        out_shape=jax.ShapeDtypeStruct((n, h, w, cout), jnp.bfloat16),
        grid=(g,),
        in_specs=[pl.BlockSpec((nb * hw, cin), lambda i: (i, 0)),
                  pl.BlockSpec((cin, cout), lambda i: (0, 0)),
                  pl.BlockSpec((9, cout), lambda i: (0, 0)),
                  pl.BlockSpec((1, cout), lambda i: (0, 0))],
        out_specs=pl.BlockSpec((nb, h, w, cout), lambda i: (i, 0, 0, 0)),
        scratch_shapes=[pltpu.VMEM((nb, h + 2, w + 2, cout), jnp.float32)],
        compiler_params=_cparams(1),
    )(x2d, lvl['pw'], lvl['dwk'], lvl['bias'])


def se4_sum(branches, gate, n, h, w, c):
    """Shared SE gate on the four OSBlock branch outputs + sum, one kernel."""
    hw = h * w
    g = _batch_groups(n)
    nb = n // g
    cr = gate['w1'].shape[1]
    ins = [b.reshape(n, hw, c) for b in branches]
    feat_spec = pl.BlockSpec((nb, hw, c), lambda i: (i, 0, 0))
    out = pl.pallas_call(
        _se4_sum_kernel,
        out_shape=jax.ShapeDtypeStruct((n, hw, c), jnp.bfloat16),
        grid=(g,),
        in_specs=[feat_spec, feat_spec, feat_spec, feat_spec,
                  pl.BlockSpec((c, cr), lambda i: (0, 0)),
                  pl.BlockSpec((1, cr), lambda i: (0, 0)),
                  pl.BlockSpec((cr, c), lambda i: (0, 0)),
                  pl.BlockSpec((1, c), lambda i: (0, 0))],
        out_specs=pl.BlockSpec((nb, hw, c), lambda i: (i, 0, 0)),
        compiler_params=_cparams(1),
    )(*ins, gate['w1'], gate['b1'], gate['w2'], gate['b2'])
    return out.reshape(n, h, w, c)


# ------------------------------- JAX glue ----------------------------------

def extract_patches(x, k, stride, pad):
    """im2col for the stem convs (bf16): (N,H,W,C) -> (N,Ho,Wo,k*k*C), order (dy, dx, c)."""
    # TODO(synk): at production resolutions move the 9-tap accumulation in-kernel to
    # avoid the 9x im2col HBM expansion; tiny at the shapes exercised here.
    n, H, W, C = x.shape
    xp = jnp.pad(x, ((0, 0), (pad, pad), (pad, pad), (0, 0)))
    Ho = (H + 2 * pad - k) // stride + 1
    Wo = (W + 2 * pad - k) // stride + 1
    cols = []
    for dy in range(k):
        for dx in range(k):
            cols.append(xp[:, dy:dy + (Ho - 1) * stride + 1:stride,
                           dx:dx + (Wo - 1) * stride + 1:stride, :])
    return jnp.concatenate(cols, axis=-1), Ho, Wo


def maxpool3x3_s2(x):
    init = jnp.array(-jnp.inf, x.dtype)
    return jax.lax.reduce_window(x, init, jax.lax.max, (1, 3, 3, 1), (1, 2, 2, 1),
                                 padding=((0, 0), (1, 1), (1, 1), (0, 0)))


def avgpool2x2(x):
    init = jnp.array(0.0, x.dtype)
    s = jax.lax.reduce_window(x, init, jax.lax.add, (1, 2, 2, 1), (1, 2, 2, 1), 'VALID')
    return s * 0.25


# --------------------------- functional modules ----------------------------

def conv1x1(x, prep, act='relu'):
    """ConvModule k=1: 1x1 conv + folded BN + activation as one GEMM kernel."""
    n, h, w, cin = x.shape
    cout = prep['w'].shape[1]
    y = gemm_bias_act(x.reshape(n * h * w, cin), prep['w'], prep['b'], act)
    return y.reshape(n, h, w, cout)


def conv3x3_bn_relu(x, prep, stride):
    """Stem 3x3 conv + BN + ReLU: XLA im2col feeding one fused GEMM kernel."""
    n, h, w, cin = x.shape
    cout = prep['w'].shape[1]
    patches, ho, wo = extract_patches(x, 3, stride, 1)
    y = gemm_bias_act(patches.reshape(n * ho * wo, 9 * cin), prep['w'], prep['b'], 'relu')
    return y.reshape(n, ho, wo, cout)


def os_block_fwd(x, bp):
    n, h, w, cin = x.shape
    mid = bp['mid']
    x1 = conv1x1(x, bp['conv1'], act='relu')                       # (n,h,w,mid)

    # Branch "levels": every lite conv that can run concurrently is one fused kernel.
    # Level outputs are ordered so channels [:mid] are the branch that terminates there
    # and channels [mid:] feed the next level.
    # TODO(synk): DropChannel between stacked lite convs is training-time channel
    # dropout; treated as identity (inference semantics).
    cur = x1.reshape(n * h * w, mid)
    branch_feats = []
    for lvl in bp['levels']:
        out = multi_lite(cur, lvl, n, h, w)                        # (n,h,w,k*mid)
        branch_feats.append(out[..., :mid])
        if out.shape[-1] > mid:
            cur = out[..., mid:].reshape(n * h * w, out.shape[-1] - mid)

    x2 = se4_sum(branch_feats, bp['gate'], n, h, w, mid)           # (n,h,w,mid)

    # conv3 (linear) + optional downsample (linear) + residual add + ReLU, fused.
    cout = bp['conv3']['w'].shape[1]
    m = n * h * w
    x2f = x2.reshape(m, mid)
    if bp['downsample'] is not None:
        y = gemm_dual_residual_relu(x2f, bp['conv3']['w'], bp['conv3']['b'],
                                    x.reshape(m, cin),
                                    bp['downsample']['w'], bp['downsample']['b'])
    else:
        y = gemm_residual_relu(x2f, bp['conv3']['w'], bp['conv3']['b'], x.reshape(m, cout))
    return y.reshape(n, h, w, cout)


def stem_apply(x, p):
    x = conv3x3_bn_relu(x, p['conv1'], stride=2)
    x = conv3x3_bn_relu(x, p['conv2'], stride=1)
    x = conv3x3_bn_relu(x, p['conv3'], stride=1)
    return maxpool3x3_s2(x)


def apply_layer(layer, x):
    t = layer['type']
    if t == 'osblock':
        return os_block_fwd(x, layer['p'])
    if t == 'conv_pool':
        return avgpool2x2(conv1x1(x, layer['p'], act='relu'))
    return conv1x1(x, layer['p'], act='relu')


def osnet_forward(prepared, x_nchw):
    x = jnp.transpose(x_nchw, (0, 2, 3, 1)).astype(jnp.bfloat16)   # NCHW -> NHWC, bf16
    x = stem_apply(x, prepared['stem'])
    feats = []
    for stage in prepared['stages']:
        for layer in stage:
            x = apply_layer(layer, x)
        feats.append(jnp.transpose(x, (0, 3, 1, 2)).astype(jnp.float32))  # NCHW out
    return feats


# ------------------- parameter init (PyTorch-equivalent) -------------------

class KeyGen:
    def __init__(self, key):
        self.key = key

    def __call__(self):
        self.key, sub = jax.random.split(self.key)
        return sub


def init_conv_bn(kg, cin, cout, k):
    fan_out = cout * k * k                       # kaiming_normal_, mode='fan_out'
    w = math.sqrt(2.0 / fan_out) * jax.random.normal(kg(), (k, k, cin, cout), jnp.float32)
    z = jnp.zeros((cout,), jnp.float32)
    o = jnp.ones((cout,), jnp.float32)
    return dict(w=w, gamma=o, beta=z, mean=z, var=o)


def init_lite(kg, cin, cout):
    pw = math.sqrt(2.0 / cout) * jax.random.normal(kg(), (1, 1, cin, cout), jnp.float32)
    dw = math.sqrt(2.0 / 9.0) * jax.random.normal(kg(), (3, 3, cout), jnp.float32)
    z = jnp.zeros((cout,), jnp.float32)
    o = jnp.ones((cout,), jnp.float32)
    return dict(pw=pw, dw=dw, gamma=o, beta=z, mean=z, var=o)


def init_se(kg, c, reduction=4):
    cr = max(1, c // reduction)
    w1 = math.sqrt(2.0 / cr) * jax.random.normal(kg(), (c, cr), jnp.float32)
    w2 = math.sqrt(2.0 / c) * jax.random.normal(kg(), (cr, c), jnp.float32)
    return dict(w1=w1, b1=jnp.zeros((cr,), jnp.float32),
                w2=w2, b2=jnp.zeros((c,), jnp.float32))


def init_osblock(kg, cin, cout, bottleneck_reduction=4):
    mid = cout // bottleneck_reduction
    return dict(
        conv1=init_conv_bn(kg, cin, mid, 1),
        conv2a=init_lite(kg, mid, mid),
        conv2b=[init_lite(kg, mid, mid) for _ in range(2)],
        conv2c=[init_lite(kg, mid, mid) for _ in range(3)],
        conv2d=[init_lite(kg, mid, mid) for _ in range(4)],
        gate=init_se(kg, mid),
        conv3=init_conv_bn(kg, mid, cout, 1),
        downsample=init_conv_bn(kg, cin, cout, 1) if cin != cout else None,
    )


def init_osnet(kg, first_channel, stage_repeat, arch):
    mid = first_channel // 2
    params = dict(
        stem=dict(conv1=init_conv_bn(kg, 3, mid, 3),
                  conv2=init_conv_bn(kg, mid, mid, 3),
                  conv3=init_conv_bn(kg, mid, first_channel, 3)),
        stages=[],
    )
    a_idx = 0
    for s_idx in range(len(stage_repeat)):
        stage = []
        for _ in range(stage_repeat[s_idx]):
            block, inc, ouc, s = arch[a_idx]
            a_idx += 1
            if block == 'OSBlock':
                if s == 1:
                    stage.append(dict(type='osblock', p=init_osblock(kg, inc, ouc)))
                else:
                    stage.append(dict(type='conv_pool', p=init_conv_bn(kg, inc, ouc, 1)))
            elif block == 'ConvModule':
                stage.append(dict(type='conv', p=init_conv_bn(kg, inc, ouc, 1)))
        params['stages'].append(stage)
    return params


# ----------------- weight preparation (runs ONCE, outside jit) --------------

def _prep_conv(p):
    scale, shift = _bn_fold(p)
    cout = p['w'].shape[-1]
    w = (p['w'] * scale).reshape(-1, cout).astype(jnp.bfloat16)
    return dict(w=w, b=shift.reshape(1, cout).astype(jnp.float32))


def _prep_lite_level(branch_ps, shared_input):
    """Pack k parallel InversedDepthwiseSeparable ops into one fused-kernel weight set.
    shared_input=True  -> all branches read the same input: dense (Cin, k*C) weight.
    shared_input=False -> distinct per-branch inputs: block-diagonal (k*Cin, k*C) weight.
    The pointwise conv has no bias (required so in-kernel zero padding stays zero)."""
    k = len(branch_ps)
    cin = branch_ps[0]['pw'].shape[-2]
    c = branch_ps[0]['pw'].shape[-1]
    pws, dwks, shifts = [], [], []
    for p in branch_ps:
        scale, shift = _bn_fold(p)
        pws.append(p['pw'].reshape(cin, c))
        dwks.append((p['dw'] * scale).reshape(9, c))
        shifts.append(shift)
    if shared_input or k == 1:
        pw = jnp.concatenate(pws, axis=1)                               # (Cin, k*C)
    else:
        pw = jnp.zeros((k * cin, k * c), jnp.float32)
        for i, m in enumerate(pws):
            pw = pw.at[i * cin:(i + 1) * cin, i * c:(i + 1) * c].set(m)  # block-diag
    return dict(pw=pw.astype(jnp.bfloat16),
                dwk=jnp.concatenate(dwks, axis=1).astype(jnp.float32),   # (9, k*C)
                bias=jnp.concatenate(shifts).reshape(1, k * c).astype(jnp.float32))


def _prep_gate(g):
    return dict(w1=g['w1'].astype(jnp.bfloat16),
                b1=g['b1'].reshape(1, -1).astype(jnp.float32),
                w2=g['w2'].astype(jnp.bfloat16),
                b2=g['b2'].reshape(1, -1).astype(jnp.float32))


def _prep_osblock(p):
    mid = p['conv1']['w'].shape[-1]
    levels = [
        _prep_lite_level([p['conv2a'], p['conv2b'][0], p['conv2c'][0], p['conv2d'][0]], True),
        _prep_lite_level([p['conv2b'][1], p['conv2c'][1], p['conv2d'][1]], False),
        _prep_lite_level([p['conv2c'][2], p['conv2d'][2]], False),
        _prep_lite_level([p['conv2d'][3]], False),
    ]
    return dict(mid=mid,
                conv1=_prep_conv(p['conv1']),
                levels=levels,
                gate=_prep_gate(p['gate']),
                conv3=_prep_conv(p['conv3']),
                downsample=_prep_conv(p['downsample']) if p['downsample'] is not None else None)


def prepare_osnet(params):
    prepared = dict(stem={k: _prep_conv(v) for k, v in params['stem'].items()}, stages=[])
    for stage in params['stages']:
        ps = []
        for layer in stage:
            if layer['type'] == 'osblock':
                ps.append(dict(type='osblock', p=_prep_osblock(layer['p'])))
            else:
                ps.append(dict(type=layer['type'], p=_prep_conv(layer['p'])))
        prepared['stages'].append(ps)
    return prepared


# ---------------------------------- main ------------------------------------

if __name__ == "__main__":
    # Small synthetic OSNet config (consistent with OSNet(first_channel, stage_repeat, arch))
    first_channel = 16
    stage_repeat = [2, 2]
    arch = [
        ('OSBlock', 16, 32, 1),   # OSBlock(16, 32)
        ('OSBlock', 32, 32, 2),   # ConvModule(32,32,1) + AvgPool2d(2)
        ('OSBlock', 32, 64, 1),   # OSBlock(32, 64)
        ('ConvModule', 64, 64, 1),
    ]

    raw_params = init_osnet(KeyGen(jax.random.PRNGKey(1)), first_channel, stage_repeat, arch)
    prepared = prepare_osnet(raw_params)   # BN folding / bf16 cast / packing, outside jit

    x = jax.random.normal(jax.random.PRNGKey(0), (2, 3, 32, 32), jnp.float32)  # NCHW

    fwd = jax.jit(lambda inp: osnet_forward(prepared, inp))
    feats = jax.block_until_ready(fwd(x))

    assert feats[0].shape == (2, 32, 4, 4), feats[0].shape
    assert feats[1].shape == (2, 64, 4, 4), feats[1].shape
    assert all(bool(jnp.all(jnp.isfinite(f))) for f in feats)
    print("KERNEL_OK")
</pallas_src>

<mosaic_0001>
module attributes {stable_mosaic.version = 11 : i64} {
  func.func @_gemm_bias_act_kernel(%arg0: i32, %arg1: memref<256x27xbf16, #tpu.memory_space<vmem>>, %arg2: memref<27x8xbf16, #tpu.memory_space<vmem>>, %arg3: memref<1x8xf32, #tpu.memory_space<vmem>>, %arg4: memref<256x8xbf16, #tpu.memory_space<vmem>>) attributes {dimension_semantics = [#tpu.dimension_semantics<parallel>], iteration_bounds = array<i64: 2>, scalar_prefetch = 0 : i64, scratch_operands = 0 : i64, tpu.core_type = #tpu.core_type<tc>, window_params = [{transform_indices = @transform_0, window_bounds = array<i64: 256, 27>}, {pipeline_mode = #tpu.pipeline_mode<synchronous>, transform_indices = @transform_1, window_bounds = array<i64: 27, 8>}, {pipeline_mode = #tpu.pipeline_mode<synchronous>, transform_indices = @transform_2, window_bounds = array<i64: 1, 8>}, {transform_indices = @transform_3, window_bounds = array<i64: 256, 8>}]} {
    %c0 = arith.constant 0 : index
    %c0_0 = arith.constant 0 : index
    %0 = vector.load %arg1[%c0, %c0_0] : memref<256x27xbf16, #tpu.memory_space<vmem>>, vector<256x27xbf16>
    %c0_1 = arith.constant 0 : index
    %c0_2 = arith.constant 0 : index
    %1 = vector.load %arg2[%c0_1, %c0_2] : memref<27x8xbf16, #tpu.memory_space<vmem>>, vector<27x8xbf16>
    %cst = arith.constant dense<0.000000e+00> : vector<256x8xf32>
    %2 = tpu.matmul %0, %1, %cst {dimension_numbers = #tpu.dot_dimension_numbers<[1], [0], [0], [1], [0, 0, 1, 1], [], []>} : vector<256x27xbf16>, vector<27x8xbf16>, vector<256x8xf32> -> vector<256x8xf32>
    %c0_3 = arith.constant 0 : index
    %c0_4 = arith.constant 0 : index
    %3 = vector.load %arg3[%c0_3, %c0_4] : memref<1x8xf32, #tpu.memory_space<vmem>>, vector<1x8xf32>
    %4 = vector.broadcast %3 : vector<1x8xf32> to vector<256x8xf32>
    %5 = arith.addf %2, %4 : vector<256x8xf32>
    %cst_5 = arith.constant 0.000000e+00 : f32
    %6 = vector.broadcast %cst_5 : f32 to vector<256x8xf32>
    %7 = arith.maximumf %5, %6 : vector<256x8xf32>
    %8 = arith.truncf %7 : vector<256x8xf32> to vector<256x8xbf16>
    %c0_6 = arith.constant 0 : index
    %c0_7 = arith.constant 0 : index
    %9 = vector.load %arg4[%c0_6, %c0_7] : memref<256x8xbf16, #tpu.memory_space<vmem>>, vector<256x8xbf16>
    tpu.vector_store %arg4[%c0_6, %c0_7], %8 {strides = array<i32>} : memref<256x8xbf16, #tpu.memory_space<vmem>>, vector<256x8xbf16>,
    return
  }
  func.func @transform_0(%arg0: i32) -> (i32, i32) {
    %c0_i32 = arith.constant 0 : i32
    %c0_i32_0 = arith.constant 0 : i32
    return %arg0, %c0_i32 : i32, i32
  }
  func.func @transform_1(%arg0: i32) -> (i32, i32) {
    %c0_i32 = arith.constant 0 : i32
    %c0_i32_0 = arith.constant 0 : i32
    %c0_i32_1 = arith.constant 0 : i32
    return %c0_i32, %c0_i32_0 : i32, i32
  }
  func.func @transform_2(%arg0: i32) -> (i32, i32) {
    %c0_i32 = arith.constant 0 : i32
    %c0_i32_0 = arith.constant 0 : i32
    %c0_i32_1 = arith.constant 0 : i32
    return %c0_i32, %c0_i32_0 : i32, i32
  }
  func.func @transform_3(%arg0: i32) -> (i32, i32) {
    %c0_i32 = arith.constant 0 : i32
    %c0_i32_0 = arith.constant 0 : i32
    return %arg0, %c0_i32 : i32, i32
  }
}

module attributes {stable_mosaic.version = 11 : i64} {
  func.func @_gemm_bias_act_kernel(%arg0: i32, %arg1: memref<256x72xbf16, #tpu.memory_space<vmem>>, %arg2: memref<72x8xbf16, #tpu.memory_space<vmem>>, %arg3: memref<1x8xf32, #tpu.memory_space<vmem>>, %arg4: memref<256x8xbf16, #tpu.memory_space<vmem>>) attributes {dimension_semantics = [#tpu.dimension_semantics<parallel>], iteration_bounds = array<i64: 2>, scalar_prefetch = 0 : i64, scratch_operands = 0 : i64, tpu.core_type = #tpu.core_type<tc>, window_params = [{transform_indices = @transform_0, window_bounds = array<i64: 256, 72>}, {pipeline_mode = #tpu.pipeline_mode<synchronous>, transform_indices = @transform_1, window_bounds = array<i64: 72, 8>}, {pipeline_mode = #tpu.pipeline_mode<synchronous>, transform_indices = @transform_2, window_bounds = array<i64: 1, 8>}, {transform_indices = @transform_3, window_bounds = array<i64: 256, 8>}]} {
    %c0 = arith.constant 0 : index
    %c0_0 = arith.constant 0 : index
    %0 = vector.load %arg1[%c0, %c0_0] : memref<256x72xbf16, #tpu.memory_space<vmem>>, vector<256x72xbf16>
    %c0_1 = arith.constant 0 : index
    %c0_2 = arith.constant 0 : index
    %1 = vector.load %arg2[%c0_1, %c0_2] : memref<72x8xbf16, #tpu.memory_space<vmem>>, vector<72x8xbf16>
    %cst = arith.constant dense<0.000000e+00> : vector<256x8xf32>
    %2 = tpu.matmul %0, %1, %cst {dimension_numbers = #tpu.dot_dimension_numbers<[1], [0], [0], [1], [0, 0, 1, 1], [], []>} : vector<256x72xbf16>, vector<72x8xbf16>, vector<256x8xf32> -> vector<256x8xf32>
    %c0_3 = arith.constant 0 : index
    %c0_4 = arith.constant 0 : index
    %3 = vector.load %arg3[%c0_3, %c0_4] : memref<1x8xf32, #tpu.memory_space<vmem>>, vector<1x8xf32>
    %4 = vector.broadcast %3 : vector<1x8xf32> to vector<256x8xf32>
    %5 = arith.addf %2, %4 : vector<256x8xf32>
    %cst_5 = arith.constant 0.000000e+00 : f32
    %6 = vector.broadcast %cst_5 : f32 to vector<256x8xf32>
    %7 = arith.maximumf %5, %6 : vector<256x8xf32>
    %8 = arith.truncf %7 : vector<256x8xf32> to vector<256x8xbf16>
    %c0_6 = arith.constant 0 : index
    %c0_7 = arith.constant 0 : index
    %9 = vector.load %arg4[%c0_6, %c0_7] : memref<256x8xbf16, #tpu.memory_space<vmem>>, vector<256x8xbf16>
    tpu.vector_store %arg4[%c0_6, %c0_7], %8 {strides = array<i32>} : memref<256x8xbf16, #tpu.memory_space<vmem>>, vector<256x8xbf16>,
    return
  }
  func.func @transform_0(%arg0: i32) -> (i32, i32) {
    %c0_i32 = arith.constant 0 : i32
    %c0_i32_0 = arith.constant 0 : i32
    return %arg0, %c0_i32 : i32, i32
  }
  func.func @transform_1(%arg0: i32) -> (i32, i32) {
    %c0_i32 = arith.constant 0 : i32
    %c0_i32_0 = arith.constant 0 : i32
    %c0_i32_1 = arith.constant 0 : i32
    return %c0_i32, %c0_i32_0 : i32, i32
  }
  func.func @transform_2(%arg0: i32) -> (i32, i32) {
    %c0_i32 = arith.constant 0 : i32
    %c0_i32_0 = arith.constant 0 : i32
    %c0_i32_1 = arith.constant 0 : i32
    return %c0_i32, %c0_i32_0 : i32, i32
  }
  func.func @transform_3(%arg0: i32) -> (i32, i32) {
    %c0_i32 = arith.constant 0 : i32
    %c0_i32_0 = arith.constant 0 : i32
    return %arg0, %c0_i32 : i32, i32
  }
}

module attributes {stable_mosaic.version = 11 : i64} {
  func.func @_gemm_bias_act_kernel(%arg0: i32, %arg1: memref<256x72xbf16, #tpu.memory_space<vmem>>, %arg2: memref<72x16xbf16, #tpu.memory_space<vmem>>, %arg3: memref<1x16xf32, #tpu.memory_space<vmem>>, %arg4: memref<256x16xbf16, #tpu.memory_space<vmem>>) attributes {dimension_semantics = [#tpu.dimension_semantics<parallel>], iteration_bounds = array<i64: 2>, scalar_prefetch = 0 : i64, scratch_operands = 0 : i64, tpu.core_type = #tpu.core_type<tc>, window_params = [{transform_indices = @transform_0, window_bounds = array<i64: 256, 72>}, {pipeline_mode = #tpu.pipeline_mode<synchronous>, transform_indices = @transform_1, window_bounds = array<i64: 72, 16>}, {pipeline_mode = #tpu.pipeline_mode<synchronous>, transform_indices = @transform_2, window_bounds = array<i64: 1, 16>}, {transform_indices = @transform_3, window_bounds = array<i64: 256, 16>}]} {
    %c0 = arith.constant 0 : index
    %c0_0 = arith.constant 0 : index
    %0 = vector.load %arg1[%c0, %c0_0] : memref<256x72xbf16, #tpu.memory_space<vmem>>, vector<256x72xbf16>
    %c0_1 = arith.constant 0 : index
    %c0_2 = arith.constant 0 : index
    %1 = vector.load %arg2[%c0_1, %c0_2] : memref<72x16xbf16, #tpu.memory_space<vmem>>, vector<72x16xbf16>
    %cst = arith.constant dense<0.000000e+00> : vector<256x16xf32>
    %2 = tpu.matmul %0, %1, %cst {dimension_numbers = #tpu.dot_dimension_numbers<[1], [0], [0], [1], [0, 0, 1, 1], [], []>} : vector<256x72xbf16>, vector<72x16xbf16>, vector<256x16xf32> -> vector<256x16xf32>
    %c0_3 = arith.constant 0 : index
    %c0_4 = arith.constant 0 : index
    %3 = vector.load %arg3[%c0_3, %c0_4] : memref<1x16xf32, #tpu.memory_space<vmem>>, vector<1x16xf32>
    %4 = vector.broadcast %3 : vector<1x16xf32> to vector<256x16xf32>
    %5 = arith.addf %2, %4 : vector<256x16xf32>
    %cst_5 = arith.constant 0.000000e+00 : f32
    %6 = vector.broadcast %cst_5 : f32 to vector<256x16xf32>
    %7 = arith.maximumf %5, %6 : vector<256x16xf32>
    %8 = arith.truncf %7 : vector<256x16xf32> to vector<256x16xbf16>
    %c0_6 = arith.constant 0 : index
    %c0_7 = arith.constant 0 : index
    %9 = vector.load %arg4[%c0_6, %c0_7] : memref<256x16xbf16, #tpu.memory_space<vmem>>, vector<256x16xbf16>
    tpu.vector_store %arg4[%c0_6, %c0_7], %8 {strides = array<i32>} : memref<256x16xbf16, #tpu.memory_space<vmem>>, vector<256x16xbf16>,
    return
  }
  func.func @transform_0(%arg0: i32) -> (i32, i32) {
    %c0_i32 = arith.constant 0 : i32
    %c0_i32_0 = arith.constant 0 : i32
    return %arg0, %c0_i32 : i32, i32
  }
  func.func @transform_1(%arg0: i32) -> (i32, i32) {
    %c0_i32 = arith.constant 0 : i32
    %c0_i32_0 = arith.constant 0 : i32
    %c0_i32_1 = arith.constant 0 : i32
    return %c0_i32, %c0_i32_0 : i32, i32
  }
  func.func @transform_2(%arg0: i32) -> (i32, i32) {
    %c0_i32 = arith.constant 0 : i32
    %c0_i32_0 = arith.constant 0 : i32
    %c0_i32_1 = arith.constant 0 : i32
    return %c0_i32, %c0_i32_0 : i32, i32
  }
  func.func @transform_3(%arg0: i32) -> (i32, i32) {
    %c0_i32 = arith.constant 0 : i32
    %c0_i32_0 = arith.constant 0 : i32
    return %arg0, %c0_i32 : i32, i32
  }
}

module attributes {stable_mosaic.version = 11 : i64} {
  func.func @_gemm_bias_act_kernel(%arg0: i32, %arg1: memref<64x16xbf16, #tpu.memory_space<vmem>>, %arg2: memref<16x8xbf16, #tpu.memory_space<vmem>>, %arg3: memref<1x8xf32, #tpu.memory_space<vmem>>, %arg4: memref<64x8xbf16, #tpu.memory_space<vmem>>) attributes {dimension_semantics = [#tpu.dimension_semantics<parallel>], iteration_bounds = array<i64: 2>, scalar_prefetch = 0 : i64, scratch_operands = 0 : i64, tpu.core_type = #tpu.core_type<tc>, window_params = [{transform_indices = @transform_0, window_bounds = array<i64: 64, 16>}, {pipeline_mode = #tpu.pipeline_mode<synchronous>, transform_indices = @transform_1, window_bounds = array<i64: 16, 8>}, {pipeline_mode = #tpu.pipeline_mode<synchronous>, transform_indices = @transform_2, window_bounds = array<i64: 1, 8>}, {transform_indices = @transform_3, window_bounds = array<i64: 64, 8>}]} {
    %c0 = arith.constant 0 : index
    %c0_0 = arith.constant 0 : index
    %0 = vector.load %arg1[%c0, %c0_0] : memref<64x16xbf16, #tpu.memory_space<vmem>>, vector<64x16xbf16>
    %c0_1 = arith.constant 0 : index
    %c0_2 = arith.constant 0 : index
    %1 = vector.load %arg2[%c0_1, %c0_2] : memref<16x8xbf16, #tpu.memory_space<vmem>>, vector<16x8xbf16>
    %cst = arith.constant dense<0.000000e+00> : vector<64x8xf32>
    %2 = tpu.matmul %0, %1, %cst {dimension_numbers = #tpu.dot_dimension_numbers<[1], [0], [0], [1], [0, 0, 1, 1], [], []>} : vector<64x16xbf16>, vector<16x8xbf16>, vector<64x8xf32> -> vector<64x8xf32>
    %c0_3 = arith.constant 0 : index
    %c0_4 = arith.constant 0 : index
    %3 = vector.load %arg3[%c0_3, %c0_4] : memref<1x8xf32, #tpu.memory_space<vmem>>, vector<1x8xf32>
    %4 = vector.broadcast %3 : vector<1x8xf32> to vector<64x8xf32>
    %5 = arith.addf %2, %4 : vector<64x8xf32>
    %cst_5 = arith.constant 0.000000e+00 : f32
    %6 = vector.broadcast %cst_5 : f32 to vector<64x8xf32>
    %7 = arith.maximumf %5, %6 : vector<64x8xf32>
    %8 = arith.truncf %7 : vector<64x8xf32> to vector<64x8xbf16>
    %c0_6 = arith.constant 0 : index
    %c0_7 = arith.constant 0 : index
    %9 = vector.load %arg4[%c0_6, %c0_7] : memref<64x8xbf16, #tpu.memory_space<vmem>>, vector<64x8xbf16>
    tpu.vector_store %arg4[%c0_6, %c0_7], %8 {strides = array<i32>} : memref<64x8xbf16, #tpu.memory_space<vmem>>, vector<64x8xbf16>,
    return
  }
  func.func @transform_0(%arg0: i32) -> (i32, i32) {
    %c0_i32 = arith.constant 0 : i32
    %c0_i32_0 = arith.constant 0 : i32
    return %arg0, %c0_i32 : i32, i32
  }
  func.func @transform_1(%arg0: i32) -> (i32, i32) {
    %c0_i32 = arith.constant 0 : i32
    %c0_i32_0 = arith.constant 0 : i32
    %c0_i32_1 = arith.constant 0 : i32
    return %c0_i32, %c0_i32_0 : i32, i32
  }
  func.func @transform_2(%arg0: i32) -> (i32, i32) {
    %c0_i32 = arith.constant 0 : i32
    %c0_i32_0 = arith.constant 0 : i32
    %c0_i32_1 = arith.constant 0 : i32
    return %c0_i32, %c0_i32_0 : i32, i32
  }
  func.func @transform_3(%arg0: i32) -> (i32, i32) {
    %c0_i32 = arith.constant 0 : i32
    %c0_i32_0 = arith.constant 0 : i32
    return %arg0, %c0_i32 : i32, i32
  }
}

module attributes {stable_mosaic.version = 11 : i64} {
  func.func @_multi_lite_kernel(%arg0: i32, %arg1: memref<64x8xbf16, #tpu.memory_space<vmem>>, %arg2: memref<8x32xbf16, #tpu.memory_space<vmem>>, %arg3: memref<9x32xf32, #tpu.memory_space<vmem>>, %arg4: memref<1x32xf32, #tpu.memory_space<vmem>>, %arg5: memref<1x8x8x32xbf16, #tpu.memory_space<vmem>>, %arg6: memref<1x10x10x32xf32, #tpu.memory_space<vmem>>) attributes {dimension_semantics = [#tpu.dimension_semantics<parallel>], iteration_bounds = array<i64: 2>, scalar_prefetch = 0 : i64, scratch_operands = 1 : i64, tpu.core_type = #tpu.core_type<tc>, window_params = [{transform_indices = @transform_0, window_bounds = array<i64: 64, 8>}, {pipeline_mode = #tpu.pipeline_mode<synchronous>, transform_indices = @transform_1, window_bounds = array<i64: 8, 32>}, {pipeline_mode = #tpu.pipeline_mode<synchronous>, transform_indices = @transform_2, window_bounds = array<i64: 9, 32>}, {pipeline_mode = #tpu.pipeline_mode<synchronous>, transform_indices = @transform_3, window_bounds = array<i64: 1, 32>}, {transform_indices = @transform_4, window_bounds = array<i64: 1, 8, 8, 32>}]} {
    %c0 = arith.constant 0 : index
    %c0_0 = arith.constant 0 : index
    %0 = vector.load %arg1[%c0, %c0_0] : memref<64x8xbf16, #tpu.memory_space<vmem>>, vector<64x8xbf16>
    %c0_1 = arith.constant 0 : index
    %c0_2 = arith.constant 0 : index
    %1 = vector.load %arg2[%c0_1, %c0_2] : memref<8x32xbf16, #tpu.memory_space<vmem>>, vector<8x32xbf16>
    %cst = arith.constant dense<0.000000e+00> : vector<64x32xf32>
    %2 = tpu.matmul %0, %1, %cst {dimension_numbers = #tpu.dot_dimension_numbers<[1], [0], [0], [1], [0, 0, 1, 1], [], []>} : vector<64x8xbf16>, vector<8x32xbf16>, vector<64x32xf32> -> vector<64x32xf32>
    %cst_3 = arith.constant 0.000000e+00 : f32
    %3 = vector.broadcast %cst_3 : f32 to vector<1x10x10x32xf32>
    %c0_4 = arith.constant 0 : index
    %c0_5 = arith.constant 0 : index
    %c0_6 = arith.constant 0 : index
    %c0_7 = arith.constant 0 : index
    %4 = vector.load %arg6[%c0_4, %c0_5, %c0_6, %c0_7] : memref<1x10x10x32xf32, #tpu.memory_space<vmem>>, vector<1x10x10x32xf32>
    tpu.vector_store %arg6[%c0_4, %c0_5, %c0_6, %c0_7], %3 {strides = array<i32>} : memref<1x10x10x32xf32, #tpu.memory_space<vmem>>, vector<1x10x10x32xf32>,
    %5 = vector.shape_cast %2 : vector<64x32xf32> to vector<1x8x8x32xf32>
    %c0_8 = arith.constant 0 : index
    %c1 = arith.constant 1 : index
    %c1_9 = arith.constant 1 : index
    %c0_10 = arith.constant 0 : index
    %6 = vector.load %arg6[%c0_8, %c1, %c1_9, %c0_10] : memref<1x10x10x32xf32, #tpu.memory_space<vmem>>, vector<1x8x8x32xf32>
    tpu.vector_store %arg6[%c0_8, %c1, %c1_9, %c0_10], %5 {strides = array<i32>} : memref<1x10x10x32xf32, #tpu.memory_space<vmem>>, vector<1x8x8x32xf32>,
    %c0_11 = arith.constant 0 : index
    %c0_12 = arith.constant 0 : index
    %7 = vector.load %arg3[%c0_11, %c0_12] : memref<9x32xf32, #tpu.memory_space<vmem>>, vector<9x32xf32>
    %cst_13 = arith.constant 0.000000e+00 : f32
    %8 = vector.broadcast %cst_13 : f32 to vector<1x8x8x32xf32>
    %c0_14 = arith.constant 0 : index
    %c0_15 = arith.constant 0 : index
    %c0_16 = arith.constant 0 : index
    %c0_17 = arith.constant 0 : index
    %9 = vector.load %arg6[%c0_14, %c0_15, %c0_16, %c0_17] : memref<1x10x10x32xf32, #tpu.memory_space<vmem>>, vector<1x8x8x32xf32>
    %10 = vector.extract_strided_slice %7 {offsets = [0, 0], sizes = [1, 32], strides = [1, 1]} : vector<9x32xf32> to vector<1x32xf32>
    %11 = vector.shape_cast %10 : vector<1x32xf32> to vector<1x1x1x32xf32>
    %12 = vector.broadcast %11 : vector<1x1x1x32xf32> to vector<1x8x8x32xf32>
    %13 = arith.mulf %9, %12 : vector<1x8x8x32xf32>
    %14 = arith.addf %8, %13 : vector<1x8x8x32xf32>
    %c0_18 = arith.constant 0 : index
    %c0_19 = arith.constant 0 : index
    %c1_20 = arith.constant 1 : index
    %c0_21 = arith.constant 0 : index
    %15 = vector.load %arg6[%c0_18, %c0_19, %c1_20, %c0_21] : memref<1x10x10x32xf32, #tpu.memory_space<vmem>>, vector<1x8x8x32xf32>
    %16 = vector.extract_strided_slice %7 {offsets = [1, 0], sizes = [1, 32], strides = [1, 1]} : vector<9x32xf32> to vector<1x32xf32>
    %17 = vector.shape_cast %16 : vector<1x32xf32> to vector<1x1x1x32xf32>
    %18 = vector.broadcast %17 : vector<1x1x1x32xf32> to vector<1x8x8x32xf32>
    %19 = arith.mulf %15, %18 : vector<1x8x8x32xf32>
    %20 = arith.addf %14, %19 : vector<1x8x8x32xf32>
    %c0_22 = arith.constant 0 : index
    %c0_23 = arith.constant 0 : index
    %c2 = arith.constant 2 : index
    %c0_24 = arith.constant 0 : index
    %21 = vector.load %arg6[%c0_22, %c0_23, %c2, %c0_24] : memref<1x10x10x32xf32, #tpu.memory_space<vmem>>, vector<1x8x8x32xf32>
    %22 = vector.extract_strided_slice %7 {offsets = [2, 0], sizes = [1, 32], strides = [1, 1]} : vector<9x32xf32> to vector<1x32xf32>
    %23 = vector.shape_cast %22 : vector<1x32xf32> to vector<1x1x1x32xf32>
    %24 = vector.broadcast %23 : vector<1x1x1x32xf32> to vector<1x8x8x32xf32>
    %25 = arith.mulf %21, %24 : vector<1x8x8x32xf32>
    %26 = arith.addf %20, %25 : vector<1x8x8x32xf32>
    %c0_25 = arith.constant 0 : index
    %c1_26 = arith.constant 1 : index
    %c0_27 = arith.constant 0 : index
    %c0_28 = arith.constant 0 : index
    %27 = vector.load %arg6[%c0_25, %c1_26, %c0_27, %c0_28] : memref<1x10x10x32xf32, #tpu.memory_space<vmem>>, vector<1x8x8x32xf32>
    %28 = vector.extract_strided_slice %7 {offsets = [3, 0], sizes = [1, 32], strides = [1, 1]} : vector<9x32xf32> to vector<1x32xf32>
    %29 = vector.shape_cast %28 : vector<1x32xf32> to vector<1x1x1x32xf32>
    %30 = vector.broadcast %29 : vector<1x1x1x32xf32> to vector<1x8x8x32xf32>
    %31 = arith.mulf %27, %30 : vector<1x8x8x32xf32>
    %32 = arith.addf %26, %31 : vector<1x8x8x32xf32>
    %c0_29 = arith.constant 0 : index
    %c1_30 = arith.constant 1 : index
    %c1_31 = arith.constant 1 : index
    %c0_32 = arith.constant 0 : index
    %33 = vector.load %arg6[%c0_29, %c1_30, %c1_31, %c0_32] : memref<1x10x10x32xf32, #tpu.memory_space<vmem>>, vector<1x8x8x32xf32>
    %34 = vector.extract_strided_slice %7 {offsets = [4, 0], sizes = [1, 32], strides = [1, 1]} : vector<9x32xf32> to vector<1x32xf32>
    %35 = vector.shape_cast %34 : vector<1x32xf32> to vector<1x1x1x32xf32>
    %36 = vector.broadcast %35 : vector<1x1x1x32xf32> to vector<1x8x8x32xf32>
    %37 = arith.mulf %33, %36 : vector<1x8x8x32xf32>
    %38 = arith.addf %32, %37 : vector<1x8x8x32xf32>
    %c0_33 = arith.constant 0 : index
    %c1_34 = arith.constant 1 : index
    %c2_35 = arith.constant 2 : index
    %c0_36 = arith.constant 0 : index
    %39 = vector.load %arg6[%c0_33, %c1_34, %c2_35, %c0_36] : memref<1x10x10x32xf32, #tpu.memory_space<vmem>>, vector<1x8x8x32xf32>
    %40 = vector.extract_strided_slice %7 {offsets = [5, 0], sizes = [1, 32], strides = [1, 1]} : vector<9x32xf32> to vector<1x32xf32>
    %41 = vector.shape_cast %40 : vector<1x32xf32> to vector<1x1x1x32xf32>
    %42 = vector.broadcast %41 : vector<1x1x1x32xf32> to vector<1x8x8x32xf32>
    %43 = arith.mulf %39, %42 : vector<1x8x8x32xf32>
    %44 = arith.addf %38, %43 : vector<1x8x8x32xf32>
    %c0_37 = arith.constant 0 : index
    %c2_38 = arith.constant 2 : index
    %c0_39 = arith.constant 0 : index
    %c0_40 = arith.constant 0 : index
    %45 = vector.load %arg6[%c0_37, %c2_38, %c0_39, %c0_40] : memref<1x10x10x32xf32, #tpu.memory_space<vmem>>, vector<1x8x8x32xf32>
    %46 = vector.extract_strided_slice %7 {offsets = [6, 0], sizes = [1, 32], strides = [1, 1]} : vector<9x32xf32> to vector<1x32xf32>
    %47 = vector.shape_cast %46 : vector<1x32xf32> to vector<1x1x1x32xf32>
    %48 = vector.broadcast %47 : vector<1x1x1x32xf32> to vector<1x8x8x32xf32>
    %49 = arith.mulf %45, %48 : vector<1x8x8x32xf32>
    %50 = arith.addf %44, %49 : vector<1x8x8x32xf32>
    %c0_41 = arith.constant 0 : index
    %c2_42 = arith.constant 2 : index
    %c1_43 = arith.constant 1 : index
    %c0_44 = arith.constant 0 : index
    %51 = vector.load %arg6[%c0_41, %c2_42, %c1_43, %c0_44] : memref<1x10x10x32xf32, #tpu.memory_space<vmem>>, vector<1x8x8x32xf32>
    %52 = vector.extract_strided_slice %7 {offsets = [7, 0], sizes = [1, 32], strides = [1, 1]} : vector<9x32xf32> to vector<1x32xf32>
    %53 = vector.shape_cast %52 : vector<1x32xf32> to vector<1x1x1x32xf32>
    %54 = vector.broadcast %53 : vector<1x1x1x32xf32> to vector<1x8x8x32xf32>
    %55 = arith.mulf %51, %54 : vector<1x8x8x32xf32>
    %56 = arith.addf %50, %55 : vector<1x8x8x32xf32>
    %c0_45 = arith.constant 0 : index
    %c2_46 = arith.constant 2 : index
    %c2_47 = arith.constant 2 : index
    %c0_48 = arith.constant 0 : index
    %57 = vector.load %arg6[%c0_45, %c2_46, %c2_47, %c0_48] : memref<1x10x10x32xf32, #tpu.memory_space<vmem>>, vector<1x8x8x32xf32>
    %58 = vector.extract_strided_slice %7 {offsets = [8, 0], sizes = [1, 32], strides = [1, 1]} : vector<9x32xf32> to vector<1x32xf32>
    %59 = vector.shape_cast %58 : vector<1x32xf32> to vector<1x1x1x32xf32>
    %60 = vector.broadcast %59 : vector<1x1x1x32xf32> to vector<1x8x8x32xf32>
    %61 = arith.mulf %57, %60 : vector<1x8x8x32xf32>
    %62 = arith.addf %56, %61 : vector<1x8x8x32xf32>
    %c0_49 = arith.constant 0 : index
    %c0_50 = arith.constant 0 : index
    %63 = vector.load %arg4[%c0_49, %c0_50] : memref<1x32xf32, #tpu.memory_space<vmem>>, vector<1x32xf32>
    %64 = vector.shape_cast %63 : vector<1x32xf32> to vector<1x1x1x32xf32>
    %65 = vector.broadcast %64 : vector<1x1x1x32xf32> to vector<1x8x8x32xf32>
    %66 = arith.addf %62, %65 : vector<1x8x8x32xf32>
    %cst_51 = arith.constant 0.000000e+00 : f32
    %67 = vector.broadcast %cst_51 : f32 to vector<1x8x8x32xf32>
    %68 = arith.maximumf %66, %67 : vector<1x8x8x32xf32>
    %69 = arith.truncf %68 : vector<1x8x8x32xf32> to vector<1x8x8x32xbf16>
    %c0_52 = arith.constant 0 : index
    %c0_53 = arith.constant 0 : index
    %c0_54 = arith.constant 0 : index
    %c0_55 = arith.constant 0 : index
    %70 = vector.load %arg5[%c0_52, %c0_53, %c0_54, %c0_55] : memref<1x8x8x32xbf16, #tpu.memory_space<vmem>>, vector<1x8x8x32xbf16>
    tpu.vector_store %arg5[%c0_52, %c0_53, %c0_54, %c0_55], %69 {strides = array<i32>} : memref<1x8x8x32xbf16, #tpu.memory_space<vmem>>, vector<1x8x8x32xbf16>,
    return
  }
  func.func @transform_0(%arg0: i32) -> (i32, i32) {
    %c0_i32 = arith.constant 0 : i32
    %c0_i32_0 = arith.constant 0 : i32
    return %arg0, %c0_i32 : i32, i32
  }
  func.func @transform_1(%arg0: i32) -> (i32, i32) {
    %c0_i32 = arith.constant 0 : i32
    %c0_i32_0 = arith.constant 0 : i32
    %c0_i32_1 = arith.constant 0 : i32
    return %c0_i32, %c0_i32_0 : i32, i32
  }
  func.func @transform_2(%arg0: i32) -> (i32, i32) {
    %c0_i32 = arith.constant 0 : i32
    %c0_i32_0 = arith.constant 0 : i32
    %c0_i32_1 = arith.constant 0 : i32
    return %c0_i32, %c0_i32_0 : i32, i32
  }
  func.func @transform_3(%arg0: i32) -> (i32, i32) {
    %c0_i32 = arith.constant 0 : i32
    %c0_i32_0 = arith.constant 0 : i32
    %c0_i32_1 = arith.constant 0 : i32
    return %c0_i32, %c0_i32_0 : i32, i32
  }
  func.func @transform_4(%arg0: i32) -> (i32, i32, i32, i32) {
    %c0_i32 = arith.constant 0 : i32
    %c0_i32_0 = arith.constant 0 : i32
    %c0_i32_1 = arith.constant 0 : i32
    %c0_i32_2 = arith.constant 0 : i32
    return %arg0, %c0_i32, %c0_i32_0, %c0_i32_1 : i32, i32, i32, i32
  }
}

module attributes {stable_mosaic.version = 11 : i64} {
  func.func @_multi_lite_kernel(%arg0: i32, %arg1: memref<64x24xbf16, #tpu.memory_space<vmem>>, %arg2: memref<24x24xbf16, #tpu.memory_space<vmem>>, %arg3: memref<9x24xf32, #tpu.memory_space<vmem>>, %arg4: memref<1x24xf32, #tpu.memory_space<vmem>>, %arg5: memref<1x8x8x24xbf16, #tpu.memory_space<vmem>>, %arg6: memref<1x10x10x24xf32, #tpu.memory_space<vmem>>) attributes {dimension_semantics = [#tpu.dimension_semantics<parallel>], iteration_bounds = array<i64: 2>, scalar_prefetch = 0 : i64, scratch_operands = 1 : i64, tpu.core_type = #tpu.core_type<tc>, window_params = [{transform_indices = @transform_0, window_bounds = array<i64: 64, 24>}, {pipeline_mode = #tpu.pipeline_mode<synchronous>, transform_indices = @transform_1, window_bounds = array<i64: 24, 24>}, {pipeline_mode = #tpu.pipeline_mode<synchronous>, transform_indices = @transform_2, window_bounds = array<i64: 9, 24>}, {pipeline_mode = #tpu.pipeline_mode<synchronous>, transform_indices = @transform_3, window_bounds = array<i64: 1, 24>}, {transform_indices = @transform_4, window_bounds = array<i64: 1, 8, 8, 24>}]} {
    %c0 = arith.constant 0 : index
    %c0_0 = arith.constant 0 : index
    %0 = vector.load %arg1[%c0, %c0_0] : memref<64x24xbf16, #tpu.memory_space<vmem>>, vector<64x24xbf16>
    %c0_1 = arith.constant 0 : index
    %c0_2 = arith.constant 0 : index
    %1 = vector.load %arg2[%c0_1, %c0_2] : memref<24x24xbf16, #tpu.memory_space<vmem>>, vector<24x24xbf16>
    %cst = arith.constant dense<0.000000e+00> : vector<64x24xf32>
    %2 = tpu.matmul %0, %1, %cst {dimension_numbers = #tpu.dot_dimension_numbers<[1], [0], [0], [1], [0, 0, 1, 1], [], []>} : vector<64x24xbf16>, vector<24x24xbf16>, vector<64x24xf32> -> vector<64x24xf32>
    %cst_3 = arith.constant 0.000000e+00 : f32
    %3 = vector.broadcast %cst_3 : f32 to vector<1x10x10x24xf32>
    %c0_4 = arith.constant 0 : index
    %c0_5 = arith.constant 0 : index
    %c0_6 = arith.constant 0 : index
    %c0_7 = arith.constant 0 : index
    %4 = vector.load %arg6[%c0_4, %c0_5, %c0_6, %c0_7] : memref<1x10x10x24xf32, #tpu.memory_space<vmem>>, vector<1x10x10x24xf32>
    tpu.vector_store %arg6[%c0_4, %c0_5, %c0_6, %c0_7], %3 {strides = array<i32>} : memref<1x10x10x24xf32, #tpu.memory_space<vmem>>, vector<1x10x10x24xf32>,
    %5 = vector.shape_cast %2 : vector<64x24xf32> to vector<1x8x8x24xf32>
    %c0_8 = arith.constant 0 : index
    %c1 = arith.constant 1 : index
    %c1_9 = arith.constant 1 : index
    %c0_10 = arith.constant 0 : index
    %6 = vector.load %arg6[%c0_8, %c1, %c1_9, %c0_10] : memref<1x10x10x24xf32, #tpu.memory_space<vmem>>, vector<1x8x8x24xf32>
    tpu.vector_store %arg6[%c0_8, %c1, %c1_9, %c0_10], %5 {strides = array<i32>} : memref<1x10x10x24xf32, #tpu.memory_space<vmem>>, vector<1x8x8x24xf32>,
    %c0_11 = arith.constant 0 : index
    %c0_12 = arith.constant 0 : index
    %7 = vector.load %arg3[%c0_11, %c0_12] : memref<9x24xf32, #tpu.memory_space<vmem>>, vector<9x24xf32>
    %cst_13 = arith.constant 0.000000e+00 : f32
    %8 = vector.broadcast %cst_13 : f32 to vector<1x8x8x24xf32>
    %c0_14 = arith.constant 0 : index
    %c0_15 = arith.constant 0 : index
    %c0_16 = arith.constant 0 : index
    %c0_17 = arith.constant 0 : index
    %9 = vector.load %arg6[%c0_14, %c0_15, %c0_16, %c0_17] : memref<1x10x10x24xf32, #tpu.memory_space<vmem>>, vector<1x8x8x24xf32>
    %10 = vector.extract_strided_slice %7 {offsets = [0, 0], sizes = [1, 24], strides = [1, 1]} : vector<9x24xf32> to vector<1x24xf32>
    %11 = vector.shape_cast %10 : vector<1x24xf32> to vector<1x1x1x24xf32>
    %12 = vector.broadcast %11 : vector<1x1x1x24xf32> to vector<1x8x8x24xf32>
    %13 = arith.mulf %9, %12 : vector<1x8x8x24xf32>
    %14 = arith.addf %8, %13 : vector<1x8x8x24xf32>
    %c0_18 = arith.constant 0 : index
    %c0_19 = arith.constant 0 : index
    %c1_20 = arith.constant 1 : index
    %c0_21 = arith.constant 0 : index
    %15 = vector.load %arg6[%c0_18, %c0_19, %c1_20, %c0_21] : memref<1x10x10x24xf32, #tpu.memory_space<vmem>>, vector<1x8x8x24xf32>
    %16 = vector.extract_strided_slice %7 {offsets = [1, 0], sizes = [1, 24], strides = [1, 1]} : vector<9x24xf32> to vector<1x24xf32>
    %17 = vector.shape_cast %16 : vector<1x24xf32> to vector<1x1x1x24xf32>
    %18 = vector.broadcast %17 : vector<1x1x1x24xf32> to vector<1x8x8x24xf32>
    %19 = arith.mulf %15, %18 : vector<1x8x8x24xf32>
    %20 = arith.addf %14, %19 : vector<1x8x8x24xf32>
    %c0_22 = arith.constant 0 : index
    %c0_23 = arith.constant 0 : index
    %c2 = arith.constant 2 : index
    %c0_24 = arith.constant 0 : index
    %21 = vector.load %arg6[%c0_22, %c0_23, %c2, %c0_24] : memref<1x10x10x24xf32, #tpu.memory_space<vmem>>, vector<1x8x8x24xf32>
    %22 = vector.extract_strided_slice %7 {offsets = [2, 0], sizes = [1, 24], strides = [1, 1]} : vector<9x24xf32> to vector<1x24xf32>
    %23 = vector.shape_cast %22 : vector<1x24xf32> to vector<1x1x1x24xf32>
    %24 = vector.broadcast %23 : vector<1x1x1x24xf32> to vector<1x8x8x24xf32>
    %25 = arith.mulf %21, %24 : vector<1x8x8x24xf32>
    %26 = arith.addf %20, %25 : vector<1x8x8x24xf32>
    %c0_25 = arith.constant 0 : index
    %c1_26 = arith.constant 1 : index
    %c0_27 = arith.constant 0 : index
    %c0_28 = arith.constant 0 : index
    %27 = vector.load %arg6[%c0_25, %c1_26, %c0_27, %c0_28] : memref<1x10x10x24xf32, #tpu.memory_space<vmem>>, vector<1x8x8x24xf32>
    %28 = vector.extract_strided_slice %7 {offsets = [3, 0], sizes = [1, 24], strides = [1, 1]} : vector<9x24xf32> to vector<1x24xf32>
    %29 = vector.shape_cast %28 : vector<1x24xf32> to vector<1x1x1x24xf32>
    %30 = vector.broadcast %29 : vector<1x1x1x24xf32> to vector<1x8x8x24xf32>
    %31 = arith.mulf %27, %30 : vector<1x8x8x24xf32>
    %32 = arith.addf %26, %31 : vector<1x8x8x24xf32>
    %c0_29 = arith.constant 0 : index
    %c1_30 = arith.constant 1 : index
    %c1_31 = arith.constant 1 : index
    %c0_32 = arith.constant 0 : index
    %33 = vector.load %arg6[%c0_29, %c1_30, %c1_31, %c0_32] : memref<1x10x10x24xf32, #tpu.memory_space<vmem>>, vector<1x8x8x24xf32>
    %34 = vector.extract_strided_slice %7 {offsets = [4, 0], sizes = [1, 24], strides = [1, 1]} : vector<9x24xf32> to vector<1x24xf32>
    %35 = vector.shape_cast %34 : vector<1x24xf32> to vector<1x1x1x24xf32>
    %36 = vector.broadcast %35 : vector<1x1x1x24xf32> to vector<1x8x8x24xf32>
    %37 = arith.mulf %33, %36 : vector<1x8x8x24xf32>
    %38 = arith.addf %32, %37 : vector<1x8x8x24xf32>
    %c0_33 = arith.constant 0 : index
    %c1_34 = arith.constant 1 : index
    %c2_35 = arith.constant 2 : index
    %c0_36 = arith.constant 0 : index
    %39 = vector.load %arg6[%c0_33, %c1_34, %c2_35, %c0_36] : memref<1x10x10x24xf32, #tpu.memory_space<vmem>>, vector<1x8x8x24xf32>
    %40 = vector.extract_strided_slice %7 {offsets = [5, 0], sizes = [1, 24], strides = [1, 1]} : vector<9x24xf32> to vector<1x24xf32>
    %41 = vector.shape_cast %40 : vector<1x24xf32> to vector<1x1x1x24xf32>
    %42 = vector.broadcast %41 : vector<1x1x1x24xf32> to vector<1x8x8x24xf32>
    %43 = arith.mulf %39, %42 : vector<1x8x8x24xf32>
    %44 = arith.addf %38, %43 : vector<1x8x8x24xf32>
    %c0_37 = arith.constant 0 : index
    %c2_38 = arith.constant 2 : index
    %c0_39 = arith.constant 0 : index
    %c0_40 = arith.constant 0 : index
    %45 = vector.load %arg6[%c0_37, %c2_38, %c0_39, %c0_40] : memref<1x10x10x24xf32, #tpu.memory_space<vmem>>, vector<1x8x8x24xf32>
    %46 = vector.extract_strided_slice %7 {offsets = [6, 0], sizes = [1, 24], strides = [1, 1]} : vector<9x24xf32> to vector<1x24xf32>
    %47 = vector.shape_cast %46 : vector<1x24xf32> to vector<1x1x1x24xf32>
    %48 = vector.broadcast %47 : vector<1x1x1x24xf32> to vector<1x8x8x24xf32>
    %49 = arith.mulf %45, %48 : vector<1x8x8x24xf32>
    %50 = arith.addf %44, %49 : vector<1x8x8x24xf32>
    %c0_41 = arith.constant 0 : index
    %c2_42 = arith.constant 2 : index
    %c1_43 = arith.constant 1 : index
    %c0_44 = arith.constant 0 : index
    %51 = vector.load %arg6[%c0_41, %c2_42, %c1_43, %c0_44] : memref<1x10x10x24xf32, #tpu.memory_space<vmem>>, vector<1x8x8x24xf32>
    %52 = vector.extract_strided_slice %7 {offsets = [7, 0], sizes = [1, 24], strides = [1, 1]} : vector<9x24xf32> to vector<1x24xf32>
    %53 = vector.shape_cast %52 : vector<1x24xf32> to vector<1x1x1x24xf32>
    %54 = vector.broadcast %53 : vector<1x1x1x24xf32> to vector<1x8x8x24xf32>
    %55 = arith.mulf %51, %54 : vector<1x8x8x24xf32>
    %56 = arith.addf %50, %55 : vector<1x8x8x24xf32>
    %c0_45 = arith.constant 0 : index
    %c2_46 = arith.constant 2 : index
    %c2_47 = arith.constant 2 : index
    %c0_48 = arith.constant 0 : index
    %57 = vector.load %arg6[%c0_45, %c2_46, %c2_47, %c0_48] : memref<1x10x10x24xf32, #tpu.memory_space<vmem>>, vector<1x8x8x24xf32>
    %58 = vector.extract_strided_slice %7 {offsets = [8, 0], sizes = [1, 24], strides = [1, 1]} : vector<9x24xf32> to vector<1x24xf32>
    %59 = vector.shape_cast %58 : vector<1x24xf32> to vector<1x1x1x24xf32>
    %60 = vector.broadcast %59 : vector<1x1x1x24xf32> to vector<1x8x8x24xf32>
    %61 = arith.mulf %57, %60 : vector<1x8x8x24xf32>
    %62 = arith.addf %56, %61 : vector<1x8x8x24xf32>
    %c0_49 = arith.constant 0 : index
    %c0_50 = arith.constant 0 : index
    %63 = vector.load %arg4[%c0_49, %c0_50] : memref<1x24xf32, #tpu.memory_space<vmem>>, vector<1x24xf32>
    %64 = vector.shape_cast %63 : vector<1x24xf32> to vector<1x1x1x24xf32>
    %65 = vector.broadcast %64 : vector<1x1x1x24xf32> to vector<1x8x8x24xf32>
    %66 = arith.addf %62, %65 : vector<1x8x8x24xf32>
    %cst_51 = arith.constant 0.000000e+00 : f32
    %67 = vector.broadcast %cst_51 : f32 to vector<1x8x8x24xf32>
    %68 = arith.maximumf %66, %67 : vector<1x8x8x24xf32>
    %69 = arith.truncf %68 : vector<1x8x8x24xf32> to vector<1x8x8x24xbf16>
    %c0_52 = arith.constant 0 : index
    %c0_53 = arith.constant 0 : index
    %c0_54 = arith.constant 0 : index
    %c0_55 = arith.constant 0 : index
    %70 = vector.load %arg5[%c0_52, %c0_53, %c0_54, %c0_55] : memref<1x8x8x24xbf16, #tpu.memory_space<vmem>>, vector<1x8x8x24xbf16>
    tpu.vector_store %arg5[%c0_52, %c0_53, %c0_54, %c0_55], %69 {strides = array<i32>} : memref<1x8x8x24xbf16, #tpu.memory_space<vmem>>, vector<1x8x8x24xbf16>,
    return
  }
  func.func @transform_0(%arg0: i32) -> (i32, i32) {
    %c0_i32 = arith.constant 0 : i32
    %c0_i32_0 = arith.constant 0 : i32
    return %arg0, %c0_i32 : i32, i32
  }
  func.func @transform_1(%arg0: i32) -> (i32, i32) {
    %c0_i32 = arith.constant 0 : i32
    %c0_i32_0 = arith.constant 0 : i32
    %c0_i32_1 = arith.constant 0 : i32
    return %c0_i32, %c0_i32_0 : i32, i32
  }
  func.func @transform_2(%arg0: i32) -> (i32, i32) {
    %c0_i32 = arith.constant 0 : i32
    %c0_i32_0 = arith.constant 0 : i32
    %c0_i32_1 = arith.constant 0 : i32
    return %c0_i32, %c0_i32_0 : i32, i32
  }
  func.func @transform_3(%arg0: i32) -> (i32, i32) {
    %c0_i32 = arith.constant 0 : i32
    %c0_i32_0 = arith.constant 0 : i32
    %c0_i32_1 = arith.constant 0 : i32
    return %c0_i32, %c0_i32_0 : i32, i32
  }
  func.func @transform_4(%arg0: i32) -> (i32, i32, i32, i32) {
    %c0_i32 = arith.constant 0 : i32
    %c0_i32_0 = arith.constant 0 : i32
    %c0_i32_1 = arith.constant 0 : i32
    %c0_i32_2 = arith.constant 0 : i32
    return %arg0, %c0_i32, %c0_i32_0, %c0_i32_1 : i32, i32, i32, i32
  }
}

module attributes {stable_mosaic.version = 11 : i64} {
  func.func @_multi_lite_kernel(%arg0: i32, %arg1: memref<64x16xbf16, #tpu.memory_space<vmem>>, %arg2: memref<16x16xbf16, #tpu.memory_space<vmem>>, %arg3: memref<9x16xf32, #tpu.memory_space<vmem>>, %arg4: memref<1x16xf32, #tpu.memory_space<vmem>>, %arg5: memref<1x8x8x16xbf16, #tpu.memory_space<vmem>>, %arg6: memref<1x10x10x16xf32, #tpu.memory_space<vmem>>) attributes {dimension_semantics = [#tpu.dimension_semantics<parallel>], iteration_bounds = array<i64: 2>, scalar_prefetch = 0 : i64, scratch_operands = 1 : i64, tpu.core_type = #tpu.core_type<tc>, window_params = [{transform_indices = @transform_0, window_bounds = array<i64: 64, 16>}, {pipeline_mode = #tpu.pipeline_mode<synchronous>, transform_indices = @transform_1, window_bounds = array<i64: 16, 16>}, {pipeline_mode = #tpu.pipeline_mode<synchronous>, transform_indices = @transform_2, window_bounds = array<i64: 9, 16>}, {pipeline_mode = #tpu.pipeline_mode<synchronous>, transform_indices = @transform_3, window_bounds = array<i64: 1, 16>}, {transform_indices = @transform_4, window_bounds = array<i64: 1, 8, 8, 16>}]} {
    %c0 = arith.constant 0 : index
    %c0_0 = arith.constant 0 : index
    %0 = vector.load %arg1[%c0, %c0_0] : memref<64x16xbf16, #tpu.memory_space<vmem>>, vector<64x16xbf16>
    %c0_1 = arith.constant 0 : index
    %c0_2 = arith.constant 0 : index
    %1 = vector.load %arg2[%c0_1, %c0_2] : memref<16x16xbf16, #tpu.memory_space<vmem>>, vector<16x16xbf16>
    %cst = arith.constant dense<0.000000e+00> : vector<64x16xf32>
    %2 = tpu.matmul %0, %1, %cst {dimension_numbers = #tpu.dot_dimension_numbers<[1], [0], [0], [1], [0, 0, 1, 1], [], []>} : vector<64x16xbf16>, vector<16x16xbf16>, vector<64x16xf32> -> vector<64x16xf32>
    %cst_3 = arith.constant 0.000000e+00 : f32
    %3 = vector.broadcast %cst_3 : f32 to vector<1x10x10x16xf32>
    %c0_4 = arith.constant 0 : index
    %c0_5 = arith.constant 0 : index
    %c0_6 = arith.constant 0 : index
    %c0_7 = arith.constant 0 : index
    %4 = vector.load %arg6[%c0_4, %c0_5, %c0_6, %c0_7] : memref<1x10x10x16xf32, #tpu.memory_space<vmem>>, vector<1x10x10x16xf32>
    tpu.vector_store %arg6[%c0_4, %c0_5, %c0_6, %c0_7], %3 {strides = array<i32>} : memref<1x10x10x16xf32, #tpu.memory_space<vmem>>, vector<1x10x10x16xf32>,
    %5 = vector.shape_cast %2 : vector<64x16xf32> to vector<1x8x8x16xf32>
    %c0_8 = arith.constant 0 : index
    %c1 = arith.constant 1 : index
    %c1_9 = arith.constant 1 : index
    %c0_10 = arith.constant 0 : index
    %6 = vector.load %arg6[%c0_8, %c1, %c1_9, %c0_10] : memref<1x10x10x16xf32, #tpu.memory_space<vmem>>, vector<1x8x8x16xf32>
    tpu.vector_store %arg6[%c0_8, %c1, %c1_9, %c0_10], %5 {strides = array<i32>} : memref<1x10x10x16xf32, #tpu.memory_space<vmem>>, vector<1x8x8x16xf32>,
    %c0_11 = arith.constant 0 : index
    %c0_12 = arith.constant 0 : index
    %7 = vector.load %arg3[%c0_11, %c0_12] : memref<9x16xf32, #tpu.memory_space<vmem>>, vector<9x16xf32>
    %cst_13 = arith.constant 0.000000e+00 : f32
    %8 = vector.broadcast %cst_13 : f32 to vector<1x8x8x16xf32>
    %c0_14 = arith.constant 0 : index
    %c0_15 = arith.constant 0 : index
    %c0_16 = arith.constant 0 : index
    %c0_17 = arith.constant 0 : index
    %9 = vector.load %arg6[%c0_14, %c0_15, %c0_16, %c0_17] : memref<1x10x10x16xf32, #tpu.memory_space<vmem>>, vector<1x8x8x16xf32>
    %10 = vector.extract_strided_slice %7 {offsets = [0, 0], sizes = [1, 16], strides = [1, 1]} : vector<9x16xf32> to vector<1x16xf32>
    %11 = vector.shape_cast %10 : vector<1x16xf32> to vector<1x1x1x16xf32>
    %12 = vector.broadcast %11 : vector<1x1x1x16xf32> to vector<1x8x8x16xf32>
    %13 = arith.mulf %9, %12 : vector<1x8x8x16xf32>
    %14 = arith.addf %8, %13 : vector<1x8x8x16xf32>
    %c0_18 = arith.constant 0 : index
    %c0_19 = arith.constant 0 : index
    %c1_20 = arith.constant 1 : index
    %c0_21 = arith.constant 0 : index
    %15 = vector.load %arg6[%c0_18, %c0_19, %c1_20, %c0_21] : memref<1x10x10x16xf32, #tpu.memory_space<vmem>>, vector<1x8x8x16xf32>
    %16 = vector.extract_strided_slice %7 {offsets = [1, 0], sizes = [1, 16], strides = [1, 1]} : vector<9x16xf32> to vector<1x16xf32>
    %17 = vector.shape_cast %16 : vector<1x16xf32> to vector<1x1x1x16xf32>
    %18 = vector.broadcast %17 : vector<1x1x1x16xf32> to vector<1x8x8x16xf32>
    %19 = arith.mulf %15, %18 : vector<1x8x8x16xf32>
    %20 = arith.addf %14, %19 : vector<1x8x8x16xf32>
    %c0_22 = arith.constant 0 : index
    %c0_23 = arith.constant 0 : index
    %c2 = arith.constant 2 : index
    %c0_24 = arith.constant 0 : index
    %21 = vector.load %arg6[%c0_22, %c0_23, %c2, %c0_24] : memref<1x10x10x16xf32, #tpu.memory_space<vmem>>, vector<1x8x8x16xf32>
    %22 = vector.extract_strided_slice %7 {offsets = [2, 0], sizes = [1, 16], strides = [1, 1]} : vector<9x16xf32> to vector<1x16xf32>
    %23 = vector.shape_cast %22 : vector<1x16xf32> to vector<1x1x1x16xf32>
    %24 = vector.broadcast %23 : vector<1x1x1x16xf32> to vector<1x8x8x16xf32>
    %25 = arith.mulf %21, %24 : vector<1x8x8x16xf32>
    %26 = arith.addf %20, %25 : vector<1x8x8x16xf32>
    %c0_25 = arith.constant 0 : index
    %c1_26 = arith.constant 1 : index
    %c0_27 = arith.constant 0 : index
    %c0_28 = arith.constant 0 : index
    %27 = vector.load %arg6[%c0_25, %c1_26, %c0_27, %c0_28] : memref<1x10x10x16xf32, #tpu.memory_space<vmem>>, vector<1x8x8x16xf32>
    %28 = vector.extract_strided_slice %7 {offsets = [3, 0], sizes = [1, 16], strides = [1, 1]} : vector<9x16xf32> to vector<1x16xf32>
    %29 = vector.shape_cast %28 : vector<1x16xf32> to vector<1x1x1x16xf32>
    %30 = vector.broadcast %29 : vector<1x1x1x16xf32> to vector<1x8x8x16xf32>
    %31 = arith.mulf %27, %30 : vector<1x8x8x16xf32>
    %32 = arith.addf %26, %31 : vector<1x8x8x16xf32>
    %c0_29 = arith.constant 0 : index
    %c1_30 = arith.constant 1 : index
    %c1_31 = arith.constant 1 : index
    %c0_32 = arith.constant 0 : index
    %33 = vector.load %arg6[%c0_29, %c1_30, %c1_31, %c0_32] : memref<1x10x10x16xf32, #tpu.memory_space<vmem>>, vector<1x8x8x16xf32>
    %34 = vector.extract_strided_slice %7 {offsets = [4, 0], sizes = [1, 16], strides = [1, 1]} : vector<9x16xf32> to vector<1x16xf32>
    %35 = vector.shape_cast %34 : vector<1x16xf32> to vector<1x1x1x16xf32>
    %36 = vector.broadcast %35 : vector<1x1x1x16xf32> to vector<1x8x8x16xf32>
    %37 = arith.mulf %33, %36 : vector<1x8x8x16xf32>
    %38 = arith.addf %32, %37 : vector<1x8x8x16xf32>
    %c0_33 = arith.constant 0 : index
    %c1_34 = arith.constant 1 : index
    %c2_35 = arith.constant 2 : index
    %c0_36 = arith.constant 0 : index
    %39 = vector.load %arg6[%c0_33, %c1_34, %c2_35, %c0_36] : memref<1x10x10x16xf32, #tpu.memory_space<vmem>>, vector<1x8x8x16xf32>
    %40 = vector.extract_strided_slice %7 {offsets = [5, 0], sizes = [1, 16], strides = [1, 1]} : vector<9x16xf32> to vector<1x16xf32>
    %41 = vector.shape_cast %40 : vector<1x16xf32> to vector<1x1x1x16xf32>
    %42 = vector.broadcast %41 : vector<1x1x1x16xf32> to vector<1x8x8x16xf32>
    %43 = arith.mulf %39, %42 : vector<1x8x8x16xf32>
    %44 = arith.addf %38, %43 : vector<1x8x8x16xf32>
    %c0_37 = arith.constant 0 : index
    %c2_38 = arith.constant 2 : index
    %c0_39 = arith.constant 0 : index
    %c0_40 = arith.constant 0 : index
    %45 = vector.load %arg6[%c0_37, %c2_38, %c0_39, %c0_40] : memref<1x10x10x16xf32, #tpu.memory_space<vmem>>, vector<1x8x8x16xf32>
    %46 = vector.extract_strided_slice %7 {offsets = [6, 0], sizes = [1, 16], strides = [1, 1]} : vector<9x16xf32> to vector<1x16xf32>
    %47 = vector.shape_cast %46 : vector<1x16xf32> to vector<1x1x1x16xf32>
    %48 = vector.broadcast %47 : vector<1x1x1x16xf32> to vector<1x8x8x16xf32>
    %49 = arith.mulf %45, %48 : vector<1x8x8x16xf32>
    %50 = arith.addf %44, %49 : vector<1x8x8x16xf32>
    %c0_41 = arith.constant 0 : index
    %c2_42 = arith.constant 2 : index
    %c1_43 = arith.constant 1 : index
    %c0_44 = arith.constant 0 : index
    %51 = vector.load %arg6[%c0_41, %c2_42, %c1_43, %c0_44] : memref<1x10x10x16xf32, #tpu.memory_space<vmem>>, vector<1x8x8x16xf32>
    %52 = vector.extract_strided_slice %7 {offsets = [7, 0], sizes = [1, 16], strides = [1, 1]} : vector<9x16xf32> to vector<1x16xf32>
    %53 = vector.shape_cast %52 : vector<1x16xf32> to vector<1x1x1x16xf32>
    %54 = vector.broadcast %53 : vector<1x1x1x16xf32> to vector<1x8x8x16xf32>
    %55 = arith.mulf %51, %54 : vector<1x8x8x16xf32>
    %56 = arith.addf %50, %55 : vector<1x8x8x16xf32>
    %c0_45 = arith.constant 0 : index
    %c2_46 = arith.constant 2 : index
    %c2_47 = arith.constant 2 : index
    %c0_48 = arith.constant 0 : index
    %57 = vector.load %arg6[%c0_45, %c2_46, %c2_47, %c0_48] : memref<1x10x10x16xf32, #tpu.memory_space<vmem>>, vector<1x8x8x16xf32>
    %58 = vector.extract_strided_slice %7 {offsets = [8, 0], sizes = [1, 16], strides = [1, 1]} : vector<9x16xf32> to vector<1x16xf32>
    %59 = vector.shape_cast %58 : vector<1x16xf32> to vector<1x1x1x16xf32>
    %60 = vector.broadcast %59 : vector<1x1x1x16xf32> to vector<1x8x8x16xf32>
    %61 = arith.mulf %57, %60 : vector<1x8x8x16xf32>
    %62 = arith.addf %56, %61 : vector<1x8x8x16xf32>
    %c0_49 = arith.constant 0 : index
    %c0_50 = arith.constant 0 : index
    %63 = vector.load %arg4[%c0_49, %c0_50] : memref<1x16xf32, #tpu.memory_space<vmem>>, vector<1x16xf32>
    %64 = vector.shape_cast %63 : vector<1x16xf32> to vector<1x1x1x16xf32>
    %65 = vector.broadcast %64 : vector<1x1x1x16xf32> to vector<1x8x8x16xf32>
    %66 = arith.addf %62, %65 : vector<1x8x8x16xf32>
    %cst_51 = arith.constant 0.000000e+00 : f32
    %67 = vector.broadcast %cst_51 : f32 to vector<1x8x8x16xf32>
    %68 = arith.maximumf %66, %67 : vector<1x8x8x16xf32>
    %69 = arith.truncf %68 : vector<1x8x8x16xf32> to vector<1x8x8x16xbf16>
    %c0_52 = arith.constant 0 : index
    %c0_53 = arith.constant 0 : index
    %c0_54 = arith.constant 0 : index
    %c0_55 = arith.constant 0 : index
    %70 = vector.load %arg5[%c0_52, %c0_53, %c0_54, %c0_55] : memref<1x8x8x16xbf16, #tpu.memory_space<vmem>>, vector<1x8x8x16xbf16>
    tpu.vector_store %arg5[%c0_52, %c0_53, %c0_54, %c0_55], %69 {strides = array<i32>} : memref<1x8x8x16xbf16, #tpu.memory_space<vmem>>, vector<1x8x8x16xbf16>,
    return
  }
  func.func @transform_0(%arg0: i32) -> (i32, i32) {
    %c0_i32 = arith.constant 0 : i32
    %c0_i32_0 = arith.constant 0 : i32
    return %arg0, %c0_i32 : i32, i32
  }
  func.func @transform_1(%arg0: i32) -> (i32, i32) {
    %c0_i32 = arith.constant 0 : i32
    %c0_i32_0 = arith.constant 0 : i32
    %c0_i32_1 = arith.constant 0 : i32
    return %c0_i32, %c0_i32_0 : i32, i32
  }
  func.func @transform_2(%arg0: i32) -> (i32, i32) {
    %c0_i32 = arith.constant 0 : i32
    %c0_i32_0 = arith.constant 0 : i32
    %c0_i32_1 = arith.constant 0 : i32
    return %c0_i32, %c0_i32_0 : i32, i32
  }
  func.func @transform_3(%arg0: i32) -> (i32, i32) {
    %c0_i32 = arith.constant 0 : i32
    %c0_i32_0 = arith.constant 0 : i32
    %c0_i32_1 = arith.constant 0 : i32
    return %c0_i32, %c0_i32_0 : i32, i32
  }
  func.func @transform_4(%arg0: i32) -> (i32, i32, i32, i32) {
    %c0_i32 = arith.constant 0 : i32
    %c0_i32_0 = arith.constant 0 : i32
    %c0_i32_1 = arith.constant 0 : i32
    %c0_i32_2 = arith.constant 0 : i32
    return %arg0, %c0_i32, %c0_i32_0, %c0_i32_1 : i32, i32, i32, i32
  }
}

module attributes {stable_mosaic.version = 11 : i64} {
  func.func @_multi_lite_kernel(%arg0: i32, %arg1: memref<64x8xbf16, #tpu.memory_space<vmem>>, %arg2: memref<8x8xbf16, #tpu.memory_space<vmem>>, %arg3: memref<9x8xf32, #tpu.memory_space<vmem>>, %arg4: memref<1x8xf32, #tpu.memory_space<vmem>>, %arg5: memref<1x8x8x8xbf16, #tpu.memory_space<vmem>>, %arg6: memref<1x10x10x8xf32, #tpu.memory_space<vmem>>) attributes {dimension_semantics = [#tpu.dimension_semantics<parallel>], iteration_bounds = array<i64: 2>, scalar_prefetch = 0 : i64, scratch_operands = 1 : i64, tpu.core_type = #tpu.core_type<tc>, window_params = [{transform_indices = @transform_0, window_bounds = array<i64: 64, 8>}, {pipeline_mode = #tpu.pipeline_mode<synchronous>, transform_indices = @transform_1, window_bounds = array<i64: 8, 8>}, {pipeline_mode = #tpu.pipeline_mode<synchronous>, transform_indices = @transform_2, window_bounds = array<i64: 9, 8>}, {pipeline_mode = #tpu.pipeline_mode<synchronous>, transform_indices = @transform_3, window_bounds = array<i64: 1, 8>}, {transform_indices = @transform_4, window_bounds = array<i64: 1, 8, 8, 8>}]} {
    %c0 = arith.constant 0 : index
    %c0_0 = arith.constant 0 : index
    %0 = vector.load %arg1[%c0, %c0_0] : memref<64x8xbf16, #tpu.memory_space<vmem>>, vector<64x8xbf16>
    %c0_1 = arith.constant 0 : index
    %c0_2 = arith.constant 0 : index
    %1 = vector.load %arg2[%c0_1, %c0_2] : memref<8x8xbf16, #tpu.memory_space<vmem>>, vector<8x8xbf16>
    %cst = arith.constant dense<0.000000e+00> : vector<64x8xf32>
    %2 = tpu.matmul %0, %1, %cst {dimension_numbers = #tpu.dot_dimension_numbers<[1], [0], [0], [1], [0, 0, 1, 1], [], []>} : vector<64x8xbf16>, vector<8x8xbf16>, vector<64x8xf32> -> vector<64x8xf32>
    %cst_3 = arith.constant 0.000000e+00 : f32
    %3 = vector.broadcast %cst_3 : f32 to vector<1x10x10x8xf32>
    %c0_4 = arith.constant 0 : index
    %c0_5 = arith.constant 0 : index
    %c0_6 = arith.constant 0 : index
    %c0_7 = arith.constant 0 : index
    %4 = vector.load %arg6[%c0_4, %c0_5, %c0_6, %c0_7] : memref<1x10x10x8xf32, #tpu.memory_space<vmem>>, vector<1x10x10x8xf32>
    tpu.vector_store %arg6[%c0_4, %c0_5, %c0_6, %c0_7], %3 {strides = array<i32>} : memref<1x10x10x8xf32, #tpu.memory_space<vmem>>, vector<1x10x10x8xf32>,
    %5 = vector.shape_cast %2 : vector<64x8xf32> to vector<1x8x8x8xf32>
    %c0_8 = arith.constant 0 : index
    %c1 = arith.constant 1 : index
    %c1_9 = arith.constant 1 : index
    %c0_10 = arith.constant 0 : index
    %6 = vector.load %arg6[%c0_8, %c1, %c1_9, %c0_10] : memref<1x10x10x8xf32, #tpu.memory_space<vmem>>, vector<1x8x8x8xf32>
    tpu.vector_store %arg6[%c0_8, %c1, %c1_9, %c0_10], %5 {strides = array<i32>} : memref<1x10x10x8xf32, #tpu.memory_space<vmem>>, vector<1x8x8x8xf32>,
    %c0_11 = arith.constant 0 : index
    %c0_12 = arith.constant 0 : index
    %7 = vector.load %arg3[%c0_11, %c0_12] : memref<9x8xf32, #tpu.memory_space<vmem>>, vector<9x8xf32>
    %cst_13 = arith.constant 0.000000e+00 : f32
    %8 = vector.broadcast %cst_13 : f32 to vector<1x8x8x8xf32>
    %c0_14 = arith.constant 0 : index
    %c0_15 = arith.constant 0 : index
    %c0_16 = arith.constant 0 : index
    %c0_17 = arith.constant 0 : index
    %9 = vector.load %arg6[%c0_14, %c0_15, %c0_16, %c0_17] : memref<1x10x10x8xf32, #tpu.memory_space<vmem>>, vector<1x8x8x8xf32>
    %10 = vector.extract_strided_slice %7 {offsets = [0, 0], sizes = [1, 8], strides = [1, 1]} : vector<9x8xf32> to vector<1x8xf32>
    %11 = vector.shape_cast %10 : vector<1x8xf32> to vector<1x1x1x8xf32>
    %12 = vector.broadcast %11 : vector<1x1x1x8xf32> to vector<1x8x8x8xf32>
    %13 = arith.mulf %9, %12 : vector<1x8x8x8xf32>
    %14 = arith.addf %8, %13 : vector<1x8x8x8xf32>
    %c0_18 = arith.constant 0 : index
    %c0_19 = arith.constant 0 : index
    %c1_20 = arith.constant 1 : index
    %c0_21 = arith.constant 0 : index
    %15 = vector.load %arg6[%c0_18, %c0_19, %c1_20, %c0_21] : memref<1x10x10x8xf32, #tpu.memory_space<vmem>>, vector<1x8x8x8xf32>
    %16 = vector.extract_strided_slice %7 {offsets = [1, 0], sizes = [1, 8], strides = [1, 1]} : vector<9x8xf32> to vector<1x8xf32>
    %17 = vector.shape_cast %16 : vector<1x8xf32> to vector<1x1x1x8xf32>
    %18 = vector.broadcast %17 : vector<1x1x1x8xf32> to vector<1x8x8x8xf32>
    %19 = arith.mulf %15, %18 : vector<1x8x8x8xf32>
    %20 = arith.addf %14, %19 : vector<1x8x8x8xf32>
    %c0_22 = arith.constant 0 : index
    %c0_23 = arith.constant 0 : index
    %c2 = arith.constant 2 : index
    %c0_24 = arith.constant 0 : index
    %21 = vector.load %arg6[%c0_22, %c0_23, %c2, %c0_24] : memref<1x10x10x8xf32, #tpu.memory_space<vmem>>, vector<1x8x8x8xf32>
    %22 = vector.extract_strided_slice %7 {offsets = [2, 0], sizes = [1, 8], strides = [1, 1]} : vector<9x8xf32> to vector<1x8xf32>
    %23 = vector.shape_cast %22 : vector<1x8xf32> to vector<1x1x1x8xf32>
    %24 = vector.broadcast %23 : vector<1x1x1x8xf32> to vector<1x8x8x8xf32>
    %25 = arith.mulf %21, %24 : vector<1x8x8x8xf32>
    %26 = arith.addf %20, %25 : vector<1x8x8x8xf32>
    %c0_25 = arith.constant 0 : index
    %c1_26 = arith.constant 1 : index
    %c0_27 = arith.constant 0 : index
    %c0_28 = arith.constant 0 : index
    %27 = vector.load %arg6[%c0_25, %c1_26, %c0_27, %c0_28] : memref<1x10x10x8xf32, #tpu.memory_space<vmem>>, vector<1x8x8x8xf32>
    %28 = vector.extract_strided_slice %7 {offsets = [3, 0], sizes = [1, 8], strides = [1, 1]} : vector<9x8xf32> to vector<1x8xf32>
    %29 = vector.shape_cast %28 : vector<1x8xf32> to vector<1x1x1x8xf32>
    %30 = vector.broadcast %29 : vector<1x1x1x8xf32> to vector<1x8x8x8xf32>
    %31 = arith.mulf %27, %30 : vector<1x8x8x8xf32>
    %32 = arith.addf %26, %31 : vector<1x8x8x8xf32>
    %c0_29 = arith.constant 0 : index
    %c1_30 = arith.constant 1 : index
    %c1_31 = arith.constant 1 : index
    %c0_32 = arith.constant 0 : index
    %33 = vector.load %arg6[%c0_29, %c1_30, %c1_31, %c0_32] : memref<1x10x10x8xf32, #tpu.memory_space<vmem>>, vector<1x8x8x8xf32>
    %34 = vector.extract_strided_slice %7 {offsets = [4, 0], sizes = [1, 8], strides = [1, 1]} : vector<9x8xf32> to vector<1x8xf32>
    %35 = vector.shape_cast %34 : vector<1x8xf32> to vector<1x1x1x8xf32>
    %36 = vector.broadcast %35 : vector<1x1x1x8xf32> to vector<1x8x8x8xf32>
    %37 = arith.mulf %33, %36 : vector<1x8x8x8xf32>
    %38 = arith.addf %32, %37 : vector<1x8x8x8xf32>
    %c0_33 = arith.constant 0 : index
    %c1_34 = arith.constant 1 : index
    %c2_35 = arith.constant 2 : index
    %c0_36 = arith.constant 0 : index
    %39 = vector.load %arg6[%c0_33, %c1_34, %c2_35, %c0_36] : memref<1x10x10x8xf32, #tpu.memory_space<vmem>>, vector<1x8x8x8xf32>
    %40 = vector.extract_strided_slice %7 {offsets = [5, 0], sizes = [1, 8], strides = [1, 1]} : vector<9x8xf32> to vector<1x8xf32>
    %41 = vector.shape_cast %40 : vector<1x8xf32> to vector<1x1x1x8xf32>
    %42 = vector.broadcast %41 : vector<1x1x1x8xf32> to vector<1x8x8x8xf32>
    %43 = arith.mulf %39, %42 : vector<1x8x8x8xf32>
    %44 = arith.addf %38, %43 : vector<1x8x8x8xf32>
    %c0_37 = arith.constant 0 : index
    %c2_38 = arith.constant 2 : index
    %c0_39 = arith.constant 0 : index
    %c0_40 = arith.constant 0 : index
    %45 = vector.load %arg6[%c0_37, %c2_38, %c0_39, %c0_40] : memref<1x10x10x8xf32, #tpu.memory_space<vmem>>, vector<1x8x8x8xf32>
    %46 = vector.extract_strided_slice %7 {offsets = [6, 0], sizes = [1, 8], strides = [1, 1]} : vector<9x8xf32> to vector<1x8xf32>
    %47 = vector.shape_cast %46 : vector<1x8xf32> to vector<1x1x1x8xf32>
    %48 = vector.broadcast %47 : vector<1x1x1x8xf32> to vector<1x8x8x8xf32>
    %49 = arith.mulf %45, %48 : vector<1x8x8x8xf32>
    %50 = arith.addf %44, %49 : vector<1x8x8x8xf32>
    %c0_41 = arith.constant 0 : index
    %c2_42 = arith.constant 2 : index
    %c1_43 = arith.constant 1 : index
    %c0_44 = arith.constant 0 : index
    %51 = vector.load %arg6[%c0_41, %c2_42, %c1_43, %c0_44] : memref<1x10x10x8xf32, #tpu.memory_space<vmem>>, vector<1x8x8x8xf32>
    %52 = vector.extract_strided_slice %7 {offsets = [7, 0], sizes = [1, 8], strides = [1, 1]} : vector<9x8xf32> to vector<1x8xf32>
    %53 = vector.shape_cast %52 : vector<1x8xf32> to vector<1x1x1x8xf32>
    %54 = vector.broadcast %53 : vector<1x1x1x8xf32> to vector<1x8x8x8xf32>
    %55 = arith.mulf %51, %54 : vector<1x8x8x8xf32>
    %56 = arith.addf %50, %55 : vector<1x8x8x8xf32>
    %c0_45 = arith.constant 0 : index
    %c2_46 = arith.constant 2 : index
    %c2_47 = arith.constant 2 : index
    %c0_48 = arith.constant 0 : index
    %57 = vector.load %arg6[%c0_45, %c2_46, %c2_47, %c0_48] : memref<1x10x10x8xf32, #tpu.memory_space<vmem>>, vector<1x8x8x8xf32>
    %58 = vector.extract_strided_slice %7 {offsets = [8, 0], sizes = [1, 8], strides = [1, 1]} : vector<9x8xf32> to vector<1x8xf32>
    %59 = vector.shape_cast %58 : vector<1x8xf32> to vector<1x1x1x8xf32>
    %60 = vector.broadcast %59 : vector<1x1x1x8xf32> to vector<1x8x8x8xf32>
    %61 = arith.mulf %57, %60 : vector<1x8x8x8xf32>
    %62 = arith.addf %56, %61 : vector<1x8x8x8xf32>
    %c0_49 = arith.constant 0 : index
    %c0_50 = arith.constant 0 : index
    %63 = vector.load %arg4[%c0_49, %c0_50] : memref<1x8xf32, #tpu.memory_space<vmem>>, vector<1x8xf32>
    %64 = vector.shape_cast %63 : vector<1x8xf32> to vector<1x1x1x8xf32>
    %65 = vector.broadcast %64 : vector<1x1x1x8xf32> to vector<1x8x8x8xf32>
    %66 = arith.addf %62, %65 : vector<1x8x8x8xf32>
    %cst_51 = arith.constant 0.000000e+00 : f32
    %67 = vector.broadcast %cst_51 : f32 to vector<1x8x8x8xf32>
    %68 = arith.maximumf %66, %67 : vector<1x8x8x8xf32>
    %69 = arith.truncf %68 : vector<1x8x8x8xf32> to vector<1x8x8x8xbf16>
    %c0_52 = arith.constant 0 : index
    %c0_53 = arith.constant 0 : index
    %c0_54 = arith.constant 0 : index
    %c0_55 = arith.constant 0 : index
    %70 = vector.load %arg5[%c0_52, %c0_53, %c0_54, %c0_55] : memref<1x8x8x8xbf16, #tpu.memory_space<vmem>>, vector<1x8x8x8xbf16>
    tpu.vector_store %arg5[%c0_52, %c0_53, %c0_54, %c0_55], %69 {strides = array<i32>} : memref<1x8x8x8xbf16, #tpu.memory_space<vmem>>, vector<1x8x8x8xbf16>,
    return
  }
  func.func @transform_0(%arg0: i32) -> (i32, i32) {
    %c0_i32 = arith.constant 0 : i32
    %c0_i32_0 = arith.constant 0 : i32
    return %arg0, %c0_i32 : i32, i32
  }
  func.func @transform_1(%arg0: i32) -> (i32, i32) {
    %c0_i32 = arith.constant 0 : i32
    %c0_i32_0 = arith.constant 0 : i32
    %c0_i32_1 = arith.constant 0 : i32
    return %c0_i32, %c0_i32_0 : i32, i32
  }
  func.func @transform_2(%arg0: i32) -> (i32, i32) {
    %c0_i32 = arith.constant 0 : i32
    %c0_i32_0 = arith.constant 0 : i32
    %c0_i32_1 = arith.constant 0 : i32
    return %c0_i32, %c0_i32_0 : i32, i32
  }
  func.func @transform_3(%arg0: i32) -> (i32, i32) {
    %c0_i32 = arith.constant 0 : i32
    %c0_i32_0 = arith.constant 0 : i32
    %c0_i32_1 = arith.constant 0 : i32
    return %c0_i32, %c0_i32_0 : i32, i32
  }
  func.func @transform_4(%arg0: i32) -> (i32, i32, i32, i32) {
    %c0_i32 = arith.constant 0 : i32
    %c0_i32_0 = arith.constant 0 : i32
    %c0_i32_1 = arith.constant 0 : i32
    %c0_i32_2 = arith.constant 0 : i32
    return %arg0, %c0_i32, %c0_i32_0, %c0_i32_1 : i32, i32, i32, i32
  }
}

module attributes {stable_mosaic.version = 11 : i64} {
  func.func @_se4_sum_kernel(%arg0: i32, %arg1: memref<1x64x8xbf16, #tpu.memory_space<vmem>>, %arg2: memref<1x64x8xbf16, #tpu.memory_space<vmem>>, %arg3: memref<1x64x8xbf16, #tpu.memory_space<vmem>>, %arg4: memref<1x64x8xbf16, #tpu.memory_space<vmem>>, %arg5: memref<8x2xbf16, #tpu.memory_space<vmem>>, %arg6: memref<1x2xf32, #tpu.memory_space<vmem>>, %arg7: memref<2x8xbf16, #tpu.memory_space<vmem>>, %arg8: memref<1x8xf32, #tpu.memory_space<vmem>>, %arg9: memref<1x64x8xbf16, #tpu.memory_space<vmem>>) attributes {dimension_semantics = [#tpu.dimension_semantics<parallel>], iteration_bounds = array<i64: 2>, scalar_prefetch = 0 : i64, scratch_operands = 0 : i64, tpu.core_type = #tpu.core_type<tc>, window_params = [{transform_indices = @transform_0, window_bounds = array<i64: 1, 64, 8>}, {transform_indices = @transform_1, window_bounds = array<i64: 1, 64, 8>}, {transform_indices = @transform_2, window_bounds = array<i64: 1, 64, 8>}, {transform_indices = @transform_3, window_bounds = array<i64: 1, 64, 8>}, {pipeline_mode = #tpu.pipeline_mode<synchronous>, transform_indices = @transform_4, window_bounds = array<i64: 8, 2>}, {pipeline_mode = #tpu.pipeline_mode<synchronous>, transform_indices = @transform_5, window_bounds = array<i64: 1, 2>}, {pipeline_mode = #tpu.pipeline_mode<synchronous>, transform_indices = @transform_6, window_bounds = array<i64: 2, 8>}, {pipeline_mode = #tpu.pipeline_mode<synchronous>, transform_indices = @transform_7, window_bounds = array<i64: 1, 8>}, {transform_indices = @transform_8, window_bounds = array<i64: 1, 64, 8>}]} {
    %c0 = arith.constant 0 : index
    %c0_0 = arith.constant 0 : index
    %c0_1 = arith.constant 0 : index
    %0 = vector.load %arg1[%c0, %c0_0, %c0_1] : memref<1x64x8xbf16, #tpu.memory_space<vmem>>, vector<1x64x8xbf16>
    %c0_2 = arith.constant 0 : index
    %c0_3 = arith.constant 0 : index
    %c0_4 = arith.constant 0 : index
    %1 = vector.load %arg2[%c0_2, %c0_3, %c0_4] : memref<1x64x8xbf16, #tpu.memory_space<vmem>>, vector<1x64x8xbf16>
    %c0_5 = arith.constant 0 : index
    %c0_6 = arith.constant 0 : index
    %c0_7 = arith.constant 0 : index
    %2 = vector.load %arg3[%c0_5, %c0_6, %c0_7] : memref<1x64x8xbf16, #tpu.memory_space<vmem>>, vector<1x64x8xbf16>
    %c0_8 = arith.constant 0 : index
    %c0_9 = arith.constant 0 : index
    %c0_10 = arith.constant 0 : index
    %3 = vector.load %arg4[%c0_8, %c0_9, %c0_10] : memref<1x64x8xbf16, #tpu.memory_space<vmem>>, vector<1x64x8xbf16>
    %4 = arith.extf %0 : vector<1x64x8xbf16> to vector<1x64x8xf32>
    %cst = arith.constant dense<0.000000e+00> : vector<1x8xf32>
    %5 = vector.multi_reduction <add>, %4, %cst [1] : vector<1x64x8xf32> to vector<1x8xf32>
    %cst_11 = arith.constant 1.562500e-02 : f32
    %6 = vector.broadcast %cst_11 : f32 to vector<1x8xf32>
    %7 = arith.mulf %5, %6 : vector<1x8xf32>
    %8 = arith.extf %1 : vector<1x64x8xbf16> to vector<1x64x8xf32>
    %cst_12 = arith.constant dense<0.000000e+00> : vector<1x8xf32>
    %9 = vector.multi_reduction <add>, %8, %cst_12 [1] : vector<1x64x8xf32> to vector<1x8xf32>
    %cst_13 = arith.constant 1.562500e-02 : f32
    %10 = vector.broadcast %cst_13 : f32 to vector<1x8xf32>
    %11 = arith.mulf %9, %10 : vector<1x8xf32>
    %12 = arith.extf %2 : vector<1x64x8xbf16> to vector<1x64x8xf32>
    %cst_14 = arith.constant dense<0.000000e+00> : vector<1x8xf32>
    %13 = vector.multi_reduction <add>, %12, %cst_14 [1] : vector<1x64x8xf32> to vector<1x8xf32>
    %cst_15 = arith.constant 1.562500e-02 : f32
    %14 = vector.broadcast %cst_15 : f32 to vector<1x8xf32>
    %15 = arith.mulf %13, %14 : vector<1x8xf32>
    %16 = arith.extf %3 : vector<1x64x8xbf16> to vector<1x64x8xf32>
    %cst_16 = arith.constant dense<0.000000e+00> : vector<1x8xf32>
    %17 = vector.multi_reduction <add>, %16, %cst_16 [1] : vector<1x64x8xf32> to vector<1x8xf32>
    %cst_17 = arith.constant 1.562500e-02 : f32
    %18 = vector.broadcast %cst_17 : f32 to vector<1x8xf32>
    %19 = arith.mulf %17, %18 : vector<1x8xf32>
    %20 = tpu.concatenate %7, %11, %15, %19 in 0 : vector<1x8xf32>, vector<1x8xf32>, vector<1x8xf32>, vector<1x8xf32> -> vector<4x8xf32>
    %21 = arith.truncf %20 : vector<4x8xf32> to vector<4x8xbf16>
    %c0_18 = arith.constant 0 : index
    %c0_19 = arith.constant 0 : index
    %22 = vector.load %arg5[%c0_18, %c0_19] : memref<8x2xbf16, #tpu.memory_space<vmem>>, vector<8x2xbf16>
    %cst_20 = arith.constant dense<0.000000e+00> : vector<4x2xf32>
    %23 = tpu.matmul %21, %22, %cst_20 {dimension_numbers = #tpu.dot_dimension_numbers<[1], [0], [0], [1], [0, 0, 1, 1], [], []>} : vector<4x8xbf16>, vector<8x2xbf16>, vector<4x2xf32> -> vector<4x2xf32>
    %c0_21 = arith.constant 0 : index
    %c0_22 = arith.constant 0 : index
    %24 = vector.load %arg6[%c0_21, %c0_22] : memref<1x2xf32, #tpu.memory_space<vmem>>, vector<1x2xf32>
    %25 = vector.broadcast %24 : vector<1x2xf32> to vector<4x2xf32>
    %26 = arith.addf %23, %25 : vector<4x2xf32>
    %cst_23 = arith.constant 0.000000e+00 : f32
    %27 = vector.broadcast %cst_23 : f32 to vector<4x2xf32>
    %28 = arith.maximumf %26, %27 : vector<4x2xf32>
    %29 = arith.truncf %28 : vector<4x2xf32> to vector<4x2xbf16>
    %c0_24 = arith.constant 0 : index
    %c0_25 = arith.constant 0 : index
    %30 = vector.load %arg7[%c0_24, %c0_25] : memref<2x8xbf16, #tpu.memory_space<vmem>>, vector<2x8xbf16>
    %cst_26 = arith.constant dense<0.000000e+00> : vector<4x8xf32>
    %31 = tpu.matmul %29, %30, %cst_26 {dimension_numbers = #tpu.dot_dimension_numbers<[1], [0], [0], [1], [0, 0, 1, 1], [], []>} : vector<4x2xbf16>, vector<2x8xbf16>, vector<4x8xf32> -> vector<4x8xf32>
    %c0_27 = arith.constant 0 : index
    %c0_28 = arith.constant 0 : index
    %32 = vector.load %arg8[%c0_27, %c0_28] : memref<1x8xf32, #tpu.memory_space<vmem>>, vector<1x8xf32>
    %33 = vector.broadcast %32 : vector<1x8xf32> to vector<4x8xf32>
    %34 = arith.addf %31, %33 : vector<4x8xf32>
    %cst_29 = arith.constant 0.000000e+00 : f32
    %35 = vector.broadcast %cst_29 : f32 to vector<4x8xf32>
    %36 = arith.subf %35, %34 : vector<4x8xf32>
    %37 = math.exp %36 : vector<4x8xf32>
    %cst_30 = arith.constant 1.000000e+00 : f32
    %38 = vector.broadcast %cst_30 : f32 to vector<4x8xf32>
    %39 = arith.addf %38, %37 : vector<4x8xf32>
    %40 = tpu.reciprocal %39 {approx = true} : vector<4x8xf32> -> vector<4x8xf32>
    %cst_31 = arith.constant 0.000000e+00 : f32
    %41 = vector.broadcast %cst_31 : f32 to vector<1x64x8xf32>
    %42 = vector.extract_strided_slice %40 {offsets = [0, 0], sizes = [1, 8], strides = [1, 1]} : vector<4x8xf32> to vector<1x8xf32>
    %43 = vector.shape_cast %42 : vector<1x8xf32> to vector<1x1x8xf32>
    %44 = arith.extf %0 : vector<1x64x8xbf16> to vector<1x64x8xf32>
    %45 = vector.broadcast %43 : vector<1x1x8xf32> to vector<1x64x8xf32>
    %46 = arith.mulf %44, %45 : vector<1x64x8xf32>
    %47 = arith.addf %41, %46 : vector<1x64x8xf32>
    %48 = vector.extract_strided_slice %40 {offsets = [1, 0], sizes = [1, 8], strides = [1, 1]} : vector<4x8xf32> to vector<1x8xf32>
    %49 = vector.shape_cast %48 : vector<1x8xf32> to vector<1x1x8xf32>
    %50 = arith.extf %1 : vector<1x64x8xbf16> to vector<1x64x8xf32>
    %51 = vector.broadcast %49 : vector<1x1x8xf32> to vector<1x64x8xf32>
    %52 = arith.mulf %50, %51 : vector<1x64x8xf32>
    %53 = arith.addf %47, %52 : vector<1x64x8xf32>
    %54 = vector.extract_strided_slice %40 {offsets = [2, 0], sizes = [1, 8], strides = [1, 1]} : vector<4x8xf32> to vector<1x8xf32>
    %55 = vector.shape_cast %54 : vector<1x8xf32> to vector<1x1x8xf32>
    %56 = arith.extf %2 : vector<1x64x8xbf16> to vector<1x64x8xf32>
    %57 = vector.broadcast %55 : vector<1x1x8xf32> to vector<1x64x8xf32>
    %58 = arith.mulf %56, %57 : vector<1x64x8xf32>
    %59 = arith.addf %53, %58 : vector<1x64x8xf32>
    %60 = vector.extract_strided_slice %40 {offsets = [3, 0], sizes = [1, 8], strides = [1, 1]} : vector<4x8xf32> to vector<1x8xf32>
    %61 = vector.shape_cast %60 : vector<1x8xf32> to vector<1x1x8xf32>
    %62 = arith.extf %3 : vector<1x64x8xbf16> to vector<1x64x8xf32>
    %63 = vector.broadcast %61 : vector<1x1x8xf32> to vector<1x64x8xf32>
    %64 = arith.mulf %62, %63 : vector<1x64x8xf32>
    %65 = arith.addf %59, %64 : vector<1x64x8xf32>
    %66 = arith.truncf %65 : vector<1x64x8xf32> to vector<1x64x8xbf16>
    %c0_32 = arith.constant 0 : index
    %c0_33 = arith.constant 0 : index
    %c0_34 = arith.constant 0 : index
    %67 = vector.load %arg9[%c0_32, %c0_33, %c0_34] : memref<1x64x8xbf16, #tpu.memory_space<vmem>>, vector<1x64x8xbf16>
    tpu.vector_store %arg9[%c0_32, %c0_33, %c0_34], %66 {strides = array<i32>} : memref<1x64x8xbf16, #tpu.memory_space<vmem>>, vector<1x64x8xbf16>,
    return
  }
  func.func @transform_0(%arg0: i32) -> (i32, i32, i32) {
    %c0_i32 = arith.constant 0 : i32
    %c0_i32_0 = arith.constant 0 : i32
    %c0_i32_1 = arith.constant 0 : i32
    return %arg0, %c0_i32, %c0_i32_0 : i32, i32, i32
  }
  func.func @transform_1(%arg0: i32) -> (i32, i32, i32) {
    %c0_i32 = arith.constant 0 : i32
    %c0_i32_0 = arith.constant 0 : i32
    %c0_i32_1 = arith.constant 0 : i32
    return %arg0, %c0_i32, %c0_i32_0 : i32, i32, i32
  }
  func.func @transform_2(%arg0: i32) -> (i32, i32, i32) {
    %c0_i32 = arith.constant 0 : i32
    %c0_i32_0 = arith.constant 0 : i32
    %c0_i32_1 = arith.constant 0 : i32
    return %arg0, %c0_i32, %c0_i32_0 : i32, i32, i32
  }
  func.func @transform_3(%arg0: i32) -> (i32, i32, i32) {
    %c0_i32 = arith.constant 0 : i32
    %c0_i32_0 = arith.constant 0 : i32
    %c0_i32_1 = arith.constant 0 : i32
    return %arg0, %c0_i32, %c0_i32_0 : i32, i32, i32
  }
  func.func @transform_4(%arg0: i32) -> (i32, i32) {
    %c0_i32 = arith.constant 0 : i32
    %c0_i32_0 = arith.constant 0 : i32
    %c0_i32_1 = arith.constant 0 : i32
    return %c0_i32, %c0_i32_0 : i32, i32
  }
  func.func @transform_5(%arg0: i32) -> (i32, i32) {
    %c0_i32 = arith.constant 0 : i32
    %c0_i32_0 = arith.constant 0 : i32
    %c0_i32_1 = arith.constant 0 : i32
    return %c0_i32, %c0_i32_0 : i32, i32
  }
  func.func @transform_6(%arg0: i32) -> (i32, i32) {
    %c0_i32 = arith.constant 0 : i32
    %c0_i32_0 = arith.constant 0 : i32
    %c0_i32_1 = arith.constant 0 : i32
    return %c0_i32, %c0_i32_0 : i32, i32
  }
  func.func @transform_7(%arg0: i32) -> (i32, i32) {
    %c0_i32 = arith.constant 0 : i32
    %c0_i32_0 = arith.constant 0 : i32
    %c0_i32_1 = arith.constant 0 : i32
    return %c0_i32, %c0_i32_0 : i32, i32
  }
  func.func @transform_8(%arg0: i32) -> (i32, i32, i32) {
    %c0_i32 = arith.constant 0 : i32
    %c0_i32_0 = arith.constant 0 : i32
    %c0_i32_1 = arith.constant 0 : i32
    return %arg0, %c0_i32, %c0_i32_0 : i32, i32, i32
  }
}

module attributes {stable_mosaic.version = 11 : i64} {
  func.func @_gemm_bias_act_kernel(%arg0: i32, %arg1: memref<64x32xbf16, #tpu.memory_space<vmem>>, %arg2: memref<32x32xbf16, #tpu.memory_space<vmem>>, %arg3: memref<1x32xf32, #tpu.memory_space<vmem>>, %arg4: memref<64x32xbf16, #tpu.memory_space<vmem>>) attributes {dimension_semantics = [#tpu.dimension_semantics<parallel>], iteration_bounds = array<i64: 2>, scalar_prefetch = 0 : i64, scratch_operands = 0 : i64, tpu.core_type = #tpu.core_type<tc>, window_params = [{transform_indices = @transform_0, window_bounds = array<i64: 64, 32>}, {pipeline_mode = #tpu.pipeline_mode<synchronous>, transform_indices = @transform_1, window_bounds = array<i64: 32, 32>}, {pipeline_mode = #tpu.pipeline_mode<synchronous>, transform_indices = @transform_2, window_bounds = array<i64: 1, 32>}, {transform_indices = @transform_3, window_bounds = array<i64: 64, 32>}]} {
    %c0 = arith.constant 0 : index
    %c0_0 = arith.constant 0 : index
    %0 = vector.load %arg1[%c0, %c0_0] : memref<64x32xbf16, #tpu.memory_space<vmem>>, vector<64x32xbf16>
    %c0_1 = arith.constant 0 : index
    %c0_2 = arith.constant 0 : index
    %1 = vector.load %arg2[%c0_1, %c0_2] : memref<32x32xbf16, #tpu.memory_space<vmem>>, vector<32x32xbf16>
    %cst = arith.constant dense<0.000000e+00> : vector<64x32xf32>
    %2 = tpu.matmul %0, %1, %cst {dimension_numbers = #tpu.dot_dimension_numbers<[1], [0], [0], [1], [0, 0, 1, 1], [], []>} : vector<64x32xbf16>, vector<32x32xbf16>, vector<64x32xf32> -> vector<64x32xf32>
    %c0_3 = arith.constant 0 : index
    %c0_4 = arith.constant 0 : index
    %3 = vector.load %arg3[%c0_3, %c0_4] : memref<1x32xf32, #tpu.memory_space<vmem>>, vector<1x32xf32>
    %4 = vector.broadcast %3 : vector<1x32xf32> to vector<64x32xf32>
    %5 = arith.addf %2, %4 : vector<64x32xf32>
    %cst_5 = arith.constant 0.000000e+00 : f32
    %6 = vector.broadcast %cst_5 : f32 to vector<64x32xf32>
    %7 = arith.maximumf %5, %6 : vector<64x32xf32>
    %8 = arith.truncf %7 : vector<64x32xf32> to vector<64x32xbf16>
    %c0_6 = arith.constant 0 : index
    %c0_7 = arith.constant 0 : index
    %9 = vector.load %arg4[%c0_6, %c0_7] : memref<64x32xbf16, #tpu.memory_space<vmem>>, vector<64x32xbf16>
    tpu.vector_store %arg4[%c0_6, %c0_7], %8 {strides = array<i32>} : memref<64x32xbf16, #tpu.memory_space<vmem>>, vector<64x32xbf16>,
    return
  }
  func.func @transform_0(%arg0: i32) -> (i32, i32) {
    %c0_i32 = arith.constant 0 : i32
    %c0_i32_0 = arith.constant 0 : i32
    return %arg0, %c0_i32 : i32, i32
  }
  func.func @transform_1(%arg0: i32) -> (i32, i32) {
    %c0_i32 = arith.constant 0 : i32
    %c0_i32_0 = arith.constant 0 : i32
    %c0_i32_1 = arith.constant 0 : i32
    return %c0_i32, %c0_i32_0 : i32, i32
  }
  func.func @transform_2(%arg0: i32) -> (i32, i32) {
    %c0_i32 = arith.constant 0 : i32
    %c0_i32_0 = arith.constant 0 : i32
    %c0_i32_1 = arith.constant 0 : i32
    return %c0_i32, %c0_i32_0 : i32, i32
  }
  func.func @transform_3(%arg0: i32) -> (i32, i32) {
    %c0_i32 = arith.constant 0 : i32
    %c0_i32_0 = arith.constant 0 : i32
    return %arg0, %c0_i32 : i32, i32
  }
}

module attributes {stable_mosaic.version = 11 : i64} {
  func.func @_gemm_dual_residual_relu_kernel(%arg0: i32, %arg1: memref<64x8xbf16, #tpu.memory_space<vmem>>, %arg2: memref<8x32xbf16, #tpu.memory_space<vmem>>, %arg3: memref<1x32xf32, #tpu.memory_space<vmem>>, %arg4: memref<64x16xbf16, #tpu.memory_space<vmem>>, %arg5: memref<16x32xbf16, #tpu.memory_space<vmem>>, %arg6: memref<1x32xf32, #tpu.memory_space<vmem>>, %arg7: memref<64x32xbf16, #tpu.memory_space<vmem>>) attributes {dimension_semantics = [#tpu.dimension_semantics<parallel>], iteration_bounds = array<i64: 2>, scalar_prefetch = 0 : i64, scratch_operands = 0 : i64, tpu.core_type = #tpu.core_type<tc>, window_params = [{transform_indices = @transform_0, window_bounds = array<i64: 64, 8>}, {pipeline_mode = #tpu.pipeline_mode<synchronous>, transform_indices = @transform_1, window_bounds = array<i64: 8, 32>}, {pipeline_mode = #tpu.pipeline_mode<synchronous>, transform_indices = @transform_2, window_bounds = array<i64: 1, 32>}, {transform_indices = @transform_3, window_bounds = array<i64: 64, 16>}, {pipeline_mode = #tpu.pipeline_mode<synchronous>, transform_indices = @transform_4, window_bounds = array<i64: 16, 32>}, {pipeline_mode = #tpu.pipeline_mode<synchronous>, transform_indices = @transform_5, window_bounds = array<i64: 1, 32>}, {transform_indices = @transform_6, window_bounds = array<i64: 64, 32>}]} {
    %c0 = arith.constant 0 : index
    %c0_0 = arith.constant 0 : index
    %0 = vector.load %arg1[%c0, %c0_0] : memref<64x8xbf16, #tpu.memory_space<vmem>>, vector<64x8xbf16>
    %c0_1 = arith.constant 0 : index
    %c0_2 = arith.constant 0 : index
    %1 = vector.load %arg2[%c0_1, %c0_2] : memref<8x32xbf16, #tpu.memory_space<vmem>>, vector<8x32xbf16>
    %cst = arith.constant dense<0.000000e+00> : vector<64x32xf32>
    %2 = tpu.matmul %0, %1, %cst {dimension_numbers = #tpu.dot_dimension_numbers<[1], [0], [0], [1], [0, 0, 1, 1], [], []>} : vector<64x8xbf16>, vector<8x32xbf16>, vector<64x32xf32> -> vector<64x32xf32>
    %c0_3 = arith.constant 0 : index
    %c0_4 = arith.constant 0 : index
    %3 = vector.load %arg3[%c0_3, %c0_4] : memref<1x32xf32, #tpu.memory_space<vmem>>, vector<1x32xf32>
    %4 = vector.broadcast %3 : vector<1x32xf32> to vector<64x32xf32>
    %5 = arith.addf %2, %4 : vector<64x32xf32>
    %c0_5 = arith.constant 0 : index
    %c0_6 = arith.constant 0 : index
    %6 = vector.load %arg4[%c0_5, %c0_6] : memref<64x16xbf16, #tpu.memory_space<vmem>>, vector<64x16xbf16>
    %c0_7 = arith.constant 0 : index
    %c0_8 = arith.constant 0 : index
    %7 = vector.load %arg5[%c0_7, %c0_8] : memref<16x32xbf16, #tpu.memory_space<vmem>>, vector<16x32xbf16>
    %cst_9 = arith.constant dense<0.000000e+00> : vector<64x32xf32>
    %8 = tpu.matmul %6, %7, %cst_9 {dimension_numbers = #tpu.dot_dimension_numbers<[1], [0], [0], [1], [0, 0, 1, 1], [], []>} : vector<64x16xbf16>, vector<16x32xbf16>, vector<64x32xf32> -> vector<64x32xf32>
    %9 = arith.addf %5, %8 : vector<64x32xf32>
    %c0_10 = arith.constant 0 : index
    %c0_11 = arith.constant 0 : index
    %10 = vector.load %arg6[%c0_10, %c0_11] : memref<1x32xf32, #tpu.memory_space<vmem>>, vector<1x32xf32>
    %11 = vector.broadcast %10 : vector<1x32xf32> to vector<64x32xf32>
    %12 = arith.addf %9, %11 : vector<64x32xf32>
    %cst_12 = arith.constant 0.000000e+00 : f32
    %13 = vector.broadcast %cst_12 : f32 to vector<64x32xf32>
    %14 = arith.maximumf %12, %13 : vector<64x32xf32>
    %15 = arith.truncf %14 : vector<64x32xf32> to vector<64x32xbf16>
    %c0_13 = arith.constant 0 : index
    %c0_14 = arith.constant 0 : index
    %16 = vector.load %arg7[%c0_13, %c0_14] : memref<64x32xbf16, #tpu.memory_space<vmem>>, vector<64x32xbf16>
    tpu.vector_store %arg7[%c0_13, %c0_14], %15 {strides = array<i32>} : memref<64x32xbf16, #tpu.memory_space<vmem>>, vector<64x32xbf16>,
    return
  }
  func.func @transform_0(%arg0: i32) -> (i32, i32) {
    %c0_i32 = arith.constant 0 : i32
    %c0_i32_0 = arith.constant 0 : i32
    return %arg0, %c0_i32 : i32, i32
  }
  func.func @transform_1(%arg0: i32) -> (i32, i32) {
    %c0_i32 = arith.constant 0 : i32
    %c0_i32_0 = arith.constant 0 : i32
    %c0_i32_1 = arith.constant 0 : i32
    return %c0_i32, %c0_i32_0 : i32, i32
  }
  func.func @transform_2(%arg0: i32) -> (i32, i32) {
    %c0_i32 = arith.constant 0 : i32
    %c0_i32_0 = arith.constant 0 : i32
    %c0_i32_1 = arith.constant 0 : i32
    return %c0_i32, %c0_i32_0 : i32, i32
  }
  func.func @transform_3(%arg0: i32) -> (i32, i32) {
    %c0_i32 = arith.constant 0 : i32
    %c0_i32_0 = arith.constant 0 : i32
    return %arg0, %c0_i32 : i32, i32
  }
  func.func @transform_4(%arg0: i32) -> (i32, i32) {
    %c0_i32 = arith.constant 0 : i32
    %c0_i32_0 = arith.constant 0 : i32
    %c0_i32_1 = arith.constant 0 : i32
    return %c0_i32, %c0_i32_0 : i32, i32
  }
  func.func @transform_5(%arg0: i32) -> (i32, i32) {
    %c0_i32 = arith.constant 0 : i32
    %c0_i32_0 = arith.constant 0 : i32
    %c0_i32_1 = arith.constant 0 : i32
    return %c0_i32, %c0_i32_0 : i32, i32
  }
  func.func @transform_6(%arg0: i32) -> (i32, i32) {
    %c0_i32 = arith.constant 0 : i32
    %c0_i32_0 = arith.constant 0 : i32
    return %arg0, %c0_i32 : i32, i32
  }
}

module attributes {stable_mosaic.version = 11 : i64} {
  func.func @_gemm_bias_act_kernel(%arg0: i32, %arg1: memref<16x32xbf16, #tpu.memory_space<vmem>>, %arg2: memref<32x16xbf16, #tpu.memory_space<vmem>>, %arg3: memref<1x16xf32, #tpu.memory_space<vmem>>, %arg4: memref<16x16xbf16, #tpu.memory_space<vmem>>) attributes {dimension_semantics = [#tpu.dimension_semantics<parallel>], iteration_bounds = array<i64: 2>, scalar_prefetch = 0 : i64, scratch_operands = 0 : i64, tpu.core_type = #tpu.core_type<tc>, window_params = [{transform_indices = @transform_0, window_bounds = array<i64: 16, 32>}, {pipeline_mode = #tpu.pipeline_mode<synchronous>, transform_indices = @transform_1, window_bounds = array<i64: 32, 16>}, {pipeline_mode = #tpu.pipeline_mode<synchronous>, transform_indices = @transform_2, window_bounds = array<i64: 1, 16>}, {transform_indices = @transform_3, window_bounds = array<i64: 16, 16>}]} {
    %c0 = arith.constant 0 : index
    %c0_0 = arith.constant 0 : index
    %0 = vector.load %arg1[%c0, %c0_0] : memref<16x32xbf16, #tpu.memory_space<vmem>>, vector<16x32xbf16>
    %c0_1 = arith.constant 0 : index
    %c0_2 = arith.constant 0 : index
    %1 = vector.load %arg2[%c0_1, %c0_2] : memref<32x16xbf16, #tpu.memory_space<vmem>>, vector<32x16xbf16>
    %cst = arith.constant dense<0.000000e+00> : vector<16x16xf32>
    %2 = tpu.matmul %0, %1, %cst {dimension_numbers = #tpu.dot_dimension_numbers<[1], [0], [0], [1], [0, 0, 1, 1], [], []>} : vector<16x32xbf16>, vector<32x16xbf16>, vector<16x16xf32> -> vector<16x16xf32>
    %c0_3 = arith.constant 0 : index
    %c0_4 = arith.constant 0 : index
    %3 = vector.load %arg3[%c0_3, %c0_4] : memref<1x16xf32, #tpu.memory_space<vmem>>, vector<1x16xf32>
    %4 = vector.broadcast %3 : vector<1x16xf32> to vector<16x16xf32>
    %5 = arith.addf %2, %4 : vector<16x16xf32>
    %cst_5 = arith.constant 0.000000e+00 : f32
    %6 = vector.broadcast %cst_5 : f32 to vector<16x16xf32>
    %7 = arith.maximumf %5, %6 : vector<16x16xf32>
    %8 = arith.truncf %7 : vector<16x16xf32> to vector<16x16xbf16>
    %c0_6 = arith.constant 0 : index
    %c0_7 = arith.constant 0 : index
    %9 = vector.load %arg4[%c0_6, %c0_7] : memref<16x16xbf16, #tpu.memory_space<vmem>>, vector<16x16xbf16>
    tpu.vector_store %arg4[%c0_6, %c0_7], %8 {strides = array<i32>} : memref<16x16xbf16, #tpu.memory_space<vmem>>, vector<16x16xbf16>,
    return
  }
  func.func @transform_0(%arg0: i32) -> (i32, i32) {
    %c0_i32 = arith.constant 0 : i32
    %c0_i32_0 = arith.constant 0 : i32
    return %arg0, %c0_i32 : i32, i32
  }
  func.func @transform_1(%arg0: i32) -> (i32, i32) {
    %c0_i32 = arith.constant 0 : i32
    %c0_i32_0 = arith.constant 0 : i32
    %c0_i32_1 = arith.constant 0 : i32
    return %c0_i32, %c0_i32_0 : i32, i32
  }
  func.func @transform_2(%arg0: i32) -> (i32, i32) {
    %c0_i32 = arith.constant 0 : i32
    %c0_i32_0 = arith.constant 0 : i32
    %c0_i32_1 = arith.constant 0 : i32
    return %c0_i32, %c0_i32_0 : i32, i32
  }
  func.func @transform_3(%arg0: i32) -> (i32, i32) {
    %c0_i32 = arith.constant 0 : i32
    %c0_i32_0 = arith.constant 0 : i32
    return %arg0, %c0_i32 : i32, i32
  }
}

module attributes {stable_mosaic.version = 11 : i64} {
  func.func @_multi_lite_kernel(%arg0: i32, %arg1: memref<16x16xbf16, #tpu.memory_space<vmem>>, %arg2: memref<16x64xbf16, #tpu.memory_space<vmem>>, %arg3: memref<9x64xf32, #tpu.memory_space<vmem>>, %arg4: memref<1x64xf32, #tpu.memory_space<vmem>>, %arg5: memref<1x4x4x64xbf16, #tpu.memory_space<vmem>>, %arg6: memref<1x6x6x64xf32, #tpu.memory_space<vmem>>) attributes {dimension_semantics = [#tpu.dimension_semantics<parallel>], iteration_bounds = array<i64: 2>, scalar_prefetch = 0 : i64, scratch_operands = 1 : i64, tpu.core_type = #tpu.core_type<tc>, window_params = [{transform_indices = @transform_0, window_bounds = array<i64: 16, 16>}, {pipeline_mode = #tpu.pipeline_mode<synchronous>, transform_indices = @transform_1, window_bounds = array<i64: 16, 64>}, {pipeline_mode = #tpu.pipeline_mode<synchronous>, transform_indices = @transform_2, window_bounds = array<i64: 9, 64>}, {pipeline_mode = #tpu.pipeline_mode<synchronous>, transform_indices = @transform_3, window_bounds = array<i64: 1, 64>}, {transform_indices = @transform_4, window_bounds = array<i64: 1, 4, 4, 64>}]} {
    %c0 = arith.constant 0 : index
    %c0_0 = arith.constant 0 : index
    %0 = vector.load %arg1[%c0, %c0_0] : memref<16x16xbf16, #tpu.memory_space<vmem>>, vector<16x16xbf16>
    %c0_1 = arith.constant 0 : index
    %c0_2 = arith.constant 0 : index
    %1 = vector.load %arg2[%c0_1, %c0_2] : memref<16x64xbf16, #tpu.memory_space<vmem>>, vector<16x64xbf16>
    %cst = arith.constant dense<0.000000e+00> : vector<16x64xf32>
    %2 = tpu.matmul %0, %1, %cst {dimension_numbers = #tpu.dot_dimension_numbers<[1], [0], [0], [1], [0, 0, 1, 1], [], []>} : vector<16x16xbf16>, vector<16x64xbf16>, vector<16x64xf32> -> vector<16x64xf32>
    %cst_3 = arith.constant 0.000000e+00 : f32
    %3 = vector.broadcast %cst_3 : f32 to vector<1x6x6x64xf32>
    %c0_4 = arith.constant 0 : index
    %c0_5 = arith.constant 0 : index
    %c0_6 = arith.constant 0 : index
    %c0_7 = arith.constant 0 : index
    %4 = vector.load %arg6[%c0_4, %c0_5, %c0_6, %c0_7] : memref<1x6x6x64xf32, #tpu.memory_space<vmem>>, vector<1x6x6x64xf32>
    tpu.vector_store %arg6[%c0_4, %c0_5, %c0_6, %c0_7], %3 {strides = array<i32>} : memref<1x6x6x64xf32, #tpu.memory_space<vmem>>, vector<1x6x6x64xf32>,
    %5 = vector.extract_strided_slice %2 {offsets = [0, 0], sizes = [4, 64], strides = [1, 1]} : vector<16x64xf32> to vector<4x64xf32>
    %c0_8 = arith.constant 0 : index
    %c1 = arith.constant 1 : index
    %c1_9 = arith.constant 1 : index
    %c0_10 = arith.constant 0 : index
    %6 = vector.load %arg6[%c0_8, %c1, %c1_9, %c0_10] : memref<1x6x6x64xf32, #tpu.memory_space<vmem>>, vector<1x1x4x64xf32>
    %7 = vector.shape_cast %6 : vector<1x1x4x64xf32> to vector<4x64xf32>
    %8 = vector.shape_cast %5 : vector<4x64xf32> to vector<1x1x4x64xf32>
    tpu.vector_store %arg6[%c0_8, %c1, %c1_9, %c0_10], %8 {strides = array<i32>} : memref<1x6x6x64xf32, #tpu.memory_space<vmem>>, vector<1x1x4x64xf32>,
    %9 = vector.extract_strided_slice %2 {offsets = [4, 0], sizes = [4, 64], strides = [1, 1]} : vector<16x64xf32> to vector<4x64xf32>
    %c0_11 = arith.constant 0 : index
    %c2 = arith.constant 2 : index
    %c1_12 = arith.constant 1 : index
    %c0_13 = arith.constant 0 : index
    %10 = vector.load %arg6[%c0_11, %c2, %c1_12, %c0_13] : memref<1x6x6x64xf32, #tpu.memory_space<vmem>>, vector<1x1x4x64xf32>
    %11 = vector.shape_cast %10 : vector<1x1x4x64xf32> to vector<4x64xf32>
    %12 = vector.shape_cast %9 : vector<4x64xf32> to vector<1x1x4x64xf32>
    tpu.vector_store %arg6[%c0_11, %c2, %c1_12, %c0_13], %12 {strides = array<i32>} : memref<1x6x6x64xf32, #tpu.memory_space<vmem>>, vector<1x1x4x64xf32>,
    %13 = vector.extract_strided_slice %2 {offsets = [8, 0], sizes = [4, 64], strides = [1, 1]} : vector<16x64xf32> to vector<4x64xf32>
    %c0_14 = arith.constant 0 : index
    %c3 = arith.constant 3 : index
    %c1_15 = arith.constant 1 : index
    %c0_16 = arith.constant 0 : index
    %14 = vector.load %arg6[%c0_14, %c3, %c1_15, %c0_16] : memref<1x6x6x64xf32, #tpu.memory_space<vmem>>, vector<1x1x4x64xf32>
    %15 = vector.shape_cast %14 : vector<1x1x4x64xf32> to vector<4x64xf32>
    %16 = vector.shape_cast %13 : vector<4x64xf32> to vector<1x1x4x64xf32>
    tpu.vector_store %arg6[%c0_14, %c3, %c1_15, %c0_16], %16 {strides = array<i32>} : memref<1x6x6x64xf32, #tpu.memory_space<vmem>>, vector<1x1x4x64xf32>,
    %17 = vector.extract_strided_slice %2 {offsets = [12, 0], sizes = [4, 64], strides = [1, 1]} : vector<16x64xf32> to vector<4x64xf32>
    %c0_17 = arith.constant 0 : index
    %c4 = arith.constant 4 : index
    %c1_18 = arith.constant 1 : index
    %c0_19 = arith.constant 0 : index
    %18 = vector.load %arg6[%c0_17, %c4, %c1_18, %c0_19] : memref<1x6x6x64xf32, #tpu.memory_space<vmem>>, vector<1x1x4x64xf32>
    %19 = vector.shape_cast %18 : vector<1x1x4x64xf32> to vector<4x64xf32>
    %20 = vector.shape_cast %17 : vector<4x64xf32> to vector<1x1x4x64xf32>
    tpu.vector_store %arg6[%c0_17, %c4, %c1_18, %c0_19], %20 {strides = array<i32>} : memref<1x6x6x64xf32, #tpu.memory_space<vmem>>, vector<1x1x4x64xf32>,
    %c0_20 = arith.constant 0 : index
    %c0_21 = arith.constant 0 : index
    %21 = vector.load %arg3[%c0_20, %c0_21] : memref<9x64xf32, #tpu.memory_space<vmem>>, vector<9x64xf32>
    %cst_22 = arith.constant 0.000000e+00 : f32
    %22 = vector.broadcast %cst_22 : f32 to vector<1x4x4x64xf32>
    %c0_23 = arith.constant 0 : index
    %c0_24 = arith.constant 0 : index
    %c0_25 = arith.constant 0 : index
    %c0_26 = arith.constant 0 : index
    %23 = vector.load %arg6[%c0_23, %c0_24, %c0_25, %c0_26] : memref<1x6x6x64xf32, #tpu.memory_space<vmem>>, vector<1x4x4x64xf32>
    %24 = vector.extract_strided_slice %21 {offsets = [0, 0], sizes = [1, 64], strides = [1, 1]} : vector<9x64xf32> to vector<1x64xf32>
    %25 = vector.shape_cast %24 : vector<1x64xf32> to vector<1x1x1x64xf32>
    %26 = vector.broadcast %25 : vector<1x1x1x64xf32> to vector<1x4x4x64xf32>
    %27 = arith.mulf %23, %26 : vector<1x4x4x64xf32>
    %28 = arith.addf %22, %27 : vector<1x4x4x64xf32>
    %c0_27 = arith.constant 0 : index
    %c0_28 = arith.constant 0 : index
    %c1_29 = arith.constant 1 : index
    %c0_30 = arith.constant 0 : index
    %29 = vector.load %arg6[%c0_27, %c0_28, %c1_29, %c0_30] : memref<1x6x6x64xf32, #tpu.memory_space<vmem>>, vector<1x4x4x64xf32>
    %30 = vector.extract_strided_slice %21 {offsets = [1, 0], sizes = [1, 64], strides = [1, 1]} : vector<9x64xf32> to vector<1x64xf32>
    %31 = vector.shape_cast %30 : vector<1x64xf32> to vector<1x1x1x64xf32>
    %32 = vector.broadcast %31 : vector<1x1x1x64xf32> to vector<1x4x4x64xf32>
    %33 = arith.mulf %29, %32 : vector<1x4x4x64xf32>
    %34 = arith.addf %28, %33 : vector<1x4x4x64xf32>
    %c0_31 = arith.constant 0 : index
    %c0_32 = arith.constant 0 : index
    %c2_33 = arith.constant 2 : index
    %c0_34 = arith.constant 0 : index
    %35 = vector.load %arg6[%c0_31, %c0_32, %c2_33, %c0_34] : memref<1x6x6x64xf32, #tpu.memory_space<vmem>>, vector<1x4x4x64xf32>
    %36 = vector.extract_strided_slice %21 {offsets = [2, 0], sizes = [1, 64], strides = [1, 1]} : vector<9x64xf32> to vector<1x64xf32>
    %37 = vector.shape_cast %36 : vector<1x64xf32> to vector<1x1x1x64xf32>
    %38 = vector.broadcast %37 : vector<1x1x1x64xf32> to vector<1x4x4x64xf32>
    %39 = arith.mulf %35, %38 : vector<1x4x4x64xf32>
    %40 = arith.addf %34, %39 : vector<1x4x4x64xf32>
    %c0_35 = arith.constant 0 : index
    %c1_36 = arith.constant 1 : index
    %c0_37 = arith.constant 0 : index
    %c0_38 = arith.constant 0 : index
    %41 = vector.load %arg6[%c0_35, %c1_36, %c0_37, %c0_38] : memref<1x6x6x64xf32, #tpu.memory_space<vmem>>, vector<1x4x4x64xf32>
    %42 = vector.extract_strided_slice %21 {offsets = [3, 0], sizes = [1, 64], strides = [1, 1]} : vector<9x64xf32> to vector<1x64xf32>
    %43 = vector.shape_cast %42 : vector<1x64xf32> to vector<1x1x1x64xf32>
    %44 = vector.broadcast %43 : vector<1x1x1x64xf32> to vector<1x4x4x64xf32>
    %45 = arith.mulf %41, %44 : vector<1x4x4x64xf32>
    %46 = arith.addf %40, %45 : vector<1x4x4x64xf32>
    %c0_39 = arith.constant 0 : index
    %c1_40 = arith.constant 1 : index
    %c1_41 = arith.constant 1 : index
    %c0_42 = arith.constant 0 : index
    %47 = vector.load %arg6[%c0_39, %c1_40, %c1_41, %c0_42] : memref<1x6x6x64xf32, #tpu.memory_space<vmem>>, vector<1x4x4x64xf32>
    %48 = vector.extract_strided_slice %21 {offsets = [4, 0], sizes = [1, 64], strides = [1, 1]} : vector<9x64xf32> to vector<1x64xf32>
    %49 = vector.shape_cast %48 : vector<1x64xf32> to vector<1x1x1x64xf32>
    %50 = vector.broadcast %49 : vector<1x1x1x64xf32> to vector<1x4x4x64xf32>
    %51 = arith.mulf %47, %50 : vector<1x4x4x64xf32>
    %52 = arith.addf %46, %51 : vector<1x4x4x64xf32>
    %c0_43 = arith.constant 0 : index
    %c1_44 = arith.constant 1 : index
    %c2_45 = arith.constant 2 : index
    %c0_46 = arith.constant 0 : index
    %53 = vector.load %arg6[%c0_43, %c1_44, %c2_45, %c0_46] : memref<1x6x6x64xf32, #tpu.memory_space<vmem>>, vector<1x4x4x64xf32>
    %54 = vector.extract_strided_slice %21 {offsets = [5, 0], sizes = [1, 64], strides = [1, 1]} : vector<9x64xf32> to vector<1x64xf32>
    %55 = vector.shape_cast %54 : vector<1x64xf32> to vector<1x1x1x64xf32>
    %56 = vector.broadcast %55 : vector<1x1x1x64xf32> to vector<1x4x4x64xf32>
    %57 = arith.mulf %53, %56 : vector<1x4x4x64xf32>
    %58 = arith.addf %52, %57 : vector<1x4x4x64xf32>
    %c0_47 = arith.constant 0 : index
    %c2_48 = arith.constant 2 : index
    %c0_49 = arith.constant 0 : index
    %c0_50 = arith.constant 0 : index
    %59 = vector.load %arg6[%c0_47, %c2_48, %c0_49, %c0_50] : memref<1x6x6x64xf32, #tpu.memory_space<vmem>>, vector<1x4x4x64xf32>
    %60 = vector.extract_strided_slice %21 {offsets = [6, 0], sizes = [1, 64], strides = [1, 1]} : vector<9x64xf32> to vector<1x64xf32>
    %61 = vector.shape_cast %60 : vector<1x64xf32> to vector<1x1x1x64xf32>
    %62 = vector.broadcast %61 : vector<1x1x1x64xf32> to vector<1x4x4x64xf32>
    %63 = arith.mulf %59, %62 : vector<1x4x4x64xf32>
    %64 = arith.addf %58, %63 : vector<1x4x4x64xf32>
    %c0_51 = arith.constant 0 : index
    %c2_52 = arith.constant 2 : index
    %c1_53 = arith.constant 1 : index
    %c0_54 = arith.constant 0 : index
    %65 = vector.load %arg6[%c0_51, %c2_52, %c1_53, %c0_54] : memref<1x6x6x64xf32, #tpu.memory_space<vmem>>, vector<1x4x4x64xf32>
    %66 = vector.extract_strided_slice %21 {offsets = [7, 0], sizes = [1, 64], strides = [1, 1]} : vector<9x64xf32> to vector<1x64xf32>
    %67 = vector.shape_cast %66 : vector<1x64xf32> to vector<1x1x1x64xf32>
    %68 = vector.broadcast %67 : vector<1x1x1x64xf32> to vector<1x4x4x64xf32>
    %69 = arith.mulf %65, %68 : vector<1x4x4x64xf32>
    %70 = arith.addf %64, %69 : vector<1x4x4x64xf32>
    %c0_55 = arith.constant 0 : index
    %c2_56 = arith.constant 2 : index
    %c2_57 = arith.constant 2 : index
    %c0_58 = arith.constant 0 : index
    %71 = vector.load %arg6[%c0_55, %c2_56, %c2_57, %c0_58] : memref<1x6x6x64xf32, #tpu.memory_space<vmem>>, vector<1x4x4x64xf32>
    %72 = vector.extract_strided_slice %21 {offsets = [8, 0], sizes = [1, 64], strides = [1, 1]} : vector<9x64xf32> to vector<1x64xf32>
    %73 = vector.shape_cast %72 : vector<1x64xf32> to vector<1x1x1x64xf32>
    %74 = vector.broadcast %73 : vector<1x1x1x64xf32> to vector<1x4x4x64xf32>
    %75 = arith.mulf %71, %74 : vector<1x4x4x64xf32>
    %76 = arith.addf %70, %75 : vector<1x4x4x64xf32>
    %c0_59 = arith.constant 0 : index
    %c0_60 = arith.constant 0 : index
    %77 = vector.load %arg4[%c0_59, %c0_60] : memref<1x64xf32, #tpu.memory_space<vmem>>, vector<1x64xf32>
    %78 = vector.shape_cast %77 : vector<1x64xf32> to vector<1x1x1x64xf32>
    %79 = vector.broadcast %78 : vector<1x1x1x64xf32> to vector<1x4x4x64xf32>
    %80 = arith.addf %76, %79 : vector<1x4x4x64xf32>
    %cst_61 = arith.constant 0.000000e+00 : f32
    %81 = vector.broadcast %cst_61 : f32 to vector<1x4x4x64xf32>
    %82 = arith.maximumf %80, %81 : vector<1x4x4x64xf32>
    %83 = arith.truncf %82 : vector<1x4x4x64xf32> to vector<1x4x4x64xbf16>
    %c0_62 = arith.constant 0 : index
    %c0_63 = arith.constant 0 : index
    %c0_64 = arith.constant 0 : index
    %c0_65 = arith.constant 0 : index
    %84 = vector.load %arg5[%c0_62, %c0_63, %c0_64, %c0_65] : memref<1x4x4x64xbf16, #tpu.memory_space<vmem>>, vector<1x4x4x64xbf16>
    tpu.vector_store %arg5[%c0_62, %c0_63, %c0_64, %c0_65], %83 {strides = array<i32>} : memref<1x4x4x64xbf16, #tpu.memory_space<vmem>>, vector<1x4x4x64xbf16>,
    return
  }
  func.func @transform_0(%arg0: i32) -> (i32, i32) {
    %c0_i32 = arith.constant 0 : i32
    %c0_i32_0 = arith.constant 0 : i32
    return %arg0, %c0_i32 : i32, i32
  }
  func.func @transform_1(%arg0: i32) -> (i32, i32) {
    %c0_i32 = arith.constant 0 : i32
    %c0_i32_0 = arith.constant 0 : i32
    %c0_i32_1 = arith.constant 0 : i32
    return %c0_i32, %c0_i32_0 : i32, i32
  }
  func.func @transform_2(%arg0: i32) -> (i32, i32) {
    %c0_i32 = arith.constant 0 : i32
    %c0_i32_0 = arith.constant 0 : i32
    %c0_i32_1 = arith.constant 0 : i32
    return %c0_i32, %c0_i32_0 : i32, i32
  }
  func.func @transform_3(%arg0: i32) -> (i32, i32) {
    %c0_i32 = arith.constant 0 : i32
    %c0_i32_0 = arith.constant 0 : i32
    %c0_i32_1 = arith.constant 0 : i32
    return %c0_i32, %c0_i32_0 : i32, i32
  }
  func.func @transform_4(%arg0: i32) -> (i32, i32, i32, i32) {
    %c0_i32 = arith.constant 0 : i32
    %c0_i32_0 = arith.constant 0 : i32
    %c0_i32_1 = arith.constant 0 : i32
    %c0_i32_2 = arith.constant 0 : i32
    return %arg0, %c0_i32, %c0_i32_0, %c0_i32_1 : i32, i32, i32, i32
  }
}

module attributes {stable_mosaic.version = 11 : i64} {
  func.func @_multi_lite_kernel(%arg0: i32, %arg1: memref<16x48xbf16, #tpu.memory_space<vmem>>, %arg2: memref<48x48xbf16, #tpu.memory_space<vmem>>, %arg3: memref<9x48xf32, #tpu.memory_space<vmem>>, %arg4: memref<1x48xf32, #tpu.memory_space<vmem>>, %arg5: memref<1x4x4x48xbf16, #tpu.memory_space<vmem>>, %arg6: memref<1x6x6x48xf32, #tpu.memory_space<vmem>>) attributes {dimension_semantics = [#tpu.dimension_semantics<parallel>], iteration_bounds = array<i64: 2>, scalar_prefetch = 0 : i64, scratch_operands = 1 : i64, tpu.core_type = #tpu.core_type<tc>, window_params = [{transform_indices = @transform_0, window_bounds = array<i64: 16, 48>}, {pipeline_mode = #tpu.pipeline_mode<synchronous>, transform_indices = @transform_1, window_bounds = array<i64: 48, 48>}, {pipeline_mode = #tpu.pipeline_mode<synchronous>, transform_indices = @transform_2, window_bounds = array<i64: 9, 48>}, {pipeline_mode = #tpu.pipeline_mode<synchronous>, transform_indices = @transform_3, window_bounds = array<i64: 1, 48>}, {transform_indices = @transform_4, window_bounds = array<i64: 1, 4, 4, 48>}]} {
    %c0 = arith.constant 0 : index
    %c0_0 = arith.constant 0 : index
    %0 = vector.load %arg1[%c0, %c0_0] : memref<16x48xbf16, #tpu.memory_space<vmem>>, vector<16x48xbf16>
    %c0_1 = arith.constant 0 : index
    %c0_2 = arith.constant 0 : index
    %1 = vector.load %arg2[%c0_1, %c0_2] : memref<48x48xbf16, #tpu.memory_space<vmem>>, vector<48x48xbf16>
    %cst = arith.constant dense<0.000000e+00> : vector<16x48xf32>
    %2 = tpu.matmul %0, %1, %cst {dimension_numbers = #tpu.dot_dimension_numbers<[1], [0], [0], [1], [0, 0, 1, 1], [], []>} : vector<16x48xbf16>, vector<48x48xbf16>, vector<16x48xf32> -> vector<16x48xf32>
    %cst_3 = arith.constant 0.000000e+00 : f32
    %3 = vector.broadcast %cst_3 : f32 to vector<1x6x6x48xf32>
    %c0_4 = arith.constant 0 : index
    %c0_5 = arith.constant 0 : index
    %c0_6 = arith.constant 0 : index
    %c0_7 = arith.constant 0 : index
    %4 = vector.load %arg6[%c0_4, %c0_5, %c0_6, %c0_7] : memref<1x6x6x48xf32, #tpu.memory_space<vmem>>, vector<1x6x6x48xf32>
    tpu.vector_store %arg6[%c0_4, %c0_5, %c0_6, %c0_7], %3 {strides = array<i32>} : memref<1x6x6x48xf32, #tpu.memory_space<vmem>>, vector<1x6x6x48xf32>,
    %5 = vector.extract_strided_slice %2 {offsets = [0, 0], sizes = [4, 48], strides = [1, 1]} : vector<16x48xf32> to vector<4x48xf32>
    %c0_8 = arith.constant 0 : index
    %c1 = arith.constant 1 : index
    %c1_9 = arith.constant 1 : index
    %c0_10 = arith.constant 0 : index
    %6 = vector.load %arg6[%c0_8, %c1, %c1_9, %c0_10] : memref<1x6x6x48xf32, #tpu.memory_space<vmem>>, vector<1x1x4x48xf32>
    %7 = vector.shape_cast %6 : vector<1x1x4x48xf32> to vector<4x48xf32>
    %8 = vector.shape_cast %5 : vector<4x48xf32> to vector<1x1x4x48xf32>
    tpu.vector_store %arg6[%c0_8, %c1, %c1_9, %c0_10], %8 {strides = array<i32>} : memref<1x6x6x48xf32, #tpu.memory_space<vmem>>, vector<1x1x4x48xf32>,
    %9 = vector.extract_strided_slice %2 {offsets = [4, 0], sizes = [4, 48], strides = [1, 1]} : vector<16x48xf32> to vector<4x48xf32>
    %c0_11 = arith.constant 0 : index
    %c2 = arith.constant 2 : index
    %c1_12 = arith.constant 1 : index
    %c0_13 = arith.constant 0 : index
    %10 = vector.load %arg6[%c0_11, %c2, %c1_12, %c0_13] : memref<1x6x6x48xf32, #tpu.memory_space<vmem>>, vector<1x1x4x48xf32>
    %11 = vector.shape_cast %10 : vector<1x1x4x48xf32> to vector<4x48xf32>
    %12 = vector.shape_cast %9 : vector<4x48xf32> to vector<1x1x4x48xf32>
    tpu.vector_store %arg6[%c0_11, %c2, %c1_12, %c0_13], %12 {strides = array<i32>} : memref<1x6x6x48xf32, #tpu.memory_space<vmem>>, vector<1x1x4x48xf32>,
    %13 = vector.extract_strided_slice %2 {offsets = [8, 0], sizes = [4, 48], strides = [1, 1]} : vector<16x48xf32> to vector<4x48xf32>
    %c0_14 = arith.constant 0 : index
    %c3 = arith.constant 3 : index
    %c1_15 = arith.constant 1 : index
    %c0_16 = arith.constant 0 : index
    %14 = vector.load %arg6[%c0_14, %c3, %c1_15, %c0_16] : memref<1x6x6x48xf32, #tpu.memory_space<vmem>>, vector<1x1x4x48xf32>
    %15 = vector.shape_cast %14 : vector<1x1x4x48xf32> to vector<4x48xf32>
    %16 = vector.shape_cast %13 : vector<4x48xf32> to vector<1x1x4x48xf32>
    tpu.vector_store %arg6[%c0_14, %c3, %c1_15, %c0_16], %16 {strides = array<i32>} : memref<1x6x6x48xf32, #tpu.memory_space<vmem>>, vector<1x1x4x48xf32>,
    %17 = vector.extract_strided_slice %2 {offsets = [12, 0], sizes = [4, 48], strides = [1, 1]} : vector<16x48xf32> to vector<4x48xf32>
    %c0_17 = arith.constant 0 : index
    %c4 = arith.constant 4 : index
    %c1_18 = arith.constant 1 : index
    %c0_19 = arith.constant 0 : index
    %18 = vector.load %arg6[%c0_17, %c4, %c1_18, %c0_19] : memref<1x6x6x48xf32, #tpu.memory_space<vmem>>, vector<1x1x4x48xf32>
    %19 = vector.shape_cast %18 : vector<1x1x4x48xf32> to vector<4x48xf32>
    %20 = vector.shape_cast %17 : vector<4x48xf32> to vector<1x1x4x48xf32>
    tpu.vector_store %arg6[%c0_17, %c4, %c1_18, %c0_19], %20 {strides = array<i32>} : memref<1x6x6x48xf32, #tpu.memory_space<vmem>>, vector<1x1x4x48xf32>,
    %c0_20 = arith.constant 0 : index
    %c0_21 = arith.constant 0 : index
    %21 = vector.load %arg3[%c0_20, %c0_21] : memref<9x48xf32, #tpu.memory_space<vmem>>, vector<9x48xf32>
    %cst_22 = arith.constant 0.000000e+00 : f32
    %22 = vector.broadcast %cst_22 : f32 to vector<1x4x4x48xf32>
    %c0_23 = arith.constant 0 : index
    %c0_24 = arith.constant 0 : index
    %c0_25 = arith.constant 0 : index
    %c0_26 = arith.constant 0 : index
    %23 = vector.load %arg6[%c0_23, %c0_24, %c0_25, %c0_26] : memref<1x6x6x48xf32, #tpu.memory_space<vmem>>, vector<1x4x4x48xf32>
    %24 = vector.extract_strided_slice %21 {offsets = [0, 0], sizes = [1, 48], strides = [1, 1]} : vector<9x48xf32> to vector<1x48xf32>
    %25 = vector.shape_cast %24 : vector<1x48xf32> to vector<1x1x1x48xf32>
    %26 = vector.broadcast %25 : vector<1x1x1x48xf32> to vector<1x4x4x48xf32>
    %27 = arith.mulf %23, %26 : vector<1x4x4x48xf32>
    %28 = arith.addf %22, %27 : vector<1x4x4x48xf32>
    %c0_27 = arith.constant 0 : index
    %c0_28 = arith.constant 0 : index
    %c1_29 = arith.constant 1 : index
    %c0_30 = arith.constant 0 : index
    %29 = vector.load %arg6[%c0_27, %c0_28, %c1_29, %c0_30] : memref<1x6x6x48xf32, #tpu.memory_space<vmem>>, vector<1x4x4x48xf32>
    %30 = vector.extract_strided_slice %21 {offsets = [1, 0], sizes = [1, 48], strides = [1, 1]} : vector<9x48xf32> to vector<1x48xf32>
    %31 = vector.shape_cast %30 : vector<1x48xf32> to vector<1x1x1x48xf32>
    %32 = vector.broadcast %31 : vector<1x1x1x48xf32> to vector<1x4x4x48xf32>
    %33 = arith.mulf %29, %32 : vector<1x4x4x48xf32>
    %34 = arith.addf %28, %33 : vector<1x4x4x48xf32>
    %c0_31 = arith.constant 0 : index
    %c0_32 = arith.constant 0 : index
    %c2_33 = arith.constant 2 : index
    %c0_34 = arith.constant 0 : index
    %35 = vector.load %arg6[%c0_31, %c0_32, %c2_33, %c0_34] : memref<1x6x6x48xf32, #tpu.memory_space<vmem>>, vector<1x4x4x48xf32>
    %36 = vector.extract_strided_slice %21 {offsets = [2, 0], sizes = [1, 48], strides = [1, 1]} : vector<9x48xf32> to vector<1x48xf32>
    %37 = vector.shape_cast %36 : vector<1x48xf32> to vector<1x1x1x48xf32>
    %38 = vector.broadcast %37 : vector<1x1x1x48xf32> to vector<1x4x4x48xf32>
    %39 = arith.mulf %35, %38 : vector<1x4x4x48xf32>
    %40 = arith.addf %34, %39 : vector<1x4x4x48xf32>
    %c0_35 = arith.constant 0 : index
    %c1_36 = arith.constant 1 : index
    %c0_37 = arith.constant 0 : index
    %c0_38 = arith.constant 0 : index
    %41 = vector.load %arg6[%c0_35, %c1_36, %c0_37, %c0_38] : memref<1x6x6x48xf32, #tpu.memory_space<vmem>>, vector<1x4x4x48xf32>
    %42 = vector.extract_strided_slice %21 {offsets = [3, 0], sizes = [1, 48], strides = [1, 1]} : vector<9x48xf32> to vector<1x48xf32>
    %43 = vector.shape_cast %42 : vector<1x48xf32> to vector<1x1x1x48xf32>
    %44 = vector.broadcast %43 : vector<1x1x1x48xf32> to vector<1x4x4x48xf32>
    %45 = arith.mulf %41, %44 : vector<1x4x4x48xf32>
    %46 = arith.addf %40, %45 : vector<1x4x4x48xf32>
    %c0_39 = arith.constant 0 : index
    %c1_40 = arith.constant 1 : index
    %c1_41 = arith.constant 1 : index
    %c0_42 = arith.constant 0 : index
    %47 = vector.load %arg6[%c0_39, %c1_40, %c1_41, %c0_42] : memref<1x6x6x48xf32, #tpu.memory_space<vmem>>, vector<1x4x4x48xf32>
    %48 = vector.extract_strided_slice %21 {offsets = [4, 0], sizes = [1, 48], strides = [1, 1]} : vector<9x48xf32> to vector<1x48xf32>
    %49 = vector.shape_cast %48 : vector<1x48xf32> to vector<1x1x1x48xf32>
    %50 = vector.broadcast %49 : vector<1x1x1x48xf32> to vector<1x4x4x48xf32>
    %51 = arith.mulf %47, %50 : vector<1x4x4x48xf32>
    %52 = arith.addf %46, %51 : vector<1x4x4x48xf32>
    %c0_43 = arith.constant 0 : index
    %c1_44 = arith.constant 1 : index
    %c2_45 = arith.constant 2 : index
    %c0_46 = arith.constant 0 : index
    %53 = vector.load %arg6[%c0_43, %c1_44, %c2_45, %c0_46] : memref<1x6x6x48xf32, #tpu.memory_space<vmem>>, vector<1x4x4x48xf32>
    %54 = vector.extract_strided_slice %21 {offsets = [5, 0], sizes = [1, 48], strides = [1, 1]} : vector<9x48xf32> to vector<1x48xf32>
    %55 = vector.shape_cast %54 : vector<1x48xf32> to vector<1x1x1x48xf32>
    %56 = vector.broadcast %55 : vector<1x1x1x48xf32> to vector<1x4x4x48xf32>
    %57 = arith.mulf %53, %56 : vector<1x4x4x48xf32>
    %58 = arith.addf %52, %57 : vector<1x4x4x48xf32>
    %c0_47 = arith.constant 0 : index
    %c2_48 = arith.constant 2 : index
    %c0_49 = arith.constant 0 : index
    %c0_50 = arith.constant 0 : index
    %59 = vector.load %arg6[%c0_47, %c2_48, %c0_49, %c0_50] : memref<1x6x6x48xf32, #tpu.memory_space<vmem>>, vector<1x4x4x48xf32>
    %60 = vector.extract_strided_slice %21 {offsets = [6, 0], sizes = [1, 48], strides = [1, 1]} : vector<9x48xf32> to vector<1x48xf32>
    %61 = vector.shape_cast %60 : vector<1x48xf32> to vector<1x1x1x48xf32>
    %62 = vector.broadcast %61 : vector<1x1x1x48xf32> to vector<1x4x4x48xf32>
    %63 = arith.mulf %59, %62 : vector<1x4x4x48xf32>
    %64 = arith.addf %58, %63 : vector<1x4x4x48xf32>
    %c0_51 = arith.constant 0 : index
    %c2_52 = arith.constant 2 : index
    %c1_53 = arith.constant 1 : index
    %c0_54 = arith.constant 0 : index
    %65 = vector.load %arg6[%c0_51, %c2_52, %c1_53, %c0_54] : memref<1x6x6x48xf32, #tpu.memory_space<vmem>>, vector<1x4x4x48xf32>
    %66 = vector.extract_strided_slice %21 {offsets = [7, 0], sizes = [1, 48], strides = [1, 1]} : vector<9x48xf32> to vector<1x48xf32>
    %67 = vector.shape_cast %66 : vector<1x48xf32> to vector<1x1x1x48xf32>
    %68 = vector.broadcast %67 : vector<1x1x1x48xf32> to vector<1x4x4x48xf32>
    %69 = arith.mulf %65, %68 : vector<1x4x4x48xf32>
    %70 = arith.addf %64, %69 : vector<1x4x4x48xf32>
    %c0_55 = arith.constant 0 : index
    %c2_56 = arith.constant 2 : index
    %c2_57 = arith.constant 2 : index
    %c0_58 = arith.constant 0 : index
    %71 = vector.load %arg6[%c0_55, %c2_56, %c2_57, %c0_58] : memref<1x6x6x48xf32, #tpu.memory_space<vmem>>, vector<1x4x4x48xf32>
    %72 = vector.extract_strided_slice %21 {offsets = [8, 0], sizes = [1, 48], strides = [1, 1]} : vector<9x48xf32> to vector<1x48xf32>
    %73 = vector.shape_cast %72 : vector<1x48xf32> to vector<1x1x1x48xf32>
    %74 = vector.broadcast %73 : vector<1x1x1x48xf32> to vector<1x4x4x48xf32>
    %75 = arith.mulf %71, %74 : vector<1x4x4x48xf32>
    %76 = arith.addf %70, %75 : vector<1x4x4x48xf32>
    %c0_59 = arith.constant 0 : index
    %c0_60 = arith.constant 0 : index
    %77 = vector.load %arg4[%c0_59, %c0_60] : memref<1x48xf32, #tpu.memory_space<vmem>>, vector<1x48xf32>
    %78 = vector.shape_cast %77 : vector<1x48xf32> to vector<1x1x1x48xf32>
    %79 = vector.broadcast %78 : vector<1x1x1x48xf32> to vector<1x4x4x48xf32>
    %80 = arith.addf %76, %79 : vector<1x4x4x48xf32>
    %cst_61 = arith.constant 0.000000e+00 : f32
    %81 = vector.broadcast %cst_61 : f32 to vector<1x4x4x48xf32>
    %82 = arith.maximumf %80, %81 : vector<1x4x4x48xf32>
    %83 = arith.truncf %82 : vector<1x4x4x48xf32> to vector<1x4x4x48xbf16>
    %c0_62 = arith.constant 0 : index
    %c0_63 = arith.constant 0 : index
    %c0_64 = arith.constant 0 : index
    %c0_65 = arith.constant 0 : index
    %84 = vector.load %arg5[%c0_62, %c0_63, %c0_64, %c0_65] : memref<1x4x4x48xbf16, #tpu.memory_space<vmem>>, vector<1x4x4x48xbf16>
    tpu.vector_store %arg5[%c0_62, %c0_63, %c0_64, %c0_65], %83 {strides = array<i32>} : memref<1x4x4x48xbf16, #tpu.memory_space<vmem>>, vector<1x4x4x48xbf16>,
    return
  }
  func.func @transform_0(%arg0: i32) -> (i32, i32) {
    %c0_i32 = arith.constant 0 : i32
    %c0_i32_0 = arith.constant 0 : i32
    return %arg0, %c0_i32 : i32, i32
  }
  func.func @transform_1(%arg0: i32) -> (i32, i32) {
    %c0_i32 = arith.constant 0 : i32
    %c0_i32_0 = arith.constant 0 : i32
    %c0_i32_1 = arith.constant 0 : i32
    return %c0_i32, %c0_i32_0 : i32, i32
  }
  func.func @transform_2(%arg0: i32) -> (i32, i32) {
    %c0_i32 = arith.constant 0 : i32
    %c0_i32_0 = arith.constant 0 : i32
    %c0_i32_1 = arith.constant 0 : i32
    return %c0_i32, %c0_i32_0 : i32, i32
  }
  func.func @transform_3(%arg0: i32) -> (i32, i32) {
    %c0_i32 = arith.constant 0 : i32
    %c0_i32_0 = arith.constant 0 : i32
    %c0_i32_1 = arith.constant 0 : i32
    return %c0_i32, %c0_i32_0 : i32, i32
  }
  func.func @transform_4(%arg0: i32) -> (i32, i32, i32, i32) {
    %c0_i32 = arith.constant 0 : i32
    %c0_i32_0 = arith.constant 0 : i32
    %c0_i32_1 = arith.constant 0 : i32
    %c0_i32_2 = arith.constant 0 : i32
    return %arg0, %c0_i32, %c0_i32_0, %c0_i32_1 : i32, i32, i32, i32
  }
}

module attributes {stable_mosaic.version = 11 : i64} {
  func.func @_multi_lite_kernel(%arg0: i32, %arg1: memref<16x32xbf16, #tpu.memory_space<vmem>>, %arg2: memref<32x32xbf16, #tpu.memory_space<vmem>>, %arg3: memref<9x32xf32, #tpu.memory_space<vmem>>, %arg4: memref<1x32xf32, #tpu.memory_space<vmem>>, %arg5: memref<1x4x4x32xbf16, #tpu.memory_space<vmem>>, %arg6: memref<1x6x6x32xf32, #tpu.memory_space<vmem>>) attributes {dimension_semantics = [#tpu.dimension_semantics<parallel>], iteration_bounds = array<i64: 2>, scalar_prefetch = 0 : i64, scratch_operands = 1 : i64, tpu.core_type = #tpu.core_type<tc>, window_params = [{transform_indices = @transform_0, window_bounds = array<i64: 16, 32>}, {pipeline_mode = #tpu.pipeline_mode<synchronous>, transform_indices = @transform_1, window_bounds = array<i64: 32, 32>}, {pipeline_mode = #tpu.pipeline_mode<synchronous>, transform_indices = @transform_2, window_bounds = array<i64: 9, 32>}, {pipeline_mode = #tpu.pipeline_mode<synchronous>, transform_indices = @transform_3, window_bounds = array<i64: 1, 32>}, {transform_indices = @transform_4, window_bounds = array<i64: 1, 4, 4, 32>}]} {
    %c0 = arith.constant 0 : index
    %c0_0 = arith.constant 0 : index
    %0 = vector.load %arg1[%c0, %c0_0] : memref<16x32xbf16, #tpu.memory_space<vmem>>, vector<16x32xbf16>
    %c0_1 = arith.constant 0 : index
    %c0_2 = arith.constant 0 : index
    %1 = vector.load %arg2[%c0_1, %c0_2] : memref<32x32xbf16, #tpu.memory_space<vmem>>, vector<32x32xbf16>
    %cst = arith.constant dense<0.000000e+00> : vector<16x32xf32>
    %2 = tpu.matmul %0, %1, %cst {dimension_numbers = #tpu.dot_dimension_numbers<[1], [0], [0], [1], [0, 0, 1, 1], [], []>} : vector<16x32xbf16>, vector<32x32xbf16>, vector<16x32xf32> -> vector<16x32xf32>
    %cst_3 = arith.constant 0.000000e+00 : f32
    %3 = vector.broadcast %cst_3 : f32 to vector<1x6x6x32xf32>
    %c0_4 = arith.constant 0 : index
    %c0_5 = arith.constant 0 : index
    %c0_6 = arith.constant 0 : index
    %c0_7 = arith.constant 0 : index
    %4 = vector.load %arg6[%c0_4, %c0_5, %c0_6, %c0_7] : memref<1x6x6x32xf32, #tpu.memory_space<vmem>>, vector<1x6x6x32xf32>
    tpu.vector_store %arg6[%c0_4, %c0_5, %c0_6, %c0_7], %3 {strides = array<i32>} : memref<1x6x6x32xf32, #tpu.memory_space<vmem>>, vector<1x6x6x32xf32>,
    %5 = vector.extract_strided_slice %2 {offsets = [0, 0], sizes = [4, 32], strides = [1, 1]} : vector<16x32xf32> to vector<4x32xf32>
    %c0_8 = arith.constant 0 : index
    %c1 = arith.constant 1 : index
    %c1_9 = arith.constant 1 : index
    %c0_10 = arith.constant 0 : index
    %6 = vector.load %arg6[%c0_8, %c1, %c1_9, %c0_10] : memref<1x6x6x32xf32, #tpu.memory_space<vmem>>, vector<1x1x4x32xf32>
    %7 = vector.shape_cast %6 : vector<1x1x4x32xf32> to vector<4x32xf32>
    %8 = vector.shape_cast %5 : vector<4x32xf32> to vector<1x1x4x32xf32>
    tpu.vector_store %arg6[%c0_8, %c1, %c1_9, %c0_10], %8 {strides = array<i32>} : memref<1x6x6x32xf32, #tpu.memory_space<vmem>>, vector<1x1x4x32xf32>,
    %9 = vector.extract_strided_slice %2 {offsets = [4, 0], sizes = [4, 32], strides = [1, 1]} : vector<16x32xf32> to vector<4x32xf32>
    %c0_11 = arith.constant 0 : index
    %c2 = arith.constant 2 : index
    %c1_12 = arith.constant 1 : index
    %c0_13 = arith.constant 0 : index
    %10 = vector.load %arg6[%c0_11, %c2, %c1_12, %c0_13] : memref<1x6x6x32xf32, #tpu.memory_space<vmem>>, vector<1x1x4x32xf32>
    %11 = vector.shape_cast %10 : vector<1x1x4x32xf32> to vector<4x32xf32>
    %12 = vector.shape_cast %9 : vector<4x32xf32> to vector<1x1x4x32xf32>
    tpu.vector_store %arg6[%c0_11, %c2, %c1_12, %c0_13], %12 {strides = array<i32>} : memref<1x6x6x32xf32, #tpu.memory_space<vmem>>, vector<1x1x4x32xf32>,
    %13 = vector.extract_strided_slice %2 {offsets = [8, 0], sizes = [4, 32], strides = [1, 1]} : vector<16x32xf32> to vector<4x32xf32>
    %c0_14 = arith.constant 0 : index
    %c3 = arith.constant 3 : index
    %c1_15 = arith.constant 1 : index
    %c0_16 = arith.constant 0 : index
    %14 = vector.load %arg6[%c0_14, %c3, %c1_15, %c0_16] : memref<1x6x6x32xf32, #tpu.memory_space<vmem>>, vector<1x1x4x32xf32>
    %15 = vector.shape_cast %14 : vector<1x1x4x32xf32> to vector<4x32xf32>
    %16 = vector.shape_cast %13 : vector<4x32xf32> to vector<1x1x4x32xf32>
    tpu.vector_store %arg6[%c0_14, %c3, %c1_15, %c0_16], %16 {strides = array<i32>} : memref<1x6x6x32xf32, #tpu.memory_space<vmem>>, vector<1x1x4x32xf32>,
    %17 = vector.extract_strided_slice %2 {offsets = [12, 0], sizes = [4, 32], strides = [1, 1]} : vector<16x32xf32> to vector<4x32xf32>
    %c0_17 = arith.constant 0 : index
    %c4 = arith.constant 4 : index
    %c1_18 = arith.constant 1 : index
    %c0_19 = arith.constant 0 : index
    %18 = vector.load %arg6[%c0_17, %c4, %c1_18, %c0_19] : memref<1x6x6x32xf32, #tpu.memory_space<vmem>>, vector<1x1x4x32xf32>
    %19 = vector.shape_cast %18 : vector<1x1x4x32xf32> to vector<4x32xf32>
    %20 = vector.shape_cast %17 : vector<4x32xf32> to vector<1x1x4x32xf32>
    tpu.vector_store %arg6[%c0_17, %c4, %c1_18, %c0_19], %20 {strides = array<i32>} : memref<1x6x6x32xf32, #tpu.memory_space<vmem>>, vector<1x1x4x32xf32>,
    %c0_20 = arith.constant 0 : index
    %c0_21 = arith.constant 0 : index
    %21 = vector.load %arg3[%c0_20, %c0_21] : memref<9x32xf32, #tpu.memory_space<vmem>>, vector<9x32xf32>
    %cst_22 = arith.constant 0.000000e+00 : f32
    %22 = vector.broadcast %cst_22 : f32 to vector<1x4x4x32xf32>
    %c0_23 = arith.constant 0 : index
    %c0_24 = arith.constant 0 : index
    %c0_25 = arith.constant 0 : index
    %c0_26 = arith.constant 0 : index
    %23 = vector.load %arg6[%c0_23, %c0_24, %c0_25, %c0_26] : memref<1x6x6x32xf32, #tpu.memory_space<vmem>>, vector<1x4x4x32xf32>
    %24 = vector.extract_strided_slice %21 {offsets = [0, 0], sizes = [1, 32], strides = [1, 1]} : vector<9x32xf32> to vector<1x32xf32>
    %25 = vector.shape_cast %24 : vector<1x32xf32> to vector<1x1x1x32xf32>
    %26 = vector.broadcast %25 : vector<1x1x1x32xf32> to vector<1x4x4x32xf32>
    %27 = arith.mulf %23, %26 : vector<1x4x4x32xf32>
    %28 = arith.addf %22, %27 : vector<1x4x4x32xf32>
    %c0_27 = arith.constant 0 : index
    %c0_28 = arith.constant 0 : index
    %c1_29 = arith.constant 1 : index
    %c0_30 = arith.constant 0 : index
    %29 = vector.load %arg6[%c0_27, %c0_28, %c1_29, %c0_30] : memref<1x6x6x32xf32, #tpu.memory_space<vmem>>, vector<1x4x4x32xf32>
    %30 = vector.extract_strided_slice %21 {offsets = [1, 0], sizes = [1, 32], strides = [1, 1]} : vector<9x32xf32> to vector<1x32xf32>
    %31 = vector.shape_cast %30 : vector<1x32xf32> to vector<1x1x1x32xf32>
    %32 = vector.broadcast %31 : vector<1x1x1x32xf32> to vector<1x4x4x32xf32>
    %33 = arith.mulf %29, %32 : vector<1x4x4x32xf32>
    %34 = arith.addf %28, %33 : vector<1x4x4x32xf32>
    %c0_31 = arith.constant 0 : index
    %c0_32 = arith.constant 0 : index
    %c2_33 = arith.constant 2 : index
    %c0_34 = arith.constant 0 : index
    %35 = vector.load %arg6[%c0_31, %c0_32, %c2_33, %c0_34] : memref<1x6x6x32xf32, #tpu.memory_space<vmem>>, vector<1x4x4x32xf32>
    %36 = vector.extract_strided_slice %21 {offsets = [2, 0], sizes = [1, 32], strides = [1, 1]} : vector<9x32xf32> to vector<1x32xf32>
    %37 = vector.shape_cast %36 : vector<1x32xf32> to vector<1x1x1x32xf32>
    %38 = vector.broadcast %37 : vector<1x1x1x32xf32> to vector<1x4x4x32xf32>
    %39 = arith.mulf %35, %38 : vector<1x4x4x32xf32>
    %40 = arith.addf %34, %39 : vector<1x4x4x32xf32>
    %c0_35 = arith.constant 0 : index
    %c1_36 = arith.constant 1 : index
    %c0_37 = arith.constant 0 : index
    %c0_38 = arith.constant 0 : index
    %41 = vector.load %arg6[%c0_35, %c1_36, %c0_37, %c0_38] : memref<1x6x6x32xf32, #tpu.memory_space<vmem>>, vector<1x4x4x32xf32>
    %42 = vector.extract_strided_slice %21 {offsets = [3, 0], sizes = [1, 32], strides = [1, 1]} : vector<9x32xf32> to vector<1x32xf32>
    %43 = vector.shape_cast %42 : vector<1x32xf32> to vector<1x1x1x32xf32>
    %44 = vector.broadcast %43 : vector<1x1x1x32xf32> to vector<1x4x4x32xf32>
    %45 = arith.mulf %41, %44 : vector<1x4x4x32xf32>
    %46 = arith.addf %40, %45 : vector<1x4x4x32xf32>
    %c0_39 = arith.constant 0 : index
    %c1_40 = arith.constant 1 : index
    %c1_41 = arith.constant 1 : index
    %c0_42 = arith.constant 0 : index
    %47 = vector.load %arg6[%c0_39, %c1_40, %c1_41, %c0_42] : memref<1x6x6x32xf32, #tpu.memory_space<vmem>>, vector<1x4x4x32xf32>
    %48 = vector.extract_strided_slice %21 {offsets = [4, 0], sizes = [1, 32], strides = [1, 1]} : vector<9x32xf32> to vector<1x32xf32>
    %49 = vector.shape_cast %48 : vector<1x32xf32> to vector<1x1x1x32xf32>
    %50 = vector.broadcast %49 : vector<1x1x1x32xf32> to vector<1x4x4x32xf32>
    %51 = arith.mulf %47, %50 : vector<1x4x4x32xf32>
    %52 = arith.addf %46, %51 : vector<1x4x4x32xf32>
    %c0_43 = arith.constant 0 : index
    %c1_44 = arith.constant 1 : index
    %c2_45 = arith.constant 2 : index
    %c0_46 = arith.constant 0 : index
    %53 = vector.load %arg6[%c0_43, %c1_44, %c2_45, %c0_46] : memref<1x6x6x32xf32, #tpu.memory_space<vmem>>, vector<1x4x4x32xf32>
    %54 = vector.extract_strided_slice %21 {offsets = [5, 0], sizes = [1, 32], strides = [1, 1]} : vector<9x32xf32> to vector<1x32xf32>
    %55 = vector.shape_cast %54 : vector<1x32xf32> to vector<1x1x1x32xf32>
    %56 = vector.broadcast %55 : vector<1x1x1x32xf32> to vector<1x4x4x32xf32>
    %57 = arith.mulf %53, %56 : vector<1x4x4x32xf32>
    %58 = arith.addf %52, %57 : vector<1x4x4x32xf32>
    %c0_47 = arith.constant 0 : index
    %c2_48 = arith.constant 2 : index
    %c0_49 = arith.constant 0 : index
    %c0_50 = arith.constant 0 : index
    %59 = vector.load %arg6[%c0_47, %c2_48, %c0_49, %c0_50] : memref<1x6x6x32xf32, #tpu.memory_space<vmem>>, vector<1x4x4x32xf32>
    %60 = vector.extract_strided_slice %21 {offsets = [6, 0], sizes = [1, 32], strides = [1, 1]} : vector<9x32xf32> to vector<1x32xf32>
    %61 = vector.shape_cast %60 : vector<1x32xf32> to vector<1x1x1x32xf32>
    %62 = vector.broadcast %61 : vector<1x1x1x32xf32> to vector<1x4x4x32xf32>
    %63 = arith.mulf %59, %62 : vector<1x4x4x32xf32>
    %64 = arith.addf %58, %63 : vector<1x4x4x32xf32>
    %c0_51 = arith.constant 0 : index
    %c2_52 = arith.constant 2 : index
    %c1_53 = arith.constant 1 : index
    %c0_54 = arith.constant 0 : index
    %65 = vector.load %arg6[%c0_51, %c2_52, %c1_53, %c0_54] : memref<1x6x6x32xf32, #tpu.memory_space<vmem>>, vector<1x4x4x32xf32>
    %66 = vector.extract_strided_slice %21 {offsets = [7, 0], sizes = [1, 32], strides = [1, 1]} : vector<9x32xf32> to vector<1x32xf32>
    %67 = vector.shape_cast %66 : vector<1x32xf32> to vector<1x1x1x32xf32>
    %68 = vector.broadcast %67 : vector<1x1x1x32xf32> to vector<1x4x4x32xf32>
    %69 = arith.mulf %65, %68 : vector<1x4x4x32xf32>
    %70 = arith.addf %64, %69 : vector<1x4x4x32xf32>
    %c0_55 = arith.constant 0 : index
    %c2_56 = arith.constant 2 : index
    %c2_57 = arith.constant 2 : index
    %c0_58 = arith.constant 0 : index
    %71 = vector.load %arg6[%c0_55, %c2_56, %c2_57, %c0_58] : memref<1x6x6x32xf32, #tpu.memory_space<vmem>>, vector<1x4x4x32xf32>
    %72 = vector.extract_strided_slice %21 {offsets = [8, 0], sizes = [1, 32], strides = [1, 1]} : vector<9x32xf32> to vector<1x32xf32>
    %73 = vector.shape_cast %72 : vector<1x32xf32> to vector<1x1x1x32xf32>
    %74 = vector.broadcast %73 : vector<1x1x1x32xf32> to vector<1x4x4x32xf32>
    %75 = arith.mulf %71, %74 : vector<1x4x4x32xf32>
    %76 = arith.addf %70, %75 : vector<1x4x4x32xf32>
    %c0_59 = arith.constant 0 : index
    %c0_60 = arith.constant 0 : index
    %77 = vector.load %arg4[%c0_59, %c0_60] : memref<1x32xf32, #tpu.memory_space<vmem>>, vector<1x32xf32>
    %78 = vector.shape_cast %77 : vector<1x32xf32> to vector<1x1x1x32xf32>
    %79 = vector.broadcast %78 : vector<1x1x1x32xf32> to vector<1x4x4x32xf32>
    %80 = arith.addf %76, %79 : vector<1x4x4x32xf32>
    %cst_61 = arith.constant 0.000000e+00 : f32
    %81 = vector.broadcast %cst_61 : f32 to vector<1x4x4x32xf32>
    %82 = arith.maximumf %80, %81 : vector<1x4x4x32xf32>
    %83 = arith.truncf %82 : vector<1x4x4x32xf32> to vector<1x4x4x32xbf16>
    %c0_62 = arith.constant 0 : index
    %c0_63 = arith.constant 0 : index
    %c0_64 = arith.constant 0 : index
    %c0_65 = arith.constant 0 : index
    %84 = vector.load %arg5[%c0_62, %c0_63, %c0_64, %c0_65] : memref<1x4x4x32xbf16, #tpu.memory_space<vmem>>, vector<1x4x4x32xbf16>
    tpu.vector_store %arg5[%c0_62, %c0_63, %c0_64, %c0_65], %83 {strides = array<i32>} : memref<1x4x4x32xbf16, #tpu.memory_space<vmem>>, vector<1x4x4x32xbf16>,
    return
  }
  func.func @transform_0(%arg0: i32) -> (i32, i32) {
    %c0_i32 = arith.constant 0 : i32
    %c0_i32_0 = arith.constant 0 : i32
    return %arg0, %c0_i32 : i32, i32
  }
  func.func @transform_1(%arg0: i32) -> (i32, i32) {
    %c0_i32 = arith.constant 0 : i32
    %c0_i32_0 = arith.constant 0 : i32
    %c0_i32_1 = arith.constant 0 : i32
    return %c0_i32, %c0_i32_0 : i32, i32
  }
  func.func @transform_2(%arg0: i32) -> (i32, i32) {
    %c0_i32 = arith.constant 0 : i32
    %c0_i32_0 = arith.constant 0 : i32
    %c0_i32_1 = arith.constant 0 : i32
    return %c0_i32, %c0_i32_0 : i32, i32
  }
  func.func @transform_3(%arg0: i32) -> (i32, i32) {
    %c0_i32 = arith.constant 0 : i32
    %c0_i32_0 = arith.constant 0 : i32
    %c0_i32_1 = arith.constant 0 : i32
    return %c0_i32, %c0_i32_0 : i32, i32
  }
  func.func @transform_4(%arg0: i32) -> (i32, i32, i32, i32) {
    %c0_i32 = arith.constant 0 : i32
    %c0_i32_0 = arith.constant 0 : i32
    %c0_i32_1 = arith.constant 0 : i32
    %c0_i32_2 = arith.constant 0 : i32
    return %arg0, %c0_i32, %c0_i32_0, %c0_i32_1 : i32, i32, i32, i32
  }
}

module attributes {stable_mosaic.version = 11 : i64} {
  func.func @_multi_lite_kernel(%arg0: i32, %arg1: memref<16x16xbf16, #tpu.memory_space<vmem>>, %arg2: memref<16x16xbf16, #tpu.memory_space<vmem>>, %arg3: memref<9x16xf32, #tpu.memory_space<vmem>>, %arg4: memref<1x16xf32, #tpu.memory_space<vmem>>, %arg5: memref<1x4x4x16xbf16, #tpu.memory_space<vmem>>, %arg6: memref<1x6x6x16xf32, #tpu.memory_space<vmem>>) attributes {dimension_semantics = [#tpu.dimension_semantics<parallel>], iteration_bounds = array<i64: 2>, scalar_prefetch = 0 : i64, scratch_operands = 1 : i64, tpu.core_type = #tpu.core_type<tc>, window_params = [{transform_indices = @transform_0, window_bounds = array<i64: 16, 16>}, {pipeline_mode = #tpu.pipeline_mode<synchronous>, transform_indices = @transform_1, window_bounds = array<i64: 16, 16>}, {pipeline_mode = #tpu.pipeline_mode<synchronous>, transform_indices = @transform_2, window_bounds = array<i64: 9, 16>}, {pipeline_mode = #tpu.pipeline_mode<synchronous>, transform_indices = @transform_3, window_bounds = array<i64: 1, 16>}, {transform_indices = @transform_4, window_bounds = array<i64: 1, 4, 4, 16>}]} {
    %c0 = arith.constant 0 : index
    %c0_0 = arith.constant 0 : index
    %0 = vector.load %arg1[%c0, %c0_0] : memref<16x16xbf16, #tpu.memory_space<vmem>>, vector<16x16xbf16>
    %c0_1 = arith.constant 0 : index
    %c0_2 = arith.constant 0 : index
    %1 = vector.load %arg2[%c0_1, %c0_2] : memref<16x16xbf16, #tpu.memory_space<vmem>>, vector<16x16xbf16>
    %cst = arith.constant dense<0.000000e+00> : vector<16x16xf32>
    %2 = tpu.matmul %0, %1, %cst {dimension_numbers = #tpu.dot_dimension_numbers<[1], [0], [0], [1], [0, 0, 1, 1], [], []>} : vector<16x16xbf16>, vector<16x16xbf16>, vector<16x16xf32> -> vector<16x16xf32>
    %cst_3 = arith.constant 0.000000e+00 : f32
    %3 = vector.broadcast %cst_3 : f32 to vector<1x6x6x16xf32>
    %c0_4 = arith.constant 0 : index
    %c0_5 = arith.constant 0 : index
    %c0_6 = arith.constant 0 : index
    %c0_7 = arith.constant 0 : index
    %4 = vector.load %arg6[%c0_4, %c0_5, %c0_6, %c0_7] : memref<1x6x6x16xf32, #tpu.memory_space<vmem>>, vector<1x6x6x16xf32>
    tpu.vector_store %arg6[%c0_4, %c0_5, %c0_6, %c0_7], %3 {strides = array<i32>} : memref<1x6x6x16xf32, #tpu.memory_space<vmem>>, vector<1x6x6x16xf32>,
    %5 = vector.extract_strided_slice %2 {offsets = [0, 0], sizes = [4, 16], strides = [1, 1]} : vector<16x16xf32> to vector<4x16xf32>
    %c0_8 = arith.constant 0 : index
    %c1 = arith.constant 1 : index
    %c1_9 = arith.constant 1 : index
    %c0_10 = arith.constant 0 : index
    %6 = vector.load %arg6[%c0_8, %c1, %c1_9, %c0_10] : memref<1x6x6x16xf32, #tpu.memory_space<vmem>>, vector<1x1x4x16xf32>
    %7 = vector.shape_cast %6 : vector<1x1x4x16xf32> to vector<4x16xf32>
    %8 = vector.shape_cast %5 : vector<4x16xf32> to vector<1x1x4x16xf32>
    tpu.vector_store %arg6[%c0_8, %c1, %c1_9, %c0_10], %8 {strides = array<i32>} : memref<1x6x6x16xf32, #tpu.memory_space<vmem>>, vector<1x1x4x16xf32>,
    %9 = vector.extract_strided_slice %2 {offsets = [4, 0], sizes = [4, 16], strides = [1, 1]} : vector<16x16xf32> to vector<4x16xf32>
    %c0_11 = arith.constant 0 : index
    %c2 = arith.constant 2 : index
    %c1_12 = arith.constant 1 : index
    %c0_13 = arith.constant 0 : index
    %10 = vector.load %arg6[%c0_11, %c2, %c1_12, %c0_13] : memref<1x6x6x16xf32, #tpu.memory_space<vmem>>, vector<1x1x4x16xf32>
    %11 = vector.shape_cast %10 : vector<1x1x4x16xf32> to vector<4x16xf32>
    %12 = vector.shape_cast %9 : vector<4x16xf32> to vector<1x1x4x16xf32>
    tpu.vector_store %arg6[%c0_11, %c2, %c1_12, %c0_13], %12 {strides = array<i32>} : memref<1x6x6x16xf32, #tpu.memory_space<vmem>>, vector<1x1x4x16xf32>,
    %13 = vector.extract_strided_slice %2 {offsets = [8, 0], sizes = [4, 16], strides = [1, 1]} : vector<16x16xf32> to vector<4x16xf32>
    %c0_14 = arith.constant 0 : index
    %c3 = arith.constant 3 : index
    %c1_15 = arith.constant 1 : index
    %c0_16 = arith.constant 0 : index
    %14 = vector.load %arg6[%c0_14, %c3, %c1_15, %c0_16] : memref<1x6x6x16xf32, #tpu.memory_space<vmem>>, vector<1x1x4x16xf32>
    %15 = vector.shape_cast %14 : vector<1x1x4x16xf32> to vector<4x16xf32>
    %16 = vector.shape_cast %13 : vector<4x16xf32> to vector<1x1x4x16xf32>
    tpu.vector_store %arg6[%c0_14, %c3, %c1_15, %c0_16], %16 {strides = array<i32>} : memref<1x6x6x16xf32, #tpu.memory_space<vmem>>, vector<1x1x4x16xf32>,
    %17 = vector.extract_strided_slice %2 {offsets = [12, 0], sizes = [4, 16], strides = [1, 1]} : vector<16x16xf32> to vector<4x16xf32>
    %c0_17 = arith.constant 0 : index
    %c4 = arith.constant 4 : index
    %c1_18 = arith.constant 1 : index
    %c0_19 = arith.constant 0 : index
    %18 = vector.load %arg6[%c0_17, %c4, %c1_18, %c0_19] : memref<1x6x6x16xf32, #tpu.memory_space<vmem>>, vector<1x1x4x16xf32>
    %19 = vector.shape_cast %18 : vector<1x1x4x16xf32> to vector<4x16xf32>
    %20 = vector.shape_cast %17 : vector<4x16xf32> to vector<1x1x4x16xf32>
    tpu.vector_store %arg6[%c0_17, %c4, %c1_18, %c0_19], %20 {strides = array<i32>} : memref<1x6x6x16xf32, #tpu.memory_space<vmem>>, vector<1x1x4x16xf32>,
    %c0_20 = arith.constant 0 : index
    %c0_21 = arith.constant 0 : index
    %21 = vector.load %arg3[%c0_20, %c0_21] : memref<9x16xf32, #tpu.memory_space<vmem>>, vector<9x16xf32>
    %cst_22 = arith.constant 0.000000e+00 : f32
    %22 = vector.broadcast %cst_22 : f32 to vector<1x4x4x16xf32>
    %c0_23 = arith.constant 0 : index
    %c0_24 = arith.constant 0 : index
    %c0_25 = arith.constant 0 : index
    %c0_26 = arith.constant 0 : index
    %23 = vector.load %arg6[%c0_23, %c0_24, %c0_25, %c0_26] : memref<1x6x6x16xf32, #tpu.memory_space<vmem>>, vector<1x4x4x16xf32>
    %24 = vector.extract_strided_slice %21 {offsets = [0, 0], sizes = [1, 16], strides = [1, 1]} : vector<9x16xf32> to vector<1x16xf32>
    %25 = vector.shape_cast %24 : vector<1x16xf32> to vector<1x1x1x16xf32>
    %26 = vector.broadcast %25 : vector<1x1x1x16xf32> to vector<1x4x4x16xf32>
    %27 = arith.mulf %23, %26 : vector<1x4x4x16xf32>
    %28 = arith.addf %22, %27 : vector<1x4x4x16xf32>
    %c0_27 = arith.constant 0 : index
    %c0_28 = arith.constant 0 : index
    %c1_29 = arith.constant 1 : index
    %c0_30 = arith.constant 0 : index
    %29 = vector.load %arg6[%c0_27, %c0_28, %c1_29, %c0_30] : memref<1x6x6x16xf32, #tpu.memory_space<vmem>>, vector<1x4x4x16xf32>
    %30 = vector.extract_strided_slice %21 {offsets = [1, 0], sizes = [1, 16], strides = [1, 1]} : vector<9x16xf32> to vector<1x16xf32>
    %31 = vector.shape_cast %30 : vector<1x16xf32> to vector<1x1x1x16xf32>
    %32 = vector.broadcast %31 : vector<1x1x1x16xf32> to vector<1x4x4x16xf32>
    %33 = arith.mulf %29, %32 : vector<1x4x4x16xf32>
    %34 = arith.addf %28, %33 : vector<1x4x4x16xf32>
    %c0_31 = arith.constant 0 : index
    %c0_32 = arith.constant 0 : index
    %c2_33 = arith.constant 2 : index
    %c0_34 = arith.constant 0 : index
    %35 = vector.load %arg6[%c0_31, %c0_32, %c2_33, %c0_34] : memref<1x6x6x16xf32, #tpu.memory_space<vmem>>, vector<1x4x4x16xf32>
    %36 = vector.extract_strided_slice %21 {offsets = [2, 0], sizes = [1, 16], strides = [1, 1]} : vector<9x16xf32> to vector<1x16xf32>
    %37 = vector.shape_cast %36 : vector<1x16xf32> to vector<1x1x1x16xf32>
    %38 = vector.broadcast %37 : vector<1x1x1x16xf32> to vector<1x4x4x16xf32>
    %39 = arith.mulf %35, %38 : vector<1x4x4x16xf32>
    %40 = arith.addf %34, %39 : vector<1x4x4x16xf32>
    %c0_35 = arith.constant 0 : index
    %c1_36 = arith.constant 1 : index
    %c0_37 = arith.constant 0 : index
    %c0_38 = arith.constant 0 : index
    %41 = vector.load %arg6[%c0_35, %c1_36, %c0_37, %c0_38] : memref<1x6x6x16xf32, #tpu.memory_space<vmem>>, vector<1x4x4x16xf32>
    %42 = vector.extract_strided_slice %21 {offsets = [3, 0], sizes = [1, 16], strides = [1, 1]} : vector<9x16xf32> to vector<1x16xf32>
    %43 = vector.shape_cast %42 : vector<1x16xf32> to vector<1x1x1x16xf32>
    %44 = vector.broadcast %43 : vector<1x1x1x16xf32> to vector<1x4x4x16xf32>
    %45 = arith.mulf %41, %44 : vector<1x4x4x16xf32>
    %46 = arith.addf %40, %45 : vector<1x4x4x16xf32>
    %c0_39 = arith.constant 0 : index
    %c1_40 = arith.constant 1 : index
    %c1_41 = arith.constant 1 : index
    %c0_42 = arith.constant 0 : index
    %47 = vector.load %arg6[%c0_39, %c1_40, %c1_41, %c0_42] : memref<1x6x6x16xf32, #tpu.memory_space<vmem>>, vector<1x4x4x16xf32>
    %48 = vector.extract_strided_slice %21 {offsets = [4, 0], sizes = [1, 16], strides = [1, 1]} : vector<9x16xf32> to vector<1x16xf32>
    %49 = vector.shape_cast %48 : vector<1x16xf32> to vector<1x1x1x16xf32>
    %50 = vector.broadcast %49 : vector<1x1x1x16xf32> to vector<1x4x4x16xf32>
    %51 = arith.mulf %47, %50 : vector<1x4x4x16xf32>
    %52 = arith.addf %46, %51 : vector<1x4x4x16xf32>
    %c0_43 = arith.constant 0 : index
    %c1_44 = arith.constant 1 : index
    %c2_45 = arith.constant 2 : index
    %c0_46 = arith.constant 0 : index
    %53 = vector.load %arg6[%c0_43, %c1_44, %c2_45, %c0_46] : memref<1x6x6x16xf32, #tpu.memory_space<vmem>>, vector<1x4x4x16xf32>
    %54 = vector.extract_strided_slice %21 {offsets = [5, 0], sizes = [1, 16], strides = [1, 1]} : vector<9x16xf32> to vector<1x16xf32>
    %55 = vector.shape_cast %54 : vector<1x16xf32> to vector<1x1x1x16xf32>
    %56 = vector.broadcast %55 : vector<1x1x1x16xf32> to vector<1x4x4x16xf32>
    %57 = arith.mulf %53, %56 : vector<1x4x4x16xf32>
    %58 = arith.addf %52, %57 : vector<1x4x4x16xf32>
    %c0_47 = arith.constant 0 : index
    %c2_48 = arith.constant 2 : index
    %c0_49 = arith.constant 0 : index
    %c0_50 = arith.constant 0 : index
    %59 = vector.load %arg6[%c0_47, %c2_48, %c0_49, %c0_50] : memref<1x6x6x16xf32, #tpu.memory_space<vmem>>, vector<1x4x4x16xf32>
    %60 = vector.extract_strided_slice %21 {offsets = [6, 0], sizes = [1, 16], strides = [1, 1]} : vector<9x16xf32> to vector<1x16xf32>
    %61 = vector.shape_cast %60 : vector<1x16xf32> to vector<1x1x1x16xf32>
    %62 = vector.broadcast %61 : vector<1x1x1x16xf32> to vector<1x4x4x16xf32>
    %63 = arith.mulf %59, %62 : vector<1x4x4x16xf32>
    %64 = arith.addf %58, %63 : vector<1x4x4x16xf32>
    %c0_51 = arith.constant 0 : index
    %c2_52 = arith.constant 2 : index
    %c1_53 = arith.constant 1 : index
    %c0_54 = arith.constant 0 : index
    %65 = vector.load %arg6[%c0_51, %c2_52, %c1_53, %c0_54] : memref<1x6x6x16xf32, #tpu.memory_space<vmem>>, vector<1x4x4x16xf32>
    %66 = vector.extract_strided_slice %21 {offsets = [7, 0], sizes = [1, 16], strides = [1, 1]} : vector<9x16xf32> to vector<1x16xf32>
    %67 = vector.shape_cast %66 : vector<1x16xf32> to vector<1x1x1x16xf32>
    %68 = vector.broadcast %67 : vector<1x1x1x16xf32> to vector<1x4x4x16xf32>
    %69 = arith.mulf %65, %68 : vector<1x4x4x16xf32>
    %70 = arith.addf %64, %69 : vector<1x4x4x16xf32>
    %c0_55 = arith.constant 0 : index
    %c2_56 = arith.constant 2 : index
    %c2_57 = arith.constant 2 : index
    %c0_58 = arith.constant 0 : index
    %71 = vector.load %arg6[%c0_55, %c2_56, %c2_57, %c0_58] : memref<1x6x6x16xf32, #tpu.memory_space<vmem>>, vector<1x4x4x16xf32>
    %72 = vector.extract_strided_slice %21 {offsets = [8, 0], sizes = [1, 16], strides = [1, 1]} : vector<9x16xf32> to vector<1x16xf32>
    %73 = vector.shape_cast %72 : vector<1x16xf32> to vector<1x1x1x16xf32>
    %74 = vector.broadcast %73 : vector<1x1x1x16xf32> to vector<1x4x4x16xf32>
    %75 = arith.mulf %71, %74 : vector<1x4x4x16xf32>
    %76 = arith.addf %70, %75 : vector<1x4x4x16xf32>
    %c0_59 = arith.constant 0 : index
    %c0_60 = arith.constant 0 : index
    %77 = vector.load %arg4[%c0_59, %c0_60] : memref<1x16xf32, #tpu.memory_space<vmem>>, vector<1x16xf32>
    %78 = vector.shape_cast %77 : vector<1x16xf32> to vector<1x1x1x16xf32>
    %79 = vector.broadcast %78 : vector<1x1x1x16xf32> to vector<1x4x4x16xf32>
    %80 = arith.addf %76, %79 : vector<1x4x4x16xf32>
    %cst_61 = arith.constant 0.000000e+00 : f32
    %81 = vector.broadcast %cst_61 : f32 to vector<1x4x4x16xf32>
    %82 = arith.maximumf %80, %81 : vector<1x4x4x16xf32>
    %83 = arith.truncf %82 : vector<1x4x4x16xf32> to vector<1x4x4x16xbf16>
    %c0_62 = arith.constant 0 : index
    %c0_63 = arith.constant 0 : index
    %c0_64 = arith.constant 0 : index
    %c0_65 = arith.constant 0 : index
    %84 = vector.load %arg5[%c0_62, %c0_63, %c0_64, %c0_65] : memref<1x4x4x16xbf16, #tpu.memory_space<vmem>>, vector<1x4x4x16xbf16>
    tpu.vector_store %arg5[%c0_62, %c0_63, %c0_64, %c0_65], %83 {strides = array<i32>} : memref<1x4x4x16xbf16, #tpu.memory_space<vmem>>, vector<1x4x4x16xbf16>,
    return
  }
  func.func @transform_0(%arg0: i32) -> (i32, i32) {
    %c0_i32 = arith.constant 0 : i32
    %c0_i32_0 = arith.constant 0 : i32
    return %arg0, %c0_i32 : i32, i32
  }
  func.func @transform_1(%arg0: i32) -> (i32, i32) {
    %c0_i32 = arith.constant 0 : i32
    %c0_i32_0 = arith.constant 0 : i32
    %c0_i32_1 = arith.constant 0 : i32
    return %c0_i32, %c0_i32_0 : i32, i32
  }
  func.func @transform_2(%arg0: i32) -> (i32, i32) {
    %c0_i32 = arith.constant 0 : i32
    %c0_i32_0 = arith.constant 0 : i32
    %c0_i32_1 = arith.constant 0 : i32
    return %c0_i32, %c0_i32_0 : i32, i32
  }
  func.func @transform_3(%arg0: i32) -> (i32, i32) {
    %c0_i32 = arith.constant 0 : i32
    %c0_i32_0 = arith.constant 0 : i32
    %c0_i32_1 = arith.constant 0 : i32
    return %c0_i32, %c0_i32_0 : i32, i32
  }
  func.func @transform_4(%arg0: i32) -> (i32, i32, i32, i32) {
    %c0_i32 = arith.constant 0 : i32
    %c0_i32_0 = arith.constant 0 : i32
    %c0_i32_1 = arith.constant 0 : i32
    %c0_i32_2 = arith.constant 0 : i32
    return %arg0, %c0_i32, %c0_i32_0, %c0_i32_1 : i32, i32, i32, i32
  }
}

module attributes {stable_mosaic.version = 11 : i64} {
  func.func @_gemm_dual_residual_relu_kernel(%arg0: i32, %arg1: memref<16x16xbf16, #tpu.memory_space<vmem>>, %arg2: memref<16x64xbf16, #tpu.memory_space<vmem>>, %arg3: memref<1x64xf32, #tpu.memory_space<vmem>>, %arg4: memref<16x32xbf16, #tpu.memory_space<vmem>>, %arg5: memref<32x64xbf16, #tpu.memory_space<vmem>>, %arg6: memref<1x64xf32, #tpu.memory_space<vmem>>, %arg7: memref<16x64xbf16, #tpu.memory_space<vmem>>) attributes {dimension_semantics = [#tpu.dimension_semantics<parallel>], iteration_bounds = array<i64: 2>, scalar_prefetch = 0 : i64, scratch_operands = 0 : i64, tpu.core_type = #tpu.core_type<tc>, window_params = [{transform_indices = @transform_0, window_bounds = array<i64: 16, 16>}, {pipeline_mode = #tpu.pipeline_mode<synchronous>, transform_indices = @transform_1, window_bounds = array<i64: 16, 64>}, {pipeline_mode = #tpu.pipeline_mode<synchronous>, transform_indices = @transform_2, window_bounds = array<i64: 1, 64>}, {transform_indices = @transform_3, window_bounds = array<i64: 16, 32>}, {pipeline_mode = #tpu.pipeline_mode<synchronous>, transform_indices = @transform_4, window_bounds = array<i64: 32, 64>}, {pipeline_mode = #tpu.pipeline_mode<synchronous>, transform_indices = @transform_5, window_bounds = array<i64: 1, 64>}, {transform_indices = @transform_6, window_bounds = array<i64: 16, 64>}]} {
    %c0 = arith.constant 0 : index
    %c0_0 = arith.constant 0 : index
    %0 = vector.load %arg1[%c0, %c0_0] : memref<16x16xbf16, #tpu.memory_space<vmem>>, vector<16x16xbf16>
    %c0_1 = arith.constant 0 : index
    %c0_2 = arith.constant 0 : index
    %1 = vector.load %arg2[%c0_1, %c0_2] : memref<16x64xbf16, #tpu.memory_space<vmem>>, vector<16x64xbf16>
    %cst = arith.constant dense<0.000000e+00> : vector<16x64xf32>
    %2 = tpu.matmul %0, %1, %cst {dimension_numbers = #tpu.dot_dimension_numbers<[1], [0], [0], [1], [0, 0, 1, 1], [], []>} : vector<16x16xbf16>, vector<16x64xbf16>, vector<16x64xf32> -> vector<16x64xf32>
    %c0_3 = arith.constant 0 : index
    %c0_4 = arith.constant 0 : index
    %3 = vector.load %arg3[%c0_3, %c0_4] : memref<1x64xf32, #tpu.memory_space<vmem>>, vector<1x64xf32>
    %4 = vector.broadcast %3 : vector<1x64xf32> to vector<16x64xf32>
    %5 = arith.addf %2, %4 : vector<16x64xf32>
    %c0_5 = arith.constant 0 : index
    %c0_6 = arith.constant 0 : index
    %6 = vector.load %arg4[%c0_5, %c0_6] : memref<16x32xbf16, #tpu.memory_space<vmem>>, vector<16x32xbf16>
    %c0_7 = arith.constant 0 : index
    %c0_8 = arith.constant 0 : index
    %7 = vector.load %arg5[%c0_7, %c0_8] : memref<32x64xbf16, #tpu.memory_space<vmem>>, vector<32x64xbf16>
    %cst_9 = arith.constant dense<0.000000e+00> : vector<16x64xf32>
    %8 = tpu.matmul %6, %7, %cst_9 {dimension_numbers = #tpu.dot_dimension_numbers<[1], [0], [0], [1], [0, 0, 1, 1], [], []>} : vector<16x32xbf16>, vector<32x64xbf16>, vector<16x64xf32> -> vector<16x64xf32>
    %9 = arith.addf %5, %8 : vector<16x64xf32>
    %c0_10 = arith.constant 0 : index
    %c0_11 = arith.constant 0 : index
    %10 = vector.load %arg6[%c0_10, %c0_11] : memref<1x64xf32, #tpu.memory_space<vmem>>, vector<1x64xf32>
    %11 = vector.broadcast %10 : vector<1x64xf32> to vector<16x64xf32>
    %12 = arith.addf %9, %11 : vector<16x64xf32>
    %cst_12 = arith.constant 0.000000e+00 : f32
    %13 = vector.broadcast %cst_12 : f32 to vector<16x64xf32>
    %14 = arith.maximumf %12, %13 : vector<16x64xf32>
    %15 = arith.truncf %14 : vector<16x64xf32> to vector<16x64xbf16>
    %c0_13 = arith.constant 0 : index
    %c0_14 = arith.constant 0 : index
    %16 = vector.load %arg7[%c0_13, %c0_14] : memref<16x64xbf16, #tpu.memory_space<vmem>>, vector<16x64xbf16>
    tpu.vector_store %arg7[%c0_13, %c0_14], %15 {strides = array<i32>} : memref<16x64xbf16, #tpu.memory_space<vmem>>, vector<16x64xbf16>,
    return
  }
  func.func @transform_0(%arg0: i32) -> (i32, i32) {
    %c0_i32 = arith.constant 0 : i32
    %c0_i32_0 = arith.constant 0 : i32
    return %arg0, %c0_i32 : i32, i32
  }
  func.func @transform_1(%arg0: i32) -> (i32, i32) {
    %c0_i32 = arith.constant 0 : i32
    %c0_i32_0 = arith.constant 0 : i32
    %c0_i32_1 = arith.constant 0 : i32
    return %c0_i32, %c0_i32_0 : i32, i32
  }
  func.func @transform_2(%arg0: i32) -> (i32, i32) {
    %c0_i32 = arith.constant 0 : i32
    %c0_i32_0 = arith.constant 0 : i32
    %c0_i32_1 = arith.constant 0 : i32
    return %c0_i32, %c0_i32_0 : i32, i32
  }
  func.func @transform_3(%arg0: i32) -> (i32, i32) {
    %c0_i32 = arith.constant 0 : i32
    %c0_i32_0 = arith.constant 0 : i32
    return %arg0, %c0_i32 : i32, i32
  }
  func.func @transform_4(%arg0: i32) -> (i32, i32) {
    %c0_i32 = arith.constant 0 : i32
    %c0_i32_0 = arith.constant 0 : i32
    %c0_i32_1 = arith.constant 0 : i32
    return %c0_i32, %c0_i32_0 : i32, i32
  }
  func.func @transform_5(%arg0: i32) -> (i32, i32) {
    %c0_i32 = arith.constant 0 : i32
    %c0_i32_0 = arith.constant 0 : i32
    %c0_i32_1 = arith.constant 0 : i32
    return %c0_i32, %c0_i32_0 : i32, i32
  }
  func.func @transform_6(%arg0: i32) -> (i32, i32) {
    %c0_i32 = arith.constant 0 : i32
    %c0_i32_0 = arith.constant 0 : i32
    return %arg0, %c0_i32 : i32, i32
  }
}

module attributes {stable_mosaic.version = 11 : i64} {
  func.func @_gemm_bias_act_kernel(%arg0: i32, %arg1: memref<16x64xbf16, #tpu.memory_space<vmem>>, %arg2: memref<64x64xbf16, #tpu.memory_space<vmem>>, %arg3: memref<1x64xf32, #tpu.memory_space<vmem>>, %arg4: memref<16x64xbf16, #tpu.memory_space<vmem>>) attributes {dimension_semantics = [#tpu.dimension_semantics<parallel>], iteration_bounds = array<i64: 2>, scalar_prefetch = 0 : i64, scratch_operands = 0 : i64, tpu.core_type = #tpu.core_type<tc>, window_params = [{transform_indices = @transform_0, window_bounds = array<i64: 16, 64>}, {pipeline_mode = #tpu.pipeline_mode<synchronous>, transform_indices = @transform_1, window_bounds = array<i64: 64, 64>}, {pipeline_mode = #tpu.pipeline_mode<synchronous>, transform_indices = @transform_2, window_bounds = array<i64: 1, 64>}, {transform_indices = @transform_3, window_bounds = array<i64: 16, 64>}]} {
    %c0 = arith.constant 0 : index
    %c0_0 = arith.constant 0 : index
    %0 = vector.load %arg1[%c0, %c0_0] : memref<16x64xbf16, #tpu.memory_space<vmem>>, vector<16x64xbf16>
    %c0_1 = arith.constant 0 : index
    %c0_2 = arith.constant 0 : index
    %1 = vector.load %arg2[%c0_1, %c0_2] : memref<64x64xbf16, #tpu.memory_space<vmem>>, vector<64x64xbf16>
    %cst = arith.constant dense<0.000000e+00> : vector<16x64xf32>
    %2 = tpu.matmul %0, %1, %cst {dimension_numbers = #tpu.dot_dimension_numbers<[1], [0], [0], [1], [0, 0, 1, 1], [], []>} : vector<16x64xbf16>, vector<64x64xbf16>, vector<16x64xf32> -> vector<16x64xf32>
    %c0_3 = arith.constant 0 : index
    %c0_4 = arith.constant 0 : index
    %3 = vector.load %arg3[%c0_3, %c0_4] : memref<1x64xf32, #tpu.memory_space<vmem>>, vector<1x64xf32>
    %4 = vector.broadcast %3 : vector<1x64xf32> to vector<16x64xf32>
    %5 = arith.addf %2, %4 : vector<16x64xf32>
    %cst_5 = arith.constant 0.000000e+00 : f32
    %6 = vector.broadcast %cst_5 : f32 to vector<16x64xf32>
    %7 = arith.maximumf %5, %6 : vector<16x64xf32>
    %8 = arith.truncf %7 : vector<16x64xf32> to vector<16x64xbf16>
    %c0_6 = arith.constant 0 : index
    %c0_7 = arith.constant 0 : index
    %9 = vector.load %arg4[%c0_6, %c0_7] : memref<16x64xbf16, #tpu.memory_space<vmem>>, vector<16x64xbf16>
    tpu.vector_store %arg4[%c0_6, %c0_7], %8 {strides = array<i32>} : memref<16x64xbf16, #tpu.memory_space<vmem>>, vector<16x64xbf16>,
    return
  }
  func.func @transform_0(%arg0: i32) -> (i32, i32) {
    %c0_i32 = arith.constant 0 : i32
    %c0_i32_0 = arith.constant 0 : i32
    return %arg0, %c0_i32 : i32, i32
  }
  func.func @transform_1(%arg0: i32) -> (i32, i32) {
    %c0_i32 = arith.constant 0 : i32
    %c0_i32_0 = arith.constant 0 : i32
    %c0_i32_1 = arith.constant 0 : i32
    return %c0_i32, %c0_i32_0 : i32, i32
  }
  func.func @transform_2(%arg0: i32) -> (i32, i32) {
    %c0_i32 = arith.constant 0 : i32
    %c0_i32_0 = arith.constant 0 : i32
    %c0_i32_1 = arith.constant 0 : i32
    return %c0_i32, %c0_i32_0 : i32, i32
  }
  func.func @transform_3(%arg0: i32) -> (i32, i32) {
    %c0_i32 = arith.constant 0 : i32
    %c0_i32_0 = arith.constant 0 : i32
    return %arg0, %c0_i32 : i32, i32
  }
}

module attributes {stable_mosaic.version = 11 : i64} {
  func.func @_se4_sum_kernel(%arg0: i32, %arg1: memref<1x16x16xbf16, #tpu.memory_space<vmem>>, %arg2: memref<1x16x16xbf16, #tpu.memory_space<vmem>>, %arg3: memref<1x16x16xbf16, #tpu.memory_space<vmem>>, %arg4: memref<1x16x16xbf16, #tpu.memory_space<vmem>>, %arg5: memref<16x4xbf16, #tpu.memory_space<vmem>>, %arg6: memref<1x4xf32, #tpu.memory_space<vmem>>, %arg7: memref<4x16xbf16, #tpu.memory_space<vmem>>, %arg8: memref<1x16xf32, #tpu.memory_space<vmem>>, %arg9: memref<1x16x16xbf16, #tpu.memory_space<vmem>>) attributes {dimension_semantics = [#tpu.dimension_semantics<parallel>], iteration_bounds = array<i64: 2>, scalar_prefetch = 0 : i64, scratch_operands = 0 : i64, tpu.core_type = #tpu.core_type<tc>, window_params = [{transform_indices = @transform_0, window_bounds = array<i64: 1, 16, 16>}, {transform_indices = @transform_1, window_bounds = array<i64: 1, 16, 16>}, {transform_indices = @transform_2, window_bounds = array<i64: 1, 16, 16>}, {transform_indices = @transform_3, window_bounds = array<i64: 1, 16, 16>}, {pipeline_mode = #tpu.pipeline_mode<synchronous>, transform_indices = @transform_4, window_bounds = array<i64: 16, 4>}, {pipeline_mode = #tpu.pipeline_mode<synchronous>, transform_indices = @transform_5, window_bounds = array<i64: 1, 4>}, {pipeline_mode = #tpu.pipeline_mode<synchronous>, transform_indices = @transform_6, window_bounds = array<i64: 4, 16>}, {pipeline_mode = #tpu.pipeline_mode<synchronous>, transform_indices = @transform_7, window_bounds = array<i64: 1, 16>}, {transform_indices = @transform_8, window_bounds = array<i64: 1, 16, 16>}]} {
    %c0 = arith.constant 0 : index
    %c0_0 = arith.constant 0 : index
    %c0_1 = arith.constant 0 : index
    %0 = vector.load %arg1[%c0, %c0_0, %c0_1] : memref<1x16x16xbf16, #tpu.memory_space<vmem>>, vector<1x16x16xbf16>
    %c0_2 = arith.constant 0 : index
    %c0_3 = arith.constant 0 : index
    %c0_4 = arith.constant 0 : index
    %1 = vector.load %arg2[%c0_2, %c0_3, %c0_4] : memref<1x16x16xbf16, #tpu.memory_space<vmem>>, vector<1x16x16xbf16>
    %c0_5 = arith.constant 0 : index
    %c0_6 = arith.constant 0 : index
    %c0_7 = arith.constant 0 : index
    %2 = vector.load %arg3[%c0_5, %c0_6, %c0_7] : memref<1x16x16xbf16, #tpu.memory_space<vmem>>, vector<1x16x16xbf16>
    %c0_8 = arith.constant 0 : index
    %c0_9 = arith.constant 0 : index
    %c0_10 = arith.constant 0 : index
    %3 = vector.load %arg4[%c0_8, %c0_9, %c0_10] : memref<1x16x16xbf16, #tpu.memory_space<vmem>>, vector<1x16x16xbf16>
    %4 = arith.extf %0 : vector<1x16x16xbf16> to vector<1x16x16xf32>
    %cst = arith.constant dense<0.000000e+00> : vector<1x16xf32>
    %5 = vector.multi_reduction <add>, %4, %cst [1] : vector<1x16x16xf32> to vector<1x16xf32>
    %cst_11 = arith.constant 6.250000e-02 : f32
    %6 = vector.broadcast %cst_11 : f32 to vector<1x16xf32>
    %7 = arith.mulf %5, %6 : vector<1x16xf32>
    %8 = arith.extf %1 : vector<1x16x16xbf16> to vector<1x16x16xf32>
    %cst_12 = arith.constant dense<0.000000e+00> : vector<1x16xf32>
    %9 = vector.multi_reduction <add>, %8, %cst_12 [1] : vector<1x16x16xf32> to vector<1x16xf32>
    %cst_13 = arith.constant 6.250000e-02 : f32
    %10 = vector.broadcast %cst_13 : f32 to vector<1x16xf32>
    %11 = arith.mulf %9, %10 : vector<1x16xf32>
    %12 = arith.extf %2 : vector<1x16x16xbf16> to vector<1x16x16xf32>
    %cst_14 = arith.constant dense<0.000000e+00> : vector<1x16xf32>
    %13 = vector.multi_reduction <add>, %12, %cst_14 [1] : vector<1x16x16xf32> to vector<1x16xf32>
    %cst_15 = arith.constant 6.250000e-02 : f32
    %14 = vector.broadcast %cst_15 : f32 to vector<1x16xf32>
    %15 = arith.mulf %13, %14 : vector<1x16xf32>
    %16 = arith.extf %3 : vector<1x16x16xbf16> to vector<1x16x16xf32>
    %cst_16 = arith.constant dense<0.000000e+00> : vector<1x16xf32>
    %17 = vector.multi_reduction <add>, %16, %cst_16 [1] : vector<1x16x16xf32> to vector<1x16xf32>
    %cst_17 = arith.constant 6.250000e-02 : f32
    %18 = vector.broadcast %cst_17 : f32 to vector<1x16xf32>
    %19 = arith.mulf %17, %18 : vector<1x16xf32>
    %20 = tpu.concatenate %7, %11, %15, %19 in 0 : vector<1x16xf32>, vector<1x16xf32>, vector<1x16xf32>, vector<1x16xf32> -> vector<4x16xf32>
    %21 = arith.truncf %20 : vector<4x16xf32> to vector<4x16xbf16>
    %c0_18 = arith.constant 0 : index
    %c0_19 = arith.constant 0 : index
    %22 = vector.load %arg5[%c0_18, %c0_19] : memref<16x4xbf16, #tpu.memory_space<vmem>>, vector<16x4xbf16>
    %cst_20 = arith.constant dense<0.000000e+00> : vector<4x4xf32>
    %23 = tpu.matmul %21, %22, %cst_20 {dimension_numbers = #tpu.dot_dimension_numbers<[1], [0], [0], [1], [0, 0, 1, 1], [], []>} : vector<4x16xbf16>, vector<16x4xbf16>, vector<4x4xf32> -> vector<4x4xf32>
    %c0_21 = arith.constant 0 : index
    %c0_22 = arith.constant 0 : index
    %24 = vector.load %arg6[%c0_21, %c0_22] : memref<1x4xf32, #tpu.memory_space<vmem>>, vector<1x4xf32>
    %25 = vector.broadcast %24 : vector<1x4xf32> to vector<4x4xf32>
    %26 = arith.addf %23, %25 : vector<4x4xf32>
    %cst_23 = arith.constant 0.000000e+00 : f32
    %27 = vector.broadcast %cst_23 : f32 to vector<4x4xf32>
    %28 = arith.maximumf %26, %27 : vector<4x4xf32>
    %29 = arith.truncf %28 : vector<4x4xf32> to vector<4x4xbf16>
    %c0_24 = arith.constant 0 : index
    %c0_25 = arith.constant 0 : index
    %30 = vector.load %arg7[%c0_24, %c0_25] : memref<4x16xbf16, #tpu.memory_space<vmem>>, vector<4x16xbf16>
    %cst_26 = arith.constant dense<0.000000e+00> : vector<4x16xf32>
    %31 = tpu.matmul %29, %30, %cst_26 {dimension_numbers = #tpu.dot_dimension_numbers<[1], [0], [0], [1], [0, 0, 1, 1], [], []>} : vector<4x4xbf16>, vector<4x16xbf16>, vector<4x16xf32> -> vector<4x16xf32>
    %c0_27 = arith.constant 0 : index
    %c0_28 = arith.constant 0 : index
    %32 = vector.load %arg8[%c0_27, %c0_28] : memref<1x16xf32, #tpu.memory_space<vmem>>, vector<1x16xf32>
    %33 = vector.broadcast %32 : vector<1x16xf32> to vector<4x16xf32>
    %34 = arith.addf %31, %33 : vector<4x16xf32>
    %cst_29 = arith.constant 0.000000e+00 : f32
    %35 = vector.broadcast %cst_29 : f32 to vector<4x16xf32>
    %36 = arith.subf %35, %34 : vector<4x16xf32>
    %37 = math.exp %36 : vector<4x16xf32>
    %cst_30 = arith.constant 1.000000e+00 : f32
    %38 = vector.broadcast %cst_30 : f32 to vector<4x16xf32>
    %39 = arith.addf %38, %37 : vector<4x16xf32>
    %40 = tpu.reciprocal %39 {approx = true} : vector<4x16xf32> -> vector<4x16xf32>
    %cst_31 = arith.constant 0.000000e+00 : f32
    %41 = vector.broadcast %cst_31 : f32 to vector<1x16x16xf32>
    %42 = vector.extract_strided_slice %40 {offsets = [0, 0], sizes = [1, 16], strides = [1, 1]} : vector<4x16xf32> to vector<1x16xf32>
    %43 = vector.shape_cast %42 : vector<1x16xf32> to vector<1x1x16xf32>
    %44 = arith.extf %0 : vector<1x16x16xbf16> to vector<1x16x16xf32>
    %45 = vector.broadcast %43 : vector<1x1x16xf32> to vector<1x16x16xf32>
    %46 = arith.mulf %44, %45 : vector<1x16x16xf32>
    %47 = arith.addf %41, %46 : vector<1x16x16xf32>
    %48 = vector.extract_strided_slice %40 {offsets = [1, 0], sizes = [1, 16], strides = [1, 1]} : vector<4x16xf32> to vector<1x16xf32>
    %49 = vector.shape_cast %48 : vector<1x16xf32> to vector<1x1x16xf32>
    %50 = arith.extf %1 : vector<1x16x16xbf16> to vector<1x16x16xf32>
    %51 = vector.broadcast %49 : vector<1x1x16xf32> to vector<1x16x16xf32>
    %52 = arith.mulf %50, %51 : vector<1x16x16xf32>
    %53 = arith.addf %47, %52 : vector<1x16x16xf32>
    %54 = vector.extract_strided_slice %40 {offsets = [2, 0], sizes = [1, 16], strides = [1, 1]} : vector<4x16xf32> to vector<1x16xf32>
    %55 = vector.shape_cast %54 : vector<1x16xf32> to vector<1x1x16xf32>
    %56 = arith.extf %2 : vector<1x16x16xbf16> to vector<1x16x16xf32>
    %57 = vector.broadcast %55 : vector<1x1x16xf32> to vector<1x16x16xf32>
    %58 = arith.mulf %56, %57 : vector<1x16x16xf32>
    %59 = arith.addf %53, %58 : vector<1x16x16xf32>
    %60 = vector.extract_strided_slice %40 {offsets = [3, 0], sizes = [1, 16], strides = [1, 1]} : vector<4x16xf32> to vector<1x16xf32>
    %61 = vector.shape_cast %60 : vector<1x16xf32> to vector<1x1x16xf32>
    %62 = arith.extf %3 : vector<1x16x16xbf16> to vector<1x16x16xf32>
    %63 = vector.broadcast %61 : vector<1x1x16xf32> to vector<1x16x16xf32>
    %64 = arith.mulf %62, %63 : vector<1x16x16xf32>
    %65 = arith.addf %59, %64 : vector<1x16x16xf32>
    %66 = arith.truncf %65 : vector<1x16x16xf32> to vector<1x16x16xbf16>
    %c0_32 = arith.constant 0 : index
    %c0_33 = arith.constant 0 : index
    %c0_34 = arith.constant 0 : index
    %67 = vector.load %arg9[%c0_32, %c0_33, %c0_34] : memref<1x16x16xbf16, #tpu.memory_space<vmem>>, vector<1x16x16xbf16>
    tpu.vector_store %arg9[%c0_32, %c0_33, %c0_34], %66 {strides = array<i32>} : memref<1x16x16xbf16, #tpu.memory_space<vmem>>, vector<1x16x16xbf16>,
    return
  }
  func.func @transform_0(%arg0: i32) -> (i32, i32, i32) {
    %c0_i32 = arith.constant 0 : i32
    %c0_i32_0 = arith.constant 0 : i32
    %c0_i32_1 = arith.constant 0 : i32
    return %arg0, %c0_i32, %c0_i32_0 : i32, i32, i32
  }
  func.func @transform_1(%arg0: i32) -> (i32, i32, i32) {
    %c0_i32 = arith.constant 0 : i32
    %c0_i32_0 = arith.constant 0 : i32
    %c0_i32_1 = arith.constant 0 : i32
    return %arg0, %c0_i32, %c0_i32_0 : i32, i32, i32
  }
  func.func @transform_2(%arg0: i32) -> (i32, i32, i32) {
    %c0_i32 = arith.constant 0 : i32
    %c0_i32_0 = arith.constant 0 : i32
    %c0_i32_1 = arith.constant 0 : i32
    return %arg0, %c0_i32, %c0_i32_0 : i32, i32, i32
  }
  func.func @transform_3(%arg0: i32) -> (i32, i32, i32) {
    %c0_i32 = arith.constant 0 : i32
    %c0_i32_0 = arith.constant 0 : i32
    %c0_i32_1 = arith.constant 0 : i32
    return %arg0, %c0_i32, %c0_i32_0 : i32, i32, i32
  }
  func.func @transform_4(%arg0: i32) -> (i32, i32) {
    %c0_i32 = arith.constant 0 : i32
    %c0_i32_0 = arith.constant 0 : i32
    %c0_i32_1 = arith.constant 0 : i32
    return %c0_i32, %c0_i32_0 : i32, i32
  }
  func.func @transform_5(%arg0: i32) -> (i32, i32) {
    %c0_i32 = arith.constant 0 : i32
    %c0_i32_0 = arith.constant 0 : i32
    %c0_i32_1 = arith.constant 0 : i32
    return %c0_i32, %c0_i32_0 : i32, i32
  }
  func.func @transform_6(%arg0: i32) -> (i32, i32) {
    %c0_i32 = arith.constant 0 : i32
    %c0_i32_0 = arith.constant 0 : i32
    %c0_i32_1 = arith.constant 0 : i32
    return %c0_i32, %c0_i32_0 : i32, i32
  }
  func.func @transform_7(%arg0: i32) -> (i32, i32) {
    %c0_i32 = arith.constant 0 : i32
    %c0_i32_0 = arith.constant 0 : i32
    %c0_i32_1 = arith.constant 0 : i32
    return %c0_i32, %c0_i32_0 : i32, i32
  }
  func.func @transform_8(%arg0: i32) -> (i32, i32, i32) {
    %c0_i32 = arith.constant 0 : i32
    %c0_i32_0 = arith.constant 0 : i32
    %c0_i32_1 = arith.constant 0 : i32
    return %arg0, %c0_i32, %c0_i32_0 : i32, i32, i32
  }
}

</mosaic_0001>

<bundles_post_ra>
// kernel: _lambda_.19
= control target key start
LH: loop header
LB: loop body
LE: loop exit
PB: predicated region body
PF: predicated region fallthrough
CT: control target
= control target key end

     0   :  { %s999_s12 = smov 0   ;;  %s1166_s0 = inlined_call_operand.vmem [shape: bf16[512,27], index: 0, kind: input, shape index: {}]   ;;  %s1167_s1 = inlined_call_operand.vmem [shape: bf16[27,8], index: 1, kind: input, shape index: {}]   ;;  %s1168_s2 = inlined_call_operand.vmem [shape: f32[1,8], index: 2, kind: input, shape index: {}]   ;;  %s1169_s3 = inlined_call_operand.vmem [shape: bf16[512,8], index: 3, kind: output, shape index: {}]  }
   0x1 LB: > { %s775_s13 = sadd.s32 4294967295, %s976_s12   ;;  %p779_p0 = scmp.ge.s32.totalorder %s976_s12, 1  ;;  %s976_s12 = sphi %s999_s12, %s13_s12  }
   0x2   : > { %p138_p1 = scmp.lt.s32.totalorder %s976_s12, 3 }
   0x4   : > { %p139_p2 = pnand %p779_p0, %p138_p1 }
   0x5   : > { %s780_s16 = sshll.u32 (!%p139_p2), %s775_s13, 5 }
   0x6   : > { %142 = sbr.rel (%p139_p2) target bundleno = 255 (0xff), region = 32  ;;  %p163_p3 = scmp.lt.s32.totalorder (!%p139_p2), %s780_s16, 63 }
   0xb   : > { %v952_v0 = vld [vmem:[%s1167_s1 + $0x8] sm:$0x3f]   ;;  %vm358_vm0 = vcmask 1044480   ;;  %vm359_vm1 = vcmask 1045504   ;;  %v978_v1 = vmov 65535   ;;  %v953_v5 = vld [vmem:[%s1167_s1] sm:$0xff]  }
   0xc   : > { %v360_v2 = vsel %vm358_vm0, 4294967295, %v978_v1  ;;  %s1171_s16 = smov (!%p163_p3, %s780_s16), 63  ;;  %vm309_vm2 = vcmask 220160   ;;  %v1058_v22 = vld [vmem:[%s1168_s2] ss:$0 sm:$0xff]  ;;  %vm686_vm3 = vcmask 60416  }
   0xd   : > { %v361_v3 = vsel %vm359_vm1, %v360_v2, 0  ;;  %s781_s19 = sshll.u32 %s1171_s16, 2 }
   0xe   : > { %v363_v4 = vand.u32 %v952_v0, %v361_v3  ;;  %s1021_s22 = scalar_lea.vmem %s1166_s0, %s781_s19  ;;  %s1069_s27 = scalar_lea.vmem %s1169_s3, %s781_s19 }
   0xf   : > { %v954_v6 = vld [vmem:[%s1021_s22] sm:$0xff]   ;;  %v956_v8 = vld [vmem:[%s1021_s22 + $0x8] sm:$0xff]   ;;  %v958_v10 = vld [vmem:[%s1021_s22 + $0x10] sm:$0xff]  }
  0x10   : > { %903 = vmatprep.subr.bf16.mxu0 %v363_v4  ;;  %939 = vmatprep.subr.bf16.mxu1 %v363_v4  ;;  %v955_v7 = vld [vmem:[%s1021_s22 + $0x40] sm:$0xff]   ;;  %v957_v9 = vld [vmem:[%s1021_s22 + $0x48] sm:$0xff]   ;;  %v959_v11 = vld [vmem:[%s1021_s22 + $0x50] sm:$0xff]  }
  0x11   : > { %904 = vmatpush3.bf16.msra.mxu0 %v363_v4  ;;  %941 = vmatpush3.bf16.msra.mxu1 %v363_v4  ;;  %v960_v12 = vld [vmem:[%s1021_s22 + $0x18] sm:$0xff]   ;;  %v962_v14 = vld [vmem:[%s1021_s22 + $0x20] sm:$0xff]   ;;  %v964_v16 = vld [vmem:[%s1021_s22 + $0x28] sm:$0xff]  }
  0x12   : > { %905 = vmatprep.subr.bf16.mxu0 %v953_v5  ;;  %940 = vmatprep.subr.bf16.mxu1 %v953_v5  ;;  %v961_v13 = vld [vmem:[%s1021_s22 + $0x58] sm:$0xff]   ;;  %v963_v15 = vld [vmem:[%s1021_s22 + $0x60] sm:$0xff]   ;;  %v965_v17 = vld [vmem:[%s1021_s22 + $0x68] sm:$0xff]  }
  0x13   : > { %907 = vmatprep.mubr.msk.bf16.mxu0 %vm309_vm2, %v954_v6  ;;  %923 = vmatprep.mubr.msk.bf16.mxu1 %vm309_vm2, %v955_v7  ;;  %v966_v18 = vld [vmem:[%s1021_s22 + $0x30] sm:$0xff]   ;;  %v968_v20 = vld [vmem:[%s1021_s22 + $0x38] sm:$0xff]  }
  0x14   : > { %v967_v19 = vld [vmem:[%s1021_s22 + $0x70] sm:$0xff]   ;;  %v969_v21 = vld [vmem:[%s1021_s22 + $0x78] sm:$0xff]  }
  0x15   : > { %906 = vmatpush3.bf16.msra.mxu0 %v953_v5  ;;  %942 = vmatpush3.bf16.msra.mxu1 %v953_v5 }
  0x18   : > { %908 = vmatmul.mubr.msk.bf16.vlgmr.msra.gmra.mxu0 %vm309_vm2, %v956_v8  ;;  %924 = vmatmul.mubr.msk.bf16.vlgmr.msra.gmra.mxu1 %vm309_vm2, %v957_v9 }
  0x19   : > { %911 = vmatprep.mubr.msk.bf16.mxu0 %vm309_vm2, %v958_v10  ;;  %927 = vmatprep.mubr.msk.bf16.mxu1 %vm309_vm2, %v959_v11 }
  0x20   : > { %912 = vmatmul.mubr.msk.bf16.gmra.mxu0 %vm309_vm2, %v960_v12  ;;  %928 = vmatmul.mubr.msk.bf16.gmra.mxu1 %vm309_vm2, %v961_v13 }
  0x21   : > { %915 = vmatprep.mubr.msk.bf16.mxu0 %vm309_vm2, %v962_v14  ;;  %931 = vmatprep.mubr.msk.bf16.mxu1 %vm309_vm2, %v963_v15 }
  0x28   : > { %916 = vmatmul.mubr.msk.bf16.gmra.mxu0 %vm309_vm2, %v964_v16  ;;  %932 = vmatmul.mubr.msk.bf16.gmra.mxu1 %vm309_vm2, %v965_v17 }
  0x29   : > { %919 = vmatprep.mubr.msk.bf16.mxu0 %vm309_vm2, %v966_v18  ;;  %935 = vmatprep.mubr.msk.bf16.mxu1 %vm309_vm2, %v967_v19 }
  0x30   : > { %920 = vmatmul.mubr.msk.bf16.gmra.mxu0 %vm309_vm2, %v968_v20  ;;  %936 = vmatmul.mubr.msk.bf16.gmra.mxu1 %vm309_vm2, %v969_v21 }
  0xd8   : > { %v909_v23 = vpop.f32.mrf.mxu0  ;;  %v925_v24 = vpop.f32.mrf.mxu1 }
  0xd9   : > { %v408_v25 = vadd.f32 %v909_v23, %v1058_v22  ;;  %v472_v26 = vadd.f32 %v925_v24, %v1058_v22 }
  0xda   : > { %v399_v27 = vpop.f32.mrf.mxu0  ;;  %v463_v28 = vpop.f32.mrf.mxu1 }
  0xdb   : > { %v528_v29 = vmax.f32 %v408_v25, 0.0  ;;  %v544_v30 = vmax.f32 %v472_v26, 0.0  ;;  %v400_v31 = vadd.f32 %v1058_v22, %v399_v27  ;;  %v464_v32 = vadd.f32 %v1058_v22, %v463_v28 }
  0xdc   : > { %v910_v33 = vpop.f32.mrf.mxu0  ;;  %v926_v34 = vpop.f32.mrf.mxu1 }
  0xdd   : > { %v855_v35 = vpack.c.bf16 %v528_v29, %v528_v29  ;;  %v871_v36 = vpack.c.bf16 %v544_v30, %v544_v30  ;;  %v526_v37 = vmax.f32 %v400_v31, 0.0  ;;  %v542_v38 = vmax.f32 %v464_v32, 0.0 }
  0xde   : > { %v411_v39 = vadd.f32 %v910_v33, %v1058_v22  ;;  %v475_v40 = vadd.f32 %v926_v34, %v1058_v22  ;;  %v402_v41 = vpop.f32.mrf.mxu0  ;;  %v466_v42 = vpop.f32.mrf.mxu1 }
  0xdf   : > { %689 = vst.msk [vmem:[%s1069_s27 + $0x8] sm:$0xf] %vm686_vm3, %v855_v35  ;;  %705 = vst.msk [vmem:[%s1069_s27 + $0x48] sm:$0xf] %vm686_vm3, %v871_v36  ;;  %v853_v43 = vpack.c.bf16 %v526_v37, %v526_v37  ;;  %v869_v44 = vpack.c.bf16 %v542_v38, %v542_v38  ;;  %v403_v45 = vadd.f32 %v1058_v22, %v402_v41 }
  0xe0   : > { %v467_v46 = vadd.f32 %v1058_v22, %v466_v42  ;;  %v529_v47 = vmax.f32 %v411_v39, 0.0  ;;  %v545_v48 = vmax.f32 %v475_v40, 0.0  ;;  %v913_v49 = vpop.f32.mrf.mxu0  ;;  %v929_v50 = vpop.f32.mrf.mxu1 }
  0xe1   : > { %687 = vst.msk [vmem:[%s1069_s27] sm:$0xf] %vm686_vm3, %v853_v43  ;;  %703 = vst.msk [vmem:[%s1069_s27 + $0x40] sm:$0xf] %vm686_vm3, %v869_v44  ;;  %v527_v51 = vmax.f32 %v403_v45, 0.0  ;;  %v424_v53 = vadd.f32 %v913_v49, %v1058_v22  ;;  %v488_v54 = vadd.f32 %v929_v50, %v1058_v22 }
  0xe2   : > { %v543_v52 = vmax.f32 %v467_v46, 0.0  ;;  %v856_v55 = vpack.c.bf16 %v529_v47, %v529_v47  ;;  %v872_v56 = vpack.c.bf16 %v545_v48, %v545_v48  ;;  %v415_v57 = vpop.f32.mrf.mxu0  ;;  %v479_v58 = vpop.f32.mrf.mxu1 }
  0xe3   : > { %v854_v59 = vpack.c.bf16 %v527_v51, %v527_v51  ;;  %v532_v61 = vmax.f32 %v424_v53, 0.0  ;;  %v548_v62 = vmax.f32 %v488_v54, 0.0  ;;  %v416_v63 = vadd.f32 %v1058_v22, %v415_v57 }
  0xe4   : > { %v870_v60 = vpack.c.bf16 %v543_v52, %v543_v52  ;;  %690 = vst.msk [vmem:[%s1069_s27 + $0xc] sm:$0xf] %vm686_vm3, %v856_v55  ;;  %706 = vst.msk [vmem:[%s1069_s27 + $0x4c] sm:$0xf] %vm686_vm3, %v872_v56  ;;  %v480_v0 = vadd.f32 %v1058_v22, %v479_v58  ;;  %v914_v1 = vpop.f32.mrf.mxu0  ;;  %v930_v2 = vpop.f32.mrf.mxu1 }
  0xe5   : > { %688 = vst.msk [vmem:[%s1069_s27 + $0x4] sm:$0xf] %vm686_vm3, %v854_v59  ;;  %v859_v3 = vpack.c.bf16 %v532_v61, %v532_v61  ;;  %v875_v4 = vpack.c.bf16 %v548_v62, %v548_v62  ;;  %v427_v5 = vadd.f32 %v914_v1, %v1058_v22  ;;  %v491_v6 = vadd.f32 %v930_v2, %v1058_v22 }
  0xe6   : > { %704 = vst.msk [vmem:[%s1069_s27 + $0x44] sm:$0xf] %vm686_vm3, %v870_v60  ;;  %v530_v7 = vmax.f32 %v416_v63, 0.0  ;;  %v546_v8 = vmax.f32 %v480_v0, 0.0  ;;  %v418_v9 = vpop.f32.mrf.mxu0  ;;  %v482_v10 = vpop.f32.mrf.mxu1 }
  0xe7   : > { %693 = vst.msk [vmem:[%s1069_s27 + $0x18] sm:$0xf] %vm686_vm3, %v859_v3  ;;  %709 = vst.msk [vmem:[%s1069_s27 + $0x58] sm:$0xf] %vm686_vm3, %v875_v4  ;;  %v533_v11 = vmax.f32 %v427_v5, 0.0  ;;  %v549_v12 = vmax.f32 %v491_v6, 0.0  ;;  %v419_v13 = vadd.f32 %v1058_v22, %v418_v9  ;;  %v483_v14 = vadd.f32 %v1058_v22, %v482_v10 }
  0xe8   : > { %v857_v15 = vpack.c.bf16 %v530_v7, %v530_v7  ;;  %v873_v16 = vpack.c.bf16 %v546_v8, %v546_v8  ;;  %v917_v17 = vpop.f32.mrf.mxu0  ;;  %v933_v18 = vpop.f32.mrf.mxu1 }
  0xe9   : > { %v860_v19 = vpack.c.bf16 %v533_v11, %v533_v11  ;;  %v876_v20 = vpack.c.bf16 %v549_v12, %v549_v12  ;;  %v531_v21 = vmax.f32 %v419_v13, 0.0  ;;  %v547_v23 = vmax.f32 %v483_v14, 0.0 }
  0xea   : > { %691 = vst.msk [vmem:[%s1069_s27 + $0x10] sm:$0xf] %vm686_vm3, %v857_v15  ;;  %707 = vst.msk [vmem:[%s1069_s27 + $0x50] sm:$0xf] %vm686_vm3, %v873_v16  ;;  %v440_v24 = vadd.f32 %v917_v17, %v1058_v22  ;;  %v504_v25 = vadd.f32 %v933_v18, %v1058_v22  ;;  %v431_v26 = vpop.f32.mrf.mxu0  ;;  %v495_v27 = vpop.f32.mrf.mxu1 }
  0xeb   : > { %694 = vst.msk [vmem:[%s1069_s27 + $0x1c] sm:$0xf] %vm686_vm3, %v860_v19  ;;  %710 = vst.msk [vmem:[%s1069_s27 + $0x5c] sm:$0xf] %vm686_vm3, %v876_v20  ;;  %v858_v28 = vpack.c.bf16 %v531_v21, %v531_v21  ;;  %v874_v29 = vpack.c.bf16 %v547_v23, %v547_v23  ;;  %v432_v30 = vadd.f32 %v1058_v22, %v431_v26 }
  0xec   : > { %v496_v31 = vadd.f32 %v1058_v22, %v495_v27  ;;  %v536_v32 = vmax.f32 %v440_v24, 0.0  ;;  %v552_v33 = vmax.f32 %v504_v25, 0.0  ;;  %v918_v34 = vpop.f32.mrf.mxu0  ;;  %v934_v35 = vpop.f32.mrf.mxu1 }
  0xed   : > { %692 = vst.msk [vmem:[%s1069_s27 + $0x14] sm:$0xf] %vm686_vm3, %v858_v28  ;;  %708 = vst.msk [vmem:[%s1069_s27 + $0x54] sm:$0xf] %vm686_vm3, %v874_v29  ;;  %v534_v36 = vmax.f32 %v432_v30, 0.0  ;;  %v443_v38 = vadd.f32 %v918_v34, %v1058_v22  ;;  %v507_v39 = vadd.f32 %v934_v35, %v1058_v22 }
  0xee   : > { %v550_v37 = vmax.f32 %v496_v31, 0.0  ;;  %v863_v40 = vpack.c.bf16 %v536_v32, %v536_v32  ;;  %v879_v41 = vpack.c.bf16 %v552_v33, %v552_v33  ;;  %v434_v42 = vpop.f32.mrf.mxu0  ;;  %v498_v43 = vpop.f32.mrf.mxu1 }
  0xef   : > { %v861_v44 = vpack.c.bf16 %v534_v36, %v534_v36  ;;  %v537_v46 = vmax.f32 %v443_v38, 0.0  ;;  %v553_v47 = vmax.f32 %v507_v39, 0.0  ;;  %v435_v48 = vadd.f32 %v1058_v22, %v434_v42 }
  0xf0   : > { %v877_v45 = vpack.c.bf16 %v550_v37, %v550_v37  ;;  %697 = vst.msk [vmem:[%s1069_s27 + $0x28] sm:$0xf] %vm686_vm3, %v863_v40  ;;  %713 = vst.msk [vmem:[%s1069_s27 + $0x68] sm:$0xf] %vm686_vm3, %v879_v41  ;;  %v499_v49 = vadd.f32 %v1058_v22, %v498_v43  ;;  %v921_v50 = vpop.f32.mrf.mxu0  ;;  %v937_v51 = vpop.f32.mrf.mxu1 }
  0xf1   : > { %695 = vst.msk [vmem:[%s1069_s27 + $0x20] sm:$0xf] %vm686_vm3, %v861_v44  ;;  %v864_v52 = vpack.c.bf16 %v537_v46, %v537_v46  ;;  %v880_v53 = vpack.c.bf16 %v553_v47, %v553_v47  ;;  %v456_v54 = vadd.f32 %v921_v50, %v1058_v22  ;;  %v520_v55 = vadd.f32 %v937_v51, %v1058_v22 }
  0xf2   : > { %711 = vst.msk [vmem:[%s1069_s27 + $0x60] sm:$0xf] %vm686_vm3, %v877_v45  ;;  %v535_v56 = vmax.f32 %v435_v48, 0.0  ;;  %v551_v57 = vmax.f32 %v499_v49, 0.0  ;;  %v447_v58 = vpop.f32.mrf.mxu0  ;;  %v511_v59 = vpop.f32.mrf.mxu1 }
  0xf3   : > { %698 = vst.msk [vmem:[%s1069_s27 + $0x2c] sm:$0xf] %vm686_vm3, %v864_v52  ;;  %714 = vst.msk [vmem:[%s1069_s27 + $0x6c] sm:$0xf] %vm686_vm3, %v880_v53  ;;  %v540_v60 = vmax.f32 %v456_v54, 0.0  ;;  %v556_v61 = vmax.f32 %v520_v55, 0.0  ;;  %v448_v62 = vadd.f32 %v1058_v22, %v447_v58  ;;  %v512_v63 = vadd.f32 %v1058_v22, %v511_v59 }
  0xf4   : > { %v862_v0 = vpack.c.bf16 %v535_v56, %v535_v56  ;;  %v878_v1 = vpack.c.bf16 %v551_v57, %v551_v57  ;;  %v922_v2 = vpop.f32.mrf.mxu0  ;;  %v938_v3 = vpop.f32.mrf.mxu1 }
  0xf5   : > { %v867_v4 = vpack.c.bf16 %v540_v60, %v540_v60  ;;  %v883_v5 = vpack.c.bf16 %v556_v61, %v556_v61  ;;  %v538_v6 = vmax.f32 %v448_v62, 0.0  ;;  %v554_v7 = vmax.f32 %v512_v63, 0.0 }
  0xf6   : > { %696 = vst.msk [vmem:[%s1069_s27 + $0x24] sm:$0xf] %vm686_vm3, %v862_v0  ;;  %712 = vst.msk [vmem:[%s1069_s27 + $0x64] sm:$0xf] %vm686_vm3, %v878_v1  ;;  %v459_v8 = vadd.f32 %v922_v2, %v1058_v22  ;;  %v523_v9 = vadd.f32 %v938_v3, %v1058_v22  ;;  %v450_v10 = vpop.f32.mrf.mxu0  ;;  %v514_v11 = vpop.f32.mrf.mxu1 }
  0xf7   : > { %701 = vst.msk [vmem:[%s1069_s27 + $0x38] sm:$0xf] %vm686_vm3, %v867_v4  ;;  %717 = vst.msk [vmem:[%s1069_s27 + $0x78] sm:$0xf] %vm686_vm3, %v883_v5  ;;  %v865_v12 = vpack.c.bf16 %v538_v6, %v538_v6  ;;  %v881_v13 = vpack.c.bf16 %v554_v7, %v554_v7  ;;  %v451_v14 = vadd.f32 %v1058_v22, %v450_v10 }
  0xf8   : > { %v515_v15 = vadd.f32 %v1058_v22, %v514_v11  ;;  %v541_v16 = vmax.f32 %v459_v8, 0.0  ;;  %v557_v17 = vmax.f32 %v523_v9, 0.0 }
  0xf9   : > { %699 = vst.msk [vmem:[%s1069_s27 + $0x30] sm:$0xf] %vm686_vm3, %v865_v12  ;;  %715 = vst.msk [vmem:[%s1069_s27 + $0x70] sm:$0xf] %vm686_vm3, %v881_v13  ;;  %v539_v18 = vmax.f32 %v451_v14, 0.0 }
  0xfa   : > { %v555_v19 = vmax.f32 %v515_v15, 0.0  ;;  %v868_v20 = vpack.c.bf16 %v541_v16, %v541_v16  ;;  %v884_v21 = vpack.c.bf16 %v557_v17, %v557_v17 }
  0xfb   : > { %v866_v23 = vpack.c.bf16 %v539_v18, %v539_v18 }
  0xfc   : > { %v882_v24 = vpack.c.bf16 %v555_v19, %v555_v19  ;;  %702 = vst.msk [vmem:[%s1069_s27 + $0x3c] sm:$0xf] %vm686_vm3, %v868_v20  ;;  %718 = vst.msk [vmem:[%s1069_s27 + $0x7c] sm:$0xf] %vm686_vm3, %v884_v21 }
  0xfd   : > { %700 = vst.msk [vmem:[%s1069_s27 + $0x34] sm:$0xf] %vm686_vm3, %v866_v23 }
  0xfe   : > { %716 = vst.msk [vmem:[%s1069_s27 + $0x74] sm:$0xf] %vm686_vm3, %v882_v24 }
  0xff PF: > { %s13_s12 = sadd.s32 1, %s976_s12  }
 0x100   : > { %p10_p4 = scmp.ge.s32.totalorder %s13_s12, 4  }
 0x102   :  { %12 = sbr.rel (!%p10_p4) target bundleno = 1 (0x1), region = 62 }

// kernel: _lambda_.20
= control target key start
LH: loop header
LB: loop body
LE: loop exit
PB: predicated region body
PF: predicated region fallthrough
CT: control target
= control target key end

     0   :  { %s1038_s12 = smov 0   ;;  %s1214_s0 = inlined_call_operand.vmem [shape: bf16[512,72], index: 0, kind: input, shape index: {}]   ;;  %s1215_s1 = inlined_call_operand.vmem [shape: bf16[72,8], index: 1, kind: input, shape index: {}]   ;;  %s1216_s2 = inlined_call_operand.vmem [shape: f32[1,8], index: 2, kind: input, shape index: {}]   ;;  %s1217_s3 = inlined_call_operand.vmem [shape: bf16[512,8], index: 3, kind: output, shape index: {}]  }
   0x1 LB: > { %s793_s13 = sadd.s32 4294967295, %s1016_s12   ;;  %p797_p0 = scmp.ge.s32.totalorder %s1016_s12, 1  ;;  %s1016_s12 = sphi %s1038_s12, %s13_s12  }
   0x2   : > { %p138_p1 = scmp.lt.s32.totalorder %s1016_s12, 3 }
   0x4   : > { %p139_p2 = pnand %p797_p0, %p138_p1 }
   0x5   : > { %s798_s18 = sshll.u32 (!%p139_p2), %s793_s13, 5 }
   0x6   : > { %142 = sbr.rel (%p139_p2) target bundleno = 263 (0x107), region = 32  ;;  %p163_p3 = scmp.lt.s32.totalorder (!%p139_p2), %s798_s18, 63 }
   0xb   : > { %v989_v0 = vld [vmem:[%s1215_s1 + $0x20] ss:$0 sps:$4 sm:$0xff]   ;;  %vm379_vm0 = vcmask 1043456   ;;  %v990_v1 = vld [vmem:[%s1215_s1 + $0x18] sm:$0xff]   ;;  %v991_v3 = vld [vmem:[%s1215_s1 + $0x10] sm:$0xff]   ;;  %s1219_s18 = smov (!%p163_p3, %s798_s18), 63 }
   0xc   : > { %979 = vmatprep.subr.msk.bf16.mxu0 %vm379_vm0, %v989_v0  ;;  %980 = vmatprep.subr.msk.bf16.mxu1 %vm379_vm0, %v989_v0  ;;  %v381_v2 = vsel %vm379_vm0, %v989_v0, 0  ;;  %v992_v4 = vld [vmem:[%s1215_s1 + $0x8] sm:$0xff]   ;;  %s799_s23 = sshll.u32 %s1219_s18, 2  ;;  %vm330_vm1 = vcmask 588800   ;;  %v993_v7 = vld [vmem:[%s1215_s1] sm:$0xff]   ;;  %vm704_vm2 = vcmask 60416  }
   0xd   : > { %928 = vmatpush3.bf16.msra.mxu0 %v381_v2  ;;  %974 = vmatpush3.bf16.msra.mxu1 %v381_v2  ;;  %s1066_s26 = scalar_lea.vmem %s1214_s0, %s799_s23  ;;  %v1106_v22 = vld [vmem:[%s1216_s2] ss:$0 sm:$0xff]  ;;  %s1117_s6 = scalar_lea.vmem %s1217_s3, %s799_s23 }
   0xe   : > { %929 = vmatprep.subr.bf16.mxu0 %v990_v1  ;;  %970 = vmatprep.subr.bf16.mxu1 %v990_v1  ;;  %v994_v5 = vld [vmem:[%s1066_s26] sm:$0xff]   ;;  %v996_v8 = vld [vmem:[%s1066_s26 + $0x8] sm:$0xff]   ;;  %v998_v10 = vld [vmem:[%s1066_s26 + $0x10] sm:$0xff]  }
   0xf   : > { %v995_v6 = vld [vmem:[%s1066_s26 + $0x40] sm:$0xff]   ;;  %937 = vmatprep.mubr.msk.bf16.mxu0 %vm330_vm1, %v994_v5  ;;  %v997_v9 = vld [vmem:[%s1066_s26 + $0x48] sm:$0xff]   ;;  %v999_v11 = vld [vmem:[%s1066_s26 + $0x50] sm:$0xff]  }
  0x10   : > { %953 = vmatprep.mubr.msk.bf16.mxu1 %vm330_vm1, %v995_v6  ;;  %v1000_v12 = vld [vmem:[%s1066_s26 + $0x18] sm:$0xff]   ;;  %v1002_v14 = vld [vmem:[%s1066_s26 + $0x20] sm:$0xff]   ;;  %v1004_v16 = vld [vmem:[%s1066_s26 + $0x28] sm:$0xff]  }
  0x11   : > { %930 = vmatpush3.bf16.msra.mxu0 %v990_v1  ;;  %975 = vmatpush3.bf16.msra.mxu1 %v990_v1  ;;  %v1001_v13 = vld [vmem:[%s1066_s26 + $0x58] sm:$0xff]   ;;  %v1003_v15 = vld [vmem:[%s1066_s26 + $0x60] sm:$0xff]   ;;  %v1005_v17 = vld [vmem:[%s1066_s26 + $0x68] sm:$0xff]  }
  0x12   : > { %931 = vmatprep.subr.bf16.mxu0 %v991_v3  ;;  %971 = vmatprep.subr.bf16.mxu1 %v991_v3  ;;  %v1006_v18 = vld [vmem:[%s1066_s26 + $0x30] sm:$0xff]   ;;  %v1008_v20 = vld [vmem:[%s1066_s26 + $0x38] sm:$0xff]  }
  0x13   : > { %v1007_v19 = vld [vmem:[%s1066_s26 + $0x70] sm:$0xff]   ;;  %v1009_v21 = vld [vmem:[%s1066_s26 + $0x78] sm:$0xff]  }
  0x15   : > { %932 = vmatpush3.bf16.msra.mxu0 %v991_v3  ;;  %976 = vmatpush3.bf16.msra.mxu1 %v991_v3 }
  0x16   : > { %933 = vmatprep.subr.bf16.mxu0 %v992_v4  ;;  %972 = vmatprep.subr.bf16.mxu1 %v992_v4 }
  0x19   : > { %934 = vmatpush3.bf16.msra.mxu0 %v992_v4  ;;  %977 = vmatpush3.bf16.msra.mxu1 %v992_v4 }
  0x1a   : > { %935 = vmatprep.subr.bf16.mxu0 %v993_v7  ;;  %973 = vmatprep.subr.bf16.mxu1 %v993_v7 }
  0x1d   : > { %936 = vmatpush3.bf16.msra.mxu0 %v993_v7  ;;  %978 = vmatpush3.bf16.msra.mxu1 %v993_v7 }
  0x20   : > { %938 = vmatmul.mubr.msk.bf16.vlgmr.msra.gmra.mxu0 %vm330_vm1, %v996_v8  ;;  %954 = vmatmul.mubr.msk.bf16.vlgmr.msra.gmra.mxu1 %vm330_vm1, %v997_v9 }
  0x21   : > { %941 = vmatprep.mubr.msk.bf16.mxu0 %vm330_vm1, %v998_v10  ;;  %957 = vmatprep.mubr.msk.bf16.mxu1 %vm330_vm1, %v999_v11 }
  0x28   : > { %942 = vmatmul.mubr.msk.bf16.gmra.mxu0 %vm330_vm1, %v1000_v12  ;;  %958 = vmatmul.mubr.msk.bf16.gmra.mxu1 %vm330_vm1, %v1001_v13 }
  0x29   : > { %945 = vmatprep.mubr.msk.bf16.mxu0 %vm330_vm1, %v1002_v14  ;;  %961 = vmatprep.mubr.msk.bf16.mxu1 %vm330_vm1, %v1003_v15 }
  0x30   : > { %946 = vmatmul.mubr.msk.bf16.gmra.mxu0 %vm330_vm1, %v1004_v16  ;;  %962 = vmatmul.mubr.msk.bf16.gmra.mxu1 %vm330_vm1, %v1005_v17 }
  0x31   : > { %949 = vmatprep.mubr.msk.bf16.mxu0 %vm330_vm1, %v1006_v18  ;;  %965 = vmatprep.mubr.msk.bf16.mxu1 %vm330_vm1, %v1007_v19 }
  0x38   : > { %950 = vmatmul.mubr.msk.bf16.gmra.mxu0 %vm330_vm1, %v1008_v20  ;;  %966 = vmatmul.mubr.msk.bf16.gmra.mxu1 %vm330_vm1, %v1009_v21 }
  0xe0   : > { %v939_v23 = vpop.f32.mrf.mxu0  ;;  %v955_v24 = vpop.f32.mrf.mxu1 }
  0xe1   : > { %v426_v25 = vadd.f32 %v939_v23, %v1106_v22  ;;  %v490_v26 = vadd.f32 %v955_v24, %v1106_v22 }
  0xe2   : > { %v417_v27 = vpop.f32.mrf.mxu0  ;;  %v481_v28 = vpop.f32.mrf.mxu1 }
  0xe3   : > { %v546_v29 = vmax.f32 %v426_v25, 0.0  ;;  %v562_v30 = vmax.f32 %v490_v26, 0.0  ;;  %v418_v31 = vadd.f32 %v1106_v22, %v417_v27  ;;  %v482_v32 = vadd.f32 %v1106_v22, %v481_v28 }
  0xe4   : > { %v940_v33 = vpop.f32.mrf.mxu0  ;;  %v956_v34 = vpop.f32.mrf.mxu1 }
  0xe5   : > { %v876_v35 = vpack.c.bf16 %v546_v29, %v546_v29  ;;  %v892_v36 = vpack.c.bf16 %v562_v30, %v562_v30  ;;  %v544_v37 = vmax.f32 %v418_v31, 0.0  ;;  %v560_v38 = vmax.f32 %v482_v32, 0.0 }
  0xe6   : > { %v429_v39 = vadd.f32 %v940_v33, %v1106_v22  ;;  %v493_v40 = vadd.f32 %v956_v34, %v1106_v22  ;;  %v420_v41 = vpop.f32.mrf.mxu0  ;;  %v484_v42 = vpop.f32.mrf.mxu1 }
  0xe7   : > { %707 = vst.msk [vmem:[%s1117_s6 + $0x8] sm:$0xf] %vm704_vm2, %v876_v35  ;;  %723 = vst.msk [vmem:[%s1117_s6 + $0x48] sm:$0xf] %vm704_vm2, %v892_v36  ;;  %v874_v43 = vpack.c.bf16 %v544_v37, %v544_v37  ;;  %v890_v44 = vpack.c.bf16 %v560_v38, %v560_v38  ;;  %v421_v45 = vadd.f32 %v1106_v22, %v420_v41 }
  0xe8   : > { %v485_v46 = vadd.f32 %v1106_v22, %v484_v42  ;;  %v547_v47 = vmax.f32 %v429_v39, 0.0  ;;  %v563_v48 = vmax.f32 %v493_v40, 0.0  ;;  %v943_v49 = vpop.f32.mrf.mxu0  ;;  %v959_v50 = vpop.f32.mrf.mxu1 }
  0xe9   : > { %705 = vst.msk [vmem:[%s1117_s6] sm:$0xf] %vm704_vm2, %v874_v43  ;;  %721 = vst.msk [vmem:[%s1117_s6 + $0x40] sm:$0xf] %vm704_vm2, %v890_v44  ;;  %v545_v51 = vmax.f32 %v421_v45, 0.0  ;;  %v442_v53 = vadd.f32 %v943_v49, %v1106_v22  ;;  %v506_v54 = vadd.f32 %v959_v50, %v1106_v22 }
  0xea   : > { %v561_v52 = vmax.f32 %v485_v46, 0.0  ;;  %v877_v55 = vpack.c.bf16 %v547_v47, %v547_v47  ;;  %v893_v56 = vpack.c.bf16 %v563_v48, %v563_v48  ;;  %v433_v57 = vpop.f32.mrf.mxu0  ;;  %v497_v58 = vpop.f32.mrf.mxu1 }
  0xeb   : > { %v875_v59 = vpack.c.bf16 %v545_v51, %v545_v51  ;;  %v550_v61 = vmax.f32 %v442_v53, 0.0  ;;  %v566_v62 = vmax.f32 %v506_v54, 0.0  ;;  %v434_v63 = vadd.f32 %v1106_v22, %v433_v57 }
  0xec   : > { %v891_v60 = vpack.c.bf16 %v561_v52, %v561_v52  ;;  %708 = vst.msk [vmem:[%s1117_s6 + $0xc] sm:$0xf] %vm704_vm2, %v877_v55  ;;  %724 = vst.msk [vmem:[%s1117_s6 + $0x4c] sm:$0xf] %vm704_vm2, %v893_v56  ;;  %v498_v0 = vadd.f32 %v1106_v22, %v497_v58  ;;  %v944_v1 = vpop.f32.mrf.mxu0  ;;  %v960_v2 = vpop.f32.mrf.mxu1 }
  0xed   : > { %706 = vst.msk [vmem:[%s1117_s6 + $0x4] sm:$0xf] %vm704_vm2, %v875_v59  ;;  %v880_v3 = vpack.c.bf16 %v550_v61, %v550_v61  ;;  %v896_v4 = vpack.c.bf16 %v566_v62, %v566_v62  ;;  %v445_v5 = vadd.f32 %v944_v1, %v1106_v22  ;;  %v509_v6 = vadd.f32 %v960_v2, %v1106_v22 }
  0xee   : > { %722 = vst.msk [vmem:[%s1117_s6 + $0x44] sm:$0xf] %vm704_vm2, %v891_v60  ;;  %v548_v7 = vmax.f32 %v434_v63, 0.0  ;;  %v564_v8 = vmax.f32 %v498_v0, 0.0  ;;  %v436_v9 = vpop.f32.mrf.mxu0  ;;  %v500_v10 = vpop.f32.mrf.mxu1 }
  0xef   : > { %711 = vst.msk [vmem:[%s1117_s6 + $0x18] sm:$0xf] %vm704_vm2, %v880_v3  ;;  %727 = vst.msk [vmem:[%s1117_s6 + $0x58] sm:$0xf] %vm704_vm2, %v896_v4  ;;  %v551_v11 = vmax.f32 %v445_v5, 0.0  ;;  %v567_v12 = vmax.f32 %v509_v6, 0.0  ;;  %v437_v13 = vadd.f32 %v1106_v22, %v436_v9  ;;  %v501_v14 = vadd.f32 %v1106_v22, %v500_v10 }
  0xf0   : > { %v878_v15 = vpack.c.bf16 %v548_v7, %v548_v7  ;;  %v894_v16 = vpack.c.bf16 %v564_v8, %v564_v8  ;;  %v947_v17 = vpop.f32.mrf.mxu0  ;;  %v963_v18 = vpop.f32.mrf.mxu1 }
  0xf1   : > { %v881_v19 = vpack.c.bf16 %v551_v11, %v551_v11  ;;  %v897_v20 = vpack.c.bf16 %v567_v12, %v567_v12  ;;  %v549_v21 = vmax.f32 %v437_v13, 0.0  ;;  %v565_v23 = vmax.f32 %v501_v14, 0.0 }
  0xf2   : > { %709 = vst.msk [vmem:[%s1117_s6 + $0x10] sm:$0xf] %vm704_vm2, %v878_v15  ;;  %725 = vst.msk [vmem:[%s1117_s6 + $0x50] sm:$0xf] %vm704_vm2, %v894_v16  ;;  %v458_v24 = vadd.f32 %v947_v17, %v1106_v22  ;;  %v522_v25 = vadd.f32 %v963_v18, %v1106_v22  ;;  %v449_v26 = vpop.f32.mrf.mxu0  ;;  %v513_v27 = vpop.f32.mrf.mxu1 }
  0xf3   : > { %712 = vst.msk [vmem:[%s1117_s6 + $0x1c] sm:$0xf] %vm704_vm2, %v881_v19  ;;  %728 = vst.msk [vmem:[%s1117_s6 + $0x5c] sm:$0xf] %vm704_vm2, %v897_v20  ;;  %v879_v28 = vpack.c.bf16 %v549_v21, %v549_v21  ;;  %v895_v29 = vpack.c.bf16 %v565_v23, %v565_v23  ;;  %v450_v30 = vadd.f32 %v1106_v22, %v449_v26 }
  0xf4   : > { %v514_v31 = vadd.f32 %v1106_v22, %v513_v27  ;;  %v554_v32 = vmax.f32 %v458_v24, 0.0  ;;  %v570_v33 = vmax.f32 %v522_v25, 0.0  ;;  %v948_v34 = vpop.f32.mrf.mxu0  ;;  %v964_v35 = vpop.f32.mrf.mxu1 }
  0xf5   : > { %710 = vst.msk [vmem:[%s1117_s6 + $0x14] sm:$0xf] %vm704_vm2, %v879_v28  ;;  %726 = vst.msk [vmem:[%s1117_s6 + $0x54] sm:$0xf] %vm704_vm2, %v895_v29  ;;  %v552_v36 = vmax.f32 %v450_v30, 0.0  ;;  %v461_v38 = vadd.f32 %v948_v34, %v1106_v22  ;;  %v525_v39 = vadd.f32 %v964_v35, %v1106_v22 }
  0xf6   : > { %v568_v37 = vmax.f32 %v514_v31, 0.0  ;;  %v884_v40 = vpack.c.bf16 %v554_v32, %v554_v32  ;;  %v900_v41 = vpack.c.bf16 %v570_v33, %v570_v33  ;;  %v452_v42 = vpop.f32.mrf.mxu0  ;;  %v516_v43 = vpop.f32.mrf.mxu1 }
  0xf7   : > { %v882_v44 = vpack.c.bf16 %v552_v36, %v552_v36  ;;  %v555_v46 = vmax.f32 %v461_v38, 0.0  ;;  %v571_v47 = vmax.f32 %v525_v39, 0.0  ;;  %v453_v48 = vadd.f32 %v1106_v22, %v452_v42 }
  0xf8   : > { %v898_v45 = vpack.c.bf16 %v568_v37, %v568_v37  ;;  %715 = vst.msk [vmem:[%s1117_s6 + $0x28] sm:$0xf] %vm704_vm2, %v884_v40  ;;  %731 = vst.msk [vmem:[%s1117_s6 + $0x68] sm:$0xf] %vm704_vm2, %v900_v41  ;;  %v517_v49 = vadd.f32 %v1106_v22, %v516_v43  ;;  %v951_v50 = vpop.f32.mrf.mxu0  ;;  %v967_v51 = vpop.f32.mrf.mxu1 }
  0xf9   : > { %713 = vst.msk [vmem:[%s1117_s6 + $0x20] sm:$0xf] %vm704_vm2, %v882_v44  ;;  %v885_v52 = vpack.c.bf16 %v555_v46, %v555_v46  ;;  %v901_v53 = vpack.c.bf16 %v571_v47, %v571_v47  ;;  %v474_v54 = vadd.f32 %v951_v50, %v1106_v22  ;;  %v538_v55 = vadd.f32 %v967_v51, %v1106_v22 }
  0xfa   : > { %729 = vst.msk [vmem:[%s1117_s6 + $0x60] sm:$0xf] %vm704_vm2, %v898_v45  ;;  %v553_v56 = vmax.f32 %v453_v48, 0.0  ;;  %v569_v57 = vmax.f32 %v517_v49, 0.0  ;;  %v465_v58 = vpop.f32.mrf.mxu0  ;;  %v529_v59 = vpop.f32.mrf.mxu1 }
  0xfb   : > { %716 = vst.msk [vmem:[%s1117_s6 + $0x2c] sm:$0xf] %vm704_vm2, %v885_v52  ;;  %732 = vst.msk [vmem:[%s1117_s6 + $0x6c] sm:$0xf] %vm704_vm2, %v901_v53  ;;  %v558_v60 = vmax.f32 %v474_v54, 0.0  ;;  %v574_v61 = vmax.f32 %v538_v55, 0.0  ;;  %v466_v62 = vadd.f32 %v1106_v22, %v465_v58  ;;  %v530_v63 = vadd.f32 %v1106_v22, %v529_v59 }
  0xfc   : > { %v883_v0 = vpack.c.bf16 %v553_v56, %v553_v56  ;;  %v899_v1 = vpack.c.bf16 %v569_v57, %v569_v57  ;;  %v952_v2 = vpop.f32.mrf.mxu0  ;;  %v968_v3 = vpop.f32.mrf.mxu1 }
  0xfd   : > { %v888_v4 = vpack.c.bf16 %v558_v60, %v558_v60  ;;  %v904_v5 = vpack.c.bf16 %v574_v61, %v574_v61  ;;  %v556_v6 = vmax.f32 %v466_v62, 0.0  ;;  %v572_v7 = vmax.f32 %v530_v63, 0.0 }
  0xfe   : > { %714 = vst.msk [vmem:[%s1117_s6 + $0x24] sm:$0xf] %vm704_vm2, %v883_v0  ;;  %730 = vst.msk [vmem:[%s1117_s6 + $0x64] sm:$0xf] %vm704_vm2, %v899_v1  ;;  %v477_v8 = vadd.f32 %v952_v2, %v1106_v22  ;;  %v541_v9 = vadd.f32 %v968_v3, %v1106_v22  ;;  %v468_v10 = vpop.f32.mrf.mxu0  ;;  %v532_v11 = vpop.f32.mrf.mxu1 }
  0xff   : > { %719 = vst.msk [vmem:[%s1117_s6 + $0x38] sm:$0xf] %vm704_vm2, %v888_v4  ;;  %735 = vst.msk [vmem:[%s1117_s6 + $0x78] sm:$0xf] %vm704_vm2, %v904_v5  ;;  %v886_v12 = vpack.c.bf16 %v556_v6, %v556_v6  ;;  %v902_v13 = vpack.c.bf16 %v572_v7, %v572_v7  ;;  %v469_v14 = vadd.f32 %v1106_v22, %v468_v10 }
 0x100   : > { %v533_v15 = vadd.f32 %v1106_v22, %v532_v11  ;;  %v559_v16 = vmax.f32 %v477_v8, 0.0  ;;  %v575_v17 = vmax.f32 %v541_v9, 0.0 }
 0x101   : > { %717 = vst.msk [vmem:[%s1117_s6 + $0x30] sm:$0xf] %vm704_vm2, %v886_v12  ;;  %733 = vst.msk [vmem:[%s1117_s6 + $0x70] sm:$0xf] %vm704_vm2, %v902_v13  ;;  %v557_v18 = vmax.f32 %v469_v14, 0.0 }
 0x102   : > { %v573_v19 = vmax.f32 %v533_v15, 0.0  ;;  %v889_v20 = vpack.c.bf16 %v559_v16, %v559_v16  ;;  %v905_v21 = vpack.c.bf16 %v575_v17, %v575_v17 }
 0x103   : > { %v887_v23 = vpack.c.bf16 %v557_v18, %v557_v18 }
 0x104   : > { %v903_v24 = vpack.c.bf16 %v573_v19, %v573_v19  ;;  %720 = vst.msk [vmem:[%s1117_s6 + $0x3c] sm:$0xf] %vm704_vm2, %v889_v20  ;;  %736 = vst.msk [vmem:[%s1117_s6 + $0x7c] sm:$0xf] %vm704_vm2, %v905_v21 }
 0x105   : > { %718 = vst.msk [vmem:[%s1117_s6 + $0x34] sm:$0xf] %vm704_vm2, %v887_v23 }
 0x106   : > { %734 = vst.msk [vmem:[%s1117_s6 + $0x74] sm:$0xf] %vm704_vm2, %v903_v24 }
 0x107 PF: > { %s13_s12 = sadd.s32 1, %s1016_s12  }
 0x108   : > { %p10_p4 = scmp.ge.s32.totalorder %s13_s12, 4  }
 0x10a   :  { %12 = sbr.rel (!%p10_p4) target bundleno = 1 (0x1), region = 62 }

// kernel: _lambda_.21
= control target key start
LH: loop header
LB: loop body
LE: loop exit
PB: predicated region body
PF: predicated region fallthrough
CT: control target
= control target key end

     0   :  { %s1038_s12 = smov 0   ;;  %s1214_s0 = inlined_call_operand.vmem [shape: bf16[512,72], index: 0, kind: input, shape index: {}]   ;;  %s1215_s1 = inlined_call_operand.vmem [shape: bf16[72,16], index: 1, kind: input, shape index: {}]   ;;  %s1216_s2 = inlined_call_operand.vmem [shape: f32[1,16], index: 2, kind: input, shape index: {}]   ;;  %s1217_s3 = inlined_call_operand.vmem [shape: bf16[512,16], index: 3, kind: output, shape index: {}]  }
   0x1 LB: > { %s793_s13 = sadd.s32 4294967295, %s1016_s12   ;;  %p797_p0 = scmp.ge.s32.totalorder %s1016_s12, 1  ;;  %s1016_s12 = sphi %s1038_s12, %s13_s12  }
   0x2   : > { %p138_p1 = scmp.lt.s32.totalorder %s1016_s12, 3 }
   0x4   : > { %p139_p2 = pnand %p797_p0, %p138_p1 }
   0x5   : > { %s798_s18 = sshll.u32 (!%p139_p2), %s793_s13, 5 }
   0x6   : > { %142 = sbr.rel (%p139_p2) target bundleno = 263 (0x107), region = 32  ;;  %p163_p3 = scmp.lt.s32.totalorder (!%p139_p2), %s798_s18, 63 }
   0xb   : > { %v989_v0 = vld [vmem:[%s1215_s1 + $0x20] ss:$0 sps:$4 sm:$0xff]   ;;  %vm379_vm0 = vcmask 1043456   ;;  %v990_v1 = vld [vmem:[%s1215_s1 + $0x18] sm:$0xff]   ;;  %v991_v3 = vld [vmem:[%s1215_s1 + $0x10] sm:$0xff]   ;;  %s1219_s18 = smov (!%p163_p3, %s798_s18), 63 }
   0xc   : > { %979 = vmatprep.subr.msk.bf16.mxu0 %vm379_vm0, %v989_v0  ;;  %980 = vmatprep.subr.msk.bf16.mxu1 %vm379_vm0, %v989_v0  ;;  %v381_v2 = vsel %vm379_vm0, %v989_v0, 0  ;;  %v992_v4 = vld [vmem:[%s1215_s1 + $0x8] sm:$0xff]   ;;  %s799_s23 = sshll.u32 %s1219_s18, 2  ;;  %vm330_vm1 = vcmask 588800   ;;  %v993_v7 = vld [vmem:[%s1215_s1] sm:$0xff]   ;;  %vm704_vm2 = vcmask 125952  }
   0xd   : > { %928 = vmatpush3.bf16.msra.mxu0 %v381_v2  ;;  %974 = vmatpush3.bf16.msra.mxu1 %v381_v2  ;;  %s1066_s26 = scalar_lea.vmem %s1214_s0, %s799_s23  ;;  %v1106_v22 = vld [vmem:[%s1216_s2] ss:$0 sm:$0xff]  ;;  %s1117_s6 = scalar_lea.vmem %s1217_s3, %s799_s23 }
   0xe   : > { %929 = vmatprep.subr.bf16.mxu0 %v990_v1  ;;  %970 = vmatprep.subr.bf16.mxu1 %v990_v1  ;;  %v994_v5 = vld [vmem:[%s1066_s26] sm:$0xff]   ;;  %v996_v8 = vld [vmem:[%s1066_s26 + $0x8] sm:$0xff]   ;;  %v998_v10 = vld [vmem:[%s1066_s26 + $0x10] sm:$0xff]  }
   0xf   : > { %v995_v6 = vld [vmem:[%s1066_s26 + $0x40] sm:$0xff]   ;;  %937 = vmatprep.mubr.msk.bf16.mxu0 %vm330_vm1, %v994_v5  ;;  %v997_v9 = vld [vmem:[%s1066_s26 + $0x48] sm:$0xff]   ;;  %v999_v11 = vld [vmem:[%s1066_s26 + $0x50] sm:$0xff]  }
  0x10   : > { %953 = vmatprep.mubr.msk.bf16.mxu1 %vm330_vm1, %v995_v6  ;;  %v1000_v12 = vld [vmem:[%s1066_s26 + $0x18] sm:$0xff]   ;;  %v1002_v14 = vld [vmem:[%s1066_s26 + $0x20] sm:$0xff]   ;;  %v1004_v16 = vld [vmem:[%s1066_s26 + $0x28] sm:$0xff]  }
  0x11   : > { %930 = vmatpush3.bf16.msra.mxu0 %v990_v1  ;;  %975 = vmatpush3.bf16.msra.mxu1 %v990_v1  ;;  %v1001_v13 = vld [vmem:[%s1066_s26 + $0x58] sm:$0xff]   ;;  %v1003_v15 = vld [vmem:[%s1066_s26 + $0x60] sm:$0xff]   ;;  %v1005_v17 = vld [vmem:[%s1066_s26 + $0x68] sm:$0xff]  }
  0x12   : > { %931 = vmatprep.subr.bf16.mxu0 %v991_v3  ;;  %971 = vmatprep.subr.bf16.mxu1 %v991_v3  ;;  %v1006_v18 = vld [vmem:[%s1066_s26 + $0x30] sm:$0xff]   ;;  %v1008_v20 = vld [vmem:[%s1066_s26 + $0x38] sm:$0xff]  }
  0x13   : > { %v1007_v19 = vld [vmem:[%s1066_s26 + $0x70] sm:$0xff]   ;;  %v1009_v21 = vld [vmem:[%s1066_s26 + $0x78] sm:$0xff]  }
  0x15   : > { %932 = vmatpush3.bf16.msra.mxu0 %v991_v3  ;;  %976 = vmatpush3.bf16.msra.mxu1 %v991_v3 }
  0x16   : > { %933 = vmatprep.subr.bf16.mxu0 %v992_v4  ;;  %972 = vmatprep.subr.bf16.mxu1 %v992_v4 }
  0x19   : > { %934 = vmatpush3.bf16.msra.mxu0 %v992_v4  ;;  %977 = vmatpush3.bf16.msra.mxu1 %v992_v4 }
  0x1a   : > { %935 = vmatprep.subr.bf16.mxu0 %v993_v7  ;;  %973 = vmatprep.subr.bf16.mxu1 %v993_v7 }
  0x1d   : > { %936 = vmatpush3.bf16.msra.mxu0 %v993_v7  ;;  %978 = vmatpush3.bf16.msra.mxu1 %v993_v7 }
  0x20   : > { %938 = vmatmul.mubr.msk.bf16.vlgmr.msra.gmra.mxu0 %vm330_vm1, %v996_v8  ;;  %954 = vmatmul.mubr.msk.bf16.vlgmr.msra.gmra.mxu1 %vm330_vm1, %v997_v9 }
  0x21   : > { %941 = vmatprep.mubr.msk.bf16.mxu0 %vm330_vm1, %v998_v10  ;;  %957 = vmatprep.mubr.msk.bf16.mxu1 %vm330_vm1, %v999_v11 }
  0x28   : > { %942 = vmatmul.mubr.msk.bf16.gmra.mxu0 %vm330_vm1, %v1000_v12  ;;  %958 = vmatmul.mubr.msk.bf16.gmra.mxu1 %vm330_vm1, %v1001_v13 }
  0x29   : > { %945 = vmatprep.mubr.msk.bf16.mxu0 %vm330_vm1, %v1002_v14  ;;  %961 = vmatprep.mubr.msk.bf16.mxu1 %vm330_vm1, %v1003_v15 }
  0x30   : > { %946 = vmatmul.mubr.msk.bf16.gmra.mxu0 %vm330_vm1, %v1004_v16  ;;  %962 = vmatmul.mubr.msk.bf16.gmra.mxu1 %vm330_vm1, %v1005_v17 }
  0x31   : > { %949 = vmatprep.mubr.msk.bf16.mxu0 %vm330_vm1, %v1006_v18  ;;  %965 = vmatprep.mubr.msk.bf16.mxu1 %vm330_vm1, %v1007_v19 }
  0x38   : > { %950 = vmatmul.mubr.msk.bf16.gmra.mxu0 %vm330_vm1, %v1008_v20  ;;  %966 = vmatmul.mubr.msk.bf16.gmra.mxu1 %vm330_vm1, %v1009_v21 }
  0xe0   : > { %v939_v23 = vpop.f32.mrf.mxu0  ;;  %v955_v24 = vpop.f32.mrf.mxu1 }
  0xe1   : > { %v426_v25 = vadd.f32 %v939_v23, %v1106_v22  ;;  %v490_v26 = vadd.f32 %v955_v24, %v1106_v22 }
  0xe2   : > { %v417_v27 = vpop.f32.mrf.mxu0  ;;  %v481_v28 = vpop.f32.mrf.mxu1 }
  0xe3   : > { %v546_v29 = vmax.f32 %v426_v25, 0.0  ;;  %v562_v30 = vmax.f32 %v490_v26, 0.0  ;;  %v418_v31 = vadd.f32 %v1106_v22, %v417_v27  ;;  %v482_v32 = vadd.f32 %v1106_v22, %v481_v28 }
  0xe4   : > { %v940_v33 = vpop.f32.mrf.mxu0  ;;  %v956_v34 = vpop.f32.mrf.mxu1 }
  0xe5   : > { %v876_v35 = vpack.c.bf16 %v546_v29, %v546_v29  ;;  %v892_v36 = vpack.c.bf16 %v562_v30, %v562_v30  ;;  %v544_v37 = vmax.f32 %v418_v31, 0.0  ;;  %v560_v38 = vmax.f32 %v482_v32, 0.0 }
  0xe6   : > { %v429_v39 = vadd.f32 %v940_v33, %v1106_v22  ;;  %v493_v40 = vadd.f32 %v956_v34, %v1106_v22  ;;  %v420_v41 = vpop.f32.mrf.mxu0  ;;  %v484_v42 = vpop.f32.mrf.mxu1 }
  0xe7   : > { %707 = vst.msk [vmem:[%s1117_s6 + $0x8] sm:$0xf] %vm704_vm2, %v876_v35  ;;  %723 = vst.msk [vmem:[%s1117_s6 + $0x48] sm:$0xf] %vm704_vm2, %v892_v36  ;;  %v874_v43 = vpack.c.bf16 %v544_v37, %v544_v37  ;;  %v890_v44 = vpack.c.bf16 %v560_v38, %v560_v38  ;;  %v421_v45 = vadd.f32 %v1106_v22, %v420_v41 }
  0xe8   : > { %v485_v46 = vadd.f32 %v1106_v22, %v484_v42  ;;  %v547_v47 = vmax.f32 %v429_v39, 0.0  ;;  %v563_v48 = vmax.f32 %v493_v40, 0.0  ;;  %v943_v49 = vpop.f32.mrf.mxu0  ;;  %v959_v50 = vpop.f32.mrf.mxu1 }
  0xe9   : > { %705 = vst.msk [vmem:[%s1117_s6] sm:$0xf] %vm704_vm2, %v874_v43  ;;  %721 = vst.msk [vmem:[%s1117_s6 + $0x40] sm:$0xf] %vm704_vm2, %v890_v44  ;;  %v545_v51 = vmax.f32 %v421_v45, 0.0  ;;  %v442_v53 = vadd.f32 %v943_v49, %v1106_v22  ;;  %v506_v54 = vadd.f32 %v959_v50, %v1106_v22 }
  0xea   : > { %v561_v52 = vmax.f32 %v485_v46, 0.0  ;;  %v877_v55 = vpack.c.bf16 %v547_v47, %v547_v47  ;;  %v893_v56 = vpack.c.bf16 %v563_v48, %v563_v48  ;;  %v433_v57 = vpop.f32.mrf.mxu0  ;;  %v497_v58 = vpop.f32.mrf.mxu1 }
  0xeb   : > { %v875_v59 = vpack.c.bf16 %v545_v51, %v545_v51  ;;  %v550_v61 = vmax.f32 %v442_v53, 0.0  ;;  %v566_v62 = vmax.f32 %v506_v54, 0.0  ;;  %v434_v63 = vadd.f32 %v1106_v22, %v433_v57 }
  0xec   : > { %v891_v60 = vpack.c.bf16 %v561_v52, %v561_v52  ;;  %708 = vst.msk [vmem:[%s1117_s6 + $0xc] sm:$0xf] %vm704_vm2, %v877_v55  ;;  %724 = vst.msk [vmem:[%s1117_s6 + $0x4c] sm:$0xf] %vm704_vm2, %v893_v56  ;;  %v498_v0 = vadd.f32 %v1106_v22, %v497_v58  ;;  %v944_v1 = vpop.f32.mrf.mxu0  ;;  %v960_v2 = vpop.f32.mrf.mxu1 }
  0xed   : > { %706 = vst.msk [vmem:[%s1117_s6 + $0x4] sm:$0xf] %vm704_vm2, %v875_v59  ;;  %v880_v3 = vpack.c.bf16 %v550_v61, %v550_v61  ;;  %v896_v4 = vpack.c.bf16 %v566_v62, %v566_v62  ;;  %v445_v5 = vadd.f32 %v944_v1, %v1106_v22  ;;  %v509_v6 = vadd.f32 %v960_v2, %v1106_v22 }
  0xee   : > { %722 = vst.msk [vmem:[%s1117_s6 + $0x44] sm:$0xf] %vm704_vm2, %v891_v60  ;;  %v548_v7 = vmax.f32 %v434_v63, 0.0  ;;  %v564_v8 = vmax.f32 %v498_v0, 0.0  ;;  %v436_v9 = vpop.f32.mrf.mxu0  ;;  %v500_v10 = vpop.f32.mrf.mxu1 }
  0xef   : > { %711 = vst.msk [vmem:[%s1117_s6 + $0x18] sm:$0xf] %vm704_vm2, %v880_v3  ;;  %727 = vst.msk [vmem:[%s1117_s6 + $0x58] sm:$0xf] %vm704_vm2, %v896_v4  ;;  %v551_v11 = vmax.f32 %v445_v5, 0.0  ;;  %v567_v12 = vmax.f32 %v509_v6, 0.0  ;;  %v437_v13 = vadd.f32 %v1106_v22, %v436_v9  ;;  %v501_v14 = vadd.f32 %v1106_v22, %v500_v10 }
  0xf0   : > { %v878_v15 = vpack.c.bf16 %v548_v7, %v548_v7  ;;  %v894_v16 = vpack.c.bf16 %v564_v8, %v564_v8  ;;  %v947_v17 = vpop.f32.mrf.mxu0  ;;  %v963_v18 = vpop.f32.mrf.mxu1 }
  0xf1   : > { %v881_v19 = vpack.c.bf16 %v551_v11, %v551_v11  ;;  %v897_v20 = vpack.c.bf16 %v567_v12, %v567_v12  ;;  %v549_v21 = vmax.f32 %v437_v13, 0.0  ;;  %v565_v23 = vmax.f32 %v501_v14, 0.0 }
  0xf2   : > { %709 = vst.msk [vmem:[%s1117_s6 + $0x10] sm:$0xf] %vm704_vm2, %v878_v15  ;;  %725 = vst.msk [vmem:[%s1117_s6 + $0x50] sm:$0xf] %vm704_vm2, %v894_v16  ;;  %v458_v24 = vadd.f32 %v947_v17, %v1106_v22  ;;  %v522_v25 = vadd.f32 %v963_v18, %v1106_v22  ;;  %v449_v26 = vpop.f32.mrf.mxu0  ;;  %v513_v27 = vpop.f32.mrf.mxu1 }
  0xf3   : > { %712 = vst.msk [vmem:[%s1117_s6 + $0x1c] sm:$0xf] %vm704_vm2, %v881_v19  ;;  %728 = vst.msk [vmem:[%s1117_s6 + $0x5c] sm:$0xf] %vm704_vm2, %v897_v20  ;;  %v879_v28 = vpack.c.bf16 %v549_v21, %v549_v21  ;;  %v895_v29 = vpack.c.bf16 %v565_v23, %v565_v23  ;;  %v450_v30 = vadd.f32 %v1106_v22, %v449_v26 }
  0xf4   : > { %v514_v31 = vadd.f32 %v1106_v22, %v513_v27  ;;  %v554_v32 = vmax.f32 %v458_v24, 0.0  ;;  %v570_v33 = vmax.f32 %v522_v25, 0.0  ;;  %v948_v34 = vpop.f32.mrf.mxu0  ;;  %v964_v35 = vpop.f32.mrf.mxu1 }
  0xf5   : > { %710 = vst.msk [vmem:[%s1117_s6 + $0x14] sm:$0xf] %vm704_vm2, %v879_v28  ;;  %726 = vst.msk [vmem:[%s1117_s6 + $0x54] sm:$0xf] %vm704_vm2, %v895_v29  ;;  %v552_v36 = vmax.f32 %v450_v30, 0.0  ;;  %v461_v38 = vadd.f32 %v948_v34, %v1106_v22  ;;  %v525_v39 = vadd.f32 %v964_v35, %v1106_v22 }
  0xf6   : > { %v568_v37 = vmax.f32 %v514_v31, 0.0  ;;  %v884_v40 = vpack.c.bf16 %v554_v32, %v554_v32  ;;  %v900_v41 = vpack.c.bf16 %v570_v33, %v570_v33  ;;  %v452_v42 = vpop.f32.mrf.mxu0  ;;  %v516_v43 = vpop.f32.mrf.mxu1 }
  0xf7   : > { %v882_v44 = vpack.c.bf16 %v552_v36, %v552_v36  ;;  %v555_v46 = vmax.f32 %v461_v38, 0.0  ;;  %v571_v47 = vmax.f32 %v525_v39, 0.0  ;;  %v453_v48 = vadd.f32 %v1106_v22, %v452_v42 }
  0xf8   : > { %v898_v45 = vpack.c.bf16 %v568_v37, %v568_v37  ;;  %715 = vst.msk [vmem:[%s1117_s6 + $0x28] sm:$0xf] %vm704_vm2, %v884_v40  ;;  %731 = vst.msk [vmem:[%s1117_s6 + $0x68] sm:$0xf] %vm704_vm2, %v900_v41  ;;  %v517_v49 = vadd.f32 %v1106_v22, %v516_v43  ;;  %v951_v50 = vpop.f32.mrf.mxu0  ;;  %v967_v51 = vpop.f32.mrf.mxu1 }
  0xf9   : > { %713 = vst.msk [vmem:[%s1117_s6 + $0x20] sm:$0xf] %vm704_vm2, %v882_v44  ;;  %v885_v52 = vpack.c.bf16 %v555_v46, %v555_v46  ;;  %v901_v53 = vpack.c.bf16 %v571_v47, %v571_v47  ;;  %v474_v54 = vadd.f32 %v951_v50, %v1106_v22  ;;  %v538_v55 = vadd.f32 %v967_v51, %v1106_v22 }
  0xfa   : > { %729 = vst.msk [vmem:[%s1117_s6 + $0x60] sm:$0xf] %vm704_vm2, %v898_v45  ;;  %v553_v56 = vmax.f32 %v453_v48, 0.0  ;;  %v569_v57 = vmax.f32 %v517_v49, 0.0  ;;  %v465_v58 = vpop.f32.mrf.mxu0  ;;  %v529_v59 = vpop.f32.mrf.mxu1 }
  0xfb   : > { %716 = vst.msk [vmem:[%s1117_s6 + $0x2c] sm:$0xf] %vm704_vm2, %v885_v52  ;;  %732 = vst.msk [vmem:[%s1117_s6 + $0x6c] sm:$0xf] %vm704_vm2, %v901_v53  ;;  %v558_v60 = vmax.f32 %v474_v54, 0.0  ;;  %v574_v61 = vmax.f32 %v538_v55, 0.0  ;;  %v466_v62 = vadd.f32 %v1106_v22, %v465_v58  ;;  %v530_v63 = vadd.f32 %v1106_v22, %v529_v59 }
  0xfc   : > { %v883_v0 = vpack.c.bf16 %v553_v56, %v553_v56  ;;  %v899_v1 = vpack.c.bf16 %v569_v57, %v569_v57  ;;  %v952_v2 = vpop.f32.mrf.mxu0  ;;  %v968_v3 = vpop.f32.mrf.mxu1 }
  0xfd   : > { %v888_v4 = vpack.c.bf16 %v558_v60, %v558_v60  ;;  %v904_v5 = vpack.c.bf16 %v574_v61, %v574_v61  ;;  %v556_v6 = vmax.f32 %v466_v62, 0.0  ;;  %v572_v7 = vmax.f32 %v530_v63, 0.0 }
  0xfe   : > { %714 = vst.msk [vmem:[%s1117_s6 + $0x24] sm:$0xf] %vm704_vm2, %v883_v0  ;;  %730 = vst.msk [vmem:[%s1117_s6 + $0x64] sm:$0xf] %vm704_vm2, %v899_v1  ;;  %v477_v8 = vadd.f32 %v952_v2, %v1106_v22  ;;  %v541_v9 = vadd.f32 %v968_v3, %v1106_v22  ;;  %v468_v10 = vpop.f32.mrf.mxu0  ;;  %v532_v11 = vpop.f32.mrf.mxu1 }
  0xff   : > { %719 = vst.msk [vmem:[%s1117_s6 + $0x38] sm:$0xf] %vm704_vm2, %v888_v4  ;;  %735 = vst.msk [vmem:[%s1117_s6 + $0x78] sm:$0xf] %vm704_vm2, %v904_v5  ;;  %v886_v12 = vpack.c.bf16 %v556_v6, %v556_v6  ;;  %v902_v13 = vpack.c.bf16 %v572_v7, %v572_v7  ;;  %v469_v14 = vadd.f32 %v1106_v22, %v468_v10 }
 0x100   : > { %v533_v15 = vadd.f32 %v1106_v22, %v532_v11  ;;  %v559_v16 = vmax.f32 %v477_v8, 0.0  ;;  %v575_v17 = vmax.f32 %v541_v9, 0.0 }
 0x101   : > { %717 = vst.msk [vmem:[%s1117_s6 + $0x30] sm:$0xf] %vm704_vm2, %v886_v12  ;;  %733 = vst.msk [vmem:[%s1117_s6 + $0x70] sm:$0xf] %vm704_vm2, %v902_v13  ;;  %v557_v18 = vmax.f32 %v469_v14, 0.0 }
 0x102   : > { %v573_v19 = vmax.f32 %v533_v15, 0.0  ;;  %v889_v20 = vpack.c.bf16 %v559_v16, %v559_v16  ;;  %v905_v21 = vpack.c.bf16 %v575_v17, %v575_v17 }
 0x103   : > { %v887_v23 = vpack.c.bf16 %v557_v18, %v557_v18 }
 0x104   : > { %v903_v24 = vpack.c.bf16 %v573_v19, %v573_v19  ;;  %720 = vst.msk [vmem:[%s1117_s6 + $0x3c] sm:$0xf] %vm704_vm2, %v889_v20  ;;  %736 = vst.msk [vmem:[%s1117_s6 + $0x7c] sm:$0xf] %vm704_vm2, %v905_v21 }
 0x105   : > { %718 = vst.msk [vmem:[%s1117_s6 + $0x34] sm:$0xf] %vm704_vm2, %v887_v23 }
 0x106   : > { %734 = vst.msk [vmem:[%s1117_s6 + $0x74] sm:$0xf] %vm704_vm2, %v903_v24 }
 0x107 PF: > { %s13_s12 = sadd.s32 1, %s1016_s12  }
 0x108   : > { %p10_p4 = scmp.ge.s32.totalorder %s13_s12, 4  }
 0x10a   :  { %12 = sbr.rel (!%p10_p4) target bundleno = 1 (0x1), region = 62 }

// kernel: _lambda_.22
= control target key start
LH: loop header
LB: loop body
LE: loop exit
PB: predicated region body
PF: predicated region fallthrough
CT: control target
= control target key end

     0   :  { %s496_s12 = smov 0   ;;  %s537_s0 = inlined_call_operand.vmem [shape: bf16[128,16], index: 0, kind: input, shape index: {}]   ;;  %s538_s1 = inlined_call_operand.vmem [shape: bf16[16,8], index: 1, kind: input, shape index: {}]   ;;  %s539_s2 = inlined_call_operand.vmem [shape: f32[1,8], index: 2, kind: input, shape index: {}]   ;;  %s540_s3 = inlined_call_operand.vmem [shape: bf16[128,8], index: 3, kind: output, shape index: {}]  }
   0x1 LB: > { %s401_s13 = sadd.s32 4294967295, %s474_s12   ;;  %p405_p0 = scmp.ge.s32.totalorder %s474_s12, 1  ;;  %s474_s12 = sphi %s496_s12, %s13_s12  }
   0x2   : > { %p138_p1 = scmp.lt.s32.totalorder %s474_s12, 3 }
   0x4   : > { %p139_p2 = pnand %p405_p0, %p138_p1 }
   0x5   : > { %s406_s16 = sshll.u32 (!%p139_p2), %s401_s13, 3 }
   0x6   : > { %142 = sbr.rel (%p139_p2) target bundleno = 222 (0xde), region = 32  ;;  %p163_p3 = scmp.lt.s32.totalorder (!%p139_p2), %s406_s16, 15 }
   0xb   : > { %v463_v0 = vld [vmem:[%s538_s1] sm:$0xff]   ;;  %s542_s16 = smov (!%p163_p3, %s406_s16), 15  ;;  %vm218_vm0 = vcmask 130048   ;;  %vm336_vm1 = vcmask 60416  }
   0xc   : > { %443 = vmatprep.subr.bf16.mxu0 %v463_v0  ;;  %453 = vmatprep.subr.bf16.mxu1 %v463_v0  ;;  %s407_s17 = sshll.u32 %s542_s16, 2  ;;  %v410_v5 = vld [vmem:[%s539_s2] ss:$0 sm:$0xff] }
   0xd   : > { %444 = vmatpush3.bf16.msra.mxu0 %v463_v0  ;;  %454 = vmatpush3.bf16.msra.mxu1 %v463_v0  ;;  %s166_s20 = scalar_lea.vmem %s537_s0, %s407_s17  ;;  %s516_s25 = scalar_lea.vmem %s540_s3, %s407_s17 }
   0xe   : > { %v464_v1 = vld [vmem:[%s166_s20] sm:$0xff]   ;;  %v465_v2 = vld [vmem:[%s166_s20 + $0x10] sm:$0xff]   ;;  %v466_v3 = vld [vmem:[%s166_s20 + $0x8] sm:$0xff]  }
   0xf   : > { %445 = vmatprep.mubr.msk.bf16.mxu0 %vm218_vm0, %v464_v1  ;;  %449 = vmatprep.mubr.msk.bf16.mxu1 %vm218_vm0, %v465_v2  ;;  %v467_v4 = vld [vmem:[%s166_s20 + $0x18] sm:$0xff]  }
  0x10   : > { %446 = vmatmul.mubr.msk.bf16.vlgmr.msra.gmra.mxu0 %vm218_vm0, %v466_v3  ;;  %450 = vmatmul.mubr.msk.bf16.vlgmr.msra.gmra.mxu1 %vm218_vm0, %v467_v4 }
  0xd0   : > { %v447_v6 = vpop.f32.mrf.mxu0  ;;  %v451_v8 = vpop.f32.mrf.mxu1 }
  0xd1   : > { %v274_v7 = vadd.f32 %v447_v6, %v410_v5  ;;  %v290_v9 = vadd.f32 %v451_v8, %v410_v5 }
  0xd2   : > { %v265_v10 = vpop.f32.mrf.mxu0  ;;  %v281_v13 = vpop.f32.mrf.mxu1 }
  0xd3   : > { %v298_v11 = vmax.f32 %v274_v7, 0.0  ;;  %v266_v12 = vadd.f32 %v410_v5, %v265_v10  ;;  %v302_v14 = vmax.f32 %v290_v9, 0.0  ;;  %v282_v15 = vadd.f32 %v410_v5, %v281_v13 }
  0xd4   : > { %v448_v16 = vpop.f32.mrf.mxu0  ;;  %v452_v20 = vpop.f32.mrf.mxu1 }
  0xd5   : > { %v432_v17 = vpack.c.bf16 %v298_v11, %v298_v11  ;;  %v296_v18 = vmax.f32 %v266_v12, 0.0  ;;  %v277_v19 = vadd.f32 %v448_v16, %v410_v5  ;;  %v436_v21 = vpack.c.bf16 %v302_v14, %v302_v14 }
  0xd6   : > { %v300_v22 = vmax.f32 %v282_v15, 0.0  ;;  %v293_v23 = vadd.f32 %v452_v20, %v410_v5  ;;  %v268_v24 = vpop.f32.mrf.mxu0  ;;  %v284_v28 = vpop.f32.mrf.mxu1 }
  0xd7   : > { %339 = vst.msk [vmem:[%s516_s25 + $0x8] sm:$0xf] %vm336_vm1, %v432_v17  ;;  %v430_v25 = vpack.c.bf16 %v296_v18, %v296_v18  ;;  %v299_v26 = vmax.f32 %v277_v19, 0.0  ;;  %v269_v27 = vadd.f32 %v410_v5, %v268_v24  ;;  %343 = vst.msk [vmem:[%s516_s25 + $0x18] sm:$0xf] %vm336_vm1, %v436_v21  ;;  %v285_v31 = vadd.f32 %v410_v5, %v284_v28 }
  0xd8   : > { %v434_v29 = vpack.c.bf16 %v300_v22, %v300_v22  ;;  %v303_v30 = vmax.f32 %v293_v23, 0.0 }
  0xd9   : > { %337 = vst.msk [vmem:[%s516_s25] sm:$0xf] %vm336_vm1, %v430_v25  ;;  %v433_v32 = vpack.c.bf16 %v299_v26, %v299_v26  ;;  %v297_v33 = vmax.f32 %v269_v27, 0.0  ;;  %v301_v35 = vmax.f32 %v285_v31, 0.0 }
  0xda   : > { %341 = vst.msk [vmem:[%s516_s25 + $0x10] sm:$0xf] %vm336_vm1, %v434_v29  ;;  %v437_v34 = vpack.c.bf16 %v303_v30, %v303_v30 }
  0xdb   : > { %340 = vst.msk [vmem:[%s516_s25 + $0xc] sm:$0xf] %vm336_vm1, %v433_v32  ;;  %v431_v36 = vpack.c.bf16 %v297_v33, %v297_v33  ;;  %v435_v37 = vpack.c.bf16 %v301_v35, %v301_v35 }
  0xdc   : > { %344 = vst.msk [vmem:[%s516_s25 + $0x1c] sm:$0xf] %vm336_vm1, %v437_v34 }
  0xdd   : > { %338 = vst.msk [vmem:[%s516_s25 + $0x4] sm:$0xf] %vm336_vm1, %v431_v36  ;;  %342 = vst.msk [vmem:[%s516_s25 + $0x14] sm:$0xf] %vm336_vm1, %v435_v37 }
  0xde PF: > { %s13_s12 = sadd.s32 1, %s474_s12  }
  0xdf   : > { %p10_p4 = scmp.ge.s32.totalorder %s13_s12, 4  }
  0xe1   :  { %12 = sbr.rel (!%p10_p4) target bundleno = 1 (0x1), region = 62 }

// kernel: _lambda_.23
= control target key start
LH: loop header
LB: loop body
LE: loop exit
PB: predicated region body
PF: predicated region fallthrough
CT: control target
= control target key end

     0   :  { %s781_s15 = smov 0   ;;  %s1042_s0 = inlined_call_operand.vmem [shape: bf16[128,8], index: 0, kind: input, shape index: {}]   ;;  %s1043_s1 = inlined_call_operand.vmem [shape: bf16[8,32], index: 1, kind: input, shape index: {}]   ;;  %s1044_s2 = inlined_call_operand.vmem [shape: f32[9,32], index: 2, kind: input, shape index: {}]   ;;  %s1045_s3 = inlined_call_operand.vmem [shape: f32[1,32], index: 3, kind: input, shape index: {}]   ;;  %s1046_s4 = inlined_call_operand.vmem [shape: bf16[2,8,8,32], index: 4, kind: output, shape index: {}]  }
   0x1 LB: > { %s787_s16 = sadd.s32 4294967295, %s753_s15   ;;  %p697_p0 = scmp.ge.s32.totalorder %s753_s15, 1  ;;  %s753_s15 = sphi %s781_s15, %s14_s15  }
   0x2   : > { %p163_p1 = scmp.lt.s32.totalorder %s753_s15, 3 }
   0x4   : > { %p164_p2 = pnand %p697_p0, %p163_p1 }
   0x6   : > { %167 = sbr.rel (%p164_p2) target bundleno = 266 (0x10a), region = 36 }
   0xb   : > { %v209_v0 = vld [vmem:[%s1043_s1] sm:$0xf]  ;;  %vm243_vm0 = vcmask 1043456   ;;  %s698_s19 = sshll.u32 %s787_s16, 3  ;;  %vm230_vm1 = vcmask 64512   ;;  %vm312_vm2 = vcmask 261120   ;;  %v353_v7 = vlaneseq }
   0xc   : > { %732 = vmatprep.subr.msk.bf16.mxu0 %vm243_vm0, %v209_v0  ;;  %733 = vmatprep.subr.msk.bf16.mxu1 %vm243_vm0, %v209_v0  ;;  %v245_v1 = vsel %vm243_vm0, %v209_v0, 0  ;;  %p190_p3 = scmp.lt.s32.totalorder %s698_s19, 15  ;;  %vm314_vm3 = vcmask 254976   ;;  %v755_v6 = vmov 0.0   ;;  %v343_v11 = vld [vmem:[%s1044_s2] sm:$0xff]  ;;  %p195_p4 = scmp.lt.s32.totalorder %s787_s16, 1 }
   0xd   : > { %721 = vmatpush3.bf16.msra.mxu0 %v245_v1  ;;  %731 = vmatpush3.bf16.msra.mxu1 %v245_v1  ;;  %315 = vst.msk [vmem:[#allocation2 + $0x8] sm:$0x3] %vm314_vm3, %v755_v6  ;;  %321 = vst.msk [vmem:[#allocation2 + $0x38] sm:$0x3] %vm314_vm3, %v755_v6  ;;  %v354_v8 = vshrl.u32 %v353_v7, 7  ;;  %vm629_vm4 = vcmask 257024  }
   0xe   : > { %s1050_s19 = smov (!%p190_p3, %s698_s19), 15  ;;  %320 = vst.msk [vmem:[#allocation2 + $0x30] sm:$0xff] %vm312_vm2, %v755_v6  ;;  %313 = vst.msk [vmem:[#allocation2] sm:$0xff] %vm312_vm2, %v755_v6  ;;  %v843_v39 = vld [vmem:[%s1044_s2 + $0x8] ss:$0 sm:$0xff]  ;;  %s1052_s16 = smov (!%p195_p4, %s787_s16), 1 }
   0xf   : > { %s699_s20 = sshll.u32 %s1050_s19, 2  ;;  %333 = vst.msk [vmem:[#allocation2 + $0x98] sm:$0x3] %vm314_vm3, %v755_v6  ;;  %317 = vst.msk [vmem:[#allocation2 + $0x18] sm:$0x3] %vm314_vm3, %v755_v6  ;;  %v355_v9 = vsub.s32 0, %v354_v8 }
  0x10   : > { %s193_s23 = scalar_lea.vmem %s1042_s0, %s699_s20  ;;  %316 = vst.msk [vmem:[#allocation2 + $0x10] sm:$0xff] %vm312_vm2, %v755_v6  ;;  %318 = vst.msk [vmem:[#allocation2 + $0x20] sm:$0xff] %vm312_vm2, %v755_v6  ;;  %v383_v10 = vsub.s32 1, %v354_v8  ;;  %v411_v14 = vsub.s32 2, %v354_v8  ;;  %v439_v23 = vsub.s32 3, %v354_v8  ;;  %v467_v24 = vsub.s32 4, %v354_v8 }
  0x11   : > { %v743_v2 = vld [vmem:[%s193_s23] sm:$0xff]   ;;  %v744_v3 = vld [vmem:[%s193_s23 + $0x10] sm:$0xff]   ;;  %v745_v4 = vld [vmem:[%s193_s23 + $0x8] sm:$0xff]   ;;  %319 = vst.msk [vmem:[#allocation2 + $0x28] sm:$0x3] %vm314_vm3, %v755_v6  ;;  %v821_v12 = vrot.slane %v343_v11, %v355_v9  ;;  %v495_v26 = vsub.s32 5, %v354_v8 }
  0x12   : > { %722 = vmatprep.mubr.msk.bf16.mxu0 %vm230_vm1, %v743_v2  ;;  %726 = vmatprep.mubr.msk.bf16.mxu1 %vm230_vm1, %v744_v3  ;;  %v746_v5 = vld [vmem:[%s193_s23 + $0x18] sm:$0xff]   ;;  %322 = vst.msk [vmem:[#allocation2 + $0x40] sm:$0xff] %vm312_vm2, %v755_v6  ;;  %324 = vst.msk [vmem:[#allocation2 + $0x50] sm:$0xff] %vm312_vm2, %v755_v6  ;;  %v823_v13 = vrot.slane %v343_v11, %v383_v10  ;;  %v825_v18 = vrot.slane %v343_v11, %v411_v14  ;;  %v524_v27 = vsub.s32 6, %v354_v8  ;;  %s714_s30 = sshll.u32 %s1052_s16, 5 }
  0x13   : > { %723 = vmatmul.mubr.msk.bf16.vlgmr.msra.gmra.mxu0 %vm230_vm1, %v745_v4  ;;  %727 = vmatmul.mubr.msk.bf16.vlgmr.msra.gmra.mxu1 %vm230_vm1, %v746_v5  ;;  %323 = vst.msk [vmem:[#allocation2 + $0x48] sm:$0x3] %vm314_vm3, %v755_v6  ;;  %325 = vst.msk [vmem:[#allocation2 + $0x58] sm:$0x3] %vm314_vm3, %v755_v6  ;;  %v552_v28 = vsub.s32 7, %v354_v8  ;;  %v835_v34 = vrot.slane %v343_v11, %v439_v23  ;;  %v837_v35 = vrot.slane %v343_v11, %v467_v24  ;;  %s1003_s7 = scalar_lea.vmem %s1046_s4, %s714_s30 }
  0x14   : > { %326 = vst.msk [vmem:[#allocation2 + $0x60] sm:$0xff] %vm312_vm2, %v755_v6  ;;  %328 = vst.msk [vmem:[#allocation2 + $0x70] sm:$0xff] %vm312_vm2, %v755_v6  ;;  %v845_v40 = vrot.slane %v343_v11, %v495_v26  ;;  %v847_v41 = vrot.slane %v343_v11, %v524_v27 }
  0x15   : > { %327 = vst.msk [vmem:[#allocation2 + $0x68] sm:$0x3] %vm314_vm3, %v755_v6  ;;  %329 = vst.msk [vmem:[#allocation2 + $0x78] sm:$0x3] %vm314_vm3, %v755_v6  ;;  %v345_v15 = vld [vmem:[#allocation2] sm:$0xff]  ;;  %v849_v42 = vrot.slane %v343_v11, %v552_v28 }
  0x16   : > { %330 = vst.msk [vmem:[#allocation2 + $0x80] sm:$0xff] %vm312_vm2, %v755_v6  ;;  %332 = vst.msk [vmem:[#allocation2 + $0x90] sm:$0xff] %vm312_vm2, %v755_v6  ;;  %v373_v16 = vld [vmem:[#allocation2 + $0x1] sm:$0xff]  ;;  %v357_v19 = vmul.f32 %v821_v12, %v345_v15 }
  0x17   : > { %331 = vst.msk [vmem:[#allocation2 + $0x88] sm:$0x3] %vm314_vm3, %v755_v6  ;;  %v385_v20 = vmul.f32 %v823_v13, %v373_v16  ;;  %v401_v22 = vld [vmem:[#allocation2 + $0x2] sm:$0xff] }
  0x18   : > { %v413_v31 = vmul.f32 %v825_v18, %v401_v22 }
  0x19   : > { %v393_v30 = vadd.f32 %v385_v20, %v357_v19 }
  0x1b   : > { %v421_v48 = vadd.f32 %v413_v31, %v393_v30 }
  0x1d   : > { %v521_v36 = vld [vmem:[#allocation2 + $0x90] sm:$0xff] }
  0x1e   : > { %v549_v37 = vld [vmem:[#allocation2 + $0x91] sm:$0xff]  ;;  %v858_v54 = vmul.f32 %v847_v41, %v521_v36 }
  0x1f   : > { %v577_v43 = vld [vmem:[#allocation2 + $0x92] sm:$0xff]  ;;  %v861_v55 = vmul.f32 %v849_v42, %v549_v37 }
  0x20   : > { %v871_v59 = vmul.f32 %v843_v39, %v577_v43 }
  0xd3   : > { %v724_v17 = vpop.f32.mrf.mxu0  ;;  %v728_v21 = vpop.f32.mrf.mxu1 }
  0xd4   : > { %337 = vst.msk [vmem:[#allocation2 + $0x31] sm:$0xff] %vm312_vm2, %v724_v17  ;;  %341 = vst.msk [vmem:[#allocation2 + $0x71] sm:$0xff] %vm312_vm2, %v728_v21 }
  0xd5   : > { %v281_v25 = vpop.f32.mrf.mxu0  ;;  %v297_v29 = vpop.f32.mrf.mxu1 }
  0xd6   : > { %335 = vst.msk [vmem:[#allocation2 + $0x11] sm:$0xff] %vm312_vm2, %v281_v25  ;;  %339 = vst.msk [vmem:[#allocation2 + $0x51] sm:$0xff] %vm312_vm2, %v297_v29 }
  0xd7   : > { %v725_v32 = vpop.f32.mrf.mxu0  ;;  %v729_v33 = vpop.f32.mrf.mxu1 }
  0xd8   : > { %338 = vst.msk [vmem:[#allocation2 + $0x41] sm:$0xff] %vm312_vm2, %v725_v32  ;;  %342 = vst.msk [vmem:[#allocation2 + $0x81] sm:$0xff] %vm312_vm2, %v729_v33 }
  0xd9   : > { %v284_v38 = vpop.f32.mrf.mxu0  ;;  %v300_v44 = vpop.f32.mrf.mxu1 }
  0xda   : > { %336 = vst.msk [vmem:[#allocation2 + $0x21] sm:$0xff] %vm312_vm2, %v284_v38  ;;  %340 = vst.msk [vmem:[#allocation2 + $0x61] sm:$0xff] %vm312_vm2, %v300_v44 }
  0xdb   : > { %v348_v45 = vld [vmem:[#allocation2 + $0x30] sm:$0xff] }
  0xdc   : > { %v376_v46 = vld [vmem:[#allocation2 + $0x31] sm:$0xff]  ;;  %v360_v49 = vmul.f32 %v821_v12, %v348_v45  ;;  %v865_v57 = vmul.f32 %v835_v34, %v348_v45  ;;  %v879_v2 = vmul.f32 %v847_v41, %v348_v45 }
  0xdd   : > { %v404_v47 = vld [vmem:[#allocation2 + $0x32] sm:$0xff]  ;;  %v388_v50 = vmul.f32 %v823_v13, %v376_v46  ;;  %v868_v58 = vmul.f32 %v837_v35, %v376_v46  ;;  %v882_v3 = vmul.f32 %v849_v42, %v376_v46 }
  0xde   : > { %v352_v51 = vld [vmem:[#allocation2 + $0x70] sm:$0xff]  ;;  %v416_v56 = vmul.f32 %v825_v18, %v404_v47  ;;  %v874_v61 = vmul.f32 %v845_v40, %v404_v47  ;;  %v885_v4 = vmul.f32 %v843_v39, %v404_v47 }
  0xdf   : > { %v380_v52 = vld [vmem:[#allocation2 + $0x71] sm:$0xff]  ;;  %v396_v60 = vadd.f32 %v388_v50, %v360_v49  ;;  %v364_v62 = vmul.f32 %v821_v12, %v352_v51  ;;  %v890_v8 = vmul.f32 %v835_v34, %v352_v51  ;;  %v900_v16 = vmul.f32 %v847_v41, %v352_v51  ;;  %v349_v29 = vld [vmem:[#allocation2 + $0x40] sm:$0xff] }
  0xe0   : > { %v855_v53 = vld [vmem:[#allocation2 + $0x72] sm:$0xff]  ;;  %v392_v63 = vmul.f32 %v823_v13, %v380_v52  ;;  %v893_v9 = vmul.f32 %v837_v35, %v380_v52  ;;  %v905_v22 = vmul.f32 %v849_v42, %v380_v52  ;;  %v377_v30 = vld [vmem:[#allocation2 + $0x41] sm:$0xff] }
  0xe1   : > { %v346_v0 = vld [vmem:[#allocation2 + $0x10] sm:$0xff]  ;;  %v420_v5 = vmul.f32 %v825_v18, %v855_v53  ;;  %v897_v10 = vmul.f32 %v845_v40, %v855_v53  ;;  %v424_v15 = vadd.f32 %v416_v56, %v396_v60  ;;  %v405_v45 = vld [vmem:[#allocation2 + $0x42] sm:$0xff]  ;;  %v389_v49 = vmul.f32 %v823_v13, %v377_v30 }
  0xe2   : > { %v374_v1 = vld [vmem:[#allocation2 + $0x11] sm:$0xff]  ;;  %v400_v7 = vadd.f32 %v392_v63, %v364_v62  ;;  %v358_v17 = vmul.f32 %v821_v12, %v346_v0  ;;  %1047 = vst [vmem:[#allocation3_spill] sm:$0xff] %v905_v22  ;;  %v441_v24 = vmul.f32 %v835_v34, %v346_v0  ;;  %v436_v50 = vld [vmem:[#allocation2 + $0x80] sm:$0xff]  ;;  %v444_v60 = vmul.f32 %v835_v34, %v349_v29 }
  0xe3   : > { %v402_v6 = vld [vmem:[#allocation2 + $0x12] sm:$0xff]  ;;  %v386_v19 = vmul.f32 %v823_v13, %v374_v1  ;;  %v469_v26 = vmul.f32 %v837_v35, %v374_v1  ;;  %v929_v62 = vld [vmem:[#allocation2 + $0x81] sm:$0xff]  ;;  %v417_v1 = vmul.f32 %v825_v18, %v405_v45 }
  0xe4   : > { %v350_v11 = vld [vmem:[#allocation2 + $0x50] sm:$0xff]  ;;  %v428_v21 = vadd.f32 %v420_v5, %v400_v7  ;;  %v414_v23 = vmul.f32 %v825_v18, %v402_v6  ;;  %v449_v31 = vadd.f32 %v441_v24, %v421_v48  ;;  %v497_v32 = vmul.f32 %v845_v40, %v402_v6  ;;  %v933_v6 = vld [vmem:[#allocation2 + $0x82] sm:$0xff] }
  0xe5   : > { %v378_v14 = vld [vmem:[#allocation2 + $0x51] sm:$0xff]  ;;  %v394_v25 = vadd.f32 %v386_v19, %v358_v17  ;;  %v362_v27 = vmul.f32 %v821_v12, %v350_v11  ;;  %v445_v36 = vmul.f32 %v835_v34, %v350_v11  ;;  %v529_v47 = vmul.f32 %v847_v41, %v350_v11  ;;  %v347_v19 = vld [vmem:[#allocation2 + $0x20] sm:$0xff] }
  0xe6   : > { %v406_v20 = vld [vmem:[#allocation2 + $0x52] sm:$0xff]  ;;  %v390_v28 = vmul.f32 %v823_v13, %v378_v14  ;;  %v916_v43 = vmul.f32 %v837_v35, %v378_v14  ;;  %v477_v46 = vadd.f32 %v469_v26, %v449_v31  ;;  %v361_v48 = vmul.f32 %v821_v12, %v349_v29 }
  0xe7   : > { %v418_v33 = vmul.f32 %v825_v18, %v406_v20  ;;  %v422_v37 = vadd.f32 %v414_v23, %v394_v25  ;;  %v919_v44 = vmul.f32 %v845_v40, %v406_v20  ;;  %v557_v52 = vmul.f32 %v849_v42, %v378_v14  ;;  %v403_v23 = vld [vmem:[#allocation2 + $0x22] sm:$0xff] }
  0xe8   : > { %v398_v38 = vadd.f32 %v390_v28, %v362_v27  ;;  %v585_v56 = vmul.f32 %v843_v39, %v406_v20  ;;  %v505_v63 = vadd.f32 %v497_v32, %v477_v46  ;;  %v397_v0 = vadd.f32 %v389_v49, %v361_v48  ;;  %v375_v20 = vld [vmem:[#allocation2 + $0x21] sm:$0xff] }
  0xe9   : > { %v472_v5 = vmul.f32 %v837_v35, %v377_v30  ;;  %v452_v7 = vadd.f32 %v444_v60, %v424_v15  ;;  %v500_v11 = vmul.f32 %v845_v40, %v405_v45  ;;  %v937_v17 = vmul.f32 %v847_v41, %v349_v29  ;;  %v958_v60 = vld [vmem:[#allocation2 + $0x61] sm:$0xff] }
  0xea   : > { %v924_v51 = vadd.f32 %v418_v33, %v398_v38  ;;  %v448_v14 = vmul.f32 %v835_v34, %v436_v50  ;;  %v425_v24 = vadd.f32 %v417_v1, %v397_v0  ;;  %v941_v25 = vmul.f32 %v849_v42, %v377_v30 }
  0xeb   : > { %v944_v26 = vmul.f32 %v843_v39, %v405_v45  ;;  %v476_v15 = vmul.f32 %v837_v35, %v929_v62  ;;  %v480_v27 = vadd.f32 %v472_v5, %v452_v7  ;;  %v504_v29 = vmul.f32 %v845_v40, %v933_v6  ;;  %v964_v5 = vld [vmem:[#allocation2 + $0x62] sm:$0xff] }
  0xec   : > { %v456_v28 = vadd.f32 %v448_v14, %v428_v21  ;;  %v951_v31 = vmul.f32 %v847_v41, %v436_v50  ;;  %v453_v32 = vadd.f32 %v445_v36, %v425_v24  ;;  %v359_v33 = vmul.f32 %v821_v12, %v347_v19  ;;  %v351_v21 = vld [vmem:[#allocation2 + $0x60] sm:$0xff] }
  0xed   : > { %v387_v30 = vmul.f32 %v823_v13, %v375_v20  ;;  %v415_v38 = vmul.f32 %v825_v18, %v403_v23  ;;  %v508_v45 = vadd.f32 %v500_v11, %v480_v27  ;;  %v442_v48 = vmul.f32 %v835_v34, %v347_v19 }
  0xee   : > { %v484_v46 = vadd.f32 %v476_v15, %v456_v28  ;;  %v470_v49 = vmul.f32 %v837_v35, %v375_v20  ;;  %v498_v50 = vmul.f32 %v845_v40, %v403_v23  ;;  %v526_v36 = vmul.f32 %v847_v41, %v347_v19 }
  0xef   : > { %v395_v0 = vadd.f32 %v387_v30, %v359_v33  ;;  %v554_v1 = vmul.f32 %v849_v42, %v375_v20  ;;  %v537_v7 = vadd.f32 %v529_v47, %v508_v45  ;;  %v450_v14 = vadd.f32 %v442_v48, %v422_v37 }
  0xf0   : > { %v512_v11 = vadd.f32 %v504_v29, %v484_v46  ;;  %v582_v24 = vmul.f32 %v843_v39, %v403_v23  ;;  %v534_v27 = vadd.f32 %v526_v36, %v505_v63  ;;  %v363_v28 = vmul.f32 %v821_v12, %v351_v21 }
  0xf1   : > { %v423_v15 = vadd.f32 %v415_v38, %v395_v0  ;;  %v391_v33 = vmul.f32 %v823_v13, %v958_v60  ;;  %v565_v30 = vadd.f32 %v557_v52, %v537_v7  ;;  %v478_v22 = vadd.f32 %v470_v49, %v450_v14  ;;  %v711_v13 = vld [vmem:[%s1045_s3] ss:$0 sm:$0xff] }
  0xf2   : > { %v541_v19 = vadd.f32 %v858_v54, %v512_v11  ;;  %v419_v20 = vmul.f32 %v825_v18, %v964_v5  ;;  %v562_v47 = vadd.f32 %v554_v1, %v534_v27  ;;  %v446_v12 = vmul.f32 %v835_v34, %v351_v21 }
  0xf3   : > { %v451_v37 = vadd.f32 %v865_v57, %v423_v15  ;;  %v399_v63 = vadd.f32 %v391_v33, %v363_v28  ;;  %v593_v23 = vadd.f32 %v585_v56, %v565_v30  ;;  %v506_v52 = vadd.f32 %v498_v50, %v478_v22 }
  0xf4   : > { %v569_v54 = vadd.f32 %v861_v55, %v541_v19  ;;  %v474_v18 = vmul.f32 %v837_v35, %v958_v60  ;;  %v590_v38 = vadd.f32 %v582_v24, %v562_v47  ;;  %v454_v45 = vadd.f32 %v446_v12, %v924_v51 }
  0xf5   : > { %v479_v29 = vadd.f32 %v868_v58, %v451_v37  ;;  %v427_v57 = vadd.f32 %v419_v20, %v399_v63  ;;  %v608_v46 = vadd.f32 %v711_v13, %v593_v23  ;;  %v535_v56 = vadd.f32 %v879_v2, %v506_v52 }
  0xf6   : > { %v597_v34 = vadd.f32 %v871_v59, %v569_v54  ;;  %v481_v48 = vadd.f32 %v916_v43, %v453_v32  ;;  %v605_v22 = vadd.f32 %v711_v13, %v590_v38  ;;  %v482_v35 = vadd.f32 %v474_v18, %v454_v45 }
  0xf7   : > { %v507_v55 = vadd.f32 %v874_v61, %v479_v29  ;;  %v455_v49 = vadd.f32 %v890_v8, %v427_v57  ;;  %v616_v0 = vmax.f32 %v608_v46, 0.0  ;;  %v563_v50 = vadd.f32 %v882_v3, %v535_v56 }
  0xf8   : > { %v612_v58 = vadd.f32 %v711_v13, %v597_v34  ;;  %v502_v51 = vmul.f32 %v845_v40, %v964_v5  ;;  %v613_v36 = vmax.f32 %v605_v22, 0.0  ;;  %v509_v43 = vadd.f32 %v919_v44, %v481_v48 }
  0xf9   : > { %v536_v59 = vadd.f32 %v937_v17, %v507_v55  ;;  %v483_v2 = vadd.f32 %v893_v9, %v455_v49  ;;  %v624_v61 = vpack.c.bf16 %v616_v0, %v616_v0  ;;  %v591_v3 = vadd.f32 %v885_v4, %v563_v50 }
  0xfa   : > { %v620_v8 = vmax.f32 %v612_v58, 0.0  ;;  %v510_v32 = vadd.f32 %v502_v51, %v482_v35  ;;  %v621_v17 = vpack.c.bf16 %v613_v36, %v613_v36  ;;  %v530_v44 = vmul.f32 %v847_v41, %v351_v21  ;;  %v1048_v21 = vld [vmem:[#allocation3_spill] sm:$0xff] }
  0xfb   : > { %v564_v40 = vadd.f32 %v941_v25, %v536_v59  ;;  %v511_v9 = vadd.f32 %v897_v10, %v483_v2  ;;  %633 = vst.msk [vmem:[%s1003_s7 + $0xc] sm:$0xf] %vm629_vm4, %v624_v61  ;;  %v560_v1 = vmul.f32 %v849_v42, %v929_v62  ;;  %v606_v11 = vadd.f32 %v711_v13, %v591_v3 }
  0xfc   : > { %v628_v7 = vpack.c.bf16 %v620_v8, %v620_v8  ;;  %v539_v14 = vadd.f32 %v900_v16, %v510_v32  ;;  %630 = vst.msk [vmem:[%s1003_s7] sm:$0xf] %vm629_vm4, %v621_v17  ;;  %v538_v25 = vadd.f32 %v530_v44, %v509_v43  ;;  %v558_v41 = vmul.f32 %v849_v42, %v958_v60 }
  0xfd   : > { %v592_v4 = vadd.f32 %v944_v26, %v564_v40  ;;  %v540_v24 = vadd.f32 %v951_v31, %v511_v9  ;;  %v587_v10 = vmul.f32 %v843_v39, %v855_v53  ;;  %v588_v62 = vmul.f32 %v843_v39, %v933_v6 }
  0xfe   : > { %637 = vst.msk [vmem:[%s1003_s7 + $0x1c] sm:$0xf] %vm629_vm4, %v628_v7  ;;  %v614_v16 = vmax.f32 %v606_v11, 0.0  ;;  %v567_v26 = vadd.f32 %v1048_v21, %v539_v14  ;;  %v566_v27 = vadd.f32 %v558_v41, %v538_v25  ;;  %v586_v31 = vmul.f32 %v843_v39, %v964_v5 }
  0xff   : > { %v607_v15 = vadd.f32 %v711_v13, %v592_v4  ;;  %v568_v28 = vadd.f32 %v560_v1, %v540_v24 }
 0x100   : > { %v622_v33 = vpack.c.bf16 %v614_v16, %v614_v16  ;;  %v595_v42 = vadd.f32 %v587_v10, %v567_v26  ;;  %v594_v53 = vadd.f32 %v586_v31, %v566_v27 }
 0x101   : > { %v615_v60 = vmax.f32 %v607_v15, 0.0  ;;  %v596_v6 = vadd.f32 %v588_v62, %v568_v28 }
 0x102   : > { %631 = vst.msk [vmem:[%s1003_s7 + $0x4] sm:$0xf] %vm629_vm4, %v622_v33  ;;  %v610_v30 = vadd.f32 %v711_v13, %v595_v42  ;;  %v609_v20 = vadd.f32 %v711_v13, %v594_v53 }
 0x103   : > { %v623_v19 = vpack.c.bf16 %v615_v60, %v615_v60  ;;  %v611_v37 = vadd.f32 %v711_v13, %v596_v6 }
 0x104   : > { %v618_v47 = vmax.f32 %v610_v30, 0.0  ;;  %v617_v63 = vmax.f32 %v609_v20, 0.0 }
 0x105   : > { %632 = vst.msk [vmem:[%s1003_s7 + $0x8] sm:$0xf] %vm629_vm4, %v623_v19  ;;  %v619_v12 = vmax.f32 %v611_v37, 0.0 }
 0x106   : > { %v626_v39 = vpack.c.bf16 %v618_v47, %v618_v47  ;;  %v625_v5 = vpack.c.bf16 %v617_v63, %v617_v63 }
 0x107   : > { %v627_v23 = vpack.c.bf16 %v619_v12, %v619_v12 }
 0x108   : > { %635 = vst.msk [vmem:[%s1003_s7 + $0x14] sm:$0xf] %vm629_vm4, %v626_v39  ;;  %634 = vst.msk [vmem:[%s1003_s7 + $0x10] sm:$0xf] %vm629_vm4, %v625_v5 }
 0x109   : > { %636 = vst.msk [vmem:[%s1003_s7 + $0x18] sm:$0xf] %vm629_vm4, %v627_v23 }
 0x10a PF: > { %s14_s15 = sadd.s32 1, %s753_s15  }
 0x10b   : > { %p11_p5 = scmp.ge.s32.totalorder %s14_s15, 4  }
 0x10d   :  { %13 = sbr.rel (!%p11_p5) target bundleno = 1 (0x1), region = 68 }

// kernel: _lambda_.24
= control target key start
LH: loop header
LB: loop body
LE: loop exit
PB: predicated region body
PF: predicated region fallthrough
CT: control target
= control target key end

     0   :  { %s800_s15 = smov 0   ;;  %s1068_s0 = inlined_call_operand.vmem [shape: bf16[128,24], index: 0, kind: input, shape index: {}]   ;;  %s1069_s1 = inlined_call_operand.vmem [shape: bf16[24,24], index: 1, kind: input, shape index: {}]   ;;  %s1070_s2 = inlined_call_operand.vmem [shape: f32[9,24], index: 2, kind: input, shape index: {}]   ;;  %s1071_s3 = inlined_call_operand.vmem [shape: f32[1,24], index: 3, kind: input, shape index: {}]   ;;  %s1072_s4 = inlined_call_operand.vmem [shape: bf16[2,8,8,24], index: 4, kind: output, shape index: {}]  }
   0x1 LB: > { %s806_s16 = sadd.s32 4294967295, %s772_s15   ;;  %p707_p0 = scmp.ge.s32.totalorder %s772_s15, 1  ;;  %s772_s15 = sphi %s800_s15, %s14_s15  }
   0x2   : > { %p163_p1 = scmp.lt.s32.totalorder %s772_s15, 3 }
   0x4   : > { %p164_p2 = pnand %p707_p0, %p163_p1 }
   0x6   : > { %167 = sbr.rel (%p164_p2) target bundleno = 267 (0x10b), region = 36 }
   0xb   : > { %v760_v0 = vld [vmem:[%s1069_s1 + $0x8] ss:$0 sps:$4 sm:$0xff]   ;;  %vm254_vm0 = vcmask 1043456   ;;  %v761_v1 = vld [vmem:[%s1069_s1] sm:$0xff]   ;;  %s708_s21 = sshll.u32 %s806_s16, 3  ;;  %vm241_vm1 = vcmask 195584   ;;  %v363_v8 = vlaneseq }
   0xc   : > { %749 = vmatprep.subr.msk.bf16.mxu0 %vm254_vm0, %v760_v0  ;;  %750 = vmatprep.subr.msk.bf16.mxu1 %vm254_vm0, %v760_v0  ;;  %v256_v2 = vsel %vm254_vm0, %v760_v0, 0  ;;  %p190_p3 = scmp.lt.s32.totalorder %s708_s21, 15  ;;  %vm324_vm2 = vcmask 189440   ;;  %v774_v7 = vmov 0.0   ;;  %v353_v12 = vld [vmem:[%s1070_s2] sm:$0xff]  ;;  %p195_p4 = scmp.lt.s32.totalorder %s806_s16, 1 }
   0xd   : > { %734 = vmatpush3.bf16.msra.mxu0 %v256_v2  ;;  %747 = vmatpush3.bf16.msra.mxu1 %v256_v2  ;;  %325 = vst.msk [vmem:[#allocation2 + $0x8] sm:$0x3] %vm324_vm2, %v774_v7  ;;  %331 = vst.msk [vmem:[#allocation2 + $0x38] sm:$0x3] %vm324_vm2, %v774_v7  ;;  %v364_v9 = vshrl.u32 %v363_v8, 7  ;;  %vm639_vm3 = vcmask 191488  }
   0xe   : > { %735 = vmatprep.subr.bf16.mxu0 %v761_v1  ;;  %746 = vmatprep.subr.bf16.mxu1 %v761_v1  ;;  %s1076_s21 = smov (!%p190_p3, %s708_s21), 15  ;;  %330 = vst.msk [vmem:[#allocation2 + $0x30] sm:$0xff] %vm241_vm1, %v774_v7  ;;  %323 = vst.msk [vmem:[#allocation2] sm:$0xff] %vm241_vm1, %v774_v7  ;;  %v869_v40 = vld [vmem:[%s1070_s2 + $0x8] ss:$0 sm:$0xff]  ;;  %s1078_s16 = smov (!%p195_p4, %s806_s16), 1 }
   0xf   : > { %s709_s22 = sshll.u32 %s1076_s21, 2  ;;  %343 = vst.msk [vmem:[#allocation2 + $0x98] sm:$0x3] %vm324_vm2, %v774_v7  ;;  %327 = vst.msk [vmem:[#allocation2 + $0x18] sm:$0x3] %vm324_vm2, %v774_v7  ;;  %v365_v10 = vsub.s32 0, %v364_v9 }
  0x10   : > { %s193_s25 = scalar_lea.vmem %s1068_s0, %s709_s22  ;;  %326 = vst.msk [vmem:[#allocation2 + $0x10] sm:$0xff] %vm241_vm1, %v774_v7  ;;  %328 = vst.msk [vmem:[#allocation2 + $0x20] sm:$0xff] %vm241_vm1, %v774_v7  ;;  %v393_v11 = vsub.s32 1, %v364_v9  ;;  %v421_v15 = vsub.s32 2, %v364_v9  ;;  %v449_v24 = vsub.s32 3, %v364_v9  ;;  %v477_v25 = vsub.s32 4, %v364_v9 }
  0x11   : > { %736 = vmatpush3.bf16.msra.mxu0 %v761_v1  ;;  %748 = vmatpush3.bf16.msra.mxu1 %v761_v1  ;;  %v762_v3 = vld [vmem:[%s193_s25] sm:$0xff]   ;;  %v763_v4 = vld [vmem:[%s193_s25 + $0x10] sm:$0xff]   ;;  %v764_v5 = vld [vmem:[%s193_s25 + $0x8] sm:$0xff]   ;;  %329 = vst.msk [vmem:[#allocation2 + $0x28] sm:$0x3] %vm324_vm2, %v774_v7  ;;  %v847_v13 = vrot.slane %v353_v12, %v365_v10  ;;  %v505_v27 = vsub.s32 5, %v364_v9 }
  0x12   : > { %737 = vmatprep.mubr.msk.bf16.mxu0 %vm241_vm1, %v762_v3  ;;  %741 = vmatprep.mubr.msk.bf16.mxu1 %vm241_vm1, %v763_v4  ;;  %v765_v6 = vld [vmem:[%s193_s25 + $0x18] sm:$0xff]   ;;  %332 = vst.msk [vmem:[#allocation2 + $0x40] sm:$0xff] %vm241_vm1, %v774_v7  ;;  %334 = vst.msk [vmem:[#allocation2 + $0x50] sm:$0xff] %vm241_vm1, %v774_v7  ;;  %v849_v14 = vrot.slane %v353_v12, %v393_v11  ;;  %v851_v19 = vrot.slane %v353_v12, %v421_v15  ;;  %v534_v28 = vsub.s32 6, %v364_v9  ;;  %s726_s6 = sshll.u32 %s1078_s16, 5 }
  0x13   : > { %333 = vst.msk [vmem:[#allocation2 + $0x48] sm:$0x3] %vm324_vm2, %v774_v7  ;;  %335 = vst.msk [vmem:[#allocation2 + $0x58] sm:$0x3] %vm324_vm2, %v774_v7  ;;  %v562_v29 = vsub.s32 7, %v364_v9  ;;  %v861_v35 = vrot.slane %v353_v12, %v449_v24  ;;  %v863_v36 = vrot.slane %v353_v12, %v477_v25  ;;  %v871_v41 = vrot.slane %v353_v12, %v505_v27  ;;  %s1029_s9 = scalar_lea.vmem %s1072_s4, %s726_s6 }
  0x14   : > { %738 = vmatmul.mubr.msk.bf16.vlgmr.msra.gmra.mxu0 %vm241_vm1, %v764_v5  ;;  %742 = vmatmul.mubr.msk.bf16.vlgmr.msra.gmra.mxu1 %vm241_vm1, %v765_v6  ;;  %336 = vst.msk [vmem:[#allocation2 + $0x60] sm:$0xff] %vm241_vm1, %v774_v7  ;;  %338 = vst.msk [vmem:[#allocation2 + $0x70] sm:$0xff] %vm241_vm1, %v774_v7  ;;  %v873_v42 = vrot.slane %v353_v12, %v534_v28 }
  0x15   : > { %337 = vst.msk [vmem:[#allocation2 + $0x68] sm:$0x3] %vm324_vm2, %v774_v7  ;;  %339 = vst.msk [vmem:[#allocation2 + $0x78] sm:$0x3] %vm324_vm2, %v774_v7  ;;  %v355_v16 = vld [vmem:[#allocation2] sm:$0xff]  ;;  %v875_v43 = vrot.slane %v353_v12, %v562_v29 }
  0x16   : > { %340 = vst.msk [vmem:[#allocation2 + $0x80] sm:$0xff] %vm241_vm1, %v774_v7  ;;  %342 = vst.msk [vmem:[#allocation2 + $0x90] sm:$0xff] %vm241_vm1, %v774_v7  ;;  %v383_v17 = vld [vmem:[#allocation2 + $0x1] sm:$0xff]  ;;  %v367_v20 = vmul.f32 %v847_v13, %v355_v16 }
  0x17   : > { %341 = vst.msk [vmem:[#allocation2 + $0x88] sm:$0x3] %vm324_vm2, %v774_v7  ;;  %v395_v21 = vmul.f32 %v849_v14, %v383_v17  ;;  %v411_v23 = vld [vmem:[#allocation2 + $0x2] sm:$0xff] }
  0x18   : > { %v423_v32 = vmul.f32 %v851_v19, %v411_v23 }
  0x19   : > { %v403_v31 = vadd.f32 %v395_v21, %v367_v20 }
  0x1b   : > { %v431_v49 = vadd.f32 %v423_v32, %v403_v31 }
  0x1d   : > { %v531_v37 = vld [vmem:[#allocation2 + $0x90] sm:$0xff] }
  0x1e   : > { %v559_v38 = vld [vmem:[#allocation2 + $0x91] sm:$0xff]  ;;  %v884_v55 = vmul.f32 %v873_v42, %v531_v37 }
  0x1f   : > { %v587_v44 = vld [vmem:[#allocation2 + $0x92] sm:$0xff]  ;;  %v887_v56 = vmul.f32 %v875_v43, %v559_v38 }
  0x20   : > { %v897_v60 = vmul.f32 %v869_v40, %v587_v44 }
  0xd4   : > { %v739_v18 = vpop.f32.mrf.mxu0  ;;  %v743_v22 = vpop.f32.mrf.mxu1 }
  0xd5   : > { %347 = vst.msk [vmem:[#allocation2 + $0x31] sm:$0xff] %vm241_vm1, %v739_v18  ;;  %351 = vst.msk [vmem:[#allocation2 + $0x71] sm:$0xff] %vm241_vm1, %v743_v22 }
  0xd6   : > { %v292_v26 = vpop.f32.mrf.mxu0  ;;  %v308_v30 = vpop.f32.mrf.mxu1 }
  0xd7   : > { %345 = vst.msk [vmem:[#allocation2 + $0x11] sm:$0xff] %vm241_vm1, %v292_v26  ;;  %349 = vst.msk [vmem:[#allocation2 + $0x51] sm:$0xff] %vm241_vm1, %v308_v30 }
  0xd8   : > { %v740_v33 = vpop.f32.mrf.mxu0  ;;  %v744_v34 = vpop.f32.mrf.mxu1 }
  0xd9   : > { %348 = vst.msk [vmem:[#allocation2 + $0x41] sm:$0xff] %vm241_vm1, %v740_v33  ;;  %352 = vst.msk [vmem:[#allocation2 + $0x81] sm:$0xff] %vm241_vm1, %v744_v34 }
  0xda   : > { %v295_v39 = vpop.f32.mrf.mxu0  ;;  %v311_v45 = vpop.f32.mrf.mxu1 }
  0xdb   : > { %346 = vst.msk [vmem:[#allocation2 + $0x21] sm:$0xff] %vm241_vm1, %v295_v39  ;;  %350 = vst.msk [vmem:[#allocation2 + $0x61] sm:$0xff] %vm241_vm1, %v311_v45 }
  0xdc   : > { %v358_v46 = vld [vmem:[#allocation2 + $0x30] sm:$0xff] }
  0xdd   : > { %v386_v47 = vld [vmem:[#allocation2 + $0x31] sm:$0xff]  ;;  %v370_v50 = vmul.f32 %v847_v13, %v358_v46  ;;  %v891_v58 = vmul.f32 %v861_v35, %v358_v46  ;;  %v905_v3 = vmul.f32 %v873_v42, %v358_v46 }
  0xde   : > { %v414_v48 = vld [vmem:[#allocation2 + $0x32] sm:$0xff]  ;;  %v398_v51 = vmul.f32 %v849_v14, %v386_v47  ;;  %v894_v59 = vmul.f32 %v863_v36, %v386_v47  ;;  %v908_v4 = vmul.f32 %v875_v43, %v386_v47 }
  0xdf   : > { %v362_v52 = vld [vmem:[#allocation2 + $0x70] sm:$0xff]  ;;  %v426_v57 = vmul.f32 %v851_v19, %v414_v48  ;;  %v900_v62 = vmul.f32 %v871_v41, %v414_v48  ;;  %v911_v5 = vmul.f32 %v869_v40, %v414_v48 }
  0xe0   : > { %v390_v53 = vld [vmem:[#allocation2 + $0x71] sm:$0xff]  ;;  %v406_v61 = vadd.f32 %v398_v51, %v370_v50  ;;  %v374_v63 = vmul.f32 %v847_v13, %v362_v52  ;;  %v916_v9 = vmul.f32 %v861_v35, %v362_v52  ;;  %v926_v17 = vmul.f32 %v873_v42, %v362_v52  ;;  %v359_v30 = vld [vmem:[#allocation2 + $0x40] sm:$0xff] }
  0xe1   : > { %v881_v54 = vld [vmem:[#allocation2 + $0x72] sm:$0xff]  ;;  %v402_v0 = vmul.f32 %v849_v14, %v390_v53  ;;  %v919_v10 = vmul.f32 %v863_v36, %v390_v53  ;;  %v931_v23 = vmul.f32 %v875_v43, %v390_v53  ;;  %v387_v31 = vld [vmem:[#allocation2 + $0x41] sm:$0xff] }
  0xe2   : > { %v356_v1 = vld [vmem:[#allocation2 + $0x10] sm:$0xff]  ;;  %v430_v6 = vmul.f32 %v851_v19, %v881_v54  ;;  %v923_v11 = vmul.f32 %v871_v41, %v881_v54  ;;  %v434_v16 = vadd.f32 %v426_v57, %v406_v61  ;;  %v415_v46 = vld [vmem:[#allocation2 + $0x42] sm:$0xff]  ;;  %v399_v50 = vmul.f32 %v849_v14, %v387_v31 }
  0xe3   : > { %v384_v2 = vld [vmem:[#allocation2 + $0x11] sm:$0xff]  ;;  %v410_v8 = vadd.f32 %v402_v0, %v374_v63  ;;  %v368_v18 = vmul.f32 %v847_v13, %v356_v1  ;;  %1073 = vst [vmem:[#allocation3_spill] sm:$0xff] %v931_v23  ;;  %v451_v25 = vmul.f32 %v861_v35, %v356_v1  ;;  %v446_v51 = vld [vmem:[#allocation2 + $0x80] sm:$0xff]  ;;  %v454_v61 = vmul.f32 %v861_v35, %v359_v30 }
  0xe4   : > { %v412_v7 = vld [vmem:[#allocation2 + $0x12] sm:$0xff]  ;;  %v396_v20 = vmul.f32 %v849_v14, %v384_v2  ;;  %v479_v27 = vmul.f32 %v863_v36, %v384_v2  ;;  %v955_v63 = vld [vmem:[#allocation2 + $0x81] sm:$0xff]  ;;  %v427_v2 = vmul.f32 %v851_v19, %v415_v46 }
  0xe5   : > { %v360_v12 = vld [vmem:[#allocation2 + $0x50] sm:$0xff]  ;;  %v438_v22 = vadd.f32 %v430_v6, %v410_v8  ;;  %v424_v24 = vmul.f32 %v851_v19, %v412_v7  ;;  %v459_v32 = vadd.f32 %v451_v25, %v431_v49  ;;  %v507_v33 = vmul.f32 %v871_v41, %v412_v7  ;;  %v959_v7 = vld [vmem:[#allocation2 + $0x82] sm:$0xff] }
  0xe6   : > { %v388_v15 = vld [vmem:[#allocation2 + $0x51] sm:$0xff]  ;;  %v404_v26 = vadd.f32 %v396_v20, %v368_v18  ;;  %v372_v28 = vmul.f32 %v847_v13, %v360_v12  ;;  %v455_v37 = vmul.f32 %v861_v35, %v360_v12  ;;  %v539_v48 = vmul.f32 %v873_v42, %v360_v12  ;;  %v357_v20 = vld [vmem:[#allocation2 + $0x20] sm:$0xff] }
  0xe7   : > { %v416_v21 = vld [vmem:[#allocation2 + $0x52] sm:$0xff]  ;;  %v400_v29 = vmul.f32 %v849_v14, %v388_v15  ;;  %v942_v44 = vmul.f32 %v863_v36, %v388_v15  ;;  %v487_v47 = vadd.f32 %v479_v27, %v459_v32  ;;  %v371_v49 = vmul.f32 %v847_v13, %v359_v30 }
  0xe8   : > { %v428_v34 = vmul.f32 %v851_v19, %v416_v21  ;;  %v432_v38 = vadd.f32 %v424_v24, %v404_v26  ;;  %v945_v45 = vmul.f32 %v871_v41, %v416_v21  ;;  %v567_v53 = vmul.f32 %v875_v43, %v388_v15  ;;  %v413_v24 = vld [vmem:[#allocation2 + $0x22] sm:$0xff] }
  0xe9   : > { %v408_v39 = vadd.f32 %v400_v29, %v372_v28  ;;  %v595_v57 = vmul.f32 %v869_v40, %v416_v21  ;;  %v515_v0 = vadd.f32 %v507_v33, %v487_v47  ;;  %v407_v1 = vadd.f32 %v399_v50, %v371_v49  ;;  %v385_v21 = vld [vmem:[#allocation2 + $0x21] sm:$0xff] }
  0xea   : > { %v482_v6 = vmul.f32 %v863_v36, %v387_v31  ;;  %v462_v8 = vadd.f32 %v454_v61, %v434_v16  ;;  %v510_v12 = vmul.f32 %v871_v41, %v415_v46  ;;  %v963_v18 = vmul.f32 %v873_v42, %v359_v30  ;;  %v984_v61 = vld [vmem:[#allocation2 + $0x61] sm:$0xff] }
  0xeb   : > { %v950_v52 = vadd.f32 %v428_v34, %v408_v39  ;;  %v458_v15 = vmul.f32 %v861_v35, %v446_v51  ;;  %v435_v25 = vadd.f32 %v427_v2, %v407_v1  ;;  %v967_v26 = vmul.f32 %v875_v43, %v387_v31 }
  0xec   : > { %v970_v27 = vmul.f32 %v869_v40, %v415_v46  ;;  %v486_v16 = vmul.f32 %v863_v36, %v955_v63  ;;  %v490_v28 = vadd.f32 %v482_v6, %v462_v8  ;;  %v514_v30 = vmul.f32 %v871_v41, %v959_v7  ;;  %v990_v6 = vld [vmem:[#allocation2 + $0x62] sm:$0xff] }
  0xed   : > { %v466_v29 = vadd.f32 %v458_v15, %v438_v22  ;;  %v977_v32 = vmul.f32 %v873_v42, %v446_v51  ;;  %v463_v33 = vadd.f32 %v455_v37, %v435_v25  ;;  %v369_v34 = vmul.f32 %v847_v13, %v357_v20  ;;  %v361_v22 = vld [vmem:[#allocation2 + $0x60] sm:$0xff] }
  0xee   : > { %v397_v31 = vmul.f32 %v849_v14, %v385_v21  ;;  %v425_v39 = vmul.f32 %v851_v19, %v413_v24  ;;  %v518_v46 = vadd.f32 %v510_v12, %v490_v28  ;;  %v452_v49 = vmul.f32 %v861_v35, %v357_v20 }
  0xef   : > { %v494_v47 = vadd.f32 %v486_v16, %v466_v29  ;;  %v480_v50 = vmul.f32 %v863_v36, %v385_v21  ;;  %v508_v51 = vmul.f32 %v871_v41, %v413_v24  ;;  %v536_v37 = vmul.f32 %v873_v42, %v357_v20 }
  0xf0   : > { %v405_v1 = vadd.f32 %v397_v31, %v369_v34  ;;  %v564_v2 = vmul.f32 %v875_v43, %v385_v21  ;;  %v547_v8 = vadd.f32 %v539_v48, %v518_v46  ;;  %v460_v15 = vadd.f32 %v452_v49, %v432_v38 }
  0xf1   : > { %v522_v12 = vadd.f32 %v514_v30, %v494_v47  ;;  %v592_v25 = vmul.f32 %v869_v40, %v413_v24  ;;  %v544_v28 = vadd.f32 %v536_v37, %v515_v0  ;;  %v373_v29 = vmul.f32 %v847_v13, %v361_v22 }
  0xf2   : > { %v433_v16 = vadd.f32 %v425_v39, %v405_v1  ;;  %v401_v34 = vmul.f32 %v849_v14, %v984_v61  ;;  %v575_v31 = vadd.f32 %v567_v53, %v547_v8  ;;  %v488_v23 = vadd.f32 %v480_v50, %v460_v15  ;;  %v723_v14 = vld [vmem:[%s1071_s3] ss:$0 sm:$0xff] }
  0xf3   : > { %v551_v20 = vadd.f32 %v884_v55, %v522_v12  ;;  %v429_v21 = vmul.f32 %v851_v19, %v990_v6  ;;  %v572_v48 = vadd.f32 %v564_v2, %v544_v28  ;;  %v456_v13 = vmul.f32 %v861_v35, %v361_v22 }
  0xf4   : > { %v461_v38 = vadd.f32 %v891_v58, %v433_v16  ;;  %v409_v0 = vadd.f32 %v401_v34, %v373_v29  ;;  %v603_v24 = vadd.f32 %v595_v57, %v575_v31  ;;  %v516_v53 = vadd.f32 %v508_v51, %v488_v23 }
  0xf5   : > { %v579_v55 = vadd.f32 %v887_v56, %v551_v20  ;;  %v484_v19 = vmul.f32 %v863_v36, %v984_v61  ;;  %v600_v39 = vadd.f32 %v592_v25, %v572_v48  ;;  %v464_v46 = vadd.f32 %v456_v13, %v950_v52 }
  0xf6   : > { %v489_v30 = vadd.f32 %v894_v59, %v461_v38  ;;  %v437_v58 = vadd.f32 %v429_v21, %v409_v0  ;;  %v618_v47 = vadd.f32 %v723_v14, %v603_v24  ;;  %v545_v57 = vadd.f32 %v905_v3, %v516_v53 }
  0xf7   : > { %v607_v35 = vadd.f32 %v897_v60, %v579_v55  ;;  %v491_v49 = vadd.f32 %v942_v44, %v463_v33  ;;  %v615_v23 = vadd.f32 %v723_v14, %v600_v39  ;;  %v492_v36 = vadd.f32 %v484_v19, %v464_v46 }
  0xf8   : > { %v517_v56 = vadd.f32 %v900_v62, %v489_v30  ;;  %v465_v50 = vadd.f32 %v916_v9, %v437_v58  ;;  %v626_v1 = vmax.f32 %v618_v47, 0.0  ;;  %v573_v51 = vadd.f32 %v908_v4, %v545_v57 }
  0xf9   : > { %v622_v59 = vadd.f32 %v723_v14, %v607_v35  ;;  %v512_v52 = vmul.f32 %v871_v41, %v990_v6  ;;  %v623_v37 = vmax.f32 %v615_v23, 0.0  ;;  %v519_v44 = vadd.f32 %v945_v45, %v491_v49 }
  0xfa   : > { %v546_v60 = vadd.f32 %v963_v18, %v517_v56  ;;  %v493_v3 = vadd.f32 %v919_v10, %v465_v50  ;;  %v634_v62 = vpack.c.bf16 %v626_v1, %v626_v1  ;;  %v601_v4 = vadd.f32 %v911_v5, %v573_v51 }
  0xfb   : > { %v630_v9 = vmax.f32 %v622_v59, 0.0  ;;  %v520_v33 = vadd.f32 %v512_v52, %v492_v36  ;;  %v631_v18 = vpack.c.bf16 %v623_v37, %v623_v37  ;;  %v540_v45 = vmul.f32 %v873_v42, %v361_v22  ;;  %v1074_v22 = vld [vmem:[#allocation3_spill] sm:$0xff] }
  0xfc   : > { %v574_v41 = vadd.f32 %v967_v26, %v546_v60  ;;  %v521_v10 = vadd.f32 %v923_v11, %v493_v3  ;;  %643 = vst.msk [vmem:[%s1029_s9 + $0xc] sm:$0xf] %vm639_vm3, %v634_v62  ;;  %v570_v2 = vmul.f32 %v875_v43, %v955_v63  ;;  %v616_v12 = vadd.f32 %v723_v14, %v601_v4 }
  0xfd   : > { %v638_v8 = vpack.c.bf16 %v630_v9, %v630_v9  ;;  %v549_v15 = vadd.f32 %v926_v17, %v520_v33  ;;  %640 = vst.msk [vmem:[%s1029_s9] sm:$0xf] %vm639_vm3, %v631_v18  ;;  %v548_v26 = vadd.f32 %v540_v45, %v519_v44  ;;  %v568_v42 = vmul.f32 %v875_v43, %v984_v61 }
  0xfe   : > { %v602_v5 = vadd.f32 %v970_v27, %v574_v41  ;;  %v550_v25 = vadd.f32 %v977_v32, %v521_v10  ;;  %v597_v11 = vmul.f32 %v869_v40, %v881_v54  ;;  %v598_v63 = vmul.f32 %v869_v40, %v959_v7 }
  0xff   : > { %647 = vst.msk [vmem:[%s1029_s9 + $0x1c] sm:$0xf] %vm639_vm3, %v638_v8  ;;  %v624_v17 = vmax.f32 %v616_v12, 0.0  ;;  %v577_v27 = vadd.f32 %v1074_v22, %v549_v15  ;;  %v576_v28 = vadd.f32 %v568_v42, %v548_v26  ;;  %v596_v32 = vmul.f32 %v869_v40, %v990_v6 }
 0x100   : > { %v617_v16 = vadd.f32 %v723_v14, %v602_v5  ;;  %v578_v29 = vadd.f32 %v570_v2, %v550_v25 }
 0x101   : > { %v632_v34 = vpack.c.bf16 %v624_v17, %v624_v17  ;;  %v605_v43 = vadd.f32 %v597_v11, %v577_v27  ;;  %v604_v54 = vadd.f32 %v596_v32, %v576_v28 }
 0x102   : > { %v625_v61 = vmax.f32 %v617_v16, 0.0  ;;  %v606_v7 = vadd.f32 %v598_v63, %v578_v29 }
 0x103   : > { %641 = vst.msk [vmem:[%s1029_s9 + $0x4] sm:$0xf] %vm639_vm3, %v632_v34  ;;  %v620_v31 = vadd.f32 %v723_v14, %v605_v43  ;;  %v619_v21 = vadd.f32 %v723_v14, %v604_v54 }
 0x104   : > { %v633_v20 = vpack.c.bf16 %v625_v61, %v625_v61  ;;  %v621_v38 = vadd.f32 %v723_v14, %v606_v7 }
 0x105   : > { %v628_v48 = vmax.f32 %v620_v31, 0.0  ;;  %v627_v0 = vmax.f32 %v619_v21, 0.0 }
 0x106   : > { %642 = vst.msk [vmem:[%s1029_s9 + $0x8] sm:$0xf] %vm639_vm3, %v633_v20  ;;  %v629_v13 = vmax.f32 %v621_v38, 0.0 }
 0x107   : > { %v636_v40 = vpack.c.bf16 %v628_v48, %v628_v48  ;;  %v635_v6 = vpack.c.bf16 %v627_v0, %v627_v0 }
 0x108   : > { %v637_v24 = vpack.c.bf16 %v629_v13, %v629_v13 }
 0x109   : > { %645 = vst.msk [vmem:[%s1029_s9 + $0x14] sm:$0xf] %vm639_vm3, %v636_v40  ;;  %644 = vst.msk [vmem:[%s1029_s9 + $0x10] sm:$0xf] %vm639_vm3, %v635_v6 }
 0x10a   : > { %646 = vst.msk [vmem:[%s1029_s9 + $0x18] sm:$0xf] %vm639_vm3, %v637_v24 }
 0x10b PF: > { %s14_s15 = sadd.s32 1, %s772_s15  }
 0x10c   : > { %p11_p5 = scmp.ge.s32.totalorder %s14_s15, 4  }
 0x10e   :  { %13 = sbr.rel (!%p11_p5) target bundleno = 1 (0x1), region = 68 }

// kernel: _lambda_.25
= control target key start
LH: loop header
LB: loop body
LE: loop exit
PB: predicated region body
PF: predicated region fallthrough
CT: control target
= control target key end

     0   :  { %s783_s15 = smov 0   ;;  %s1048_s0 = inlined_call_operand.vmem [shape: bf16[128,16], index: 0, kind: input, shape index: {}]   ;;  %s1049_s1 = inlined_call_operand.vmem [shape: bf16[16,16], index: 1, kind: input, shape index: {}]   ;;  %s1050_s2 = inlined_call_operand.vmem [shape: f32[9,16], index: 2, kind: input, shape index: {}]   ;;  %s1051_s3 = inlined_call_operand.vmem [shape: f32[1,16], index: 3, kind: input, shape index: {}]   ;;  %s1052_s4 = inlined_call_operand.vmem [shape: bf16[2,8,8,16], index: 4, kind: output, shape index: {}]  }
   0x1 LB: > { %s789_s16 = sadd.s32 4294967295, %s755_s15   ;;  %p699_p0 = scmp.ge.s32.totalorder %s755_s15, 1  ;;  %s755_s15 = sphi %s783_s15, %s14_s15  }
   0x2   : > { %p163_p1 = scmp.lt.s32.totalorder %s755_s15, 3 }
   0x4   : > { %p164_p2 = pnand %p699_p0, %p163_p1 }
   0x6   : > { %167 = sbr.rel (%p164_p2) target bundleno = 266 (0x10a), region = 36 }
   0xb   : > { %v744_v0 = vld [vmem:[%s1049_s1] sm:$0xff]   ;;  %s700_s19 = sshll.u32 %s789_s16, 3  ;;  %vm237_vm0 = vcmask 130048   ;;  %vm316_vm1 = vcmask 123904   ;;  %v757_v5 = vmov 0.0   ;;  %v355_v6 = vlaneseq  ;;  %p195_p4 = scmp.lt.s32.totalorder %s789_s16, 1 }
   0xc   : > { %p190_p3 = scmp.lt.s32.totalorder %s700_s19, 15  ;;  %723 = vmatprep.subr.bf16.mxu0 %v744_v0  ;;  %733 = vmatprep.subr.bf16.mxu1 %v744_v0  ;;  %317 = vst.msk [vmem:[#allocation2 + $0x8] sm:$0x3] %vm316_vm1, %v757_v5  ;;  %323 = vst.msk [vmem:[#allocation2 + $0x38] sm:$0x3] %vm316_vm1, %v757_v5  ;;  %v345_v10 = vld [vmem:[%s1050_s2] sm:$0xff] }
   0xd   : > { %724 = vmatpush3.bf16.msra.mxu0 %v744_v0  ;;  %734 = vmatpush3.bf16.msra.mxu1 %v744_v0  ;;  %322 = vst.msk [vmem:[#allocation2 + $0x30] sm:$0xff] %vm237_vm0, %v757_v5  ;;  %315 = vst.msk [vmem:[#allocation2] sm:$0xff] %vm237_vm0, %v757_v5  ;;  %v356_v7 = vshrl.u32 %v355_v6, 7  ;;  %v849_v38 = vld [vmem:[%s1050_s2 + $0x8] ss:$0 sm:$0xff]  ;;  %vm631_vm2 = vcmask 125952  }
   0xe   : > { %s1056_s19 = smov (!%p190_p3, %s700_s19), 15  ;;  %335 = vst.msk [vmem:[#allocation2 + $0x98] sm:$0x3] %vm316_vm1, %v757_v5  ;;  %319 = vst.msk [vmem:[#allocation2 + $0x18] sm:$0x3] %vm316_vm1, %v757_v5  ;;  %s1058_s16 = smov (!%p195_p4, %s789_s16), 1 }
   0xf   : > { %s701_s20 = sshll.u32 %s1056_s19, 2  ;;  %318 = vst.msk [vmem:[#allocation2 + $0x10] sm:$0xff] %vm237_vm0, %v757_v5  ;;  %320 = vst.msk [vmem:[#allocation2 + $0x20] sm:$0xff] %vm237_vm0, %v757_v5  ;;  %v357_v8 = vsub.s32 0, %v356_v7  ;;  %v385_v9 = vsub.s32 1, %v356_v7  ;;  %v413_v13 = vsub.s32 2, %v356_v7 }
  0x10   : > { %s193_s23 = scalar_lea.vmem %s1048_s0, %s701_s20  ;;  %321 = vst.msk [vmem:[#allocation2 + $0x28] sm:$0x3] %vm316_vm1, %v757_v5  ;;  %325 = vst.msk [vmem:[#allocation2 + $0x48] sm:$0x3] %vm316_vm1, %v757_v5  ;;  %v441_v22 = vsub.s32 3, %v356_v7  ;;  %v469_v23 = vsub.s32 4, %v356_v7 }
  0x11   : > { %v745_v1 = vld [vmem:[%s193_s23] sm:$0xff]   ;;  %v746_v2 = vld [vmem:[%s193_s23 + $0x10] sm:$0xff]   ;;  %v747_v3 = vld [vmem:[%s193_s23 + $0x8] sm:$0xff]   ;;  %324 = vst.msk [vmem:[#allocation2 + $0x40] sm:$0xff] %vm237_vm0, %v757_v5  ;;  %v827_v11 = vrot.slane %v345_v10, %v357_v8  ;;  %v829_v12 = vrot.slane %v345_v10, %v385_v9  ;;  %v831_v17 = vrot.slane %v345_v10, %v413_v13  ;;  %v497_v25 = vsub.s32 5, %v356_v7  ;;  %s717_s30 = sshll.u32 %s1058_s16, 5 }
  0x12   : > { %725 = vmatprep.mubr.msk.bf16.mxu0 %vm237_vm0, %v745_v1  ;;  %729 = vmatprep.mubr.msk.bf16.mxu1 %vm237_vm0, %v746_v2  ;;  %v748_v4 = vld [vmem:[%s193_s23 + $0x18] sm:$0xff]   ;;  %326 = vst.msk [vmem:[#allocation2 + $0x50] sm:$0xff] %vm237_vm0, %v757_v5  ;;  %328 = vst.msk [vmem:[#allocation2 + $0x60] sm:$0xff] %vm237_vm0, %v757_v5  ;;  %v526_v26 = vsub.s32 6, %v356_v7  ;;  %v554_v27 = vsub.s32 7, %v356_v7  ;;  %v841_v33 = vrot.slane %v345_v10, %v441_v22  ;;  %s1009_s7 = scalar_lea.vmem %s1052_s4, %s717_s30 }
  0x13   : > { %726 = vmatmul.mubr.msk.bf16.vlgmr.msra.gmra.mxu0 %vm237_vm0, %v747_v3  ;;  %730 = vmatmul.mubr.msk.bf16.vlgmr.msra.gmra.mxu1 %vm237_vm0, %v748_v4  ;;  %327 = vst.msk [vmem:[#allocation2 + $0x58] sm:$0x3] %vm316_vm1, %v757_v5  ;;  %329 = vst.msk [vmem:[#allocation2 + $0x68] sm:$0x3] %vm316_vm1, %v757_v5  ;;  %v843_v34 = vrot.slane %v345_v10, %v469_v23  ;;  %v851_v39 = vrot.slane %v345_v10, %v497_v25 }
  0x14   : > { %330 = vst.msk [vmem:[#allocation2 + $0x70] sm:$0xff] %vm237_vm0, %v757_v5  ;;  %332 = vst.msk [vmem:[#allocation2 + $0x80] sm:$0xff] %vm237_vm0, %v757_v5  ;;  %v347_v14 = vld [vmem:[#allocation2] sm:$0xff]  ;;  %v853_v40 = vrot.slane %v345_v10, %v526_v26  ;;  %v855_v41 = vrot.slane %v345_v10, %v554_v27 }
  0x15   : > { %331 = vst.msk [vmem:[#allocation2 + $0x78] sm:$0x3] %vm316_vm1, %v757_v5  ;;  %333 = vst.msk [vmem:[#allocation2 + $0x88] sm:$0x3] %vm316_vm1, %v757_v5  ;;  %v375_v15 = vld [vmem:[#allocation2 + $0x1] sm:$0xff]  ;;  %v359_v18 = vmul.f32 %v827_v11, %v347_v14 }
  0x16   : > { %334 = vst.msk [vmem:[#allocation2 + $0x90] sm:$0xff] %vm237_vm0, %v757_v5  ;;  %v387_v19 = vmul.f32 %v829_v12, %v375_v15  ;;  %v403_v21 = vld [vmem:[#allocation2 + $0x2] sm:$0xff] }
  0x17   : > { %v415_v30 = vmul.f32 %v831_v17, %v403_v21 }
  0x18   : > { %v395_v29 = vadd.f32 %v387_v19, %v359_v18 }
  0x1a   : > { %v423_v47 = vadd.f32 %v415_v30, %v395_v29 }
  0x1d   : > { %v523_v35 = vld [vmem:[#allocation2 + $0x90] sm:$0xff] }
  0x1e   : > { %v551_v36 = vld [vmem:[#allocation2 + $0x91] sm:$0xff]  ;;  %v864_v53 = vmul.f32 %v853_v40, %v523_v35 }
  0x1f   : > { %v579_v42 = vld [vmem:[#allocation2 + $0x92] sm:$0xff]  ;;  %v867_v54 = vmul.f32 %v855_v41, %v551_v36 }
  0x20   : > { %v877_v58 = vmul.f32 %v849_v38, %v579_v42 }
  0xd3   : > { %v727_v16 = vpop.f32.mrf.mxu0  ;;  %v731_v20 = vpop.f32.mrf.mxu1 }
  0xd4   : > { %339 = vst.msk [vmem:[#allocation2 + $0x31] sm:$0xff] %vm237_vm0, %v727_v16  ;;  %343 = vst.msk [vmem:[#allocation2 + $0x71] sm:$0xff] %vm237_vm0, %v731_v20 }
  0xd5   : > { %v284_v24 = vpop.f32.mrf.mxu0  ;;  %v300_v28 = vpop.f32.mrf.mxu1 }
  0xd6   : > { %337 = vst.msk [vmem:[#allocation2 + $0x11] sm:$0xff] %vm237_vm0, %v284_v24  ;;  %341 = vst.msk [vmem:[#allocation2 + $0x51] sm:$0xff] %vm237_vm0, %v300_v28 }
  0xd7   : > { %v728_v31 = vpop.f32.mrf.mxu0  ;;  %v732_v32 = vpop.f32.mrf.mxu1 }
  0xd8   : > { %340 = vst.msk [vmem:[#allocation2 + $0x41] sm:$0xff] %vm237_vm0, %v728_v31  ;;  %344 = vst.msk [vmem:[#allocation2 + $0x81] sm:$0xff] %vm237_vm0, %v732_v32 }
  0xd9   : > { %v287_v37 = vpop.f32.mrf.mxu0  ;;  %v303_v43 = vpop.f32.mrf.mxu1 }
  0xda   : > { %338 = vst.msk [vmem:[#allocation2 + $0x21] sm:$0xff] %vm237_vm0, %v287_v37  ;;  %342 = vst.msk [vmem:[#allocation2 + $0x61] sm:$0xff] %vm237_vm0, %v303_v43 }
  0xdb   : > { %v350_v44 = vld [vmem:[#allocation2 + $0x30] sm:$0xff] }
  0xdc   : > { %v378_v45 = vld [vmem:[#allocation2 + $0x31] sm:$0xff]  ;;  %v362_v48 = vmul.f32 %v827_v11, %v350_v44  ;;  %v871_v56 = vmul.f32 %v841_v33, %v350_v44  ;;  %v885_v1 = vmul.f32 %v853_v40, %v350_v44 }
  0xdd   : > { %v406_v46 = vld [vmem:[#allocation2 + $0x32] sm:$0xff]  ;;  %v390_v49 = vmul.f32 %v829_v12, %v378_v45  ;;  %v874_v57 = vmul.f32 %v843_v34, %v378_v45  ;;  %v888_v2 = vmul.f32 %v855_v41, %v378_v45 }
  0xde   : > { %v354_v50 = vld [vmem:[#allocation2 + $0x70] sm:$0xff]  ;;  %v418_v55 = vmul.f32 %v831_v17, %v406_v46  ;;  %v880_v60 = vmul.f32 %v851_v39, %v406_v46  ;;  %v891_v3 = vmul.f32 %v849_v38, %v406_v46 }
  0xdf   : > { %v382_v51 = vld [vmem:[#allocation2 + $0x71] sm:$0xff]  ;;  %v398_v59 = vadd.f32 %v390_v49, %v362_v48  ;;  %v366_v61 = vmul.f32 %v827_v11, %v354_v50  ;;  %v896_v7 = vmul.f32 %v841_v33, %v354_v50  ;;  %v906_v15 = vmul.f32 %v853_v40, %v354_v50  ;;  %v351_v28 = vld [vmem:[#allocation2 + $0x40] sm:$0xff] }
  0xe0   : > { %v861_v52 = vld [vmem:[#allocation2 + $0x72] sm:$0xff]  ;;  %v394_v62 = vmul.f32 %v829_v12, %v382_v51  ;;  %v899_v8 = vmul.f32 %v843_v34, %v382_v51  ;;  %v911_v21 = vmul.f32 %v855_v41, %v382_v51  ;;  %v379_v29 = vld [vmem:[#allocation2 + $0x41] sm:$0xff] }
  0xe1   : > { %v348_v63 = vld [vmem:[#allocation2 + $0x10] sm:$0xff]  ;;  %v422_v4 = vmul.f32 %v831_v17, %v861_v52  ;;  %v903_v9 = vmul.f32 %v851_v39, %v861_v52  ;;  %v426_v14 = vadd.f32 %v418_v55, %v398_v59  ;;  %v407_v44 = vld [vmem:[#allocation2 + $0x42] sm:$0xff]  ;;  %v391_v48 = vmul.f32 %v829_v12, %v379_v29 }
  0xe2   : > { %v376_v0 = vld [vmem:[#allocation2 + $0x11] sm:$0xff]  ;;  %v402_v6 = vadd.f32 %v394_v62, %v366_v61  ;;  %v360_v16 = vmul.f32 %v827_v11, %v348_v63  ;;  %1053 = vst [vmem:[#allocation3_spill] sm:$0xff] %v911_v21  ;;  %v443_v23 = vmul.f32 %v841_v33, %v348_v63  ;;  %v438_v49 = vld [vmem:[#allocation2 + $0x80] sm:$0xff]  ;;  %v446_v59 = vmul.f32 %v841_v33, %v351_v28 }
  0xe3   : > { %v404_v5 = vld [vmem:[#allocation2 + $0x12] sm:$0xff]  ;;  %v388_v18 = vmul.f32 %v829_v12, %v376_v0  ;;  %v471_v25 = vmul.f32 %v843_v34, %v376_v0  ;;  %v935_v61 = vld [vmem:[#allocation2 + $0x81] sm:$0xff]  ;;  %v419_v0 = vmul.f32 %v831_v17, %v407_v44 }
  0xe4   : > { %v352_v10 = vld [vmem:[#allocation2 + $0x50] sm:$0xff]  ;;  %v430_v20 = vadd.f32 %v422_v4, %v402_v6  ;;  %v416_v22 = vmul.f32 %v831_v17, %v404_v5  ;;  %v451_v30 = vadd.f32 %v443_v23, %v423_v47  ;;  %v499_v31 = vmul.f32 %v851_v39, %v404_v5  ;;  %v939_v5 = vld [vmem:[#allocation2 + $0x82] sm:$0xff] }
  0xe5   : > { %v380_v13 = vld [vmem:[#allocation2 + $0x51] sm:$0xff]  ;;  %v396_v24 = vadd.f32 %v388_v18, %v360_v16  ;;  %v364_v26 = vmul.f32 %v827_v11, %v352_v10  ;;  %v447_v35 = vmul.f32 %v841_v33, %v352_v10  ;;  %v531_v46 = vmul.f32 %v853_v40, %v352_v10  ;;  %v349_v18 = vld [vmem:[#allocation2 + $0x20] sm:$0xff] }
  0xe6   : > { %v408_v19 = vld [vmem:[#allocation2 + $0x52] sm:$0xff]  ;;  %v392_v27 = vmul.f32 %v829_v12, %v380_v13  ;;  %v922_v42 = vmul.f32 %v843_v34, %v380_v13  ;;  %v479_v45 = vadd.f32 %v471_v25, %v451_v30  ;;  %v363_v47 = vmul.f32 %v827_v11, %v351_v28 }
  0xe7   : > { %v420_v32 = vmul.f32 %v831_v17, %v408_v19  ;;  %v424_v36 = vadd.f32 %v416_v22, %v396_v24  ;;  %v925_v43 = vmul.f32 %v851_v39, %v408_v19  ;;  %v559_v51 = vmul.f32 %v855_v41, %v380_v13  ;;  %v405_v22 = vld [vmem:[#allocation2 + $0x22] sm:$0xff] }
  0xe8   : > { %v400_v37 = vadd.f32 %v392_v27, %v364_v26  ;;  %v587_v55 = vmul.f32 %v849_v38, %v408_v19  ;;  %v507_v62 = vadd.f32 %v499_v31, %v479_v45  ;;  %v399_v63 = vadd.f32 %v391_v48, %v363_v47  ;;  %v377_v19 = vld [vmem:[#allocation2 + $0x21] sm:$0xff] }
  0xe9   : > { %v474_v4 = vmul.f32 %v843_v34, %v379_v29  ;;  %v454_v6 = vadd.f32 %v446_v59, %v426_v14  ;;  %v502_v10 = vmul.f32 %v851_v39, %v407_v44  ;;  %v943_v16 = vmul.f32 %v853_v40, %v351_v28  ;;  %v964_v59 = vld [vmem:[#allocation2 + $0x61] sm:$0xff] }
  0xea   : > { %v930_v50 = vadd.f32 %v420_v32, %v400_v37  ;;  %v450_v13 = vmul.f32 %v841_v33, %v438_v49  ;;  %v427_v23 = vadd.f32 %v419_v0, %v399_v63  ;;  %v947_v24 = vmul.f32 %v855_v41, %v379_v29 }
  0xeb   : > { %v950_v25 = vmul.f32 %v849_v38, %v407_v44  ;;  %v478_v14 = vmul.f32 %v843_v34, %v935_v61  ;;  %v482_v26 = vadd.f32 %v474_v4, %v454_v6  ;;  %v506_v28 = vmul.f32 %v851_v39, %v939_v5  ;;  %v970_v4 = vld [vmem:[#allocation2 + $0x62] sm:$0xff] }
  0xec   : > { %v458_v27 = vadd.f32 %v450_v13, %v430_v20  ;;  %v957_v30 = vmul.f32 %v853_v40, %v438_v49  ;;  %v455_v31 = vadd.f32 %v447_v35, %v427_v23  ;;  %v361_v32 = vmul.f32 %v827_v11, %v349_v18  ;;  %v353_v20 = vld [vmem:[#allocation2 + $0x60] sm:$0xff] }
  0xed   : > { %v389_v29 = vmul.f32 %v829_v12, %v377_v19  ;;  %v417_v37 = vmul.f32 %v831_v17, %v405_v22  ;;  %v510_v44 = vadd.f32 %v502_v10, %v482_v26  ;;  %v444_v47 = vmul.f32 %v841_v33, %v349_v18 }
  0xee   : > { %v486_v45 = vadd.f32 %v478_v14, %v458_v27  ;;  %v472_v48 = vmul.f32 %v843_v34, %v377_v19  ;;  %v500_v49 = vmul.f32 %v851_v39, %v405_v22  ;;  %v528_v35 = vmul.f32 %v853_v40, %v349_v18 }
  0xef   : > { %v397_v63 = vadd.f32 %v389_v29, %v361_v32  ;;  %v556_v0 = vmul.f32 %v855_v41, %v377_v19  ;;  %v539_v6 = vadd.f32 %v531_v46, %v510_v44  ;;  %v452_v13 = vadd.f32 %v444_v47, %v424_v36 }
  0xf0   : > { %v514_v10 = vadd.f32 %v506_v28, %v486_v45  ;;  %v584_v23 = vmul.f32 %v849_v38, %v405_v22  ;;  %v536_v26 = vadd.f32 %v528_v35, %v507_v62  ;;  %v365_v27 = vmul.f32 %v827_v11, %v353_v20 }
  0xf1   : > { %v425_v14 = vadd.f32 %v417_v37, %v397_v63  ;;  %v393_v32 = vmul.f32 %v829_v12, %v964_v59  ;;  %v567_v29 = vadd.f32 %v559_v51, %v539_v6  ;;  %v480_v21 = vadd.f32 %v472_v48, %v452_v13  ;;  %v714_v12 = vld [vmem:[%s1051_s3] ss:$0 sm:$0xff] }
  0xf2   : > { %v543_v18 = vadd.f32 %v864_v53, %v514_v10  ;;  %v421_v19 = vmul.f32 %v831_v17, %v970_v4  ;;  %v564_v46 = vadd.f32 %v556_v0, %v536_v26  ;;  %v448_v11 = vmul.f32 %v841_v33, %v353_v20 }
  0xf3   : > { %v453_v36 = vadd.f32 %v871_v56, %v425_v14  ;;  %v401_v62 = vadd.f32 %v393_v32, %v365_v27  ;;  %v595_v22 = vadd.f32 %v587_v55, %v567_v29  ;;  %v508_v51 = vadd.f32 %v500_v49, %v480_v21 }
  0xf4   : > { %v571_v53 = vadd.f32 %v867_v54, %v543_v18  ;;  %v476_v17 = vmul.f32 %v843_v34, %v964_v59  ;;  %v592_v37 = vadd.f32 %v584_v23, %v564_v46  ;;  %v456_v44 = vadd.f32 %v448_v11, %v930_v50 }
  0xf5   : > { %v481_v28 = vadd.f32 %v874_v57, %v453_v36  ;;  %v429_v56 = vadd.f32 %v421_v19, %v401_v62  ;;  %v610_v45 = vadd.f32 %v714_v12, %v595_v22  ;;  %v537_v55 = vadd.f32 %v885_v1, %v508_v51 }
  0xf6   : > { %v599_v33 = vadd.f32 %v877_v58, %v571_v53  ;;  %v483_v47 = vadd.f32 %v922_v42, %v455_v31  ;;  %v607_v21 = vadd.f32 %v714_v12, %v592_v37  ;;  %v484_v34 = vadd.f32 %v476_v17, %v456_v44 }
  0xf7   : > { %v509_v54 = vadd.f32 %v880_v60, %v481_v28  ;;  %v457_v48 = vadd.f32 %v896_v7, %v429_v56  ;;  %v618_v63 = vmax.f32 %v610_v45, 0.0  ;;  %v565_v49 = vadd.f32 %v888_v2, %v537_v55 }
  0xf8   : > { %v614_v57 = vadd.f32 %v714_v12, %v599_v33  ;;  %v504_v50 = vmul.f32 %v851_v39, %v970_v4  ;;  %v615_v35 = vmax.f32 %v607_v21, 0.0  ;;  %v511_v42 = vadd.f32 %v925_v43, %v483_v47 }
  0xf9   : > { %v538_v58 = vadd.f32 %v943_v16, %v509_v54  ;;  %v485_v1 = vadd.f32 %v899_v8, %v457_v48  ;;  %v626_v60 = vpack.c.bf16 %v618_v63, %v618_v63  ;;  %v593_v2 = vadd.f32 %v891_v3, %v565_v49 }
  0xfa   : > { %v622_v7 = vmax.f32 %v614_v57, 0.0  ;;  %v512_v31 = vadd.f32 %v504_v50, %v484_v34  ;;  %v623_v16 = vpack.c.bf16 %v615_v35, %v615_v35  ;;  %v532_v43 = vmul.f32 %v853_v40, %v353_v20  ;;  %v1054_v20 = vld [vmem:[#allocation3_spill] sm:$0xff] }
  0xfb   : > { %v566_v39 = vadd.f32 %v947_v24, %v538_v58  ;;  %v513_v8 = vadd.f32 %v903_v9, %v485_v1  ;;  %635 = vst.msk [vmem:[%s1009_s7 + $0xc] sm:$0xf] %vm631_vm2, %v626_v60  ;;  %v562_v0 = vmul.f32 %v855_v41, %v935_v61  ;;  %v608_v10 = vadd.f32 %v714_v12, %v593_v2 }
  0xfc   : > { %v630_v6 = vpack.c.bf16 %v622_v7, %v622_v7  ;;  %v541_v13 = vadd.f32 %v906_v15, %v512_v31  ;;  %632 = vst.msk [vmem:[%s1009_s7] sm:$0xf] %vm631_vm2, %v623_v16  ;;  %v540_v24 = vadd.f32 %v532_v43, %v511_v42  ;;  %v560_v40 = vmul.f32 %v855_v41, %v964_v59 }
  0xfd   : > { %v594_v3 = vadd.f32 %v950_v25, %v566_v39  ;;  %v542_v23 = vadd.f32 %v957_v30, %v513_v8  ;;  %v589_v9 = vmul.f32 %v849_v38, %v861_v52  ;;  %v590_v61 = vmul.f32 %v849_v38, %v939_v5 }
  0xfe   : > { %639 = vst.msk [vmem:[%s1009_s7 + $0x1c] sm:$0xf] %vm631_vm2, %v630_v6  ;;  %v616_v15 = vmax.f32 %v608_v10, 0.0  ;;  %v569_v25 = vadd.f32 %v1054_v20, %v541_v13  ;;  %v568_v26 = vadd.f32 %v560_v40, %v540_v24  ;;  %v588_v30 = vmul.f32 %v849_v38, %v970_v4 }
  0xff   : > { %v609_v14 = vadd.f32 %v714_v12, %v594_v3  ;;  %v570_v27 = vadd.f32 %v562_v0, %v542_v23 }
 0x100   : > { %v624_v32 = vpack.c.bf16 %v616_v15, %v616_v15  ;;  %v597_v41 = vadd.f32 %v589_v9, %v569_v25  ;;  %v596_v52 = vadd.f32 %v588_v30, %v568_v26 }
 0x101   : > { %v617_v59 = vmax.f32 %v609_v14, 0.0  ;;  %v598_v5 = vadd.f32 %v590_v61, %v570_v27 }
 0x102   : > { %633 = vst.msk [vmem:[%s1009_s7 + $0x4] sm:$0xf] %vm631_vm2, %v624_v32  ;;  %v612_v29 = vadd.f32 %v714_v12, %v597_v41  ;;  %v611_v19 = vadd.f32 %v714_v12, %v596_v52 }
 0x103   : > { %v625_v18 = vpack.c.bf16 %v617_v59, %v617_v59  ;;  %v613_v36 = vadd.f32 %v714_v12, %v598_v5 }
 0x104   : > { %v620_v46 = vmax.f32 %v612_v29, 0.0  ;;  %v619_v62 = vmax.f32 %v611_v19, 0.0 }
 0x105   : > { %634 = vst.msk [vmem:[%s1009_s7 + $0x8] sm:$0xf] %vm631_vm2, %v625_v18  ;;  %v621_v11 = vmax.f32 %v613_v36, 0.0 }
 0x106   : > { %v628_v38 = vpack.c.bf16 %v620_v46, %v620_v46  ;;  %v627_v4 = vpack.c.bf16 %v619_v62, %v619_v62 }
 0x107   : > { %v629_v22 = vpack.c.bf16 %v621_v11, %v621_v11 }
 0x108   : > { %637 = vst.msk [vmem:[%s1009_s7 + $0x14] sm:$0xf] %vm631_vm2, %v628_v38  ;;  %636 = vst.msk [vmem:[%s1009_s7 + $0x10] sm:$0xf] %vm631_vm2, %v627_v4 }
 0x109   : > { %638 = vst.msk [vmem:[%s1009_s7 + $0x18] sm:$0xf] %vm631_vm2, %v629_v22 }
 0x10a PF: > { %s14_s15 = sadd.s32 1, %s755_s15  }
 0x10b   : > { %p11_p5 = scmp.ge.s32.totalorder %s14_s15, 4  }
 0x10d   :  { %13 = sbr.rel (!%p11_p5) target bundleno = 1 (0x1), region = 68 }

// kernel: _lambda_.26
= control target key start
LH: loop header
LB: loop body
LE: loop exit
PB: predicated region body
PF: predicated region fallthrough
CT: control target
= control target key end

     0   :  { %s780_s15 = smov 0   ;;  %s1045_s0 = inlined_call_operand.vmem [shape: bf16[128,8], index: 0, kind: input, shape index: {}]   ;;  %s1046_s1 = inlined_call_operand.vmem [shape: bf16[8,8], index: 1, kind: input, shape index: {}]   ;;  %s1047_s2 = inlined_call_operand.vmem [shape: f32[9,8], index: 2, kind: input, shape index: {}]   ;;  %s1048_s3 = inlined_call_operand.vmem [shape: f32[1,8], index: 3, kind: input, shape index: {}]   ;;  %s1049_s4 = inlined_call_operand.vmem [shape: bf16[2,8,8,8], index: 4, kind: output, shape index: {}]  }
   0x1 LB: > { %s786_s16 = sadd.s32 4294967295, %s752_s15   ;;  %p696_p0 = scmp.ge.s32.totalorder %s752_s15, 1  ;;  %s752_s15 = sphi %s780_s15, %s14_s15  }
   0x2   : > { %p163_p1 = scmp.lt.s32.totalorder %s752_s15, 3 }
   0x4   : > { %p164_p2 = pnand %p696_p0, %p163_p1 }
   0x6   : > { %167 = sbr.rel (%p164_p2) target bundleno = 266 (0x10a), region = 36 }
   0xb   : > { %v209_v0 = vld [vmem:[%s1046_s1] sm:$0xf]  ;;  %vm243_vm0 = vcmask 1043456   ;;  %s697_s19 = sshll.u32 %s786_s16, 3  ;;  %vm230_vm1 = vcmask 64512   ;;  %vm313_vm2 = vcmask 58368   ;;  %v352_v7 = vlaneseq }
   0xc   : > { %731 = vmatprep.subr.msk.bf16.mxu0 %vm243_vm0, %v209_v0  ;;  %732 = vmatprep.subr.msk.bf16.mxu1 %vm243_vm0, %v209_v0  ;;  %v245_v1 = vsel %vm243_vm0, %v209_v0, 0  ;;  %p190_p3 = scmp.lt.s32.totalorder %s697_s19, 15  ;;  %v754_v6 = vmov 0.0   ;;  %v342_v11 = vld [vmem:[%s1047_s2] sm:$0xff]  ;;  %v846_v39 = vld [vmem:[%s1047_s2 + $0x8] ss:$0 sm:$0xff] }
   0xd   : > { %720 = vmatpush3.bf16.msra.mxu0 %v245_v1  ;;  %730 = vmatpush3.bf16.msra.mxu1 %v245_v1  ;;  %314 = vst.msk [vmem:[#allocation2 + $0x8] sm:$0x3] %vm313_vm2, %v754_v6  ;;  %320 = vst.msk [vmem:[#allocation2 + $0x38] sm:$0x3] %vm313_vm2, %v754_v6  ;;  %v353_v8 = vshrl.u32 %v352_v7, 7  ;;  %p195_p4 = scmp.lt.s32.totalorder %s786_s16, 1 }
   0xe   : > { %s1053_s19 = smov (!%p190_p3, %s697_s19), 15  ;;  %319 = vst.msk [vmem:[#allocation2 + $0x30] sm:$0xff] %vm230_vm1, %v754_v6  ;;  %312 = vst.msk [vmem:[#allocation2] sm:$0xff] %vm230_vm1, %v754_v6  ;;  %vm628_vm3 = vcmask 60416  }
   0xf   : > { %s698_s20 = sshll.u32 %s1053_s19, 2  ;;  %332 = vst.msk [vmem:[#allocation2 + $0x98] sm:$0x3] %vm313_vm2, %v754_v6  ;;  %316 = vst.msk [vmem:[#allocation2 + $0x18] sm:$0x3] %vm313_vm2, %v754_v6  ;;  %v354_v9 = vsub.s32 0, %v353_v8 }
  0x10   : > { %s193_s23 = scalar_lea.vmem %s1045_s0, %s698_s20  ;;  %315 = vst.msk [vmem:[#allocation2 + $0x10] sm:$0xff] %vm230_vm1, %v754_v6  ;;  %317 = vst.msk [vmem:[#allocation2 + $0x20] sm:$0xff] %vm230_vm1, %v754_v6  ;;  %v382_v10 = vsub.s32 1, %v353_v8  ;;  %v410_v14 = vsub.s32 2, %v353_v8  ;;  %v438_v23 = vsub.s32 3, %v353_v8  ;;  %v466_v24 = vsub.s32 4, %v353_v8 }
  0x11   : > { %v742_v2 = vld [vmem:[%s193_s23] sm:$0xff]   ;;  %v743_v3 = vld [vmem:[%s193_s23 + $0x10] sm:$0xff]   ;;  %v744_v4 = vld [vmem:[%s193_s23 + $0x8] sm:$0xff]   ;;  %318 = vst.msk [vmem:[#allocation2 + $0x28] sm:$0x3] %vm313_vm2, %v754_v6  ;;  %v824_v12 = vrot.slane %v342_v11, %v354_v9  ;;  %v494_v26 = vsub.s32 5, %v353_v8 }
  0x12   : > { %721 = vmatprep.mubr.msk.bf16.mxu0 %vm230_vm1, %v742_v2  ;;  %725 = vmatprep.mubr.msk.bf16.mxu1 %vm230_vm1, %v743_v3  ;;  %v745_v5 = vld [vmem:[%s193_s23 + $0x18] sm:$0xff]   ;;  %321 = vst.msk [vmem:[#allocation2 + $0x40] sm:$0xff] %vm230_vm1, %v754_v6  ;;  %323 = vst.msk [vmem:[#allocation2 + $0x50] sm:$0xff] %vm230_vm1, %v754_v6  ;;  %v826_v13 = vrot.slane %v342_v11, %v382_v10  ;;  %v828_v18 = vrot.slane %v342_v11, %v410_v14  ;;  %v523_v27 = vsub.s32 6, %v353_v8  ;;  %s1055_s16 = smov (!%p195_p4, %s786_s16), 1 }
  0x13   : > { %722 = vmatmul.mubr.msk.bf16.vlgmr.msra.gmra.mxu0 %vm230_vm1, %v744_v4  ;;  %726 = vmatmul.mubr.msk.bf16.vlgmr.msra.gmra.mxu1 %vm230_vm1, %v745_v5  ;;  %322 = vst.msk [vmem:[#allocation2 + $0x48] sm:$0x3] %vm313_vm2, %v754_v6  ;;  %324 = vst.msk [vmem:[#allocation2 + $0x58] sm:$0x3] %vm313_vm2, %v754_v6  ;;  %v551_v28 = vsub.s32 7, %v353_v8  ;;  %v838_v34 = vrot.slane %v342_v11, %v438_v23  ;;  %v840_v35 = vrot.slane %v342_v11, %v466_v24  ;;  %s713_s30 = sshll.u32 %s1055_s16, 5 }
  0x14   : > { %325 = vst.msk [vmem:[#allocation2 + $0x60] sm:$0xff] %vm230_vm1, %v754_v6  ;;  %327 = vst.msk [vmem:[#allocation2 + $0x70] sm:$0xff] %vm230_vm1, %v754_v6  ;;  %v848_v40 = vrot.slane %v342_v11, %v494_v26  ;;  %v850_v41 = vrot.slane %v342_v11, %v523_v27  ;;  %s1006_s7 = scalar_lea.vmem %s1049_s4, %s713_s30 }
  0x15   : > { %326 = vst.msk [vmem:[#allocation2 + $0x68] sm:$0x3] %vm313_vm2, %v754_v6  ;;  %328 = vst.msk [vmem:[#allocation2 + $0x78] sm:$0x3] %vm313_vm2, %v754_v6  ;;  %v344_v15 = vld [vmem:[#allocation2] sm:$0xff]  ;;  %v852_v42 = vrot.slane %v342_v11, %v551_v28 }
  0x16   : > { %329 = vst.msk [vmem:[#allocation2 + $0x80] sm:$0xff] %vm230_vm1, %v754_v6  ;;  %331 = vst.msk [vmem:[#allocation2 + $0x90] sm:$0xff] %vm230_vm1, %v754_v6  ;;  %v372_v16 = vld [vmem:[#allocation2 + $0x1] sm:$0xff]  ;;  %v356_v19 = vmul.f32 %v824_v12, %v344_v15 }
  0x17   : > { %330 = vst.msk [vmem:[#allocation2 + $0x88] sm:$0x3] %vm313_vm2, %v754_v6  ;;  %v384_v20 = vmul.f32 %v826_v13, %v372_v16  ;;  %v400_v22 = vld [vmem:[#allocation2 + $0x2] sm:$0xff] }
  0x18   : > { %v412_v31 = vmul.f32 %v828_v18, %v400_v22 }
  0x19   : > { %v392_v30 = vadd.f32 %v384_v20, %v356_v19 }
  0x1b   : > { %v420_v48 = vadd.f32 %v412_v31, %v392_v30 }
  0x1d   : > { %v520_v36 = vld [vmem:[#allocation2 + $0x90] sm:$0xff] }
  0x1e   : > { %v548_v37 = vld [vmem:[#allocation2 + $0x91] sm:$0xff]  ;;  %v861_v54 = vmul.f32 %v850_v41, %v520_v36 }
  0x1f   : > { %v576_v43 = vld [vmem:[#allocation2 + $0x92] sm:$0xff]  ;;  %v864_v55 = vmul.f32 %v852_v42, %v548_v37 }
  0x20   : > { %v874_v59 = vmul.f32 %v846_v39, %v576_v43 }
  0xd3   : > { %v723_v17 = vpop.f32.mrf.mxu0  ;;  %v727_v21 = vpop.f32.mrf.mxu1 }
  0xd4   : > { %336 = vst.msk [vmem:[#allocation2 + $0x31] sm:$0xff] %vm230_vm1, %v723_v17  ;;  %340 = vst.msk [vmem:[#allocation2 + $0x71] sm:$0xff] %vm230_vm1, %v727_v21 }
  0xd5   : > { %v281_v25 = vpop.f32.mrf.mxu0  ;;  %v297_v29 = vpop.f32.mrf.mxu1 }
  0xd6   : > { %334 = vst.msk [vmem:[#allocation2 + $0x11] sm:$0xff] %vm230_vm1, %v281_v25  ;;  %338 = vst.msk [vmem:[#allocation2 + $0x51] sm:$0xff] %vm230_vm1, %v297_v29 }
  0xd7   : > { %v724_v32 = vpop.f32.mrf.mxu0  ;;  %v728_v33 = vpop.f32.mrf.mxu1 }
  0xd8   : > { %337 = vst.msk [vmem:[#allocation2 + $0x41] sm:$0xff] %vm230_vm1, %v724_v32  ;;  %341 = vst.msk [vmem:[#allocation2 + $0x81] sm:$0xff] %vm230_vm1, %v728_v33 }
  0xd9   : > { %v284_v38 = vpop.f32.mrf.mxu0  ;;  %v300_v44 = vpop.f32.mrf.mxu1 }
  0xda   : > { %335 = vst.msk [vmem:[#allocation2 + $0x21] sm:$0xff] %vm230_vm1, %v284_v38  ;;  %339 = vst.msk [vmem:[#allocation2 + $0x61] sm:$0xff] %vm230_vm1, %v300_v44 }
  0xdb   : > { %v347_v45 = vld [vmem:[#allocation2 + $0x30] sm:$0xff] }
  0xdc   : > { %v375_v46 = vld [vmem:[#allocation2 + $0x31] sm:$0xff]  ;;  %v359_v49 = vmul.f32 %v824_v12, %v347_v45  ;;  %v868_v57 = vmul.f32 %v838_v34, %v347_v45  ;;  %v882_v2 = vmul.f32 %v850_v41, %v347_v45 }
  0xdd   : > { %v403_v47 = vld [vmem:[#allocation2 + $0x32] sm:$0xff]  ;;  %v387_v50 = vmul.f32 %v826_v13, %v375_v46  ;;  %v871_v58 = vmul.f32 %v840_v35, %v375_v46  ;;  %v885_v3 = vmul.f32 %v852_v42, %v375_v46 }
  0xde   : > { %v351_v51 = vld [vmem:[#allocation2 + $0x70] sm:$0xff]  ;;  %v415_v56 = vmul.f32 %v828_v18, %v403_v47  ;;  %v877_v61 = vmul.f32 %v848_v40, %v403_v47  ;;  %v888_v4 = vmul.f32 %v846_v39, %v403_v47 }
  0xdf   : > { %v379_v52 = vld [vmem:[#allocation2 + $0x71] sm:$0xff]  ;;  %v395_v60 = vadd.f32 %v387_v50, %v359_v49  ;;  %v363_v62 = vmul.f32 %v824_v12, %v351_v51  ;;  %v893_v8 = vmul.f32 %v838_v34, %v351_v51  ;;  %v903_v16 = vmul.f32 %v850_v41, %v351_v51  ;;  %v348_v29 = vld [vmem:[#allocation2 + $0x40] sm:$0xff] }
  0xe0   : > { %v858_v53 = vld [vmem:[#allocation2 + $0x72] sm:$0xff]  ;;  %v391_v63 = vmul.f32 %v826_v13, %v379_v52  ;;  %v896_v9 = vmul.f32 %v840_v35, %v379_v52  ;;  %v908_v22 = vmul.f32 %v852_v42, %v379_v52  ;;  %v376_v30 = vld [vmem:[#allocation2 + $0x41] sm:$0xff] }
  0xe1   : > { %v345_v0 = vld [vmem:[#allocation2 + $0x10] sm:$0xff]  ;;  %v419_v5 = vmul.f32 %v828_v18, %v858_v53  ;;  %v900_v10 = vmul.f32 %v848_v40, %v858_v53  ;;  %v423_v15 = vadd.f32 %v415_v56, %v395_v60  ;;  %v404_v45 = vld [vmem:[#allocation2 + $0x42] sm:$0xff]  ;;  %v388_v49 = vmul.f32 %v826_v13, %v376_v30 }
  0xe2   : > { %v373_v1 = vld [vmem:[#allocation2 + $0x11] sm:$0xff]  ;;  %v399_v7 = vadd.f32 %v391_v63, %v363_v62  ;;  %v357_v17 = vmul.f32 %v824_v12, %v345_v0  ;;  %1050 = vst [vmem:[#allocation3_spill] sm:$0xff] %v908_v22  ;;  %v440_v24 = vmul.f32 %v838_v34, %v345_v0  ;;  %v435_v50 = vld [vmem:[#allocation2 + $0x80] sm:$0xff]  ;;  %v443_v60 = vmul.f32 %v838_v34, %v348_v29 }
  0xe3   : > { %v401_v6 = vld [vmem:[#allocation2 + $0x12] sm:$0xff]  ;;  %v385_v19 = vmul.f32 %v826_v13, %v373_v1  ;;  %v468_v26 = vmul.f32 %v840_v35, %v373_v1  ;;  %v932_v62 = vld [vmem:[#allocation2 + $0x81] sm:$0xff]  ;;  %v416_v1 = vmul.f32 %v828_v18, %v404_v45 }
  0xe4   : > { %v349_v11 = vld [vmem:[#allocation2 + $0x50] sm:$0xff]  ;;  %v427_v21 = vadd.f32 %v419_v5, %v399_v7  ;;  %v413_v23 = vmul.f32 %v828_v18, %v401_v6  ;;  %v448_v31 = vadd.f32 %v440_v24, %v420_v48  ;;  %v496_v32 = vmul.f32 %v848_v40, %v401_v6  ;;  %v936_v6 = vld [vmem:[#allocation2 + $0x82] sm:$0xff] }
  0xe5   : > { %v377_v14 = vld [vmem:[#allocation2 + $0x51] sm:$0xff]  ;;  %v393_v25 = vadd.f32 %v385_v19, %v357_v17  ;;  %v361_v27 = vmul.f32 %v824_v12, %v349_v11  ;;  %v444_v36 = vmul.f32 %v838_v34, %v349_v11  ;;  %v528_v47 = vmul.f32 %v850_v41, %v349_v11  ;;  %v346_v19 = vld [vmem:[#allocation2 + $0x20] sm:$0xff] }
  0xe6   : > { %v405_v20 = vld [vmem:[#allocation2 + $0x52] sm:$0xff]  ;;  %v389_v28 = vmul.f32 %v826_v13, %v377_v14  ;;  %v919_v43 = vmul.f32 %v840_v35, %v377_v14  ;;  %v476_v46 = vadd.f32 %v468_v26, %v448_v31  ;;  %v360_v48 = vmul.f32 %v824_v12, %v348_v29 }
  0xe7   : > { %v417_v33 = vmul.f32 %v828_v18, %v405_v20  ;;  %v421_v37 = vadd.f32 %v413_v23, %v393_v25  ;;  %v922_v44 = vmul.f32 %v848_v40, %v405_v20  ;;  %v556_v52 = vmul.f32 %v852_v42, %v377_v14  ;;  %v402_v23 = vld [vmem:[#allocation2 + $0x22] sm:$0xff] }
  0xe8   : > { %v397_v38 = vadd.f32 %v389_v28, %v361_v27  ;;  %v584_v56 = vmul.f32 %v846_v39, %v405_v20  ;;  %v504_v63 = vadd.f32 %v496_v32, %v476_v46  ;;  %v396_v0 = vadd.f32 %v388_v49, %v360_v48  ;;  %v374_v20 = vld [vmem:[#allocation2 + $0x21] sm:$0xff] }
  0xe9   : > { %v471_v5 = vmul.f32 %v840_v35, %v376_v30  ;;  %v451_v7 = vadd.f32 %v443_v60, %v423_v15  ;;  %v499_v11 = vmul.f32 %v848_v40, %v404_v45  ;;  %v940_v17 = vmul.f32 %v850_v41, %v348_v29  ;;  %v961_v60 = vld [vmem:[#allocation2 + $0x61] sm:$0xff] }
  0xea   : > { %v927_v51 = vadd.f32 %v417_v33, %v397_v38  ;;  %v447_v14 = vmul.f32 %v838_v34, %v435_v50  ;;  %v424_v24 = vadd.f32 %v416_v1, %v396_v0  ;;  %v944_v25 = vmul.f32 %v852_v42, %v376_v30 }
  0xeb   : > { %v947_v26 = vmul.f32 %v846_v39, %v404_v45  ;;  %v475_v15 = vmul.f32 %v840_v35, %v932_v62  ;;  %v479_v27 = vadd.f32 %v471_v5, %v451_v7  ;;  %v503_v29 = vmul.f32 %v848_v40, %v936_v6  ;;  %v967_v5 = vld [vmem:[#allocation2 + $0x62] sm:$0xff] }
  0xec   : > { %v455_v28 = vadd.f32 %v447_v14, %v427_v21  ;;  %v954_v31 = vmul.f32 %v850_v41, %v435_v50  ;;  %v452_v32 = vadd.f32 %v444_v36, %v424_v24  ;;  %v358_v33 = vmul.f32 %v824_v12, %v346_v19  ;;  %v350_v21 = vld [vmem:[#allocation2 + $0x60] sm:$0xff] }
  0xed   : > { %v386_v30 = vmul.f32 %v826_v13, %v374_v20  ;;  %v414_v38 = vmul.f32 %v828_v18, %v402_v23  ;;  %v507_v45 = vadd.f32 %v499_v11, %v479_v27  ;;  %v441_v48 = vmul.f32 %v838_v34, %v346_v19 }
  0xee   : > { %v483_v46 = vadd.f32 %v475_v15, %v455_v28  ;;  %v469_v49 = vmul.f32 %v840_v35, %v374_v20  ;;  %v497_v50 = vmul.f32 %v848_v40, %v402_v23  ;;  %v525_v36 = vmul.f32 %v850_v41, %v346_v19 }
  0xef   : > { %v394_v0 = vadd.f32 %v386_v30, %v358_v33  ;;  %v553_v1 = vmul.f32 %v852_v42, %v374_v20  ;;  %v536_v7 = vadd.f32 %v528_v47, %v507_v45  ;;  %v449_v14 = vadd.f32 %v441_v48, %v421_v37 }
  0xf0   : > { %v511_v11 = vadd.f32 %v503_v29, %v483_v46  ;;  %v581_v24 = vmul.f32 %v846_v39, %v402_v23  ;;  %v533_v27 = vadd.f32 %v525_v36, %v504_v63  ;;  %v362_v28 = vmul.f32 %v824_v12, %v350_v21 }
  0xf1   : > { %v422_v15 = vadd.f32 %v414_v38, %v394_v0  ;;  %v390_v33 = vmul.f32 %v826_v13, %v961_v60  ;;  %v564_v30 = vadd.f32 %v556_v52, %v536_v7  ;;  %v477_v22 = vadd.f32 %v469_v49, %v449_v14  ;;  %v710_v13 = vld [vmem:[%s1048_s3] ss:$0 sm:$0xff] }
  0xf2   : > { %v540_v19 = vadd.f32 %v861_v54, %v511_v11  ;;  %v418_v20 = vmul.f32 %v828_v18, %v967_v5  ;;  %v561_v47 = vadd.f32 %v553_v1, %v533_v27  ;;  %v445_v12 = vmul.f32 %v838_v34, %v350_v21 }
  0xf3   : > { %v450_v37 = vadd.f32 %v868_v57, %v422_v15  ;;  %v398_v63 = vadd.f32 %v390_v33, %v362_v28  ;;  %v592_v23 = vadd.f32 %v584_v56, %v564_v30  ;;  %v505_v52 = vadd.f32 %v497_v50, %v477_v22 }
  0xf4   : > { %v568_v54 = vadd.f32 %v864_v55, %v540_v19  ;;  %v473_v18 = vmul.f32 %v840_v35, %v961_v60  ;;  %v589_v38 = vadd.f32 %v581_v24, %v561_v47  ;;  %v453_v45 = vadd.f32 %v445_v12, %v927_v51 }
  0xf5   : > { %v478_v29 = vadd.f32 %v871_v58, %v450_v37  ;;  %v426_v57 = vadd.f32 %v418_v20, %v398_v63  ;;  %v607_v46 = vadd.f32 %v710_v13, %v592_v23  ;;  %v534_v56 = vadd.f32 %v882_v2, %v505_v52 }
  0xf6   : > { %v596_v34 = vadd.f32 %v874_v59, %v568_v54  ;;  %v480_v48 = vadd.f32 %v919_v43, %v452_v32  ;;  %v604_v22 = vadd.f32 %v710_v13, %v589_v38  ;;  %v481_v35 = vadd.f32 %v473_v18, %v453_v45 }
  0xf7   : > { %v506_v55 = vadd.f32 %v877_v61, %v478_v29  ;;  %v454_v49 = vadd.f32 %v893_v8, %v426_v57  ;;  %v615_v0 = vmax.f32 %v607_v46, 0.0  ;;  %v562_v50 = vadd.f32 %v885_v3, %v534_v56 }
  0xf8   : > { %v611_v58 = vadd.f32 %v710_v13, %v596_v34  ;;  %v501_v51 = vmul.f32 %v848_v40, %v967_v5  ;;  %v612_v36 = vmax.f32 %v604_v22, 0.0  ;;  %v508_v43 = vadd.f32 %v922_v44, %v480_v48 }
  0xf9   : > { %v535_v59 = vadd.f32 %v940_v17, %v506_v55  ;;  %v482_v2 = vadd.f32 %v896_v9, %v454_v49  ;;  %v623_v61 = vpack.c.bf16 %v615_v0, %v615_v0  ;;  %v590_v3 = vadd.f32 %v888_v4, %v562_v50 }
  0xfa   : > { %v619_v8 = vmax.f32 %v611_v58, 0.0  ;;  %v509_v32 = vadd.f32 %v501_v51, %v481_v35  ;;  %v620_v17 = vpack.c.bf16 %v612_v36, %v612_v36  ;;  %v529_v44 = vmul.f32 %v850_v41, %v350_v21  ;;  %v1051_v21 = vld [vmem:[#allocation3_spill] sm:$0xff] }
  0xfb   : > { %v563_v40 = vadd.f32 %v944_v25, %v535_v59  ;;  %v510_v9 = vadd.f32 %v900_v10, %v482_v2  ;;  %632 = vst.msk [vmem:[%s1006_s7 + $0xc] sm:$0xf] %vm628_vm3, %v623_v61  ;;  %v559_v1 = vmul.f32 %v852_v42, %v932_v62  ;;  %v605_v11 = vadd.f32 %v710_v13, %v590_v3 }
  0xfc   : > { %v627_v7 = vpack.c.bf16 %v619_v8, %v619_v8  ;;  %v538_v14 = vadd.f32 %v903_v16, %v509_v32  ;;  %629 = vst.msk [vmem:[%s1006_s7] sm:$0xf] %vm628_vm3, %v620_v17  ;;  %v537_v25 = vadd.f32 %v529_v44, %v508_v43  ;;  %v557_v41 = vmul.f32 %v852_v42, %v961_v60 }
  0xfd   : > { %v591_v4 = vadd.f32 %v947_v26, %v563_v40  ;;  %v539_v24 = vadd.f32 %v954_v31, %v510_v9  ;;  %v586_v10 = vmul.f32 %v846_v39, %v858_v53  ;;  %v587_v62 = vmul.f32 %v846_v39, %v936_v6 }
  0xfe   : > { %636 = vst.msk [vmem:[%s1006_s7 + $0x1c] sm:$0xf] %vm628_vm3, %v627_v7  ;;  %v613_v16 = vmax.f32 %v605_v11, 0.0  ;;  %v566_v26 = vadd.f32 %v1051_v21, %v538_v14  ;;  %v565_v27 = vadd.f32 %v557_v41, %v537_v25  ;;  %v585_v31 = vmul.f32 %v846_v39, %v967_v5 }
  0xff   : > { %v606_v15 = vadd.f32 %v710_v13, %v591_v4  ;;  %v567_v28 = vadd.f32 %v559_v1, %v539_v24 }
 0x100   : > { %v621_v33 = vpack.c.bf16 %v613_v16, %v613_v16  ;;  %v594_v42 = vadd.f32 %v586_v10, %v566_v26  ;;  %v593_v53 = vadd.f32 %v585_v31, %v565_v27 }
 0x101   : > { %v614_v60 = vmax.f32 %v606_v15, 0.0  ;;  %v595_v6 = vadd.f32 %v587_v62, %v567_v28 }
 0x102   : > { %630 = vst.msk [vmem:[%s1006_s7 + $0x4] sm:$0xf] %vm628_vm3, %v621_v33  ;;  %v609_v30 = vadd.f32 %v710_v13, %v594_v42  ;;  %v608_v20 = vadd.f32 %v710_v13, %v593_v53 }
 0x103   : > { %v622_v19 = vpack.c.bf16 %v614_v60, %v614_v60  ;;  %v610_v37 = vadd.f32 %v710_v13, %v595_v6 }
 0x104   : > { %v617_v47 = vmax.f32 %v609_v30, 0.0  ;;  %v616_v63 = vmax.f32 %v608_v20, 0.0 }
 0x105   : > { %631 = vst.msk [vmem:[%s1006_s7 + $0x8] sm:$0xf] %vm628_vm3, %v622_v19  ;;  %v618_v12 = vmax.f32 %v610_v37, 0.0 }
 0x106   : > { %v625_v39 = vpack.c.bf16 %v617_v47, %v617_v47  ;;  %v624_v5 = vpack.c.bf16 %v616_v63, %v616_v63 }
 0x107   : > { %v626_v23 = vpack.c.bf16 %v618_v12, %v618_v12 }
 0x108   : > { %634 = vst.msk [vmem:[%s1006_s7 + $0x14] sm:$0xf] %vm628_vm3, %v625_v39  ;;  %633 = vst.msk [vmem:[%s1006_s7 + $0x10] sm:$0xf] %vm628_vm3, %v624_v5 }
 0x109   : > { %635 = vst.msk [vmem:[%s1006_s7 + $0x18] sm:$0xf] %vm628_vm3, %v626_v23 }
 0x10a PF: > { %s14_s15 = sadd.s32 1, %s752_s15  }
 0x10b   : > { %p11_p5 = scmp.ge.s32.totalorder %s14_s15, 4  }
 0x10d   :  { %13 = sbr.rel (!%p11_p5) target bundleno = 1 (0x1), region = 68 }

// kernel: _lambda_.29
= control target key start
LH: loop header
LB: loop body
LE: loop exit
PB: predicated region body
PF: predicated region fallthrough
CT: control target
= control target key end

     0   :  { %s511_s12 = smov 0   ;;  %s555_s0 = inlined_call_operand.vmem [shape: bf16[128,32], index: 0, kind: input, shape index: {}]   ;;  %s556_s1 = inlined_call_operand.vmem [shape: bf16[32,32], index: 1, kind: input, shape index: {}]   ;;  %s557_s2 = inlined_call_operand.vmem [shape: f32[1,32], index: 2, kind: input, shape index: {}]   ;;  %s558_s3 = inlined_call_operand.vmem [shape: bf16[128,32], index: 3, kind: output, shape index: {}]  }
   0x1 LB: > { %s409_s13 = sadd.s32 4294967295, %s489_s12   ;;  %p413_p0 = scmp.ge.s32.totalorder %s489_s12, 1  ;;  %s489_s12 = sphi %s511_s12, %s13_s12  }
   0x2   : > { %p138_p1 = scmp.lt.s32.totalorder %s489_s12, 3 }
   0x4   : > { %p139_p2 = pnand %p413_p0, %p138_p1 }
   0x5   : > { %s414_s16 = sshll.u32 (!%p139_p2), %s409_s13, 3 }
   0x6   : > { %142 = sbr.rel (%p139_p2) target bundleno = 226 (0xe2), region = 32  ;;  %p163_p3 = scmp.lt.s32.totalorder (!%p139_p2), %s414_s16, 15 }
   0xb   : > { %v477_v0 = vld [vmem:[%s556_s1 + $0x8] sm:$0xff]   ;;  %v478_v1 = vld [vmem:[%s556_s1] sm:$0xff]   ;;  %s560_s16 = smov (!%p163_p3, %s414_s16), 15  ;;  %vm226_vm0 = vcmask 261120   ;;  %vm344_vm1 = vcmask 257024  }
   0xc   : > { %453 = vmatprep.subr.bf16.mxu0 %v477_v0  ;;  %465 = vmatprep.subr.bf16.mxu1 %v477_v0  ;;  %s415_s19 = sshll.u32 %s560_s16, 2  ;;  %v418_v6 = vld [vmem:[%s557_s2] ss:$0 sm:$0xff] }
   0xd   : > { %454 = vmatpush3.bf16.msra.mxu0 %v477_v0  ;;  %467 = vmatpush3.bf16.msra.mxu1 %v477_v0  ;;  %s166_s22 = scalar_lea.vmem %s555_s0, %s415_s19  ;;  %s534_s27 = scalar_lea.vmem %s558_s3, %s415_s19 }
   0xe   : > { %455 = vmatprep.subr.bf16.mxu0 %v478_v1  ;;  %466 = vmatprep.subr.bf16.mxu1 %v478_v1  ;;  %v479_v2 = vld [vmem:[%s166_s22] sm:$0xff]   ;;  %v480_v3 = vld [vmem:[%s166_s22 + $0x10] sm:$0xff]   ;;  %v481_v4 = vld [vmem:[%s166_s22 + $0x8] sm:$0xff]  }
   0xf   : > { %457 = vmatprep.mubr.msk.bf16.mxu0 %vm226_vm0, %v479_v2  ;;  %461 = vmatprep.mubr.msk.bf16.mxu1 %vm226_vm0, %v480_v3  ;;  %v482_v5 = vld [vmem:[%s166_s22 + $0x18] sm:$0xff]  }
  0x11   : > { %456 = vmatpush3.bf16.msra.mxu0 %v478_v1  ;;  %468 = vmatpush3.bf16.msra.mxu1 %v478_v1 }
  0x14   : > { %458 = vmatmul.mubr.msk.bf16.vlgmr.msra.gmra.mxu0 %vm226_vm0, %v481_v4  ;;  %462 = vmatmul.mubr.msk.bf16.vlgmr.msra.gmra.mxu1 %vm226_vm0, %v482_v5 }
  0xd4   : > { %v459_v7 = vpop.f32.mrf.mxu0  ;;  %v463_v9 = vpop.f32.mrf.mxu1 }
  0xd5   : > { %v282_v8 = vadd.f32 %v459_v7, %v418_v6  ;;  %v298_v10 = vadd.f32 %v463_v9, %v418_v6 }
  0xd6   : > { %v273_v11 = vpop.f32.mrf.mxu0  ;;  %v289_v14 = vpop.f32.mrf.mxu1 }
  0xd7   : > { %v306_v12 = vmax.f32 %v282_v8, 0.0  ;;  %v274_v13 = vadd.f32 %v418_v6, %v273_v11  ;;  %v310_v15 = vmax.f32 %v298_v10, 0.0  ;;  %v290_v16 = vadd.f32 %v418_v6, %v289_v14 }
  0xd8   : > { %v460_v17 = vpop.f32.mrf.mxu0  ;;  %v464_v21 = vpop.f32.mrf.mxu1 }
  0xd9   : > { %v441_v18 = vpack.c.bf16 %v306_v12, %v306_v12  ;;  %v304_v19 = vmax.f32 %v274_v13, 0.0  ;;  %v285_v20 = vadd.f32 %v460_v17, %v418_v6  ;;  %v445_v22 = vpack.c.bf16 %v310_v15, %v310_v15 }
  0xda   : > { %v308_v23 = vmax.f32 %v290_v16, 0.0  ;;  %v301_v24 = vadd.f32 %v464_v21, %v418_v6  ;;  %v276_v25 = vpop.f32.mrf.mxu0  ;;  %v292_v29 = vpop.f32.mrf.mxu1 }
  0xdb   : > { %347 = vst.msk [vmem:[%s534_s27 + $0x8] sm:$0xf] %vm344_vm1, %v441_v18  ;;  %v439_v26 = vpack.c.bf16 %v304_v19, %v304_v19  ;;  %v307_v27 = vmax.f32 %v285_v20, 0.0  ;;  %v277_v28 = vadd.f32 %v418_v6, %v276_v25  ;;  %351 = vst.msk [vmem:[%s534_s27 + $0x18] sm:$0xf] %vm344_vm1, %v445_v22  ;;  %v293_v32 = vadd.f32 %v418_v6, %v292_v29 }
  0xdc   : > { %v443_v30 = vpack.c.bf16 %v308_v23, %v308_v23  ;;  %v311_v31 = vmax.f32 %v301_v24, 0.0 }
  0xdd   : > { %345 = vst.msk [vmem:[%s534_s27] sm:$0xf] %vm344_vm1, %v439_v26  ;;  %v442_v33 = vpack.c.bf16 %v307_v27, %v307_v27  ;;  %v305_v34 = vmax.f32 %v277_v28, 0.0  ;;  %v309_v36 = vmax.f32 %v293_v32, 0.0 }
  0xde   : > { %349 = vst.msk [vmem:[%s534_s27 + $0x10] sm:$0xf] %vm344_vm1, %v443_v30  ;;  %v446_v35 = vpack.c.bf16 %v311_v31, %v311_v31 }
  0xdf   : > { %348 = vst.msk [vmem:[%s534_s27 + $0xc] sm:$0xf] %vm344_vm1, %v442_v33  ;;  %v440_v37 = vpack.c.bf16 %v305_v34, %v305_v34  ;;  %v444_v38 = vpack.c.bf16 %v309_v36, %v309_v36 }
  0xe0   : > { %352 = vst.msk [vmem:[%s534_s27 + $0x1c] sm:$0xf] %vm344_vm1, %v446_v35 }
  0xe1   : > { %346 = vst.msk [vmem:[%s534_s27 + $0x4] sm:$0xf] %vm344_vm1, %v440_v37  ;;  %350 = vst.msk [vmem:[%s534_s27 + $0x14] sm:$0xf] %vm344_vm1, %v444_v38 }
  0xe2 PF: > { %s13_s12 = sadd.s32 1, %s489_s12  }
  0xe3   : > { %p10_p4 = scmp.ge.s32.totalorder %s13_s12, 4  }
  0xe5   :  { %12 = sbr.rel (!%p10_p4) target bundleno = 1 (0x1), region = 62 }

// kernel: _lambda_.28
= control target key start
LH: loop header
LB: loop body
LE: loop exit
PB: predicated region body
PF: predicated region fallthrough
CT: control target
= control target key end

     0   :  { %s789_s21 = smov 0   ;;  %s848_s0 = inlined_call_operand.vmem [shape: bf16[128,8], index: 0, kind: input, shape index: {}]   ;;  %s849_s1 = inlined_call_operand.vmem [shape: bf16[8,32], index: 1, kind: input, shape index: {}]   ;;  %s850_s2 = inlined_call_operand.vmem [shape: f32[1,32], index: 2, kind: input, shape index: {}, may-alias: {2,5}]   ;;  %s851_s3 = inlined_call_operand.vmem [shape: bf16[128,16], index: 3, kind: input, shape index: {}]   ;;  %s852_s4 = inlined_call_operand.vmem [shape: bf16[16,32], index: 4, kind: input, shape index: {}]   ;;  %s853_s5 = inlined_call_operand.vmem [shape: f32[1,32], index: 5, kind: input, shape index: {}, may-alias: {2,5}]   ;;  %s854_s6 = inlined_call_operand.vmem [shape: bf16[128,32], index: 6, kind: output, shape index: {}]  }
   0x1 LB: > { %s650_s22 = sadd.s32 4294967295, %s752_s21   ;;  %p654_p0 = scmp.ge.s32.totalorder %s752_s21, 1  ;;  %s752_s21 = sphi %s789_s21, %s16_s21  }
   0x2   : > { %p224_p1 = scmp.lt.s32.totalorder %s752_s21, 3 }
   0x4   : > { %p225_p2 = pnand %p654_p0, %p224_p1 }
   0x5   : > { %s655_s27 = sshll.u32 (!%p225_p2), %s650_s22, 3 }
   0x6   : > { %228 = sbr.rel (%p225_p2) target bundleno = 234 (0xea), region = 44  ;;  %p260_p3 = scmp.lt.s32.totalorder (!%p225_p2), %s655_s27, 15 }
   0xb   : > { %v286_v0 = vld [vmem:[%s849_s1] sm:$0xf]  ;;  %vm327_vm0 = vcmask 1043456   ;;  %s856_s27 = smov (!%p260_p3, %s655_s27), 15  ;;  %vm314_vm1 = vcmask 64512   ;;  %vm432_vm2 = vcmask 130048  }
   0xc   : > { %v737_v1 = vld [vmem:[%s852_s4] sm:$0xff]   ;;  %728 = vmatprep.subr.msk.bf16.mxu0 %vm327_vm0, %v286_v0  ;;  %v329_v2 = vsel %vm327_vm0, %v286_v0, 0  ;;  %s803_s28 = sshll.u32 %s856_s27, 2  ;;  %vm573_vm3 = vcmask 257024  }
   0xd   : > { %718 = vmatprep.subr.bf16.mxu1 %v737_v1  ;;  %709 = vmatpush3.bf16.msra.mxu0 %v329_v2  ;;  %s263_s7 = scalar_lea.vmem %s848_s0, %s803_s28  ;;  %s269_s10 = scalar_lea.vmem %s851_s3, %s803_s28  ;;  %v661_v11 = vld [vmem:[%s850_s2] ss:$0 sm:$0xff] }
   0xe   : > { %719 = vmatpush3.bf16.msra.mxu1 %v737_v1  ;;  %v738_v3 = vld [vmem:[%s263_s7] sm:$0xff]   ;;  %v740_v5 = vld [vmem:[%s263_s7 + $0x8] sm:$0xff]   ;;  %v742_v7 = vld [vmem:[%s263_s7 + $0x10] sm:$0xff]   ;;  %s827_s17 = scalar_lea.vmem %s854_s6, %s803_s28 }
   0xf   : > { %v739_v4 = vld [vmem:[%s269_s10] sm:$0xff]   ;;  %710 = vmatprep.mubr.msk.bf16.mxu0 %vm314_vm1, %v738_v3  ;;  %v741_v6 = vld [vmem:[%s269_s10 + $0x8] sm:$0xff]   ;;  %v743_v8 = vld [vmem:[%s269_s10 + $0x10] sm:$0xff]  }
  0x10   : > { %720 = vmatprep.mubr.msk.bf16.mxu1 %vm432_vm2, %v739_v4  ;;  %711 = vmatmul.mubr.msk.bf16.vlgmr.msra.gmra.mxu0 %vm314_vm1, %v740_v5  ;;  %v744_v9 = vld [vmem:[%s263_s7 + $0x18] sm:$0xff]   ;;  %v679_v15 = vld [vmem:[%s853_s5] ss:$0 sm:$0xff] }
  0x11   : > { %721 = vmatmul.mubr.msk.bf16.vlgmr.msra.gmra.mxu1 %vm432_vm2, %v741_v6  ;;  %714 = vmatprep.mubr.msk.bf16.mxu0 %vm314_vm1, %v742_v7  ;;  %v745_v10 = vld [vmem:[%s269_s10 + $0x18] sm:$0xff]  }
  0x12   : > { %724 = vmatprep.mubr.msk.bf16.mxu1 %vm432_vm2, %v743_v8 }
  0x18   : > { %715 = vmatmul.mubr.msk.bf16.gmra.mxu0 %vm314_vm1, %v744_v9 }
  0x19   : > { %725 = vmatmul.mubr.msk.bf16.gmra.mxu1 %vm432_vm2, %v745_v10 }
  0xd0   : > { %v712_v12 = vpop.f32.mrf.mxu0 }
  0xd1   : > { %v374_v13 = vadd.f32 %v712_v12, %v661_v11  ;;  %v722_v14 = vpop.f32.mrf.mxu1 }
  0xd2   : > { %v365_v16 = vpop.f32.mrf.mxu0 }
  0xd3   : > { %v512_v17 = vadd.f32 %v722_v14, %v374_v13  ;;  %v366_v18 = vadd.f32 %v661_v11, %v365_v16  ;;  %v479_v19 = vpop.f32.mrf.mxu1 }
  0xd4   : > { %v713_v20 = vpop.f32.mrf.mxu0 }
  0xd5   : > { %v527_v21 = vadd.f32 %v679_v15, %v512_v17  ;;  %v510_v22 = vadd.f32 %v479_v19, %v366_v18  ;;  %v377_v23 = vadd.f32 %v713_v20, %v661_v11  ;;  %v723_v24 = vpop.f32.mrf.mxu1 }
  0xd6   : > { %v368_v25 = vpop.f32.mrf.mxu0 }
  0xd7   : > { %v535_v26 = vmax.f32 %v527_v21, 0.0  ;;  %v525_v27 = vadd.f32 %v679_v15, %v510_v22  ;;  %v513_v28 = vadd.f32 %v723_v24, %v377_v23  ;;  %v369_v29 = vadd.f32 %v661_v11, %v368_v25  ;;  %v482_v30 = vpop.f32.mrf.mxu1 }
  0xd8   : > { %v716_v31 = vpop.f32.mrf.mxu0 }
  0xd9   : > { %v692_v32 = vpack.c.bf16 %v535_v26, %v535_v26  ;;  %v533_v33 = vmax.f32 %v525_v27, 0.0  ;;  %v528_v34 = vadd.f32 %v679_v15, %v513_v28  ;;  %v511_v35 = vadd.f32 %v482_v30, %v369_v29  ;;  %v726_v36 = vpop.f32.mrf.mxu1 }
  0xda   : > { %v390_v37 = vadd.f32 %v716_v31, %v661_v11  ;;  %v381_v38 = vpop.f32.mrf.mxu0 }
  0xdb   : > { %576 = vst.msk [vmem:[%s827_s17 + $0x8] sm:$0xf] %vm573_vm3, %v692_v32  ;;  %v690_v39 = vpack.c.bf16 %v533_v33, %v533_v33  ;;  %v536_v40 = vmax.f32 %v528_v34, 0.0  ;;  %v526_v41 = vadd.f32 %v679_v15, %v511_v35  ;;  %v382_v42 = vadd.f32 %v661_v11, %v381_v38  ;;  %v495_v43 = vpop.f32.mrf.mxu1 }
  0xdc   : > { %v516_v44 = vadd.f32 %v726_v36, %v390_v37  ;;  %v717_v45 = vpop.f32.mrf.mxu0 }
  0xdd   : > { %574 = vst.msk [vmem:[%s827_s17] sm:$0xf] %vm573_vm3, %v690_v39  ;;  %v693_v46 = vpack.c.bf16 %v536_v40, %v536_v40  ;;  %v534_v47 = vmax.f32 %v526_v41, 0.0  ;;  %v514_v48 = vadd.f32 %v495_v43, %v382_v42  ;;  %v393_v49 = vadd.f32 %v717_v45, %v661_v11  ;;  %v727_v50 = vpop.f32.mrf.mxu1 }
  0xde   : > { %v531_v51 = vadd.f32 %v679_v15, %v516_v44  ;;  %v384_v52 = vpop.f32.mrf.mxu0 }
  0xdf   : > { %577 = vst.msk [vmem:[%s827_s17 + $0xc] sm:$0xf] %vm573_vm3, %v693_v46  ;;  %v691_v53 = vpack.c.bf16 %v534_v47, %v534_v47  ;;  %v529_v54 = vadd.f32 %v679_v15, %v514_v48  ;;  %v517_v55 = vadd.f32 %v727_v50, %v393_v49  ;;  %v385_v56 = vadd.f32 %v661_v11, %v384_v52  ;;  %v498_v58 = vpop.f32.mrf.mxu1 }
  0xe0   : > { %v539_v57 = vmax.f32 %v531_v51, 0.0 }
  0xe1   : > { %575 = vst.msk [vmem:[%s827_s17 + $0x4] sm:$0xf] %vm573_vm3, %v691_v53  ;;  %v537_v59 = vmax.f32 %v529_v54, 0.0  ;;  %v532_v60 = vadd.f32 %v679_v15, %v517_v55  ;;  %v515_v61 = vadd.f32 %v498_v58, %v385_v56 }
  0xe2   : > { %v696_v62 = vpack.c.bf16 %v539_v57, %v539_v57 }
  0xe3   : > { %v694_v63 = vpack.c.bf16 %v537_v59, %v537_v59  ;;  %v540_v0 = vmax.f32 %v532_v60, 0.0  ;;  %v530_v1 = vadd.f32 %v679_v15, %v515_v61 }
  0xe4   : > { %580 = vst.msk [vmem:[%s827_s17 + $0x18] sm:$0xf] %vm573_vm3, %v696_v62 }
  0xe5   : > { %578 = vst.msk [vmem:[%s827_s17 + $0x10] sm:$0xf] %vm573_vm3, %v694_v63  ;;  %v697_v2 = vpack.c.bf16 %v540_v0, %v540_v0  ;;  %v538_v3 = vmax.f32 %v530_v1, 0.0 }
  0xe7   : > { %581 = vst.msk [vmem:[%s827_s17 + $0x1c] sm:$0xf] %vm573_vm3, %v697_v2  ;;  %v695_v4 = vpack.c.bf16 %v538_v3, %v538_v3 }
  0xe9   : > { %579 = vst.msk [vmem:[%s827_s17 + $0x14] sm:$0xf] %vm573_vm3, %v695_v4 }
  0xea PF: > { %s16_s21 = sadd.s32 1, %s752_s21  }
  0xeb   : > { %p13_p4 = scmp.ge.s32.totalorder %s16_s21, 4  }
  0xed   :  { %15 = sbr.rel (!%p13_p4) target bundleno = 1 (0x1), region = 77 }

// kernel: _lambda_.27
= control target key start
LH: loop header
LB: loop body
LE: loop exit
PB: predicated region body
PF: predicated region fallthrough
CT: control target
= control target key end

     0   :  { %s1059_s27 = smov 0   ;;  %s1345_s0 = inlined_call_operand.vmem [shape: bf16[2,64,8], index: 0, kind: input, shape index: {}]   ;;  %s1346_s1 = inlined_call_operand.vmem [shape: bf16[2,64,8], index: 1, kind: input, shape index: {}]   ;;  %s1347_s2 = inlined_call_operand.vmem [shape: bf16[2,64,8], index: 2, kind: input, shape index: {}]   ;;  %s1348_s3 = inlined_call_operand.vmem [shape: bf16[2,64,8], index: 3, kind: input, shape index: {}]   ;;  %s1349_s4 = inlined_call_operand.vmem [shape: bf16[8,2], index: 4, kind: input, shape index: {}]   ;;  %s1350_s5 = inlined_call_operand.vmem [shape: f32[1,2], index: 5, kind: input, shape index: {}]   ;;  %s1351_s6 = inlined_call_operand.vmem [shape: bf16[2,8], index: 6, kind: input, shape index: {}]   ;;  %s1352_s7 = inlined_call_operand.vmem [shape: f32[1,8], index: 7, kind: input, shape index: {}]   ;;  %s1353_s8 = inlined_call_operand.vmem [shape: bf16[2,64,8], index: 8, kind: output, shape index: {}]  }
   0x1 LB: > { %s856_s28 = sadd.s32 4294967295, %s1010_s27   ;;  %p860_p0 = scmp.ge.s32.totalorder %s1010_s27, 1  ;;  %s1010_s27 = sphi %s1059_s27, %s18_s27  }
   0x2   : > { %p292_p1 = scmp.lt.s32.totalorder %s1010_s27, 3 }
   0x4   : > { %p293_p2 = pnand %p860_p0, %p292_p1 }
   0x5   : > { %p341_p3 = scmp.lt.s32.totalorder (!%p293_p2), %s856_s28, 1 }
   0x6   : > { %296 = sbr.rel (%p293_p2) target bundleno = 513 (0x201), region = 52 }
   0xb   : > { %v527_v0 = vld [vmem:[%s1349_s4] sm:$0xf]  ;;  %vm538_vm0 = vcmask 1043456   ;;  %v1012_v1 = vmov 0.0   ;;  %vm1013_vm1 = vmmov 0   ;;  %s1377_s28 = smov (!%p341_p3, %s856_s28), 1 }
   0xc   : > { %978 = vmatprep.subr.bf16.mxu0 %v1012_v1  ;;  %v540_v2 = vsel %vm538_vm0, %v527_v0, 0  ;;  %980 = vmatprep.mubr.msk.bf16.mxu0 %vm1013_vm1, %v1012_v1  ;;  %s1070_s9 = sshll.u32 %s1377_s28, 5  ;;  %vm407_vm2 = vcmask 64512   ;;  %vm520_vm3 = vcmask 1040384   ;;  %vm522_vm4 = vcmask 1041408  }
   0xd   : > { %979 = vmatpush3.bf16.msra.mxu0 %v540_v2  ;;  %984 = vmatprep.subr.bf16.mxu1 %v1012_v1  ;;  %s345_s12 = scalar_lea.vmem %s1345_s0, %s1070_s9  ;;  %s350_s15 = scalar_lea.vmem %s1346_s1, %s1070_s9  ;;  %vm524_vm5 = vcmask 1042432   ;;  %vm592_vm6 = vcmask 15360   ;;  %vm756_vm7 = vcmask 60416  }
   0xe   : > { %986 = vmatprep.mubr.msk.bf16.mxu1 %vm1013_vm1, %v1012_v1  ;;  %v1080_v3 = vld [vmem:[%s345_s12] sm:$0xff]   ;;  %v1082_v4 = vld [vmem:[%s345_s12 + $0x8] sm:$0xff]   ;;  %s355_s18 = scalar_lea.vmem %s1347_s2, %s1070_s9  ;;  %v1088_v5 = vld [vmem:[%s345_s12 + $0x10] sm:$0xff]   ;;  %s1107_s21 = scalar_lea.vmem %s1348_s3, %s1070_s9 }
   0xf   : > { %v1090_v6 = vld [vmem:[%s345_s12 + $0x18] sm:$0xff]   ;;  %v1092_v7 = vld [vmem:[%s350_s15] sm:$0xff]   ;;  %v1094_v8 = vld [vmem:[%s350_s15 + $0x8] sm:$0xff]   ;;  %v900_v9 = vunpack.c.l.bf16 %v1080_v3  ;;  %v901_v10 = vunpack.c.h.bf16 %v1080_v3  ;;  %v904_v11 = vunpack.c.l.bf16 %v1082_v4  ;;  %v905_v14 = vunpack.c.h.bf16 %v1082_v4  ;;  %s365_s10 = scalar_lea.vmem %s1353_s8, %s1070_s9 }
  0x10   : > { %v1099_v12 = vld [vmem:[%s350_s15 + $0x10] sm:$0xff]   ;;  %v1101_v13 = vld [vmem:[%s350_s15 + $0x18] sm:$0xff]   ;;  %v908_v15 = vunpack.c.l.bf16 %v1088_v5  ;;  %v909_v16 = vunpack.c.h.bf16 %v1088_v5  ;;  %v912_v17 = vunpack.c.l.bf16 %v1090_v6  ;;  %v1113_v18 = vld [vmem:[%s355_s18] sm:$0xff]   ;;  %v913_v20 = vunpack.c.h.bf16 %v1090_v6 }
  0x11   : > { %v1115_v19 = vld [vmem:[%s355_s18 + $0x8] sm:$0xff]   ;;  %v916_v21 = vunpack.c.l.bf16 %v1092_v7  ;;  %v917_v22 = vunpack.c.h.bf16 %v1092_v7  ;;  %v920_v23 = vunpack.c.l.bf16 %v1094_v8  ;;  %v1121_v24 = vld [vmem:[%s355_s18 + $0x10] sm:$0xff]   ;;  %v1123_v25 = vld [vmem:[%s355_s18 + $0x18] sm:$0xff]   ;;  %v921_v26 = vunpack.c.h.bf16 %v1094_v8 }
  0x12   : > { %v924_v27 = vunpack.c.l.bf16 %v1099_v12  ;;  %v925_v28 = vunpack.c.h.bf16 %v1099_v12  ;;  %v928_v29 = vunpack.c.l.bf16 %v1101_v13  ;;  %v929_v30 = vunpack.c.h.bf16 %v1101_v13  ;;  %v1134_v34 = vld [vmem:[%s1107_s21] sm:$0xff]   ;;  %v1137_v35 = vld [vmem:[%s1107_s21 + $0x8] sm:$0xff]   ;;  %v1145_v41 = vld [vmem:[%s1107_s21 + $0x10] sm:$0xff]  }
  0x13   : > { %v932_v31 = vunpack.c.l.bf16 %v1113_v18  ;;  %v933_v32 = vunpack.c.h.bf16 %v1113_v18  ;;  %v936_v33 = vunpack.c.l.bf16 %v1115_v19  ;;  %v937_v36 = vunpack.c.h.bf16 %v1115_v19 }
  0x14   : > { %v940_v37 = vunpack.c.l.bf16 %v1121_v24  ;;  %v1363_v38 = vunpack.c.h.bf16 %v1121_v24  ;;  %v1361_v39 = vunpack.c.l.bf16 %v1123_v25  ;;  %v1360_v40 = vunpack.c.h.bf16 %v1123_v25 }
  0x15   : > { %v408_v42 = vsel %vm407_vm2, %v900_v9, 0.0  ;;  %v409_v43 = vsel %vm407_vm2, %v901_v10, 0.0  ;;  %v411_v44 = vsel %vm407_vm2, %v904_v11, 0.0  ;;  %v1359_v45 = vunpack.c.l.bf16 %v1134_v34 }
  0x16   : > { %v1355_v46 = vunpack.c.h.bf16 %v1134_v34  ;;  %v1354_v47 = vunpack.c.l.bf16 %v1137_v35  ;;  %v410_v48 = vadd.f32 %v409_v43, %v408_v42  ;;  %v413_v49 = vsel %vm407_vm2, %v905_v14, 0.0 }
  0x17   : > { %v438_v50 = vsel %vm407_vm2, %v916_v21, 0.0  ;;  %v439_v51 = vsel %vm407_vm2, %v917_v22, 0.0  ;;  %v441_v52 = vsel %vm407_vm2, %v920_v23, 0.0  ;;  %v1356_v53 = vunpack.c.h.bf16 %v1137_v35 }
  0x18   : > { %v1358_v54 = vunpack.c.l.bf16 %v1145_v41  ;;  %v412_v55 = vadd.f32 %v411_v44, %v410_v48  ;;  %v440_v56 = vadd.f32 %v439_v51, %v438_v50  ;;  %v1357_v57 = vunpack.c.h.bf16 %v1145_v41 }
  0x19   : > { %v415_v58 = vsel %vm407_vm2, %v908_v15, 0.0  ;;  %v443_v59 = vsel %vm407_vm2, %v921_v26, 0.0  ;;  %v468_v60 = vsel %vm407_vm2, %v932_v31, 0.0  ;;  %v469_v63 = vsel %vm407_vm2, %v933_v32, 0.0 }
  0x1a   : > { %v414_v61 = vadd.f32 %v413_v49, %v412_v55  ;;  %v442_v62 = vadd.f32 %v441_v52, %v440_v56  ;;  %v471_v0 = vsel %vm407_vm2, %v936_v33, 0.0  ;;  %v417_v1 = vsel %vm407_vm2, %v909_v16, 0.0 }
  0x1b   : > { %v419_v2 = vsel %vm407_vm2, %v912_v17, 0.0  ;;  %v445_v42 = vsel %vm407_vm2, %v924_v27, 0.0  ;;  %v470_v43 = vadd.f32 %v469_v63, %v468_v60  ;;  %v447_v49 = vsel %vm407_vm2, %v925_v28, 0.0 }
  0x1c   : > { %v416_v44 = vadd.f32 %v415_v58, %v414_v61  ;;  %v444_v48 = vadd.f32 %v443_v59, %v442_v62  ;;  %v473_v50 = vsel %vm407_vm2, %v937_v36, 0.0  ;;  %v498_v52 = vsel %vm407_vm2, %v1359_v45, 0.0  ;;  %v1214_v58 = vld [vmem:[%s1107_s21 + $0x18] sm:$0xff]  }
  0x1d   : > { %v472_v51 = vadd.f32 %v471_v0, %v470_v43  ;;  %v499_v55 = vsel %vm407_vm2, %v1355_v46, 0.0  ;;  %v501_v56 = vsel %vm407_vm2, %v1354_v47, 0.0  ;;  %v475_v61 = vsel %vm407_vm2, %v940_v37, 0.0 }
  0x1e   : > { %v418_v59 = vadd.f32 %v417_v1, %v416_v44  ;;  %v446_v60 = vadd.f32 %v445_v42, %v444_v48  ;;  %v500_v62 = vadd.f32 %v499_v55, %v498_v52  ;;  %v421_v63 = vsel %vm407_vm2, %v913_v20, 0.0 }
  0x1f   : > { %v449_v0 = vsel %vm407_vm2, %v928_v29, 0.0  ;;  %v474_v43 = vadd.f32 %v473_v50, %v472_v51  ;;  %v503_v47 = vsel %vm407_vm2, %v1356_v53, 0.0  ;;  %v477_v44 = vsel %vm407_vm2, %v1363_v38, 0.0 }
  0x20   : > { %v420_v1 = vadd.f32 %v419_v2, %v418_v59  ;;  %v448_v42 = vadd.f32 %v447_v49, %v446_v60  ;;  %v502_v48 = vadd.f32 %v501_v56, %v500_v62  ;;  %v1362_v52 = vunpack.c.l.bf16 %v1214_v58 }
  0x21   : > { %v451_v55 = vsel %vm407_vm2, %v929_v30, 0.0  ;;  %v476_v46 = vadd.f32 %v475_v61, %v474_v43  ;;  %v505_v50 = vsel %vm407_vm2, %v1358_v54, 0.0  ;;  %v479_v2 = vsel %vm407_vm2, %v1361_v39, 0.0 }
  0x22   : > { %v422_v51 = vadd.f32 %v421_v63, %v420_v1  ;;  %v450_v53 = vadd.f32 %v449_v0, %v448_v42  ;;  %v504_v49 = vadd.f32 %v503_v47, %v502_v48  ;;  %v1364_v56 = vunpack.c.h.bf16 %v1214_v58 }
  0x23   : > { %v478_v59 = vadd.f32 %v477_v44, %v476_v46  ;;  %v507_v60 = vsel %vm407_vm2, %v1357_v57, 0.0  ;;  %v481_v43 = vsel %vm407_vm2, %v1360_v40, 0.0  ;;  %v509_v1 = vsel %vm407_vm2, %v1362_v52, 0.0 }
  0x24   : > { %v423_v62 = vrot.slane %v422_v51, 4  ;;  %v452_v61 = vadd.f32 %v451_v55, %v450_v53  ;;  %v506_v63 = vadd.f32 %v505_v50, %v504_v49  ;;  %v511_v44 = vsel %vm407_vm2, %v1364_v56, 0.0 }
  0x25   : > { %v480_v0 = vadd.f32 %v479_v2, %v478_v59 }
  0x26   : > { %v424_v47 = vadd.f32 %v423_v62, %v422_v51  ;;  %v453_v42 = vrot.slane %v452_v61, 4  ;;  %v508_v48 = vadd.f32 %v507_v60, %v506_v63 }
  0x27   : > { %v482_v46 = vadd.f32 %v481_v43, %v480_v0 }
  0x28   : > { %v425_v57 = vrot.slane %v424_v47, 2  ;;  %v454_v53 = vadd.f32 %v453_v42, %v452_v61  ;;  %v510_v55 = vadd.f32 %v509_v1, %v508_v48 }
  0x29   : > { %v483_v54 = vrot.slane %v482_v46, 4 }
  0x2a   : > { %v426_v45 = vadd.f32 %v425_v57, %v424_v47  ;;  %v455_v40 = vrot.slane %v454_v53, 2  ;;  %v512_v50 = vadd.f32 %v511_v44, %v510_v55 }
  0x2b   : > { %v484_v2 = vadd.f32 %v483_v54, %v482_v46 }
  0x2c   : > { %v427_v49 = vrot.slane %v426_v45, 1  ;;  %v456_v59 = vadd.f32 %v455_v40, %v454_v53  ;;  %v513_v39 = vrot.slane %v512_v50, 4 }
  0x2d   : > { %v485_v52 = vrot.slane %v484_v2, 2 }
  0x2e   : > { %v428_v51 = vadd.f32 %v427_v49, %v426_v45  ;;  %v457_v62 = vrot.slane %v456_v59, 1  ;;  %v514_v60 = vadd.f32 %v513_v39, %v512_v50 }
  0x2f   : > { %v486_v43 = vadd.f32 %v485_v52, %v484_v2  ;;  %v584_v52 = vld [vmem:[%s1351_s6] sm:$0x1] }
  0x30   : > { %v429_v63 = vmul.f32 0.015625, %v428_v51  ;;  %v458_v0 = vadd.f32 %v457_v62, %v456_v59  ;;  %v515_v38 = vrot.slane %v514_v60, 2  ;;  %v873_v51 = vld [vmem:[%s1352_s7] ss:$0 sm:$0xff] }
  0x31   : > { %v487_v56 = vrot.slane %v486_v43, 1 }
  0x32   : > { %v459_v61 = vmul.f32 0.015625, %v458_v0  ;;  %v516_v1 = vadd.f32 %v515_v38, %v514_v60  ;;  %v597_v38 = vsel %vm520_vm3, %v584_v52, 0 }
  0x33   : > { %v488_v42 = vadd.f32 %v487_v56, %v486_v43  ;;  %985 = vmatpush3.bf16.msra.mxu1 %v597_v38  ;;  %v871_v56 = vld [vmem:[%s1350_s5] ss:$0 sm:$0xff] }
  0x34   : > { %v517_v57 = vrot.slane %v516_v1, 1  ;;  %v521_v47 = vsel %vm520_vm3, %v429_v63, %v459_v61 }
  0x35   : > { %v489_v54 = vmul.f32 0.015625, %v488_v42 }
  0x36   : > { %v518_v40 = vadd.f32 %v517_v57, %v516_v1 }
  0x37   : > { %v523_v48 = vsel %vm522_vm4, %v521_v47, %v489_v54  ;;  %v644_v47 = vlaneseq }
  0x38   : > { %v519_v45 = vmul.f32 0.015625, %v518_v40 }
  0x39   : > { %v645_v54 = vshrl.u32 %v644_v47, 7 }
  0x3a   : > { %v525_v46 = vsel %vm524_vm5, %v523_v48, %v519_v45 }
  0x3b   : > { %v526_v39 = vpack.c.bf16 %v525_v46, %v525_v46  ;;  %v646_v40 = vsub.s32 0, %v645_v54  ;;  %v666_v48 = vsub.s32 1, %v645_v54  ;;  %v686_v45 = vsub.s32 2, %v645_v54 }
  0x3c   : > { %v706_v46 = vsub.s32 3, %v645_v54 }
  0x3d   : > { %981 = vmatmul.mubr.msk.bf16.vlgmr.msra.gmra.mxu0 %vm407_vm2, %v526_v39 }
  0xfd   : > { %v576_v44 = vpop.f32.mrf.mxu0 }
  0xfe   : > { %v577_v53 = vadd.f32 %v871_v56, %v576_v44 }
  0xff   : > { %v982_v55 = vpop.f32.mrf.mxu0 }
 0x100   : > { %v582_v50 = vmax.f32 %v577_v53, 0.0 }
 0x101   : > { %v579_v2 = vpop.f32.mrf.mxu0 }
 0x102   : > { %v583_v49 = vpack.c.bf16 %v582_v50, %v582_v50 }
 0x103   : > { %v983_v59 = vpop.f32.mrf.mxu0 }
 0x104   : > { %987 = vmatmul.mubr.msk.bf16.vlgmr.msra.gmra.mxu1 %vm592_vm6, %v583_v49 }
 0x1c4   : > { %v633_v62 = vpop.f32.mrf.mxu1 }
 0x1c5   : > { %v634_v60 = vadd.f32 %v873_v51, %v633_v62  ;;  %v1366_v62 = vunpack.c.l.bf16 %v1123_v25 }
 0x1c6   : > { %v988_v43 = vpop.f32.mrf.mxu1 }
 0x1c7   : > { %v639_v63 = vsub.f32 0.0, %v634_v60 }
 0x1c8   : > { %v636_v0 = vpop.f32.mrf.mxu1 }
 0x1c9   : > { %v640_v61 = vmul.f32 1.442695, %v639_v63 }
 0x1ca   : > { %v989_v1 = vpop.f32.mrf.mxu1 }
 0x1cb   : > { %1000 = vpow2.f32 %v640_v61 }
 0x1d8   : > { %v1001_v42 = vpop.eup %1000 }
 0x1d9   : > { %v642_v57 = vadd.f32 1.0, %v1001_v42 }
 0x1db   : > { %1002 = vrcp.f32 %v642_v57  ;;  %v1370_v57 = vunpack.c.l.bf16 %v1137_v35 }
 0x1e8   : > { %v1003_v39 = vpop.eup %1002 }
 0x1e9   : > { %v647_v52 = vrot.slane %v1003_v39, %v646_v40  ;;  %v667_v38 = vrot.slane %v1003_v39, %v666_v48  ;;  %v687_v56 = vrot.slane %v1003_v39, %v686_v45  ;;  %v707_v44 = vrot.slane %v1003_v39, %v706_v46 }
 0x1ea   : > { %v1372_v40 = vunpack.c.l.bf16 %v1145_v41  ;;  %v1373_v45 = vunpack.c.h.bf16 %v1145_v41  ;;  %v1374_v39 = vunpack.c.l.bf16 %v1214_v58 }
 0x1eb   : > { %v648_v53 = vmul.f32 %v900_v9, %v647_v52  ;;  %v649_v55 = vmul.f32 %v901_v10, %v647_v52  ;;  %v650_v50 = vmul.f32 %v904_v11, %v647_v52  ;;  %v651_v2 = vmul.f32 %v905_v14, %v647_v52 }
 0x1ec   : > { %v652_v49 = vmul.f32 %v908_v15, %v647_v52  ;;  %v653_v59 = vmul.f32 %v909_v16, %v647_v52  ;;  %v654_v51 = vmul.f32 %v912_v17, %v647_v52  ;;  %v655_v9 = vmul.f32 %v913_v20, %v647_v52 }
 0x1ed   : > { %v668_v3 = vmul.f32 %v916_v21, %v667_v38  ;;  %v669_v10 = vmul.f32 %v917_v22, %v667_v38  ;;  %v670_v4 = vmul.f32 %v920_v23, %v667_v38  ;;  %v671_v11 = vmul.f32 %v921_v26, %v667_v38 }
 0x1ee   : > { %v672_v5 = vmul.f32 %v924_v27, %v667_v38  ;;  %v673_v14 = vmul.f32 %v925_v28, %v667_v38  ;;  %v674_v6 = vmul.f32 %v928_v29, %v667_v38  ;;  %v675_v15 = vmul.f32 %v929_v30, %v667_v38 }
 0x1ef   : > { %v676_v7 = vadd.f32 %v668_v3, %v648_v53  ;;  %v677_v16 = vadd.f32 %v669_v10, %v649_v55  ;;  %v678_v17 = vadd.f32 %v670_v4, %v650_v50  ;;  %v679_v20 = vadd.f32 %v671_v11, %v651_v2 }
 0x1f0   : > { %v680_v21 = vadd.f32 %v672_v5, %v652_v49  ;;  %v681_v22 = vadd.f32 %v673_v14, %v653_v59  ;;  %v682_v8 = vadd.f32 %v674_v6, %v654_v51  ;;  %v683_v23 = vadd.f32 %v675_v15, %v655_v9 }
 0x1f1   : > { %v688_v26 = vmul.f32 %v932_v31, %v687_v56  ;;  %v689_v12 = vmul.f32 %v933_v32, %v687_v56  ;;  %v690_v27 = vmul.f32 %v936_v33, %v687_v56  ;;  %v691_v13 = vmul.f32 %v937_v36, %v687_v56 }
 0x1f2   : > { %v692_v28 = vmul.f32 %v940_v37, %v687_v56  ;;  %v1365_v29 = vunpack.c.h.bf16 %v1121_v24  ;;  %v694_v60 = vmul.f32 %v1366_v62, %v687_v56  ;;  %v1367_v31 = vunpack.c.h.bf16 %v1123_v25 }
 0x1f3   : > { %v696_v18 = vadd.f32 %v688_v26, %v676_v7  ;;  %v697_v32 = vadd.f32 %v689_v12, %v677_v16  ;;  %v698_v63 = vadd.f32 %v690_v27, %v678_v17  ;;  %v699_v0 = vadd.f32 %v691_v13, %v679_v20 }
 0x1f4   : > { %v693_v30 = vmul.f32 %v1365_v29, %v687_v56  ;;  %v695_v43 = vmul.f32 %v1367_v31, %v687_v56  ;;  %v700_v33 = vadd.f32 %v692_v28, %v680_v21  ;;  %v702_v36 = vadd.f32 %v694_v60, %v682_v8 }
 0x1f5   : > { %v1368_v37 = vunpack.c.l.bf16 %v1134_v34  ;;  %v1369_v24 = vunpack.c.h.bf16 %v1134_v34  ;;  %v710_v47 = vmul.f32 %v1370_v57, %v707_v44  ;;  %v1371_v25 = vunpack.c.h.bf16 %v1137_v35 }
 0x1f6   : > { %v701_v19 = vadd.f32 %v693_v30, %v681_v22  ;;  %v703_v61 = vadd.f32 %v695_v43, %v683_v23  ;;  %v712_v48 = vmul.f32 %v1372_v40, %v707_v44  ;;  %v713_v46 = vmul.f32 %v1373_v45, %v707_v44 }
 0x1f7   : > { %v708_v1 = vmul.f32 %v1368_v37, %v707_v44  ;;  %v709_v42 = vmul.f32 %v1369_v24, %v707_v44  ;;  %v711_v54 = vmul.f32 %v1371_v25, %v707_v44  ;;  %v714_v52 = vmul.f32 %v1374_v39, %v707_v44 }
 0x1f8   : > { %v1375_v38 = vunpack.c.h.bf16 %v1214_v58  ;;  %v718_v55 = vadd.f32 %v710_v47, %v698_v63  ;;  %v720_v35 = vadd.f32 %v712_v48, %v700_v33  ;;  %v721_v2 = vadd.f32 %v713_v46, %v701_v19 }
 0x1f9   : > { %v716_v34 = vadd.f32 %v708_v1, %v696_v18  ;;  %v717_v53 = vadd.f32 %v709_v42, %v697_v32  ;;  %v719_v50 = vadd.f32 %v711_v54, %v699_v0  ;;  %v722_v49 = vadd.f32 %v714_v52, %v702_v36 }
 0x1fa   : > { %v715_v56 = vmul.f32 %v1375_v38, %v707_v44  ;;  %v892_v9 = vpack.c.bf16 %v718_v55, %v718_v55  ;;  %v894_v10 = vpack.c.bf16 %v720_v35, %v720_v35  ;;  %v895_v4 = vpack.c.bf16 %v721_v2, %v721_v2 }
 0x1fb   : > { %v890_v41 = vpack.c.bf16 %v716_v34, %v716_v34  ;;  %v891_v51 = vpack.c.bf16 %v717_v53, %v717_v53  ;;  %v893_v3 = vpack.c.bf16 %v719_v50, %v719_v50  ;;  %v896_v58 = vpack.c.bf16 %v722_v49, %v722_v49 }
 0x1fc   : > { %v723_v59 = vadd.f32 %v715_v56, %v703_v61  ;;  %759 = vst.msk [vmem:[%s365_s10 + $0x8] sm:$0xf] %vm756_vm7, %v892_v9  ;;  %761 = vst.msk [vmem:[%s365_s10 + $0x10] sm:$0xf] %vm756_vm7, %v894_v10 }
 0x1fd   : > { %757 = vst.msk [vmem:[%s365_s10] sm:$0xf] %vm756_vm7, %v890_v41  ;;  %758 = vst.msk [vmem:[%s365_s10 + $0x4] sm:$0xf] %vm756_vm7, %v891_v51 }
 0x1fe   : > { %v897_v44 = vpack.c.bf16 %v723_v59, %v723_v59  ;;  %760 = vst.msk [vmem:[%s365_s10 + $0xc] sm:$0xf] %vm756_vm7, %v893_v3  ;;  %762 = vst.msk [vmem:[%s365_s10 + $0x14] sm:$0xf] %vm756_vm7, %v895_v4 }
 0x1ff   : > { %763 = vst.msk [vmem:[%s365_s10 + $0x18] sm:$0xf] %vm756_vm7, %v896_v58 }
 0x200   : > { %764 = vst.msk [vmem:[%s365_s10 + $0x1c] sm:$0xf] %vm756_vm7, %v897_v44 }
 0x201 PF: > { %s18_s27 = sadd.s32 1, %s1010_s27  }
 0x202   : > { %p15_p4 = scmp.ge.s32.totalorder %s18_s27, 4  }
 0x204   :  { %17 = sbr.rel (!%p15_p4) target bundleno = 1 (0x1), region = 91 }

// kernel: _lambda_.30
= control target key start
LH: loop header
LB: loop body
LE: loop exit
PB: predicated region body
PF: predicated region fallthrough
CT: control target
= control target key end

     0   :  { %s393_s12 = smov 0   ;;  %s419_s0 = inlined_call_operand.vmem [shape: bf16[32,32], index: 0, kind: input, shape index: {}]   ;;  %s420_s1 = inlined_call_operand.vmem [shape: bf16[32,16], index: 1, kind: input, shape index: {}]   ;;  %s421_s2 = inlined_call_operand.vmem [shape: f32[1,16], index: 2, kind: input, shape index: {}]   ;;  %s422_s3 = inlined_call_operand.vmem [shape: bf16[32,16], index: 3, kind: output, shape index: {}]  }
   0x1 LB: > { %s319_s13 = sadd.s32 4294967295, %s369_s12   ;;  %p323_p0 = scmp.ge.s32.totalorder %s369_s12, 1  ;;  %s369_s12 = sphi %s393_s12, %s13_s12  }
   0x2   : > { %p138_p1 = scmp.lt.s32.totalorder %s369_s12, 3 }
   0x4   : > { %p139_p2 = pnand %p323_p0, %p138_p1 }
   0x5   : > { %s324_s18 = sshll.u32 (!%p139_p2), %s319_s13, 1 }
   0x6   : > { %142 = sbr.rel (%p139_p2) target bundleno = 224 (0xe0), region = 32  ;;  %p163_p3 = scmp.lt.s32.totalorder (!%p139_p2), %s324_s18, 3 }
   0xb   : > { %v360_v0 = vld [vmem:[%s420_s1 + $0x8] sm:$0xff]   ;;  %v371_v1 = vmov 0.0   ;;  %v361_v2 = vld [vmem:[%s420_s1] sm:$0xff]   ;;  %vm372_vm0 = vmmov 0   ;;  %s424_s18 = smov (!%p163_p3, %s324_s18), 3  ;;  %vm205_vm1 = vcmask 261120  }
   0xc   : > { %342 = vmatprep.subr.bf16.mxu0 %v371_v1  ;;  %346 = vmatprep.mubr.msk.bf16.mxu0 %vm372_vm0, %v371_v1  ;;  %s325_s19 = sshll.u32 %s424_s18, 2  ;;  %v328_v4 = vld [vmem:[%s421_s2] ss:$0 sm:$0xff]  ;;  %vm260_vm2 = vcmask 125952  }
   0xd   : > { %343 = vmatpush3.bf16.msra.mxu0 %v360_v0  ;;  %s166_s22 = scalar_lea.vmem %s419_s0, %s325_s19  ;;  %s172_s27 = scalar_lea.vmem %s422_s3, %s325_s19 }
   0xe   : > { %344 = vmatprep.subr.bf16.mxu0 %v371_v1  ;;  %v362_v3 = vld [vmem:[%s166_s22] sm:$0xff]  }
  0x11   : > { %345 = vmatpush3.bf16.msra.mxu0 %v361_v2 }
  0x14   : > { %347 = vmatmul.mubr.msk.bf16.vlgmr.msra.gmra.mxu0 %vm205_vm1, %v362_v3 }
  0xd4   : > { %v243_v5 = vpop.f32.mrf.mxu0 }
  0xd5   : > { %v244_v6 = vadd.f32 %v328_v4, %v243_v5 }
  0xd6   : > { %v348_v7 = vpop.f32.mrf.mxu0 }
  0xd7   : > { %v250_v8 = vmax.f32 %v244_v6, 0.0 }
  0xd8   : > { %v246_v9 = vpop.f32.mrf.mxu0 }
  0xd9   : > { %v337_v10 = vpack.c.bf16 %v250_v8, %v250_v8  ;;  %v247_v11 = vadd.f32 %v328_v4, %v246_v9 }
  0xda   : > { %v349_v12 = vpop.f32.mrf.mxu0 }
  0xdb   : > { %261 = vst.msk [vmem:[%s172_s27] sm:$0xf] %vm260_vm2, %v337_v10  ;;  %v251_v13 = vmax.f32 %v247_v11, 0.0 }
  0xdd   : > { %v338_v14 = vpack.c.bf16 %v251_v13, %v251_v13 }
  0xdf   : > { %262 = vst.msk [vmem:[%s172_s27 + $0x4] sm:$0xf] %vm260_vm2, %v338_v14 }
  0xe0 PF: > { %s13_s12 = sadd.s32 1, %s369_s12  }
  0xe1   : > { %p10_p4 = scmp.ge.s32.totalorder %s13_s12, 4  }
  0xe3   :  { %12 = sbr.rel (!%p10_p4) target bundleno = 1 (0x1), region = 62 }

// kernel: _lambda_.31
= control target key start
LH: loop header
LB: loop body
LE: loop exit
PB: predicated region body
PF: predicated region fallthrough
CT: control target
= control target key end

     0   :  { %s575_s15 = smov 0   ;;  %s656_s0 = inlined_call_operand.vmem [shape: bf16[32,16], index: 0, kind: input, shape index: {}]   ;;  %s657_s1 = inlined_call_operand.vmem [shape: bf16[16,64], index: 1, kind: input, shape index: {}]   ;;  %s658_s2 = inlined_call_operand.vmem [shape: f32[9,64], index: 2, kind: input, shape index: {}]   ;;  %s659_s3 = inlined_call_operand.vmem [shape: f32[1,64], index: 3, kind: input, shape index: {}]   ;;  %s660_s4 = inlined_call_operand.vmem [shape: bf16[2,4,4,64], index: 4, kind: output, shape index: {}]  }
   0x1 LB: > { %s581_s16 = sadd.s32 4294967295, %s546_s15   ;;  %p507_p0 = scmp.ge.s32.totalorder %s546_s15, 1  ;;  %s546_s15 = sphi %s575_s15, %s14_s15  }
   0x2   : > { %p163_p1 = scmp.lt.s32.totalorder %s546_s15, 3 }
   0x4   : > { %p164_p2 = pnand %p507_p0, %p163_p1 }
   0x5   : > { %s508_s19 = sshll.u32 (!%p164_p2), %s581_s16, 1  ;;  %p195_p4 = scmp.lt.s32.totalorder (!%p164_p2), %s581_s16, 1 }
   0x6   : > { %167 = sbr.rel (%p164_p2) target bundleno = 248 (0xf8), region = 36  ;;  %p190_p3 = scmp.lt.s32.totalorder (!%p164_p2), %s508_s19, 3 }
   0xb   : > { %v538_v0 = vld [vmem:[%s657_s1] sm:$0xff]   ;;  %v548_v1 = vmov 0.0   ;;  %vm549_vm0 = vmmov 0   ;;  %s662_s19 = smov (!%p190_p3, %s508_s19), 3  ;;  %vm216_vm1 = vcmask 130048   ;;  %vm261_vm2 = vcmask 521216  }
   0xc   : > { %522 = vmatprep.subr.bf16.mxu0 %v548_v1  ;;  %524 = vmatprep.mubr.msk.bf16.mxu0 %vm549_vm0, %v548_v1  ;;  %s509_s20 = sshll.u32 %s662_s19, 2  ;;  %262 = vst.msk [vmem:[#allocation2] sm:$0x3f] %vm261_vm2, %v548_v1  ;;  %263 = vst.msk [vmem:[#allocation2 + $0x8] sm:$0x3f] %vm261_vm2, %v548_v1  ;;  %v284_v3 = vlaneseq  ;;  %v278_v7 = vld [vmem:[%s658_s2] sm:$0xff] }
   0xd   : > { %523 = vmatpush3.bf16.msra.mxu0 %v538_v0  ;;  %s193_s23 = scalar_lea.vmem %s656_s0, %s509_s20  ;;  %264 = vst.msk [vmem:[#allocation2 + $0x10] sm:$0x3f] %vm261_vm2, %v548_v1  ;;  %267 = vst.msk [vmem:[#allocation2 + $0x28] sm:$0x3f] %vm261_vm2, %v548_v1  ;;  %vm269_vm3 = vcmask 519168   ;;  %vm272_vm4 = vcmask 523268  }
   0xe   : > { %v539_v2 = vld [vmem:[%s193_s23] sm:$0xff]   ;;  %265 = vst.msk [vmem:[#allocation2 + $0x18] sm:$0x3f] %vm261_vm2, %v548_v1  ;;  %266 = vst.msk [vmem:[#allocation2 + $0x20] sm:$0x3f] %vm261_vm2, %v548_v1  ;;  %v285_v4 = vshrl.u32 %v284_v3, 7 }
   0xf   : > { %s664_s16 = smov (!%p195_p4, %s581_s16), 1  ;;  %vm443_vm5 = vcmask 517120  }
  0x10   : > { %525 = vmatmul.mubr.msk.bf16.vlgmr.msra.gmra.mxu0 %vm216_vm1, %v539_v2  ;;  %v286_v5 = vsub.s32 0, %v285_v4  ;;  %v302_v6 = vsub.s32 1, %v285_v4  ;;  %v318_v10 = vsub.s32 2, %v285_v4  ;;  %v334_v19 = vsub.s32 3, %v285_v4  ;;  %s519_s30 = sshll.u32 %s664_s16, 3 }
  0x11   : > { %v350_v23 = vsub.s32 4, %v285_v4  ;;  %v366_v26 = vsub.s32 5, %v285_v4  ;;  %v382_v27 = vsub.s32 6, %v285_v4  ;;  %v398_v28 = vsub.s32 7, %v285_v4  ;;  %s199_s7 = scalar_lea.vmem %s660_s4, %s519_s30 }
  0x12   : > { %v595_v8 = vrot.slane %v278_v7, %v286_v5  ;;  %v597_v9 = vrot.slane %v278_v7, %v302_v6  ;;  %v601_v16 = vrot.slane %v278_v7, %v318_v10  ;;  %v604_v25 = vrot.slane %v278_v7, %v334_v19 }
  0x13   : > { %v280_v11 = vld [vmem:[#allocation2] sm:$0xf]  ;;  %v609_v39 = vrot.slane %v278_v7, %v350_v23  ;;  %v614_v48 = vrot.slane %v278_v7, %v366_v26  ;;  %v383_v54 = vrot.slane %v278_v7, %v382_v27  ;;  %v617_v55 = vrot.slane %v278_v7, %v398_v28 }
  0x14   : > { %v296_v12 = vld [vmem:[#allocation2 + $0x1] sm:$0xf]  ;;  %v288_v14 = vmul.f32 %v595_v8, %v280_v11 }
  0x15   : > { %v304_v15 = vmul.f32 %v597_v9, %v296_v12  ;;  %v312_v17 = vld [vmem:[#allocation2 + $0x2] sm:$0xf] }
  0x16   : > { %v320_v21 = vmul.f32 %v601_v16, %v312_v17 }
  0x17   : > { %v308_v20 = vadd.f32 %v304_v15, %v288_v14  ;;  %v515_v14 = vld [vmem:[%s658_s2 + $0x8] ss:$0 sm:$0xff] }
  0x19   : > { %v324_v32 = vadd.f32 %v320_v21, %v308_v20 }
  0xd0   : > { %v254_v13 = vpop.f32.mrf.mxu0 }
  0xd1   : > { %270 = vst.msk [vmem:[#allocation2 + $0x9] sm:$0xf] %vm269_vm3, %v254_v13 }
  0xd2   : > { %273 = vst.msk [vmem:[#allocation2 + $0xd] sm:$0xf0] %vm272_vm4, %v254_v13  ;;  %v526_v18 = vpop.f32.mrf.mxu0 }
  0xd4   : > { %v257_v22 = vpop.f32.mrf.mxu0 }
  0xd5   : > { %275 = vst.msk [vmem:[#allocation2 + $0x19] sm:$0xf] %vm269_vm3, %v257_v22 }
  0xd6   : > { %277 = vst.msk [vmem:[#allocation2 + $0x1d] sm:$0xf0] %vm272_vm4, %v257_v22  ;;  %v527_v24 = vpop.f32.mrf.mxu0 }
  0xd8   : > { %v281_v29 = vld [vmem:[#allocation2 + $0x8] sm:$0xf] }
  0xd9   : > { %v282_v30 = vld [vmem:[#allocation2 + $0x10] sm:$0xf]  ;;  %v297_v31 = vld [vmem:[#allocation2 + $0x9] sm:$0xf]  ;;  %v289_v33 = vmul.f32 %v595_v8, %v281_v29 }
  0xda   : > { %v290_v34 = vmul.f32 %v595_v8, %v282_v30  ;;  %v298_v35 = vld [vmem:[#allocation2 + $0x11] sm:$0xf]  ;;  %v305_v36 = vmul.f32 %v597_v9, %v297_v31  ;;  %v313_v37 = vld [vmem:[#allocation2 + $0xa] sm:$0xf] }
  0xdb   : > { %v314_v38 = vld [vmem:[#allocation2 + $0x12] sm:$0xf]  ;;  %v306_v40 = vmul.f32 %v597_v9, %v298_v35  ;;  %v328_v41 = vld [vmem:[#allocation2 + $0x8] sm:$0xf]  ;;  %v321_v45 = vmul.f32 %v601_v16, %v313_v37 }
  0xdc   : > { %v329_v42 = vld [vmem:[#allocation2 + $0x10] sm:$0xf]  ;;  %v344_v43 = vld [vmem:[#allocation2 + $0x9] sm:$0xf]  ;;  %v309_v44 = vadd.f32 %v305_v36, %v289_v33  ;;  %v336_v46 = vmul.f32 %v604_v25, %v328_v41  ;;  %v322_v50 = vmul.f32 %v601_v16, %v314_v38  ;;  %v283_v60 = vld [vmem:[#allocation2 + $0x18] sm:$0xf] }
  0xdd   : > { %v345_v47 = vld [vmem:[#allocation2 + $0x11] sm:$0xf]  ;;  %v310_v49 = vadd.f32 %v306_v40, %v290_v34  ;;  %v360_v51 = vld [vmem:[#allocation2 + $0xa] sm:$0xf]  ;;  %v337_v57 = vmul.f32 %v604_v25, %v329_v42  ;;  %v352_v59 = vmul.f32 %v609_v39, %v344_v43  ;;  %v299_v61 = vld [vmem:[#allocation2 + $0x19] sm:$0xf]  ;;  %v291_v1 = vmul.f32 %v595_v8, %v283_v60 }
  0xde   : > { %v361_v52 = vld [vmem:[#allocation2 + $0x12] sm:$0xf]  ;;  %v325_v56 = vadd.f32 %v321_v45, %v309_v44  ;;  %v340_v58 = vadd.f32 %v336_v46, %v324_v32  ;;  %v315_v62 = vld [vmem:[#allocation2 + $0x1a] sm:$0xf]  ;;  %v353_v0 = vmul.f32 %v609_v39, %v345_v47  ;;  %v307_v2 = vmul.f32 %v597_v9, %v299_v61  ;;  %v331_v11 = vld [vmem:[#allocation2 + $0x20] sm:$0xf] }
  0xdf   : > { %v376_v53 = vld [vmem:[#allocation2 + $0x10] sm:$0xf]  ;;  %v326_v63 = vadd.f32 %v322_v50, %v310_v49  ;;  %v330_v3 = vld [vmem:[#allocation2 + $0x18] sm:$0xf]  ;;  %v368_v7 = vmul.f32 %v614_v48, %v360_v51  ;;  %v369_v8 = vmul.f32 %v614_v48, %v361_v52  ;;  %v323_v17 = vmul.f32 %v601_v16, %v315_v62  ;;  %v347_v23 = vld [vmem:[#allocation2 + $0x21] sm:$0xf] }
  0xe0   : > { %v346_v4 = vld [vmem:[#allocation2 + $0x19] sm:$0xf]  ;;  %v341_v5 = vadd.f32 %v337_v57, %v325_v56  ;;  %v356_v6 = vadd.f32 %v352_v59, %v340_v58  ;;  %v392_v10 = vld [vmem:[#allocation2 + $0x11] sm:$0xf]  ;;  %v338_v12 = vmul.f32 %v604_v25, %v330_v3  ;;  %v384_v15 = vmul.f32 %v383_v54, %v376_v53  ;;  %v378_v26 = vld [vmem:[#allocation2 + $0x20] sm:$0xf] }
  0xe1   : > { %v362_v13 = vld [vmem:[#allocation2 + $0x1a] sm:$0xf]  ;;  %v311_v9 = vadd.f32 %v307_v2, %v291_v1  ;;  %v408_v21 = vld [vmem:[#allocation2 + $0x12] sm:$0xf]  ;;  %v354_v24 = vmul.f32 %v609_v39, %v346_v4  ;;  %v400_v27 = vmul.f32 %v617_v55, %v392_v10  ;;  %v339_v29 = vmul.f32 %v604_v25, %v331_v11  ;;  %v363_v34 = vld [vmem:[#allocation2 + $0x22] sm:$0xf] }
  0xe2   : > { %v377_v18 = vld [vmem:[#allocation2 + $0x18] sm:$0xf]  ;;  %v357_v19 = vadd.f32 %v353_v0, %v341_v5  ;;  %v372_v20 = vadd.f32 %v368_v7, %v356_v6  ;;  %v342_v22 = vadd.f32 %v338_v12, %v326_v63  ;;  %v370_v30 = vmul.f32 %v614_v48, %v362_v13  ;;  %v379_v35 = vld [vmem:[#allocation2 + $0x28] sm:$0xf]  ;;  %v394_v37 = vld [vmem:[#allocation2 + $0x21] sm:$0xf] }
  0xe3   : > { %v327_v28 = vadd.f32 %v323_v17, %v311_v9  ;;  %v393_v31 = vld [vmem:[#allocation2 + $0x19] sm:$0xf]  ;;  %v385_v36 = vmul.f32 %v383_v54, %v377_v18  ;;  %v416_v38 = vmul.f32 %v515_v14, %v408_v21  ;;  %v355_v41 = vmul.f32 %v609_v39, %v347_v23  ;;  %v395_v46 = vld [vmem:[#allocation2 + $0x29] sm:$0xf]  ;;  %v516_v49 = vld [vmem:[%s659_s3] ss:$0 sm:$0xff] }
  0xe4   : > { %v373_v16 = vadd.f32 %v369_v8, %v357_v19  ;;  %v388_v32 = vadd.f32 %v384_v15, %v372_v20  ;;  %v358_v33 = vadd.f32 %v354_v24, %v342_v22  ;;  %v386_v42 = vmul.f32 %v383_v54, %v378_v26  ;;  %v409_v43 = vld [vmem:[#allocation2 + $0x1a] sm:$0xf]  ;;  %v410_v53 = vld [vmem:[#allocation2 + $0x22] sm:$0xf]  ;;  %v411_v56 = vld [vmem:[#allocation2 + $0x2a] sm:$0xf] }
  0xe5   : > { %v343_v40 = vadd.f32 %v339_v29, %v327_v28  ;;  %v401_v47 = vmul.f32 %v617_v55, %v393_v31  ;;  %v371_v51 = vmul.f32 %v614_v48, %v363_v34  ;;  %v387_v39 = vmul.f32 %v383_v54, %v379_v35 }
  0xe6   : > { %v404_v25 = vadd.f32 %v400_v27, %v388_v32  ;;  %v374_v44 = vadd.f32 %v370_v30, %v358_v33  ;;  %v389_v45 = vadd.f32 %v385_v36, %v373_v16  ;;  %v402_v52 = vmul.f32 %v617_v55, %v394_v37 }
  0xe7   : > { %v359_v50 = vadd.f32 %v355_v41, %v343_v40  ;;  %v417_v60 = vmul.f32 %v515_v14, %v409_v43  ;;  %v403_v62 = vmul.f32 %v617_v55, %v395_v46  ;;  %v418_v1 = vmul.f32 %v515_v14, %v410_v53 }
  0xe8   : > { %v420_v57 = vadd.f32 %v416_v38, %v404_v25  ;;  %v390_v58 = vadd.f32 %v386_v42, %v374_v44  ;;  %v405_v59 = vadd.f32 %v401_v47, %v389_v45  ;;  %v419_v3 = vmul.f32 %v515_v14, %v411_v56 }
  0xe9   : > { %v375_v61 = vadd.f32 %v371_v51, %v359_v50 }
  0xea   : > { %v431_v63 = vadd.f32 %v516_v49, %v420_v57  ;;  %v406_v0 = vadd.f32 %v402_v52, %v390_v58  ;;  %v421_v2 = vadd.f32 %v417_v60, %v405_v59 }
  0xeb   : > { %v391_v4 = vadd.f32 %v387_v39, %v375_v61 }
  0xec   : > { %v435_v48 = vmax.f32 %v431_v63, 0.0  ;;  %v422_v54 = vadd.f32 %v418_v1, %v406_v0  ;;  %v432_v5 = vadd.f32 %v516_v49, %v421_v2 }
  0xed   : > { %v407_v6 = vadd.f32 %v403_v62, %v391_v4 }
  0xee   : > { %v439_v7 = vpack.c.bf16 %v435_v48, %v435_v48  ;;  %v433_v10 = vadd.f32 %v516_v49, %v422_v54  ;;  %v436_v11 = vmax.f32 %v432_v5, 0.0 }
  0xef   : > { %v423_v55 = vadd.f32 %v419_v3, %v407_v6 }
  0xf0   : > { %444 = vst.msk [vmem:[%s199_s7] sm:$0x3] %vm443_vm5, %v439_v7  ;;  %v437_v12 = vmax.f32 %v433_v10, 0.0  ;;  %v440_v13 = vpack.c.bf16 %v436_v11, %v436_v11 }
  0xf1   : > { %v434_v8 = vadd.f32 %v516_v49, %v423_v55 }
  0xf2   : > { %v441_v15 = vpack.c.bf16 %v437_v12, %v437_v12  ;;  %445 = vst.msk [vmem:[%s199_s7 + $0x2] sm:$0x3] %vm443_vm5, %v440_v13 }
  0xf3   : > { %v438_v14 = vmax.f32 %v434_v8, 0.0 }
  0xf4   : > { %446 = vst.msk [vmem:[%s199_s7 + $0x4] sm:$0x3] %vm443_vm5, %v441_v15 }
  0xf5   : > { %v442_v9 = vpack.c.bf16 %v438_v14, %v438_v14 }
  0xf7   : > { %447 = vst.msk [vmem:[%s199_s7 + $0x6] sm:$0x3] %vm443_vm5, %v442_v9 }
  0xf8 PF: > { %s14_s15 = sadd.s32 1, %s546_s15  }
  0xf9   : > { %p11_p5 = scmp.ge.s32.totalorder %s14_s15, 4  }
  0xfb   :  { %13 = sbr.rel (!%p11_p5) target bundleno = 1 (0x1), region = 70 }

// kernel: _lambda_.32
= control target key start
LH: loop header
LB: loop body
LE: loop exit
PB: predicated region body
PF: predicated region fallthrough
CT: control target
= control target key end

     0   :  { %s601_s15 = smov 0   ;;  %s688_s0 = inlined_call_operand.vmem [shape: bf16[32,48], index: 0, kind: input, shape index: {}]   ;;  %s689_s1 = inlined_call_operand.vmem [shape: bf16[48,48], index: 1, kind: input, shape index: {}]   ;;  %s690_s2 = inlined_call_operand.vmem [shape: f32[9,48], index: 2, kind: input, shape index: {}]   ;;  %s691_s3 = inlined_call_operand.vmem [shape: f32[1,48], index: 3, kind: input, shape index: {}]   ;;  %s692_s4 = inlined_call_operand.vmem [shape: bf16[2,4,4,48], index: 4, kind: output, shape index: {}]  }
   0x1 LB: > { %s607_s16 = sadd.s32 4294967295, %s572_s15   ;;  %p523_p0 = scmp.ge.s32.totalorder %s572_s15, 1  ;;  %s572_s15 = sphi %s601_s15, %s14_s15  }
   0x2   : > { %p163_p1 = scmp.lt.s32.totalorder %s572_s15, 3 }
   0x4   : > { %p164_p2 = pnand %p523_p0, %p163_p1 }
   0x5   : > { %s524_s21 = sshll.u32 (!%p164_p2), %s607_s16, 1  ;;  %p195_p4 = scmp.lt.s32.totalorder (!%p164_p2), %s607_s16, 1 }
   0x6   : > { %167 = sbr.rel (%p164_p2) target bundleno = 256 (0x100), region = 36  ;;  %p190_p3 = scmp.lt.s32.totalorder (!%p164_p2), %s524_s21, 3 }
   0xb   : > { %v562_v0 = vld [vmem:[%s689_s1 + $0x10] sm:$0xff]   ;;  %v574_v1 = vmov 0.0   ;;  %v563_v2 = vld [vmem:[%s689_s1 + $0x8] sm:$0xff]   ;;  %vm575_vm0 = vmmov 0   ;;  %s694_s21 = smov (!%p190_p3, %s524_s21), 3  ;;  %v564_v3 = vld [vmem:[%s689_s1] sm:$0xff]   ;;  %v300_v5 = vlaneseq }
   0xc   : > { %542 = vmatprep.subr.bf16.mxu0 %v574_v1  ;;  %548 = vmatprep.mubr.msk.bf16.mxu0 %vm575_vm0, %v574_v1  ;;  %s525_s24 = sshll.u32 %s694_s21, 2  ;;  %vm232_vm1 = vcmask 392192   ;;  %vm277_vm2 = vcmask 390144   ;;  %v294_v9 = vld [vmem:[%s690_s2] sm:$0xff]  ;;  %vm285_vm3 = vcmask 388096   ;;  %vm288_vm4 = vcmask 392196  }
   0xd   : > { %543 = vmatpush3.bf16.msra.mxu0 %v562_v0  ;;  %s193_s27 = scalar_lea.vmem %s688_s0, %s525_s24  ;;  %278 = vst.msk [vmem:[#allocation2] sm:$0x3f] %vm277_vm2, %v574_v1  ;;  %279 = vst.msk [vmem:[#allocation2 + $0x8] sm:$0x3f] %vm277_vm2, %v574_v1  ;;  %v301_v6 = vshrl.u32 %v300_v5, 7  ;;  %s696_s16 = smov (!%p195_p4, %s607_s16), 1 }
   0xe   : > { %544 = vmatprep.subr.bf16.mxu0 %v574_v1  ;;  %v565_v4 = vld [vmem:[%s193_s27] sm:$0xff]   ;;  %280 = vst.msk [vmem:[#allocation2 + $0x10] sm:$0x3f] %vm277_vm2, %v574_v1  ;;  %283 = vst.msk [vmem:[#allocation2 + $0x28] sm:$0x3f] %vm277_vm2, %v574_v1  ;;  %s537_s8 = sshll.u32 %s696_s16, 3 }
   0xf   : > { %281 = vst.msk [vmem:[#allocation2 + $0x18] sm:$0x3f] %vm277_vm2, %v574_v1  ;;  %282 = vst.msk [vmem:[#allocation2 + $0x20] sm:$0x3f] %vm277_vm2, %v574_v1  ;;  %v302_v7 = vsub.s32 0, %v301_v6  ;;  %v318_v8 = vsub.s32 1, %v301_v6  ;;  %s199_s11 = scalar_lea.vmem %s692_s4, %s537_s8 }
  0x10   : > { %v334_v12 = vsub.s32 2, %v301_v6  ;;  %v350_v21 = vsub.s32 3, %v301_v6  ;;  %v366_v25 = vsub.s32 4, %v301_v6  ;;  %v382_v28 = vsub.s32 5, %v301_v6 }
  0x11   : > { %545 = vmatpush3.bf16.msra.mxu0 %v563_v2  ;;  %v627_v10 = vrot.slane %v294_v9, %v302_v7  ;;  %v629_v11 = vrot.slane %v294_v9, %v318_v8  ;;  %v398_v29 = vsub.s32 6, %v301_v6  ;;  %v414_v30 = vsub.s32 7, %v301_v6 }
  0x12   : > { %546 = vmatprep.subr.bf16.mxu0 %v574_v1  ;;  %v633_v18 = vrot.slane %v294_v9, %v334_v12  ;;  %v636_v27 = vrot.slane %v294_v9, %v350_v21  ;;  %v641_v41 = vrot.slane %v294_v9, %v366_v25  ;;  %v646_v50 = vrot.slane %v294_v9, %v382_v28 }
  0x13   : > { %v399_v56 = vrot.slane %v294_v9, %v398_v29  ;;  %v649_v57 = vrot.slane %v294_v9, %v414_v30  ;;  %vm459_vm5 = vcmask 386048  }
  0x14   : > { %v296_v13 = vld [vmem:[#allocation2] sm:$0xf] }
  0x15   : > { %547 = vmatpush3.bf16.msra.mxu0 %v564_v3  ;;  %v312_v14 = vld [vmem:[#allocation2 + $0x1] sm:$0xf]  ;;  %v304_v16 = vmul.f32 %v627_v10, %v296_v13 }
  0x16   : > { %v320_v17 = vmul.f32 %v629_v11, %v312_v14  ;;  %v328_v19 = vld [vmem:[#allocation2 + $0x2] sm:$0xf] }
  0x17   : > { %v336_v23 = vmul.f32 %v633_v18, %v328_v19 }
  0x18   : > { %549 = vmatmul.mubr.msk.bf16.vlgmr.msra.gmra.mxu0 %vm232_vm1, %v565_v4  ;;  %v324_v22 = vadd.f32 %v320_v17, %v304_v16  ;;  %v533_v16 = vld [vmem:[%s690_s2 + $0x8] ss:$0 sm:$0xff] }
  0x1a   : > { %v340_v34 = vadd.f32 %v336_v23, %v324_v22 }
  0xd8   : > { %v270_v15 = vpop.f32.mrf.mxu0 }
  0xd9   : > { %286 = vst.msk [vmem:[#allocation2 + $0x9] sm:$0xf] %vm285_vm3, %v270_v15 }
  0xda   : > { %289 = vst.msk [vmem:[#allocation2 + $0xd] sm:$0xf0] %vm288_vm4, %v270_v15  ;;  %v550_v20 = vpop.f32.mrf.mxu0 }
  0xdc   : > { %v273_v24 = vpop.f32.mrf.mxu0 }
  0xdd   : > { %291 = vst.msk [vmem:[#allocation2 + $0x19] sm:$0xf] %vm285_vm3, %v273_v24 }
  0xde   : > { %293 = vst.msk [vmem:[#allocation2 + $0x1d] sm:$0xf0] %vm288_vm4, %v273_v24  ;;  %v551_v26 = vpop.f32.mrf.mxu0 }
  0xe0   : > { %v297_v31 = vld [vmem:[#allocation2 + $0x8] sm:$0xf] }
  0xe1   : > { %v298_v32 = vld [vmem:[#allocation2 + $0x10] sm:$0xf]  ;;  %v313_v33 = vld [vmem:[#allocation2 + $0x9] sm:$0xf]  ;;  %v305_v35 = vmul.f32 %v627_v10, %v297_v31 }
  0xe2   : > { %v306_v36 = vmul.f32 %v627_v10, %v298_v32  ;;  %v314_v37 = vld [vmem:[#allocation2 + $0x11] sm:$0xf]  ;;  %v321_v38 = vmul.f32 %v629_v11, %v313_v33  ;;  %v329_v39 = vld [vmem:[#allocation2 + $0xa] sm:$0xf] }
  0xe3   : > { %v330_v40 = vld [vmem:[#allocation2 + $0x12] sm:$0xf]  ;;  %v322_v42 = vmul.f32 %v629_v11, %v314_v37  ;;  %v344_v43 = vld [vmem:[#allocation2 + $0x8] sm:$0xf]  ;;  %v337_v47 = vmul.f32 %v633_v18, %v329_v39 }
  0xe4   : > { %v345_v44 = vld [vmem:[#allocation2 + $0x10] sm:$0xf]  ;;  %v360_v45 = vld [vmem:[#allocation2 + $0x9] sm:$0xf]  ;;  %v325_v46 = vadd.f32 %v321_v38, %v305_v35  ;;  %v352_v48 = vmul.f32 %v636_v27, %v344_v43  ;;  %v338_v52 = vmul.f32 %v633_v18, %v330_v40  ;;  %v299_v62 = vld [vmem:[#allocation2 + $0x18] sm:$0xf] }
  0xe5   : > { %v361_v49 = vld [vmem:[#allocation2 + $0x11] sm:$0xf]  ;;  %v326_v51 = vadd.f32 %v322_v42, %v306_v36  ;;  %v376_v53 = vld [vmem:[#allocation2 + $0xa] sm:$0xf]  ;;  %v353_v59 = vmul.f32 %v636_v27, %v345_v44  ;;  %v368_v61 = vmul.f32 %v641_v41, %v360_v45  ;;  %v315_v63 = vld [vmem:[#allocation2 + $0x19] sm:$0xf]  ;;  %v307_v3 = vmul.f32 %v627_v10, %v299_v62 }
  0xe6   : > { %v377_v54 = vld [vmem:[#allocation2 + $0x12] sm:$0xf]  ;;  %v341_v58 = vadd.f32 %v337_v47, %v325_v46  ;;  %v356_v60 = vadd.f32 %v352_v48, %v340_v34  ;;  %v331_v0 = vld [vmem:[#allocation2 + $0x1a] sm:$0xf]  ;;  %v369_v2 = vmul.f32 %v641_v41, %v361_v49  ;;  %v323_v4 = vmul.f32 %v629_v11, %v315_v63  ;;  %v347_v13 = vld [vmem:[#allocation2 + $0x20] sm:$0xf] }
  0xe7   : > { %v392_v55 = vld [vmem:[#allocation2 + $0x10] sm:$0xf]  ;;  %v342_v1 = vadd.f32 %v338_v52, %v326_v51  ;;  %v346_v5 = vld [vmem:[#allocation2 + $0x18] sm:$0xf]  ;;  %v384_v9 = vmul.f32 %v646_v50, %v376_v53  ;;  %v385_v10 = vmul.f32 %v646_v50, %v377_v54  ;;  %v339_v19 = vmul.f32 %v633_v18, %v331_v0  ;;  %v363_v25 = vld [vmem:[#allocation2 + $0x21] sm:$0xf] }
  0xe8   : > { %v362_v6 = vld [vmem:[#allocation2 + $0x19] sm:$0xf]  ;;  %v357_v7 = vadd.f32 %v353_v59, %v341_v58  ;;  %v372_v8 = vadd.f32 %v368_v61, %v356_v60  ;;  %v408_v12 = vld [vmem:[#allocation2 + $0x11] sm:$0xf]  ;;  %v354_v14 = vmul.f32 %v636_v27, %v346_v5  ;;  %v400_v17 = vmul.f32 %v399_v56, %v392_v55  ;;  %v394_v28 = vld [vmem:[#allocation2 + $0x20] sm:$0xf] }
  0xe9   : > { %v378_v15 = vld [vmem:[#allocation2 + $0x1a] sm:$0xf]  ;;  %v327_v11 = vadd.f32 %v323_v4, %v307_v3  ;;  %v424_v23 = vld [vmem:[#allocation2 + $0x12] sm:$0xf]  ;;  %v370_v26 = vmul.f32 %v641_v41, %v362_v6  ;;  %v416_v29 = vmul.f32 %v649_v57, %v408_v12  ;;  %v355_v31 = vmul.f32 %v636_v27, %v347_v13  ;;  %v379_v36 = vld [vmem:[#allocation2 + $0x22] sm:$0xf] }
  0xea   : > { %v393_v20 = vld [vmem:[#allocation2 + $0x18] sm:$0xf]  ;;  %v373_v21 = vadd.f32 %v369_v2, %v357_v7  ;;  %v388_v22 = vadd.f32 %v384_v9, %v372_v8  ;;  %v358_v24 = vadd.f32 %v354_v14, %v342_v1  ;;  %v386_v32 = vmul.f32 %v646_v50, %v378_v15  ;;  %v395_v37 = vld [vmem:[#allocation2 + $0x28] sm:$0xf]  ;;  %v410_v39 = vld [vmem:[#allocation2 + $0x21] sm:$0xf] }
  0xeb   : > { %v343_v30 = vadd.f32 %v339_v19, %v327_v11  ;;  %v409_v33 = vld [vmem:[#allocation2 + $0x19] sm:$0xf]  ;;  %v401_v38 = vmul.f32 %v399_v56, %v393_v20  ;;  %v432_v40 = vmul.f32 %v533_v16, %v424_v23  ;;  %v371_v43 = vmul.f32 %v641_v41, %v363_v25  ;;  %v411_v48 = vld [vmem:[#allocation2 + $0x29] sm:$0xf]  ;;  %v534_v51 = vld [vmem:[%s691_s3] ss:$0 sm:$0xff] }
  0xec   : > { %v389_v18 = vadd.f32 %v385_v10, %v373_v21  ;;  %v404_v34 = vadd.f32 %v400_v17, %v388_v22  ;;  %v374_v35 = vadd.f32 %v370_v26, %v358_v24  ;;  %v402_v44 = vmul.f32 %v399_v56, %v394_v28  ;;  %v425_v45 = vld [vmem:[#allocation2 + $0x1a] sm:$0xf]  ;;  %v426_v55 = vld [vmem:[#allocation2 + $0x22] sm:$0xf]  ;;  %v427_v58 = vld [vmem:[#allocation2 + $0x2a] sm:$0xf] }
  0xed   : > { %v359_v42 = vadd.f32 %v355_v31, %v343_v30  ;;  %v417_v49 = vmul.f32 %v649_v57, %v409_v33  ;;  %v387_v53 = vmul.f32 %v646_v50, %v379_v36  ;;  %v403_v41 = vmul.f32 %v399_v56, %v395_v37 }
  0xee   : > { %v420_v27 = vadd.f32 %v416_v29, %v404_v34  ;;  %v390_v46 = vadd.f32 %v386_v32, %v374_v35  ;;  %v405_v47 = vadd.f32 %v401_v38, %v389_v18  ;;  %v418_v54 = vmul.f32 %v649_v57, %v410_v39 }
  0xef   : > { %v375_v52 = vadd.f32 %v371_v43, %v359_v42  ;;  %v433_v62 = vmul.f32 %v533_v16, %v425_v45  ;;  %v419_v0 = vmul.f32 %v649_v57, %v411_v48  ;;  %v434_v3 = vmul.f32 %v533_v16, %v426_v55 }
  0xf0   : > { %v436_v59 = vadd.f32 %v432_v40, %v420_v27  ;;  %v406_v60 = vadd.f32 %v402_v44, %v390_v46  ;;  %v421_v61 = vadd.f32 %v417_v49, %v405_v47  ;;  %v435_v5 = vmul.f32 %v533_v16, %v427_v58 }
  0xf1   : > { %v391_v63 = vadd.f32 %v387_v53, %v375_v52 }
  0xf2   : > { %v447_v1 = vadd.f32 %v534_v51, %v436_v59  ;;  %v422_v2 = vadd.f32 %v418_v54, %v406_v60  ;;  %v437_v4 = vadd.f32 %v433_v62, %v421_v61 }
  0xf3   : > { %v407_v6 = vadd.f32 %v403_v41, %v391_v63 }
  0xf4   : > { %v451_v50 = vmax.f32 %v447_v1, 0.0  ;;  %v438_v56 = vadd.f32 %v434_v3, %v422_v2  ;;  %v448_v7 = vadd.f32 %v534_v51, %v437_v4 }
  0xf5   : > { %v423_v8 = vadd.f32 %v419_v0, %v407_v6 }
  0xf6   : > { %v455_v9 = vpack.c.bf16 %v451_v50, %v451_v50  ;;  %v449_v12 = vadd.f32 %v534_v51, %v438_v56  ;;  %v452_v13 = vmax.f32 %v448_v7, 0.0 }
  0xf7   : > { %v439_v57 = vadd.f32 %v435_v5, %v423_v8 }
  0xf8   : > { %460 = vst.msk [vmem:[%s199_s11] sm:$0x3] %vm459_vm5, %v455_v9  ;;  %v453_v14 = vmax.f32 %v449_v12, 0.0  ;;  %v456_v15 = vpack.c.bf16 %v452_v13, %v452_v13 }
  0xf9   : > { %v450_v10 = vadd.f32 %v534_v51, %v439_v57 }
  0xfa   : > { %v457_v17 = vpack.c.bf16 %v453_v14, %v453_v14  ;;  %461 = vst.msk [vmem:[%s199_s11 + $0x2] sm:$0x3] %vm459_vm5, %v456_v15 }
  0xfb   : > { %v454_v16 = vmax.f32 %v450_v10, 0.0 }
  0xfc   : > { %462 = vst.msk [vmem:[%s199_s11 + $0x4] sm:$0x3] %vm459_vm5, %v457_v17 }
  0xfd   : > { %v458_v11 = vpack.c.bf16 %v454_v16, %v454_v16 }
  0xff   : > { %463 = vst.msk [vmem:[%s199_s11 + $0x6] sm:$0x3] %vm459_vm5, %v458_v11 }
 0x100 PF: > { %s14_s15 = sadd.s32 1, %s572_s15  }
 0x101   : > { %p11_p5 = scmp.ge.s32.totalorder %s14_s15, 4  }
 0x103   :  { %13 = sbr.rel (!%p11_p5) target bundleno = 1 (0x1), region = 70 }

// kernel: _lambda_.33
= control target key start
LH: loop header
LB: loop body
LE: loop exit
PB: predicated region body
PF: predicated region fallthrough
CT: control target
= control target key end

     0   :  { %s588_s15 = smov 0   ;;  %s672_s0 = inlined_call_operand.vmem [shape: bf16[32,32], index: 0, kind: input, shape index: {}]   ;;  %s673_s1 = inlined_call_operand.vmem [shape: bf16[32,32], index: 1, kind: input, shape index: {}]   ;;  %s674_s2 = inlined_call_operand.vmem [shape: f32[9,32], index: 2, kind: input, shape index: {}]   ;;  %s675_s3 = inlined_call_operand.vmem [shape: f32[1,32], index: 3, kind: input, shape index: {}]   ;;  %s676_s4 = inlined_call_operand.vmem [shape: bf16[2,4,4,32], index: 4, kind: output, shape index: {}]  }
   0x1 LB: > { %s594_s16 = sadd.s32 4294967295, %s559_s15   ;;  %p515_p0 = scmp.ge.s32.totalorder %s559_s15, 1  ;;  %s559_s15 = sphi %s588_s15, %s14_s15  }
   0x2   : > { %p163_p1 = scmp.lt.s32.totalorder %s559_s15, 3 }
   0x4   : > { %p164_p2 = pnand %p515_p0, %p163_p1 }
   0x5   : > { %s516_s21 = sshll.u32 (!%p164_p2), %s594_s16, 1  ;;  %p195_p4 = scmp.lt.s32.totalorder (!%p164_p2), %s594_s16, 1 }
   0x6   : > { %167 = sbr.rel (%p164_p2) target bundleno = 252 (0xfc), region = 36  ;;  %p190_p3 = scmp.lt.s32.totalorder (!%p164_p2), %s516_s21, 3 }
   0xb   : > { %v550_v0 = vld [vmem:[%s673_s1 + $0x8] sm:$0xff]   ;;  %v561_v1 = vmov 0.0   ;;  %v551_v2 = vld [vmem:[%s673_s1] sm:$0xff]   ;;  %vm562_vm0 = vmmov 0   ;;  %s678_s21 = smov (!%p190_p3, %s516_s21), 3  ;;  %vm224_vm1 = vcmask 261120   ;;  %v292_v4 = vlaneseq }
   0xc   : > { %532 = vmatprep.subr.bf16.mxu0 %v561_v1  ;;  %536 = vmatprep.mubr.msk.bf16.mxu0 %vm562_vm0, %v561_v1  ;;  %s517_s22 = sshll.u32 %s678_s21, 2  ;;  %vm269_vm2 = vcmask 259072   ;;  %v286_v8 = vld [vmem:[%s674_s2] sm:$0xff]  ;;  %vm277_vm3 = vcmask 257024   ;;  %vm280_vm4 = vcmask 261124   ;;  %s680_s16 = smov (!%p195_p4, %s594_s16), 1 }
   0xd   : > { %533 = vmatpush3.bf16.msra.mxu0 %v550_v0  ;;  %s193_s25 = scalar_lea.vmem %s672_s0, %s517_s22  ;;  %270 = vst.msk [vmem:[#allocation2] sm:$0x3f] %vm269_vm2, %v561_v1  ;;  %271 = vst.msk [vmem:[#allocation2 + $0x8] sm:$0x3f] %vm269_vm2, %v561_v1  ;;  %v293_v5 = vshrl.u32 %v292_v4, 7  ;;  %s528_s6 = sshll.u32 %s680_s16, 3 }
   0xe   : > { %534 = vmatprep.subr.bf16.mxu0 %v561_v1  ;;  %v552_v3 = vld [vmem:[%s193_s25] sm:$0xff]   ;;  %272 = vst.msk [vmem:[#allocation2 + $0x10] sm:$0x3f] %vm269_vm2, %v561_v1  ;;  %275 = vst.msk [vmem:[#allocation2 + $0x28] sm:$0x3f] %vm269_vm2, %v561_v1  ;;  %s199_s9 = scalar_lea.vmem %s676_s4, %s528_s6  ;;  %vm451_vm5 = vcmask 254976  }
   0xf   : > { %273 = vst.msk [vmem:[#allocation2 + $0x18] sm:$0x3f] %vm269_vm2, %v561_v1  ;;  %274 = vst.msk [vmem:[#allocation2 + $0x20] sm:$0x3f] %vm269_vm2, %v561_v1  ;;  %v294_v6 = vsub.s32 0, %v293_v5  ;;  %v310_v7 = vsub.s32 1, %v293_v5 }
  0x10   : > { %v326_v11 = vsub.s32 2, %v293_v5  ;;  %v342_v20 = vsub.s32 3, %v293_v5  ;;  %v358_v24 = vsub.s32 4, %v293_v5  ;;  %v374_v27 = vsub.s32 5, %v293_v5 }
  0x11   : > { %535 = vmatpush3.bf16.msra.mxu0 %v551_v2  ;;  %v611_v9 = vrot.slane %v286_v8, %v294_v6  ;;  %v613_v10 = vrot.slane %v286_v8, %v310_v7  ;;  %v390_v28 = vsub.s32 6, %v293_v5  ;;  %v406_v29 = vsub.s32 7, %v293_v5 }
  0x12   : > { %v617_v17 = vrot.slane %v286_v8, %v326_v11  ;;  %v620_v26 = vrot.slane %v286_v8, %v342_v20  ;;  %v625_v40 = vrot.slane %v286_v8, %v358_v24  ;;  %v630_v49 = vrot.slane %v286_v8, %v374_v27 }
  0x13   : > { %v391_v55 = vrot.slane %v286_v8, %v390_v28  ;;  %v633_v56 = vrot.slane %v286_v8, %v406_v29 }
  0x14   : > { %537 = vmatmul.mubr.msk.bf16.vlgmr.msra.gmra.mxu0 %vm224_vm1, %v552_v3  ;;  %v288_v12 = vld [vmem:[#allocation2] sm:$0xf] }
  0x15   : > { %v304_v13 = vld [vmem:[#allocation2 + $0x1] sm:$0xf]  ;;  %v296_v15 = vmul.f32 %v611_v9, %v288_v12 }
  0x16   : > { %v312_v16 = vmul.f32 %v613_v10, %v304_v13  ;;  %v320_v18 = vld [vmem:[#allocation2 + $0x2] sm:$0xf] }
  0x17   : > { %v328_v22 = vmul.f32 %v617_v17, %v320_v18 }
  0x18   : > { %v316_v21 = vadd.f32 %v312_v16, %v296_v15  ;;  %v524_v15 = vld [vmem:[%s674_s2 + $0x8] ss:$0 sm:$0xff] }
  0x1a   : > { %v332_v33 = vadd.f32 %v328_v22, %v316_v21 }
  0xd4   : > { %v262_v14 = vpop.f32.mrf.mxu0 }
  0xd5   : > { %278 = vst.msk [vmem:[#allocation2 + $0x9] sm:$0xf] %vm277_vm3, %v262_v14 }
  0xd6   : > { %281 = vst.msk [vmem:[#allocation2 + $0xd] sm:$0xf0] %vm280_vm4, %v262_v14  ;;  %v538_v19 = vpop.f32.mrf.mxu0 }
  0xd8   : > { %v265_v23 = vpop.f32.mrf.mxu0 }
  0xd9   : > { %283 = vst.msk [vmem:[#allocation2 + $0x19] sm:$0xf] %vm277_vm3, %v265_v23 }
  0xda   : > { %285 = vst.msk [vmem:[#allocation2 + $0x1d] sm:$0xf0] %vm280_vm4, %v265_v23  ;;  %v539_v25 = vpop.f32.mrf.mxu0 }
  0xdc   : > { %v289_v30 = vld [vmem:[#allocation2 + $0x8] sm:$0xf] }
  0xdd   : > { %v290_v31 = vld [vmem:[#allocation2 + $0x10] sm:$0xf]  ;;  %v305_v32 = vld [vmem:[#allocation2 + $0x9] sm:$0xf]  ;;  %v297_v34 = vmul.f32 %v611_v9, %v289_v30 }
  0xde   : > { %v298_v35 = vmul.f32 %v611_v9, %v290_v31  ;;  %v306_v36 = vld [vmem:[#allocation2 + $0x11] sm:$0xf]  ;;  %v313_v37 = vmul.f32 %v613_v10, %v305_v32  ;;  %v321_v38 = vld [vmem:[#allocation2 + $0xa] sm:$0xf] }
  0xdf   : > { %v322_v39 = vld [vmem:[#allocation2 + $0x12] sm:$0xf]  ;;  %v314_v41 = vmul.f32 %v613_v10, %v306_v36  ;;  %v336_v42 = vld [vmem:[#allocation2 + $0x8] sm:$0xf]  ;;  %v329_v46 = vmul.f32 %v617_v17, %v321_v38 }
  0xe0   : > { %v337_v43 = vld [vmem:[#allocation2 + $0x10] sm:$0xf]  ;;  %v352_v44 = vld [vmem:[#allocation2 + $0x9] sm:$0xf]  ;;  %v317_v45 = vadd.f32 %v313_v37, %v297_v34  ;;  %v344_v47 = vmul.f32 %v620_v26, %v336_v42  ;;  %v330_v51 = vmul.f32 %v617_v17, %v322_v39  ;;  %v291_v61 = vld [vmem:[#allocation2 + $0x18] sm:$0xf] }
  0xe1   : > { %v353_v48 = vld [vmem:[#allocation2 + $0x11] sm:$0xf]  ;;  %v318_v50 = vadd.f32 %v314_v41, %v298_v35  ;;  %v368_v52 = vld [vmem:[#allocation2 + $0xa] sm:$0xf]  ;;  %v345_v58 = vmul.f32 %v620_v26, %v337_v43  ;;  %v360_v60 = vmul.f32 %v625_v40, %v352_v44  ;;  %v307_v62 = vld [vmem:[#allocation2 + $0x19] sm:$0xf]  ;;  %v299_v2 = vmul.f32 %v611_v9, %v291_v61 }
  0xe2   : > { %v369_v53 = vld [vmem:[#allocation2 + $0x12] sm:$0xf]  ;;  %v333_v57 = vadd.f32 %v329_v46, %v317_v45  ;;  %v348_v59 = vadd.f32 %v344_v47, %v332_v33  ;;  %v323_v63 = vld [vmem:[#allocation2 + $0x1a] sm:$0xf]  ;;  %v361_v1 = vmul.f32 %v625_v40, %v353_v48  ;;  %v315_v3 = vmul.f32 %v613_v10, %v307_v62  ;;  %v339_v12 = vld [vmem:[#allocation2 + $0x20] sm:$0xf] }
  0xe3   : > { %v384_v54 = vld [vmem:[#allocation2 + $0x10] sm:$0xf]  ;;  %v334_v0 = vadd.f32 %v330_v51, %v318_v50  ;;  %v338_v4 = vld [vmem:[#allocation2 + $0x18] sm:$0xf]  ;;  %v376_v8 = vmul.f32 %v630_v49, %v368_v52  ;;  %v377_v9 = vmul.f32 %v630_v49, %v369_v53  ;;  %v331_v18 = vmul.f32 %v617_v17, %v323_v63  ;;  %v355_v24 = vld [vmem:[#allocation2 + $0x21] sm:$0xf] }
  0xe4   : > { %v354_v5 = vld [vmem:[#allocation2 + $0x19] sm:$0xf]  ;;  %v349_v6 = vadd.f32 %v345_v58, %v333_v57  ;;  %v364_v7 = vadd.f32 %v360_v60, %v348_v59  ;;  %v400_v11 = vld [vmem:[#allocation2 + $0x11] sm:$0xf]  ;;  %v346_v13 = vmul.f32 %v620_v26, %v338_v4  ;;  %v392_v16 = vmul.f32 %v391_v55, %v384_v54  ;;  %v386_v27 = vld [vmem:[#allocation2 + $0x20] sm:$0xf] }
  0xe5   : > { %v370_v14 = vld [vmem:[#allocation2 + $0x1a] sm:$0xf]  ;;  %v319_v10 = vadd.f32 %v315_v3, %v299_v2  ;;  %v416_v22 = vld [vmem:[#allocation2 + $0x12] sm:$0xf]  ;;  %v362_v25 = vmul.f32 %v625_v40, %v354_v5  ;;  %v408_v28 = vmul.f32 %v633_v56, %v400_v11  ;;  %v347_v30 = vmul.f32 %v620_v26, %v339_v12  ;;  %v371_v35 = vld [vmem:[#allocation2 + $0x22] sm:$0xf] }
  0xe6   : > { %v385_v19 = vld [vmem:[#allocation2 + $0x18] sm:$0xf]  ;;  %v365_v20 = vadd.f32 %v361_v1, %v349_v6  ;;  %v380_v21 = vadd.f32 %v376_v8, %v364_v7  ;;  %v350_v23 = vadd.f32 %v346_v13, %v334_v0  ;;  %v378_v31 = vmul.f32 %v630_v49, %v370_v14  ;;  %v387_v36 = vld [vmem:[#allocation2 + $0x28] sm:$0xf]  ;;  %v402_v38 = vld [vmem:[#allocation2 + $0x21] sm:$0xf] }
  0xe7   : > { %v335_v29 = vadd.f32 %v331_v18, %v319_v10  ;;  %v401_v32 = vld [vmem:[#allocation2 + $0x19] sm:$0xf]  ;;  %v393_v37 = vmul.f32 %v391_v55, %v385_v19  ;;  %v424_v39 = vmul.f32 %v524_v15, %v416_v22  ;;  %v363_v42 = vmul.f32 %v625_v40, %v355_v24  ;;  %v403_v47 = vld [vmem:[#allocation2 + $0x29] sm:$0xf]  ;;  %v525_v50 = vld [vmem:[%s675_s3] ss:$0 sm:$0xff] }
  0xe8   : > { %v381_v17 = vadd.f32 %v377_v9, %v365_v20  ;;  %v396_v33 = vadd.f32 %v392_v16, %v380_v21  ;;  %v366_v34 = vadd.f32 %v362_v25, %v350_v23  ;;  %v394_v43 = vmul.f32 %v391_v55, %v386_v27  ;;  %v417_v44 = vld [vmem:[#allocation2 + $0x1a] sm:$0xf]  ;;  %v418_v54 = vld [vmem:[#allocation2 + $0x22] sm:$0xf]  ;;  %v419_v57 = vld [vmem:[#allocation2 + $0x2a] sm:$0xf] }
  0xe9   : > { %v351_v41 = vadd.f32 %v347_v30, %v335_v29  ;;  %v409_v48 = vmul.f32 %v633_v56, %v401_v32  ;;  %v379_v52 = vmul.f32 %v630_v49, %v371_v35  ;;  %v395_v40 = vmul.f32 %v391_v55, %v387_v36 }
  0xea   : > { %v412_v26 = vadd.f32 %v408_v28, %v396_v33  ;;  %v382_v45 = vadd.f32 %v378_v31, %v366_v34  ;;  %v397_v46 = vadd.f32 %v393_v37, %v381_v17  ;;  %v410_v53 = vmul.f32 %v633_v56, %v402_v38 }
  0xeb   : > { %v367_v51 = vadd.f32 %v363_v42, %v351_v41  ;;  %v425_v61 = vmul.f32 %v524_v15, %v417_v44  ;;  %v411_v63 = vmul.f32 %v633_v56, %v403_v47  ;;  %v426_v2 = vmul.f32 %v524_v15, %v418_v54 }
  0xec   : > { %v428_v58 = vadd.f32 %v424_v39, %v412_v26  ;;  %v398_v59 = vadd.f32 %v394_v43, %v382_v45  ;;  %v413_v60 = vadd.f32 %v409_v48, %v397_v46  ;;  %v427_v4 = vmul.f32 %v524_v15, %v419_v57 }
  0xed   : > { %v383_v62 = vadd.f32 %v379_v52, %v367_v51 }
  0xee   : > { %v439_v0 = vadd.f32 %v525_v50, %v428_v58  ;;  %v414_v1 = vadd.f32 %v410_v53, %v398_v59  ;;  %v429_v3 = vadd.f32 %v425_v61, %v413_v60 }
  0xef   : > { %v399_v5 = vadd.f32 %v395_v40, %v383_v62 }
  0xf0   : > { %v443_v49 = vmax.f32 %v439_v0, 0.0  ;;  %v430_v55 = vadd.f32 %v426_v2, %v414_v1  ;;  %v440_v6 = vadd.f32 %v525_v50, %v429_v3 }
  0xf1   : > { %v415_v7 = vadd.f32 %v411_v63, %v399_v5 }
  0xf2   : > { %v447_v8 = vpack.c.bf16 %v443_v49, %v443_v49  ;;  %v441_v11 = vadd.f32 %v525_v50, %v430_v55  ;;  %v444_v12 = vmax.f32 %v440_v6, 0.0 }
  0xf3   : > { %v431_v56 = vadd.f32 %v427_v4, %v415_v7 }
  0xf4   : > { %452 = vst.msk [vmem:[%s199_s9] sm:$0x3] %vm451_vm5, %v447_v8  ;;  %v445_v13 = vmax.f32 %v441_v11, 0.0  ;;  %v448_v14 = vpack.c.bf16 %v444_v12, %v444_v12 }
  0xf5   : > { %v442_v9 = vadd.f32 %v525_v50, %v431_v56 }
  0xf6   : > { %v449_v16 = vpack.c.bf16 %v445_v13, %v445_v13  ;;  %453 = vst.msk [vmem:[%s199_s9 + $0x2] sm:$0x3] %vm451_vm5, %v448_v14 }
  0xf7   : > { %v446_v15 = vmax.f32 %v442_v9, 0.0 }
  0xf8   : > { %454 = vst.msk [vmem:[%s199_s9 + $0x4] sm:$0x3] %vm451_vm5, %v449_v16 }
  0xf9   : > { %v450_v10 = vpack.c.bf16 %v446_v15, %v446_v15 }
  0xfb   : > { %455 = vst.msk [vmem:[%s199_s9 + $0x6] sm:$0x3] %vm451_vm5, %v450_v10 }
  0xfc PF: > { %s14_s15 = sadd.s32 1, %s559_s15  }
  0xfd   : > { %p11_p5 = scmp.ge.s32.totalorder %s14_s15, 4  }
  0xff   :  { %13 = sbr.rel (!%p11_p5) target bundleno = 1 (0x1), region = 70 }

// kernel: _lambda_.34
= control target key start
LH: loop header
LB: loop body
LE: loop exit
PB: predicated region body
PF: predicated region fallthrough
CT: control target
= control target key end

     0   :  { %s575_s15 = smov 0   ;;  %s656_s0 = inlined_call_operand.vmem [shape: bf16[32,16], index: 0, kind: input, shape index: {}]   ;;  %s657_s1 = inlined_call_operand.vmem [shape: bf16[16,16], index: 1, kind: input, shape index: {}]   ;;  %s658_s2 = inlined_call_operand.vmem [shape: f32[9,16], index: 2, kind: input, shape index: {}]   ;;  %s659_s3 = inlined_call_operand.vmem [shape: f32[1,16], index: 3, kind: input, shape index: {}]   ;;  %s660_s4 = inlined_call_operand.vmem [shape: bf16[2,4,4,16], index: 4, kind: output, shape index: {}]  }
   0x1 LB: > { %s581_s16 = sadd.s32 4294967295, %s546_s15   ;;  %p507_p0 = scmp.ge.s32.totalorder %s546_s15, 1  ;;  %s546_s15 = sphi %s575_s15, %s14_s15  }
   0x2   : > { %p163_p1 = scmp.lt.s32.totalorder %s546_s15, 3 }
   0x4   : > { %p164_p2 = pnand %p507_p0, %p163_p1 }
   0x5   : > { %s508_s19 = sshll.u32 (!%p164_p2), %s581_s16, 1  ;;  %p195_p4 = scmp.lt.s32.totalorder (!%p164_p2), %s581_s16, 1 }
   0x6   : > { %167 = sbr.rel (%p164_p2) target bundleno = 248 (0xf8), region = 36  ;;  %p190_p3 = scmp.lt.s32.totalorder (!%p164_p2), %s508_s19, 3 }
   0xb   : > { %v538_v0 = vld [vmem:[%s657_s1] sm:$0xff]   ;;  %v548_v1 = vmov 0.0   ;;  %vm549_vm0 = vmmov 0   ;;  %s662_s19 = smov (!%p190_p3, %s508_s19), 3  ;;  %vm216_vm1 = vcmask 130048   ;;  %vm261_vm2 = vcmask 128000  }
   0xc   : > { %522 = vmatprep.subr.bf16.mxu0 %v548_v1  ;;  %524 = vmatprep.mubr.msk.bf16.mxu0 %vm549_vm0, %v548_v1  ;;  %s509_s20 = sshll.u32 %s662_s19, 2  ;;  %262 = vst.msk [vmem:[#allocation2] sm:$0x3f] %vm261_vm2, %v548_v1  ;;  %263 = vst.msk [vmem:[#allocation2 + $0x8] sm:$0x3f] %vm261_vm2, %v548_v1  ;;  %v284_v3 = vlaneseq  ;;  %v278_v7 = vld [vmem:[%s658_s2] sm:$0xff] }
   0xd   : > { %523 = vmatpush3.bf16.msra.mxu0 %v538_v0  ;;  %s193_s23 = scalar_lea.vmem %s656_s0, %s509_s20  ;;  %264 = vst.msk [vmem:[#allocation2 + $0x10] sm:$0x3f] %vm261_vm2, %v548_v1  ;;  %267 = vst.msk [vmem:[#allocation2 + $0x28] sm:$0x3f] %vm261_vm2, %v548_v1  ;;  %vm269_vm3 = vcmask 125952   ;;  %vm272_vm4 = vcmask 130052  }
   0xe   : > { %v539_v2 = vld [vmem:[%s193_s23] sm:$0xff]   ;;  %265 = vst.msk [vmem:[#allocation2 + $0x18] sm:$0x3f] %vm261_vm2, %v548_v1  ;;  %266 = vst.msk [vmem:[#allocation2 + $0x20] sm:$0x3f] %vm261_vm2, %v548_v1  ;;  %v285_v4 = vshrl.u32 %v284_v3, 7 }
   0xf   : > { %s664_s16 = smov (!%p195_p4, %s581_s16), 1  ;;  %vm443_vm5 = vcmask 123904  }
  0x10   : > { %525 = vmatmul.mubr.msk.bf16.vlgmr.msra.gmra.mxu0 %vm216_vm1, %v539_v2  ;;  %v286_v5 = vsub.s32 0, %v285_v4  ;;  %v302_v6 = vsub.s32 1, %v285_v4  ;;  %v318_v10 = vsub.s32 2, %v285_v4  ;;  %v334_v19 = vsub.s32 3, %v285_v4  ;;  %s519_s30 = sshll.u32 %s664_s16, 3 }
  0x11   : > { %v350_v23 = vsub.s32 4, %v285_v4  ;;  %v366_v26 = vsub.s32 5, %v285_v4  ;;  %v382_v27 = vsub.s32 6, %v285_v4  ;;  %v398_v28 = vsub.s32 7, %v285_v4  ;;  %s199_s7 = scalar_lea.vmem %s660_s4, %s519_s30 }
  0x12   : > { %v595_v8 = vrot.slane %v278_v7, %v286_v5  ;;  %v597_v9 = vrot.slane %v278_v7, %v302_v6  ;;  %v601_v16 = vrot.slane %v278_v7, %v318_v10  ;;  %v604_v25 = vrot.slane %v278_v7, %v334_v19 }
  0x13   : > { %v280_v11 = vld [vmem:[#allocation2] sm:$0xf]  ;;  %v609_v39 = vrot.slane %v278_v7, %v350_v23  ;;  %v614_v48 = vrot.slane %v278_v7, %v366_v26  ;;  %v383_v54 = vrot.slane %v278_v7, %v382_v27  ;;  %v617_v55 = vrot.slane %v278_v7, %v398_v28 }
  0x14   : > { %v296_v12 = vld [vmem:[#allocation2 + $0x1] sm:$0xf]  ;;  %v288_v14 = vmul.f32 %v595_v8, %v280_v11 }
  0x15   : > { %v304_v15 = vmul.f32 %v597_v9, %v296_v12  ;;  %v312_v17 = vld [vmem:[#allocation2 + $0x2] sm:$0xf] }
  0x16   : > { %v320_v21 = vmul.f32 %v601_v16, %v312_v17 }
  0x17   : > { %v308_v20 = vadd.f32 %v304_v15, %v288_v14  ;;  %v515_v14 = vld [vmem:[%s658_s2 + $0x8] ss:$0 sm:$0xff] }
  0x19   : > { %v324_v32 = vadd.f32 %v320_v21, %v308_v20 }
  0xd0   : > { %v254_v13 = vpop.f32.mrf.mxu0 }
  0xd1   : > { %270 = vst.msk [vmem:[#allocation2 + $0x9] sm:$0xf] %vm269_vm3, %v254_v13 }
  0xd2   : > { %273 = vst.msk [vmem:[#allocation2 + $0xd] sm:$0xf0] %vm272_vm4, %v254_v13  ;;  %v526_v18 = vpop.f32.mrf.mxu0 }
  0xd4   : > { %v257_v22 = vpop.f32.mrf.mxu0 }
  0xd5   : > { %275 = vst.msk [vmem:[#allocation2 + $0x19] sm:$0xf] %vm269_vm3, %v257_v22 }
  0xd6   : > { %277 = vst.msk [vmem:[#allocation2 + $0x1d] sm:$0xf0] %vm272_vm4, %v257_v22  ;;  %v527_v24 = vpop.f32.mrf.mxu0 }
  0xd8   : > { %v281_v29 = vld [vmem:[#allocation2 + $0x8] sm:$0xf] }
  0xd9   : > { %v282_v30 = vld [vmem:[#allocation2 + $0x10] sm:$0xf]  ;;  %v297_v31 = vld [vmem:[#allocation2 + $0x9] sm:$0xf]  ;;  %v289_v33 = vmul.f32 %v595_v8, %v281_v29 }
  0xda   : > { %v290_v34 = vmul.f32 %v595_v8, %v282_v30  ;;  %v298_v35 = vld [vmem:[#allocation2 + $0x11] sm:$0xf]  ;;  %v305_v36 = vmul.f32 %v597_v9, %v297_v31  ;;  %v313_v37 = vld [vmem:[#allocation2 + $0xa] sm:$0xf] }
  0xdb   : > { %v314_v38 = vld [vmem:[#allocation2 + $0x12] sm:$0xf]  ;;  %v306_v40 = vmul.f32 %v597_v9, %v298_v35  ;;  %v328_v41 = vld [vmem:[#allocation2 + $0x8] sm:$0xf]  ;;  %v321_v45 = vmul.f32 %v601_v16, %v313_v37 }
  0xdc   : > { %v329_v42 = vld [vmem:[#allocation2 + $0x10] sm:$0xf]  ;;  %v344_v43 = vld [vmem:[#allocation2 + $0x9] sm:$0xf]  ;;  %v309_v44 = vadd.f32 %v305_v36, %v289_v33  ;;  %v336_v46 = vmul.f32 %v604_v25, %v328_v41  ;;  %v322_v50 = vmul.f32 %v601_v16, %v314_v38  ;;  %v283_v60 = vld [vmem:[#allocation2 + $0x18] sm:$0xf] }
  0xdd   : > { %v345_v47 = vld [vmem:[#allocation2 + $0x11] sm:$0xf]  ;;  %v310_v49 = vadd.f32 %v306_v40, %v290_v34  ;;  %v360_v51 = vld [vmem:[#allocation2 + $0xa] sm:$0xf]  ;;  %v337_v57 = vmul.f32 %v604_v25, %v329_v42  ;;  %v352_v59 = vmul.f32 %v609_v39, %v344_v43  ;;  %v299_v61 = vld [vmem:[#allocation2 + $0x19] sm:$0xf]  ;;  %v291_v1 = vmul.f32 %v595_v8, %v283_v60 }
  0xde   : > { %v361_v52 = vld [vmem:[#allocation2 + $0x12] sm:$0xf]  ;;  %v325_v56 = vadd.f32 %v321_v45, %v309_v44  ;;  %v340_v58 = vadd.f32 %v336_v46, %v324_v32  ;;  %v315_v62 = vld [vmem:[#allocation2 + $0x1a] sm:$0xf]  ;;  %v353_v0 = vmul.f32 %v609_v39, %v345_v47  ;;  %v307_v2 = vmul.f32 %v597_v9, %v299_v61  ;;  %v331_v11 = vld [vmem:[#allocation2 + $0x20] sm:$0xf] }
  0xdf   : > { %v376_v53 = vld [vmem:[#allocation2 + $0x10] sm:$0xf]  ;;  %v326_v63 = vadd.f32 %v322_v50, %v310_v49  ;;  %v330_v3 = vld [vmem:[#allocation2 + $0x18] sm:$0xf]  ;;  %v368_v7 = vmul.f32 %v614_v48, %v360_v51  ;;  %v369_v8 = vmul.f32 %v614_v48, %v361_v52  ;;  %v323_v17 = vmul.f32 %v601_v16, %v315_v62  ;;  %v347_v23 = vld [vmem:[#allocation2 + $0x21] sm:$0xf] }
  0xe0   : > { %v346_v4 = vld [vmem:[#allocation2 + $0x19] sm:$0xf]  ;;  %v341_v5 = vadd.f32 %v337_v57, %v325_v56  ;;  %v356_v6 = vadd.f32 %v352_v59, %v340_v58  ;;  %v392_v10 = vld [vmem:[#allocation2 + $0x11] sm:$0xf]  ;;  %v338_v12 = vmul.f32 %v604_v25, %v330_v3  ;;  %v384_v15 = vmul.f32 %v383_v54, %v376_v53  ;;  %v378_v26 = vld [vmem:[#allocation2 + $0x20] sm:$0xf] }
  0xe1   : > { %v362_v13 = vld [vmem:[#allocation2 + $0x1a] sm:$0xf]  ;;  %v311_v9 = vadd.f32 %v307_v2, %v291_v1  ;;  %v408_v21 = vld [vmem:[#allocation2 + $0x12] sm:$0xf]  ;;  %v354_v24 = vmul.f32 %v609_v39, %v346_v4  ;;  %v400_v27 = vmul.f32 %v617_v55, %v392_v10  ;;  %v339_v29 = vmul.f32 %v604_v25, %v331_v11  ;;  %v363_v34 = vld [vmem:[#allocation2 + $0x22] sm:$0xf] }
  0xe2   : > { %v377_v18 = vld [vmem:[#allocation2 + $0x18] sm:$0xf]  ;;  %v357_v19 = vadd.f32 %v353_v0, %v341_v5  ;;  %v372_v20 = vadd.f32 %v368_v7, %v356_v6  ;;  %v342_v22 = vadd.f32 %v338_v12, %v326_v63  ;;  %v370_v30 = vmul.f32 %v614_v48, %v362_v13  ;;  %v379_v35 = vld [vmem:[#allocation2 + $0x28] sm:$0xf]  ;;  %v394_v37 = vld [vmem:[#allocation2 + $0x21] sm:$0xf] }
  0xe3   : > { %v327_v28 = vadd.f32 %v323_v17, %v311_v9  ;;  %v393_v31 = vld [vmem:[#allocation2 + $0x19] sm:$0xf]  ;;  %v385_v36 = vmul.f32 %v383_v54, %v377_v18  ;;  %v416_v38 = vmul.f32 %v515_v14, %v408_v21  ;;  %v355_v41 = vmul.f32 %v609_v39, %v347_v23  ;;  %v395_v46 = vld [vmem:[#allocation2 + $0x29] sm:$0xf]  ;;  %v516_v49 = vld [vmem:[%s659_s3] ss:$0 sm:$0xff] }
  0xe4   : > { %v373_v16 = vadd.f32 %v369_v8, %v357_v19  ;;  %v388_v32 = vadd.f32 %v384_v15, %v372_v20  ;;  %v358_v33 = vadd.f32 %v354_v24, %v342_v22  ;;  %v386_v42 = vmul.f32 %v383_v54, %v378_v26  ;;  %v409_v43 = vld [vmem:[#allocation2 + $0x1a] sm:$0xf]  ;;  %v410_v53 = vld [vmem:[#allocation2 + $0x22] sm:$0xf]  ;;  %v411_v56 = vld [vmem:[#allocation2 + $0x2a] sm:$0xf] }
  0xe5   : > { %v343_v40 = vadd.f32 %v339_v29, %v327_v28  ;;  %v401_v47 = vmul.f32 %v617_v55, %v393_v31  ;;  %v371_v51 = vmul.f32 %v614_v48, %v363_v34  ;;  %v387_v39 = vmul.f32 %v383_v54, %v379_v35 }
  0xe6   : > { %v404_v25 = vadd.f32 %v400_v27, %v388_v32  ;;  %v374_v44 = vadd.f32 %v370_v30, %v358_v33  ;;  %v389_v45 = vadd.f32 %v385_v36, %v373_v16  ;;  %v402_v52 = vmul.f32 %v617_v55, %v394_v37 }
  0xe7   : > { %v359_v50 = vadd.f32 %v355_v41, %v343_v40  ;;  %v417_v60 = vmul.f32 %v515_v14, %v409_v43  ;;  %v403_v62 = vmul.f32 %v617_v55, %v395_v46  ;;  %v418_v1 = vmul.f32 %v515_v14, %v410_v53 }
  0xe8   : > { %v420_v57 = vadd.f32 %v416_v38, %v404_v25  ;;  %v390_v58 = vadd.f32 %v386_v42, %v374_v44  ;;  %v405_v59 = vadd.f32 %v401_v47, %v389_v45  ;;  %v419_v3 = vmul.f32 %v515_v14, %v411_v56 }
  0xe9   : > { %v375_v61 = vadd.f32 %v371_v51, %v359_v50 }
  0xea   : > { %v431_v63 = vadd.f32 %v516_v49, %v420_v57  ;;  %v406_v0 = vadd.f32 %v402_v52, %v390_v58  ;;  %v421_v2 = vadd.f32 %v417_v60, %v405_v59 }
  0xeb   : > { %v391_v4 = vadd.f32 %v387_v39, %v375_v61 }
  0xec   : > { %v435_v48 = vmax.f32 %v431_v63, 0.0  ;;  %v422_v54 = vadd.f32 %v418_v1, %v406_v0  ;;  %v432_v5 = vadd.f32 %v516_v49, %v421_v2 }
  0xed   : > { %v407_v6 = vadd.f32 %v403_v62, %v391_v4 }
  0xee   : > { %v439_v7 = vpack.c.bf16 %v435_v48, %v435_v48  ;;  %v433_v10 = vadd.f32 %v516_v49, %v422_v54  ;;  %v436_v11 = vmax.f32 %v432_v5, 0.0 }
  0xef   : > { %v423_v55 = vadd.f32 %v419_v3, %v407_v6 }
  0xf0   : > { %444 = vst.msk [vmem:[%s199_s7] sm:$0x3] %vm443_vm5, %v439_v7  ;;  %v437_v12 = vmax.f32 %v433_v10, 0.0  ;;  %v440_v13 = vpack.c.bf16 %v436_v11, %v436_v11 }
  0xf1   : > { %v434_v8 = vadd.f32 %v516_v49, %v423_v55 }
  0xf2   : > { %v441_v15 = vpack.c.bf16 %v437_v12, %v437_v12  ;;  %445 = vst.msk [vmem:[%s199_s7 + $0x2] sm:$0x3] %vm443_vm5, %v440_v13 }
  0xf3   : > { %v438_v14 = vmax.f32 %v434_v8, 0.0 }
  0xf4   : > { %446 = vst.msk [vmem:[%s199_s7 + $0x4] sm:$0x3] %vm443_vm5, %v441_v15 }
  0xf5   : > { %v442_v9 = vpack.c.bf16 %v438_v14, %v438_v14 }
  0xf7   : > { %447 = vst.msk [vmem:[%s199_s7 + $0x6] sm:$0x3] %vm443_vm5, %v442_v9 }
  0xf8 PF: > { %s14_s15 = sadd.s32 1, %s546_s15  }
  0xf9   : > { %p11_p5 = scmp.ge.s32.totalorder %s14_s15, 4  }
  0xfb   :  { %13 = sbr.rel (!%p11_p5) target bundleno = 1 (0x1), region = 70 }

// kernel: _lambda_.37
= control target key start
LH: loop header
LB: loop body
LE: loop exit
PB: predicated region body
PF: predicated region fallthrough
CT: control target
= control target key end

     0   :  { %s419_s12 = smov 0   ;;  %s451_s0 = inlined_call_operand.vmem [shape: bf16[32,64], index: 0, kind: input, shape index: {}]   ;;  %s452_s1 = inlined_call_operand.vmem [shape: bf16[64,64], index: 1, kind: input, shape index: {}]   ;;  %s453_s2 = inlined_call_operand.vmem [shape: f32[1,64], index: 2, kind: input, shape index: {}]   ;;  %s454_s3 = inlined_call_operand.vmem [shape: bf16[32,64], index: 3, kind: output, shape index: {}]  }
   0x1 LB: > { %s335_s13 = sadd.s32 4294967295, %s395_s12   ;;  %p339_p0 = scmp.ge.s32.totalorder %s395_s12, 1  ;;  %s395_s12 = sphi %s419_s12, %s13_s12  }
   0x2   : > { %p138_p1 = scmp.lt.s32.totalorder %s395_s12, 3 }
   0x4   : > { %p139_p2 = pnand %p339_p0, %p138_p1 }
   0x5   : > { %s340_s18 = sshll.u32 (!%p139_p2), %s335_s13, 1 }
   0x6   : > { %142 = sbr.rel (%p139_p2) target bundleno = 232 (0xe8), region = 32  ;;  %p163_p3 = scmp.lt.s32.totalorder (!%p139_p2), %s340_s18, 3 }
   0xb   : > { %v384_v0 = vld [vmem:[%s452_s1 + $0x18] sm:$0xff]   ;;  %v397_v1 = vmov 0.0   ;;  %v385_v2 = vld [vmem:[%s452_s1 + $0x10] sm:$0xff]   ;;  %vm398_vm0 = vmmov 0   ;;  %s456_s18 = smov (!%p163_p3, %s340_s18), 3  ;;  %v386_v3 = vld [vmem:[%s452_s1 + $0x8] sm:$0xff]  }
   0xc   : > { %362 = vmatprep.subr.bf16.mxu0 %v397_v1  ;;  %370 = vmatprep.mubr.msk.bf16.mxu0 %vm398_vm0, %v397_v1  ;;  %s341_s21 = sshll.u32 %s456_s18, 2  ;;  %v387_v4 = vld [vmem:[%s452_s1] sm:$0xff]   ;;  %vm221_vm1 = vcmask 523264   ;;  %vm276_vm2 = vcmask 519168  }
   0xd   : > { %363 = vmatpush3.bf16.msra.mxu0 %v384_v0  ;;  %s166_s24 = scalar_lea.vmem %s451_s0, %s341_s21  ;;  %v344_v6 = vld [vmem:[%s453_s2] ss:$0 sm:$0xff]  ;;  %s172_s4 = scalar_lea.vmem %s454_s3, %s341_s21 }
   0xe   : > { %364 = vmatprep.subr.bf16.mxu0 %v397_v1  ;;  %v388_v5 = vld [vmem:[%s166_s24] sm:$0xff]  }
  0x11   : > { %365 = vmatpush3.bf16.msra.mxu0 %v385_v2 }
  0x12   : > { %366 = vmatprep.subr.bf16.mxu0 %v397_v1 }
  0x15   : > { %367 = vmatpush3.bf16.msra.mxu0 %v386_v3 }
  0x16   : > { %368 = vmatprep.subr.bf16.mxu0 %v397_v1 }
  0x19   : > { %369 = vmatpush3.bf16.msra.mxu0 %v387_v4 }
  0x1c   : > { %371 = vmatmul.mubr.msk.bf16.vlgmr.msra.gmra.mxu0 %vm221_vm1, %v388_v5 }
  0xdc   : > { %v259_v7 = vpop.f32.mrf.mxu0 }
  0xdd   : > { %v260_v8 = vadd.f32 %v344_v6, %v259_v7 }
  0xde   : > { %v372_v9 = vpop.f32.mrf.mxu0 }
  0xdf   : > { %v266_v10 = vmax.f32 %v260_v8, 0.0 }
  0xe0   : > { %v262_v11 = vpop.f32.mrf.mxu0 }
  0xe1   : > { %v355_v12 = vpack.c.bf16 %v266_v10, %v266_v10  ;;  %v263_v13 = vadd.f32 %v344_v6, %v262_v11 }
  0xe2   : > { %v373_v14 = vpop.f32.mrf.mxu0 }
  0xe3   : > { %277 = vst.msk [vmem:[%s172_s4] sm:$0xf] %vm276_vm2, %v355_v12  ;;  %v267_v15 = vmax.f32 %v263_v13, 0.0 }
  0xe5   : > { %v356_v16 = vpack.c.bf16 %v267_v15, %v267_v15 }
  0xe7   : > { %278 = vst.msk [vmem:[%s172_s4 + $0x4] sm:$0xf] %vm276_vm2, %v356_v16 }
  0xe8 PF: > { %s13_s12 = sadd.s32 1, %s395_s12  }
  0xe9   : > { %p10_p4 = scmp.ge.s32.totalorder %s13_s12, 4  }
  0xeb   :  { %12 = sbr.rel (!%p10_p4) target bundleno = 1 (0x1), region = 62 }

// kernel: _lambda_.36
= control target key start
LH: loop header
LB: loop body
LE: loop exit
PB: predicated region body
PF: predicated region fallthrough
CT: control target
= control target key end

     0   :  { %s610_s21 = smov 0   ;;  %s645_s0 = inlined_call_operand.vmem [shape: bf16[32,16], index: 0, kind: input, shape index: {}]   ;;  %s646_s1 = inlined_call_operand.vmem [shape: bf16[16,64], index: 1, kind: input, shape index: {}]   ;;  %s647_s2 = inlined_call_operand.vmem [shape: f32[1,64], index: 2, kind: input, shape index: {}, may-alias: {2,5}]   ;;  %s648_s3 = inlined_call_operand.vmem [shape: bf16[32,32], index: 3, kind: input, shape index: {}]   ;;  %s649_s4 = inlined_call_operand.vmem [shape: bf16[32,64], index: 4, kind: input, shape index: {}]   ;;  %s650_s5 = inlined_call_operand.vmem [shape: f32[1,64], index: 5, kind: input, shape index: {}, may-alias: {2,5}]   ;;  %s651_s6 = inlined_call_operand.vmem [shape: bf16[32,64], index: 6, kind: output, shape index: {}]  }
   0x1 LB: > { %s505_s22 = sadd.s32 4294967295, %s571_s21   ;;  %p509_p0 = scmp.ge.s32.totalorder %s571_s21, 1  ;;  %s571_s21 = sphi %s610_s21, %s16_s21  }
   0x2   : > { %p224_p1 = scmp.lt.s32.totalorder %s571_s21, 3 }
   0x4   : > { %p225_p2 = pnand %p509_p0, %p224_p1 }
   0x5   : > { %s510_s29 = sshll.u32 (!%p225_p2), %s505_s22, 1 }
   0x6   : > { %228 = sbr.rel (%p225_p2) target bundleno = 226 (0xe2), region = 44  ;;  %p260_p3 = scmp.lt.s32.totalorder (!%p225_p2), %s510_s29, 3 }
   0xb   : > { %v560_v0 = vld [vmem:[%s649_s4 + $0x8] sm:$0xff]   ;;  %v573_v1 = vmov 0.0   ;;  %v561_v2 = vld [vmem:[%s646_s1] sm:$0xff]   ;;  %vm574_vm0 = vmmov 0   ;;  %s653_s29 = smov (!%p260_p3, %s510_s29), 3  ;;  %vm300_vm1 = vcmask 130048  }
   0xc   : > { %542 = vmatprep.subr.bf16.mxu1 %v573_v1  ;;  %536 = vmatprep.subr.bf16.mxu0 %v573_v1  ;;  %v562_v3 = vld [vmem:[%s649_s4] sm:$0xff]   ;;  %s511_s30 = sshll.u32 %s653_s29, 2  ;;  %vm368_vm2 = vcmask 261120   ;;  %vm434_vm3 = vcmask 519168  }
   0xd   : > { %543 = vmatpush3.bf16.msra.mxu1 %v560_v0  ;;  %538 = vmatprep.mubr.msk.bf16.mxu0 %vm574_vm0, %v573_v1  ;;  %s263_s9 = scalar_lea.vmem %s645_s0, %s511_s30  ;;  %s269_s12 = scalar_lea.vmem %s648_s3, %s511_s30  ;;  %v516_v6 = vld [vmem:[%s647_s2] ss:$0 sm:$0xff] }
   0xe   : > { %544 = vmatprep.subr.bf16.mxu1 %v573_v1  ;;  %537 = vmatpush3.bf16.msra.mxu0 %v561_v2  ;;  %v563_v4 = vld [vmem:[%s263_s9] sm:$0xff]   ;;  %s275_s19 = scalar_lea.vmem %s651_s6, %s511_s30 }
   0xf   : > { %546 = vmatprep.mubr.msk.bf16.mxu1 %vm574_vm0, %v573_v1  ;;  %v564_v5 = vld [vmem:[%s269_s12] sm:$0xff]  }
  0x10   : > { %v524_v10 = vld [vmem:[%s650_s5] ss:$0 sm:$0xff] }
  0x11   : > { %545 = vmatpush3.bf16.msra.mxu1 %v562_v3  ;;  %539 = vmatmul.mubr.msk.bf16.vlgmr.msra.gmra.mxu0 %vm300_vm1, %v563_v4 }
  0x14   : > { %547 = vmatmul.mubr.msk.bf16.vlgmr.msra.gmra.mxu1 %vm368_vm2, %v564_v5 }
  0xd1   : > { %v338_v7 = vpop.f32.mrf.mxu0 }
  0xd2   : > { %v339_v8 = vadd.f32 %v516_v6, %v338_v7 }
  0xd3   : > { %v540_v11 = vpop.f32.mrf.mxu0 }
  0xd4   : > { %v406_v9 = vpop.f32.mrf.mxu1 }
  0xd5   : > { %v413_v12 = vadd.f32 %v406_v9, %v339_v8  ;;  %v341_v14 = vpop.f32.mrf.mxu0 }
  0xd6   : > { %v548_v13 = vpop.f32.mrf.mxu1  ;;  %v342_v16 = vadd.f32 %v516_v6, %v341_v14 }
  0xd7   : > { %v422_v15 = vadd.f32 %v524_v10, %v413_v12  ;;  %v541_v18 = vpop.f32.mrf.mxu0 }
  0xd8   : > { %v409_v17 = vpop.f32.mrf.mxu1 }
  0xd9   : > { %v424_v19 = vmax.f32 %v422_v15, 0.0  ;;  %v414_v20 = vadd.f32 %v409_v17, %v342_v16 }
  0xda   : > { %v549_v21 = vpop.f32.mrf.mxu1 }
  0xdb   : > { %v529_v22 = vpack.c.bf16 %v424_v19, %v424_v19  ;;  %v423_v23 = vadd.f32 %v524_v10, %v414_v20 }
  0xdd   : > { %435 = vst.msk [vmem:[%s275_s19] sm:$0xf] %vm434_vm3, %v529_v22  ;;  %v425_v24 = vmax.f32 %v423_v23, 0.0 }
  0xdf   : > { %v530_v25 = vpack.c.bf16 %v425_v24, %v425_v24 }
  0xe1   : > { %436 = vst.msk [vmem:[%s275_s19 + $0x4] sm:$0xf] %vm434_vm3, %v530_v25 }
  0xe2 PF: > { %s16_s21 = sadd.s32 1, %s571_s21  }
  0xe3   : > { %p13_p4 = scmp.ge.s32.totalorder %s16_s21, 4  }
  0xe5   :  { %15 = sbr.rel (!%p13_p4) target bundleno = 1 (0x1), region = 77 }

// kernel: _lambda_.35
= control target key start
LH: loop header
LB: loop body
LE: loop exit
PB: predicated region body
PF: predicated region fallthrough
CT: control target
= control target key end

     0   :  { %s818_s27 = smov 0   ;;  %s920_s0 = inlined_call_operand.vmem [shape: bf16[2,16,16], index: 0, kind: input, shape index: {}]   ;;  %s921_s1 = inlined_call_operand.vmem [shape: bf16[2,16,16], index: 1, kind: input, shape index: {}]   ;;  %s922_s2 = inlined_call_operand.vmem [shape: bf16[2,16,16], index: 2, kind: input, shape index: {}]   ;;  %s923_s3 = inlined_call_operand.vmem [shape: bf16[2,16,16], index: 3, kind: input, shape index: {}]   ;;  %s924_s4 = inlined_call_operand.vmem [shape: bf16[16,4], index: 4, kind: input, shape index: {}]   ;;  %s925_s5 = inlined_call_operand.vmem [shape: f32[1,4], index: 5, kind: input, shape index: {}]   ;;  %s926_s6 = inlined_call_operand.vmem [shape: bf16[4,16], index: 6, kind: input, shape index: {}]   ;;  %s927_s7 = inlined_call_operand.vmem [shape: f32[1,16], index: 7, kind: input, shape index: {}]   ;;  %s928_s8 = inlined_call_operand.vmem [shape: bf16[2,16,16], index: 8, kind: output, shape index: {}]  }
   0x1 LB: > { %s685_s28 = sadd.s32 4294967295, %s769_s27   ;;  %p689_p0 = scmp.ge.s32.totalorder %s769_s27, 1  ;;  %s769_s27 = sphi %s818_s27, %s18_s27  }
   0x2   : > { %p292_p1 = scmp.lt.s32.totalorder %s769_s27, 3 }
   0x4   : > { %p293_p2 = pnand %p689_p0, %p292_p1 }
   0x5   : > { %p341_p3 = scmp.lt.s32.totalorder (!%p293_p2), %s685_s28, 1 }
   0x6   : > { %296 = sbr.rel (%p293_p2) target bundleno = 481 (0x1e1), region = 52 }
   0xb   : > { %v758_v0 = vld [vmem:[%s924_s4] sm:$0xff]   ;;  %v771_v1 = vmov 0.0   ;;  %vm772_vm0 = vmmov 0   ;;  %s930_s28 = smov (!%p341_p3, %s685_s28), 1  ;;  %vm377_vm1 = vcmask 130048   ;;  %vm424_vm2 = vcmask 1040384  }
   0xc   : > { %736 = vmatprep.subr.bf16.mxu0 %v771_v1  ;;  %742 = vmatprep.subr.bf16.mxu1 %v771_v1  ;;  %s829_s9 = sshll.u32 %s930_s28, 3  ;;  %vm426_vm3 = vcmask 1041408   ;;  %vm428_vm4 = vcmask 1042432   ;;  %v491_v58 = vld [vmem:[%s926_s6] sm:$0x3]  ;;  %vm499_vm5 = vcmask 31744  }
   0xd   : > { %737 = vmatpush3.bf16.msra.mxu0 %v758_v0  ;;  %738 = vmatprep.mubr.msk.bf16.mxu0 %vm772_vm0, %v771_v1  ;;  %s345_s12 = scalar_lea.vmem %s920_s0, %s829_s9  ;;  %s350_s15 = scalar_lea.vmem %s921_s1, %s829_s9  ;;  %v504_v59 = vsel %vm426_vm3, %v491_v58, 0  ;;  %v700_v60 = vld [vmem:[%s925_s5] ss:$0 sm:$0xff]  ;;  %vm591_vm6 = vcmask 125952  }
   0xe   : > { %744 = vmatprep.mubr.msk.bf16.mxu1 %vm772_vm0, %v771_v1  ;;  %s355_s18 = scalar_lea.vmem %s922_s2, %s829_s9  ;;  %s360_s21 = scalar_lea.vmem %s923_s3, %s829_s9  ;;  %v847_v2 = vld [vmem:[%s345_s12] sm:$0xff]   ;;  %743 = vmatpush3.bf16.msra.mxu1 %v504_v59 }
   0xf   : > { %v849_v3 = vld [vmem:[%s350_s15] sm:$0xff]   ;;  %v718_v4 = vunpack.c.l.bf16 %v847_v2  ;;  %v719_v5 = vunpack.c.h.bf16 %v847_v2  ;;  %s365_s10 = scalar_lea.vmem %s928_s8, %s829_s9 }
  0x10   : > { %v722_v6 = vunpack.c.l.bf16 %v849_v3  ;;  %v723_v7 = vunpack.c.h.bf16 %v849_v3  ;;  %v855_v8 = vld [vmem:[%s355_s18] sm:$0xff]  }
  0x11   : > { %v857_v9 = vld [vmem:[%s360_s21] sm:$0xff]   ;;  %v726_v10 = vunpack.c.l.bf16 %v855_v8  ;;  %v727_v11 = vunpack.c.h.bf16 %v855_v8  ;;  %v378_v14 = vsel %vm377_vm1, %v718_v4, 0.0  ;;  %v379_v15 = vsel %vm377_vm1, %v719_v5, 0.0 }
  0x12   : > { %v730_v12 = vunpack.c.l.bf16 %v857_v9  ;;  %v731_v13 = vunpack.c.h.bf16 %v857_v9  ;;  %v390_v16 = vsel %vm377_vm1, %v722_v6, 0.0  ;;  %v391_v17 = vsel %vm377_vm1, %v723_v7, 0.0 }
  0x13   : > { %v380_v18 = vadd.f32 %v379_v15, %v378_v14  ;;  %v392_v19 = vadd.f32 %v391_v17, %v390_v16  ;;  %v402_v20 = vsel %vm377_vm1, %v726_v10, 0.0  ;;  %v403_v21 = vsel %vm377_vm1, %v727_v11, 0.0  ;;  %v703_v16 = vld [vmem:[%s927_s7] ss:$0 sm:$0xff] }
  0x14   : > { %v404_v22 = vadd.f32 %v403_v21, %v402_v20  ;;  %v414_v23 = vsel %vm377_vm1, %v730_v12, 0.0  ;;  %v415_v24 = vsel %vm377_vm1, %v731_v13, 0.0 }
  0x15   : > { %v381_v25 = vrot.slane %v380_v18, 4  ;;  %v393_v26 = vrot.slane %v392_v19, 4  ;;  %v416_v27 = vadd.f32 %v415_v24, %v414_v23 }
  0x16   : > { %v405_v28 = vrot.slane %v404_v22, 4 }
  0x17   : > { %v382_v29 = vadd.f32 %v381_v25, %v380_v18  ;;  %v394_v30 = vadd.f32 %v393_v26, %v392_v19  ;;  %v417_v31 = vrot.slane %v416_v27, 4  ;;  %v551_v26 = vlaneseq }
  0x18   : > { %v406_v32 = vadd.f32 %v405_v28, %v404_v22 }
  0x19   : > { %v383_v33 = vrot.slane %v382_v29, 2  ;;  %v395_v34 = vrot.slane %v394_v30, 2  ;;  %v418_v35 = vadd.f32 %v417_v31, %v416_v27  ;;  %v552_v27 = vshrl.u32 %v551_v26, 7 }
  0x1a   : > { %v407_v36 = vrot.slane %v406_v32, 2 }
  0x1b   : > { %v384_v37 = vadd.f32 %v383_v33, %v382_v29  ;;  %v396_v38 = vadd.f32 %v395_v34, %v394_v30  ;;  %v419_v39 = vrot.slane %v418_v35, 2  ;;  %v553_v28 = vsub.s32 0, %v552_v27 }
  0x1c   : > { %v408_v40 = vadd.f32 %v407_v36, %v406_v32  ;;  %v561_v29 = vsub.s32 1, %v552_v27  ;;  %v569_v30 = vsub.s32 2, %v552_v27  ;;  %v577_v31 = vsub.s32 3, %v552_v27 }
  0x1d   : > { %v385_v41 = vrot.slane %v384_v37, 1  ;;  %v397_v42 = vrot.slane %v396_v38, 1  ;;  %v420_v43 = vadd.f32 %v419_v39, %v418_v35 }
  0x1e   : > { %v409_v44 = vrot.slane %v408_v40, 1 }
  0x1f   : > { %v386_v45 = vadd.f32 %v385_v41, %v384_v37  ;;  %v398_v46 = vadd.f32 %v397_v42, %v396_v38  ;;  %v421_v47 = vrot.slane %v420_v43, 1 }
  0x20   : > { %v410_v48 = vadd.f32 %v409_v44, %v408_v40 }
  0x21   : > { %v387_v49 = vmul.f32 0.0625, %v386_v45  ;;  %v399_v50 = vmul.f32 0.0625, %v398_v46  ;;  %v422_v51 = vadd.f32 %v421_v47, %v420_v43 }
  0x22   : > { %v411_v52 = vmul.f32 0.0625, %v410_v48 }
  0x23   : > { %v423_v53 = vmul.f32 0.0625, %v422_v51  ;;  %v425_v54 = vsel %vm424_vm2, %v387_v49, %v399_v50 }
  0x24   : > { %v427_v55 = vsel %vm426_vm3, %v425_v54, %v411_v52 }
  0x25   : > { %v429_v56 = vsel %vm428_vm4, %v427_v55, %v423_v53 }
  0x26   : > { %v430_v57 = vpack.c.bf16 %v429_v56, %v429_v56 }
  0x28   : > { %739 = vmatmul.mubr.msk.bf16.vlgmr.msra.gmra.mxu0 %vm377_vm1, %v430_v57 }
  0xe8   : > { %v483_v61 = vpop.f32.mrf.mxu0 }
  0xe9   : > { %v484_v62 = vadd.f32 %v700_v60, %v483_v61 }
  0xea   : > { %v740_v63 = vpop.f32.mrf.mxu0 }
  0xeb   : > { %v489_v0 = vmax.f32 %v484_v62, 0.0 }
  0xec   : > { %v486_v1 = vpop.f32.mrf.mxu0 }
  0xed   : > { %v490_v14 = vpack.c.bf16 %v489_v0, %v489_v0 }
  0xee   : > { %v741_v15 = vpop.f32.mrf.mxu0 }
  0xef   : > { %745 = vmatmul.mubr.msk.bf16.vlgmr.msra.gmra.mxu1 %vm499_vm5, %v490_v14 }
 0x1af   : > { %v540_v17 = vpop.f32.mrf.mxu1 }
 0x1b0   : > { %v541_v18 = vadd.f32 %v703_v16, %v540_v17 }
 0x1b1   : > { %v746_v19 = vpop.f32.mrf.mxu1 }
 0x1b2   : > { %v546_v20 = vsub.f32 0.0, %v541_v18 }
 0x1b3   : > { %v543_v21 = vpop.f32.mrf.mxu1 }
 0x1b4   : > { %v547_v22 = vmul.f32 1.442695, %v546_v20 }
 0x1b5   : > { %v747_v23 = vpop.f32.mrf.mxu1 }
 0x1b6   : > { %759 = vpow2.f32 %v547_v22 }
 0x1c3   : > { %v760_v24 = vpop.eup %759 }
 0x1c4   : > { %v549_v25 = vadd.f32 1.0, %v760_v24 }
 0x1c6   : > { %761 = vrcp.f32 %v549_v25 }
 0x1d3   : > { %v762_v32 = vpop.eup %761 }
 0x1d4   : > { %v554_v33 = vrot.slane %v762_v32, %v553_v28  ;;  %v562_v34 = vrot.slane %v762_v32, %v561_v29  ;;  %v570_v35 = vrot.slane %v762_v32, %v569_v30  ;;  %v578_v36 = vrot.slane %v762_v32, %v577_v31 }
 0x1d6   : > { %v555_v37 = vmul.f32 %v718_v4, %v554_v33  ;;  %v556_v38 = vmul.f32 %v719_v5, %v554_v33  ;;  %v563_v39 = vmul.f32 %v722_v6, %v562_v34  ;;  %v564_v40 = vmul.f32 %v723_v7, %v562_v34 }
 0x1d7   : > { %v571_v43 = vmul.f32 %v726_v10, %v570_v35  ;;  %v572_v44 = vmul.f32 %v727_v11, %v570_v35  ;;  %v579_v2 = vmul.f32 %v730_v12, %v578_v36  ;;  %v580_v4 = vmul.f32 %v731_v13, %v578_v36 }
 0x1d8   : > { %v565_v41 = vadd.f32 %v563_v39, %v555_v37  ;;  %v566_v42 = vadd.f32 %v564_v40, %v556_v38 }
 0x1da   : > { %v573_v45 = vadd.f32 %v571_v43, %v565_v41  ;;  %v574_v46 = vadd.f32 %v572_v44, %v566_v42 }
 0x1dc   : > { %v581_v5 = vadd.f32 %v579_v2, %v573_v45  ;;  %v582_v6 = vadd.f32 %v580_v4, %v574_v46 }
 0x1de   : > { %v714_v3 = vpack.c.bf16 %v581_v5, %v581_v5  ;;  %v715_v7 = vpack.c.bf16 %v582_v6, %v582_v6 }
 0x1e0   : > { %592 = vst.msk [vmem:[%s365_s10] sm:$0xf] %vm591_vm6, %v714_v3  ;;  %593 = vst.msk [vmem:[%s365_s10 + $0x4] sm:$0xf] %vm591_vm6, %v715_v7 }
 0x1e1 PF: > { %s18_s27 = sadd.s32 1, %s769_s27  }
 0x1e2   : > { %p15_p4 = scmp.ge.s32.totalorder %s18_s27, 4  }
 0x1e4   :  { %17 = sbr.rel (!%p15_p4) target bundleno = 1 (0x1), region = 91 }

</bundles_post_ra>
